<compile_context>
chip_gen: v5e
topology: v5e:2x2
jax: 0.10.0
libtpu: 0.0.40
codegen_flags: <defaults>
</compile_context>

<pallas_src>
import math
import functools

import jax
import jax.numpy as jnp
from jax.experimental import pallas as pl
from jax.experimental.pallas import tpu as pltpu


_VMEM_LIMIT = 32 * 1024 * 1024
_VMEM_SPEC = pl.BlockSpec(memory_space=pltpu.MemorySpace.VMEM)

_BLOCK_KEYS = ("ln1_g", "ln1_b", "w_qkv", "b_qkv", "w_out", "b_out",
               "ln2_g", "ln2_b", "w_fc1", "b_fc1", "w_fc2", "b_fc2")


def _grid_params():
    return pltpu.CompilerParams(dimension_semantics=("parallel",),
                                vmem_limit_bytes=_VMEM_LIMIT)


def _flat_params():
    return pltpu.CompilerParams(vmem_limit_bytes=_VMEM_LIMIT)


# --------------------------- in-kernel math helpers ---------------------------

def _gelu(x):
    # TODO(synk): tanh approximation; PyTorch default GELU is erf-exact.
    return 0.5 * x * (1.0 + jnp.tanh(0.7978845608028654 * (x + 0.044715 * x * x * x)))


def _ln(x, g, b, eps=1e-5):
    mu = jnp.mean(x, axis=-1, keepdims=True)
    var = jnp.mean((x - mu) ** 2, axis=-1, keepdims=True)
    return (x - mu) * jax.lax.rsqrt(var + eps) * g + b


def _mm(a, b):
    # bf16 MXU inputs, f32 accumulation.
    return jnp.dot(a.astype(jnp.bfloat16), b.astype(jnp.bfloat16),
                   preferred_element_type=jnp.float32)


def _mm_t(a, b):
    # a:(M,K), b:(N,K) -> (M,N); contract last axes (rhs-transposed matmul).
    return jax.lax.dot_general(a.astype(jnp.bfloat16), b.astype(jnp.bfloat16),
                               (((1,), (1,)), ((), ())),
                               preferred_element_type=jnp.float32)


def _mha(x, wqkv, bqkv, wout, bout, n_heads):
    # x: (S, D) f32.  PyTorch nn.MultiheadAttention semantics (packed qkv,
    # per-head softmax(QK^T/sqrt(dh))V, single out-proj bias).
    S, D = x.shape
    dh = D // n_heads
    scale = 1.0 / math.sqrt(dh)
    qkv = _mm(x, wqkv) + bqkv                           # (S, 3D) f32
    acc = jnp.zeros((S, D), jnp.float32)
    for h in range(n_heads):                            # static head loop
        q = qkv[:, h * dh:(h + 1) * dh]
        k = qkv[:, D + h * dh:D + (h + 1) * dh]
        v = qkv[:, 2 * D + h * dh:2 * D + (h + 1) * dh]
        s = _mm_t(q, k) * scale                         # (S, S) f32
        s = s - jnp.max(s, axis=-1, keepdims=True)
        p = jnp.exp(s)
        p = p * pl.reciprocal(jnp.sum(p, axis=-1, keepdims=True), approx=True)
        o = _mm(p, v)                                   # (S, dh)
        acc = acc + _mm(o, wout[h * dh:(h + 1) * dh, :])  # per-head out-proj
    return acc + bout


# ------------------------------ Pallas kernels ------------------------------

def _embed_kernel(patch_ref, w_ref, b_ref, cls_ref, pos_cls_ref, pos_tok_ref, o_ref):
    # patch embedding (conv-as-matmul) + cls token + positional embedding.
    tok = _mm(patch_ref[0], w_ref[...]) + b_ref[...]          # (T, D)
    T = tok.shape[0]
    o_ref[0, 0:1, :] = cls_ref[...] + pos_cls_ref[...]
    o_ref[0, 1:1 + T, :] = tok + pos_tok_ref[...]


def _vit_block_kernel(x_ref, ln1_g, ln1_b, wqkv, bqkv, wout, bout,
                      ln2_g, ln2_b, wfc1, bfc1, wfc2, bfc2, o_ref, *, n_heads):
    # torchvision ViT EncoderBlock (pre-norm), fully fused for one image.
    x = x_ref[0]                                              # (S, D) f32
    y = _ln(x, ln1_g[...], ln1_b[...])
    x = x + _mha(y, wqkv[...], bqkv[...], wout[...], bout[...], n_heads)
    y = _ln(x, ln2_g[...], ln2_b[...])
    h = _gelu(_mm(y, wfc1[...]) + bfc1[...])
    x = x + _mm(h, wfc2[...]) + bfc2[...]
    o_ref[0] = x


def _vit_head_kernel(x_ref, g_ref, b_ref, o_ref):
    # final LayerNorm applied to the class token only.
    o_ref[...] = _ln(x_ref[:, 0, :], g_ref[...], b_ref[...])


def _mil_block_kernel(x_ref, pe_ref, ln1_g, ln1_b, wqkv, bqkv, wout, bout,
                      ln2_g, ln2_b, wfc1, bfc1, wfc2, bfc2, o_ref, *,
                      n_heads, add_pe):
    # nn.TransformerEncoderLayer (post-norm, gelu), fused for one bag.
    x = x_ref[0]                                              # (P, D) f32
    if add_pe:                                                # fused PositionalEncoding
        x = x + pe_ref[...]
    a = _mha(x, wqkv[...], bqkv[...], wout[...], bout[...], n_heads)
    x = _ln(x + a, ln1_g[...], ln1_b[...])
    h = _gelu(_mm(x, wfc1[...]) + bfc1[...])
    m = _mm(h, wfc2[...]) + bfc2[...]
    x = _ln(x + m, ln2_g[...], ln2_b[...])
    o_ref[0] = x


def _classifier_kernel(f_ref, w1_ref, b1_ref, w2_ref, b2_ref, o_ref):
    # mean over patches -> Linear -> ReLU -> Linear (dropout = identity).
    f = jnp.mean(f_ref[...], axis=1)                          # (B, D)
    h = jnp.maximum(_mm(f, w1_ref[...]) + b1_ref[...], 0.0)
    o_ref[...] = _mm(h, w2_ref[...]) + b2_ref[...]


# ------------------------------- kernel wrappers -------------------------------

def _block_cost(n, s, d, ff, heads):
    dh = d // heads
    flops = 2 * n * s * d * (3 * d + d + 2 * ff) + 4 * n * heads * s * s * dh
    transcendentals = n * s * (heads * s + ff)
    bytes_accessed = 4 * 2 * n * s * d + 2 * (4 * d * d + 2 * d * ff) + 4 * (11 * d + ff)
    return pl.CostEstimate(flops=int(flops), transcendentals=int(transcendentals),
                           bytes_accessed=int(bytes_accessed))


def vit_embed(patches, p):
    N, T, K = patches.shape
    D = p["w_proj"].shape[1]
    S = T + 1
    return pl.pallas_call(
        _embed_kernel,
        grid=(N,),
        out_shape=jax.ShapeDtypeStruct((N, S, D), jnp.float32),
        in_specs=[pl.BlockSpec((1, T, K), lambda n: (n, 0, 0)),
                  pl.BlockSpec(p["w_proj"].shape, lambda n: (0, 0)),
                  pl.BlockSpec((1, D), lambda n: (0, 0)),
                  pl.BlockSpec((1, D), lambda n: (0, 0)),
                  pl.BlockSpec((1, D), lambda n: (0, 0)),
                  pl.BlockSpec((T, D), lambda n: (0, 0))],
        out_specs=pl.BlockSpec((1, S, D), lambda n: (n, 0, 0)),
        compiler_params=_grid_params(),
    )(patches, p["w_proj"], p["b_proj"], p["cls_token"], p["pos_cls"], p["pos_tok"])


def vit_block(x, p, n_heads):
    N, S, D = x.shape
    ff = p["w_fc1"].shape[1]
    w = [p[k] for k in _BLOCK_KEYS]
    return pl.pallas_call(
        functools.partial(_vit_block_kernel, n_heads=n_heads),
        grid=(N,),
        out_shape=jax.ShapeDtypeStruct((N, S, D), jnp.float32),
        in_specs=[pl.BlockSpec((1, S, D), lambda n: (n, 0, 0))]
                 + [pl.BlockSpec(a.shape, lambda n: (0, 0)) for a in w],
        out_specs=pl.BlockSpec((1, S, D), lambda n: (n, 0, 0)),
        compiler_params=_grid_params(),
        cost_estimate=_block_cost(N, S, D, ff, n_heads),
    )(x, *w)


def vit_head(x, g, b):
    N, S, D = x.shape
    return pl.pallas_call(
        _vit_head_kernel,
        out_shape=jax.ShapeDtypeStruct((N, D), jnp.float32),
        in_specs=[_VMEM_SPEC] * 3,
        out_specs=_VMEM_SPEC,
        compiler_params=_flat_params(),
    )(x, g, b)


def mil_block(x, pe, p, n_heads, add_pe):
    B, P, D = x.shape
    ff = p["w_fc1"].shape[1]
    w = [p[k] for k in _BLOCK_KEYS]
    return pl.pallas_call(
        functools.partial(_mil_block_kernel, n_heads=n_heads, add_pe=add_pe),
        grid=(B,),
        out_shape=jax.ShapeDtypeStruct((B, P, D), jnp.float32),
        in_specs=[pl.BlockSpec((1, P, D), lambda n: (n, 0, 0)),
                  pl.BlockSpec((P, D), lambda n: (0, 0))]
                 + [pl.BlockSpec(a.shape, lambda n: (0, 0)) for a in w],
        out_specs=pl.BlockSpec((1, P, D), lambda n: (n, 0, 0)),
        compiler_params=_grid_params(),
        cost_estimate=_block_cost(B, P, D, ff, n_heads),
    )(x, pe, *w)


def classifier(feats, c, n_classes):
    B = feats.shape[0]
    return pl.pallas_call(
        _classifier_kernel,
        out_shape=jax.ShapeDtypeStruct((B, n_classes), jnp.float32),
        in_specs=[_VMEM_SPEC] * 5,
        out_specs=_VMEM_SPEC,
        compiler_params=_flat_params(),
    )(feats, c["w_c1"], c["b_c1"], c["w_c2"], c["b_c2"])


# ---------------------------------- forward ----------------------------------

def transmilx_forward(x, params, cfg):
    # x: (batch, n_patches, C, H, W) -- matches the PyTorch module input.
    B, P, C, H, W = x.shape
    patch = cfg["patch"]
    hp, wp = H // patch, W // patch

    # patch extraction (pure layout glue): NCHW -> (N, T, C*p*p)
    imgs = x.reshape(B * P, C, H, W)
    patches = imgs.reshape(B * P, C, hp, patch, wp, patch)
    patches = patches.transpose(0, 2, 4, 1, 3, 5).reshape(
        B * P, hp * wp, C * patch * patch)

    vit = params["vit"]
    tok = vit_embed(patches, vit)                               # (B*P, S, D)
    for blk in vit["blocks"]:
        tok = vit_block(tok, blk, cfg["vit_heads"])
    feats = vit_head(tok, vit["ln_g"], vit["ln_b"])             # (B*P, D)

    D = feats.shape[-1]
    feats = feats.reshape(B, P, D)
    pe = params["pe"][:P]                                       # (P, D), added in block 0
    for i, blk in enumerate(params["mil_blocks"]):
        feats = mil_block(feats, pe, blk, cfg["mil_heads"], add_pe=(i == 0))

    out = classifier(feats, params["cls"], cfg["n_classes"])
    return out, out


# ------------------------------- parameters -------------------------------

def _dense(key, shape, dtype=jnp.bfloat16):
    return (0.02 * jax.random.normal(key, shape, jnp.float32)).astype(dtype)


def _block_params(key, d, ff):
    k1, k2, k3, k4 = jax.random.split(key, 4)
    return {
        "ln1_g": jnp.ones((1, d), jnp.float32), "ln1_b": jnp.zeros((1, d), jnp.float32),
        "ln2_g": jnp.ones((1, d), jnp.float32), "ln2_b": jnp.zeros((1, d), jnp.float32),
        "w_qkv": _dense(k1, (d, 3 * d)), "b_qkv": jnp.zeros((1, 3 * d), jnp.float32),
        "w_out": _dense(k2, (d, d)), "b_out": jnp.zeros((1, d), jnp.float32),
        "w_fc1": _dense(k3, (d, ff)), "b_fc1": jnp.zeros((1, ff), jnp.float32),
        "w_fc2": _dense(k4, (ff, d)), "b_fc2": jnp.zeros((1, d), jnp.float32),
    }


def sinusoidal_pe(max_len, d):
    position = jnp.arange(max_len, dtype=jnp.float32)[:, None]
    div_term = jnp.exp(jnp.arange(0, d, 2, dtype=jnp.float32) * (-math.log(10000.0) / d))
    pe = jnp.zeros((max_len, d), jnp.float32)
    pe = pe.at[:, 0::2].set(jnp.sin(position * div_term))
    pe = pe.at[:, 1::2].set(jnp.cos(position * div_term))
    return pe


def init_params(key, cfg):
    d = cfg["dim"]
    ff = 4 * d
    t = (cfg["img"] // cfg["patch"]) ** 2
    keys = jax.random.split(key, 8)
    pos = _dense(keys[2], (t + 1, d), jnp.float32)
    vit = {
        "w_proj": _dense(keys[0], (cfg["channels"] * cfg["patch"] ** 2, d)),
        "b_proj": jnp.zeros((1, d), jnp.float32),
        "cls_token": _dense(keys[1], (1, d), jnp.float32),
        "pos_cls": pos[:1],
        "pos_tok": pos[1:],
        "blocks": [_block_params(k, d, ff)
                   for k in jax.random.split(keys[3], cfg["vit_layers"])],
        "ln_g": jnp.ones((1, d), jnp.float32), "ln_b": jnp.zeros((1, d), jnp.float32),
    }
    mil_blocks = [_block_params(k, d, ff)
                  for k in jax.random.split(keys[4], cfg["mil_layers"])]
    cls = {
        "w_c1": _dense(keys[5], (d, d // 2)),
        "b_c1": jnp.zeros((1, d // 2), jnp.float32),
        "w_c2": _dense(keys[6], (d // 2, cfg["n_classes"])),
        "b_c2": jnp.zeros((1, cfg["n_classes"]), jnp.float32),
    }
    return {"vit": vit, "mil_blocks": mil_blocks, "cls": cls,
            "pe": sinusoidal_pe(cfg["max_len"], d)}


# ---------------------------------- main ----------------------------------

if __name__ == "__main__":
    CFG = dict(dim=128, n_classes=2, channels=3, img=8, patch=4,
               vit_layers=2, vit_heads=4, mil_layers=2, mil_heads=8, max_len=64)

    key = jax.random.PRNGKey(0)
    pkey, xkey = jax.random.split(key)
    params = init_params(pkey, CFG)

    # x: (batch=2, n_patches=4, C=3, H=8, W=8) -- NCHW per patch image
    x = jax.random.normal(xkey, (2, 4, CFG["channels"], CFG["img"], CFG["img"]),
                          jnp.float32)

    fwd = jax.jit(functools.partial(transmilx_forward, cfg=CFG))
    out, out_dup = fwd(x, params)
    jax.block_until_ready(out)

    assert out.shape == (2, CFG["n_classes"])
    assert bool(jnp.all(jnp.isfinite(out)))
    assert bool(jnp.all(out == out_dup))
    print("KERNEL_OK")
</pallas_src>

<mosaic_0001>
module attributes {stable_mosaic.version = 11 : i64} {
  func.func @_embed_kernel(%arg0: i32, %arg1: memref<1x4x48xf32, #tpu.memory_space<vmem>>, %arg2: memref<48x128xbf16, #tpu.memory_space<vmem>>, %arg3: memref<1x128xf32, #tpu.memory_space<vmem>>, %arg4: memref<1x128xf32, #tpu.memory_space<vmem>>, %arg5: memref<1x128xf32, #tpu.memory_space<vmem>>, %arg6: memref<4x128xf32, #tpu.memory_space<vmem>>, %arg7: memref<1x5x128xf32, #tpu.memory_space<vmem>>) attributes {dimension_semantics = [#tpu.dimension_semantics<parallel>], iteration_bounds = array<i64: 8>, scalar_prefetch = 0 : i64, scratch_operands = 0 : i64, tpu.core_type = #tpu.core_type<tc>, window_params = [{transform_indices = @transform_0, window_bounds = array<i64: 1, 4, 48>}, {pipeline_mode = #tpu.pipeline_mode<synchronous>, transform_indices = @transform_1, window_bounds = array<i64: 48, 128>}, {pipeline_mode = #tpu.pipeline_mode<synchronous>, transform_indices = @transform_2, window_bounds = array<i64: 1, 128>}, {pipeline_mode = #tpu.pipeline_mode<synchronous>, transform_indices = @transform_3, window_bounds = array<i64: 1, 128>}, {pipeline_mode = #tpu.pipeline_mode<synchronous>, transform_indices = @transform_4, window_bounds = array<i64: 1, 128>}, {pipeline_mode = #tpu.pipeline_mode<synchronous>, transform_indices = @transform_5, window_bounds = array<i64: 4, 128>}, {transform_indices = @transform_6, window_bounds = array<i64: 1, 5, 128>}]} {
    %c0 = arith.constant 0 : index
    %c0_0 = arith.constant 0 : index
    %c0_1 = arith.constant 0 : index
    %0 = vector.load %arg1[%c0, %c0_0, %c0_1] : memref<1x4x48xf32, #tpu.memory_space<vmem>>, vector<1x4x48xf32>
    %1 = vector.shape_cast %0 : vector<1x4x48xf32> to vector<4x48xf32>
    %c0_2 = arith.constant 0 : index
    %c0_3 = arith.constant 0 : index
    %2 = vector.load %arg2[%c0_2, %c0_3] : memref<48x128xbf16, #tpu.memory_space<vmem>>, vector<48x128xbf16>
    %3 = arith.truncf %1 : vector<4x48xf32> to vector<4x48xbf16>
    %cst = arith.constant dense<0.000000e+00> : vector<4x128xf32>
    %4 = tpu.matmul %3, %2, %cst {dimension_numbers = #tpu.dot_dimension_numbers<[1], [0], [0], [1], [0, 0, 1, 1], [], []>} : vector<4x48xbf16>, vector<48x128xbf16>, vector<4x128xf32> -> vector<4x128xf32>
    %c0_4 = arith.constant 0 : index
    %c0_5 = arith.constant 0 : index
    %5 = vector.load %arg3[%c0_4, %c0_5] : memref<1x128xf32, #tpu.memory_space<vmem>>, vector<1x128xf32>
    %6 = vector.broadcast %5 : vector<1x128xf32> to vector<4x128xf32>
    %7 = arith.addf %4, %6 : vector<4x128xf32>
    %c0_6 = arith.constant 0 : index
    %c0_7 = arith.constant 0 : index
    %8 = vector.load %arg4[%c0_6, %c0_7] : memref<1x128xf32, #tpu.memory_space<vmem>>, vector<1x128xf32>
    %c0_8 = arith.constant 0 : index
    %c0_9 = arith.constant 0 : index
    %9 = vector.load %arg5[%c0_8, %c0_9] : memref<1x128xf32, #tpu.memory_space<vmem>>, vector<1x128xf32>
    %10 = arith.addf %8, %9 : vector<1x128xf32>
    %c0_10 = arith.constant 0 : index
    %c0_11 = arith.constant 0 : index
    %c0_12 = arith.constant 0 : index
    %11 = vector.load %arg7[%c0_10, %c0_11, %c0_12] : memref<1x5x128xf32, #tpu.memory_space<vmem>>, vector<1x1x128xf32>
    %12 = vector.shape_cast %11 : vector<1x1x128xf32> to vector<1x128xf32>
    %13 = vector.shape_cast %10 : vector<1x128xf32> to vector<1x1x128xf32>
    tpu.vector_store %arg7[%c0_10, %c0_11, %c0_12], %13 {strides = array<i32>} : memref<1x5x128xf32, #tpu.memory_space<vmem>>, vector<1x1x128xf32>,
    %c0_13 = arith.constant 0 : index
    %c0_14 = arith.constant 0 : index
    %14 = vector.load %arg6[%c0_13, %c0_14] : memref<4x128xf32, #tpu.memory_space<vmem>>, vector<4x128xf32>
    %15 = arith.addf %7, %14 : vector<4x128xf32>
    %c0_15 = arith.constant 0 : index
    %c1 = arith.constant 1 : index
    %c0_16 = arith.constant 0 : index
    %16 = vector.load %arg7[%c0_15, %c1, %c0_16] : memref<1x5x128xf32, #tpu.memory_space<vmem>>, vector<1x4x128xf32>
    %17 = vector.shape_cast %16 : vector<1x4x128xf32> to vector<4x128xf32>
    %18 = vector.shape_cast %15 : vector<4x128xf32> to vector<1x4x128xf32>
    tpu.vector_store %arg7[%c0_15, %c1, %c0_16], %18 {strides = array<i32>} : memref<1x5x128xf32, #tpu.memory_space<vmem>>, vector<1x4x128xf32>,
    return
  }
  func.func @transform_0(%arg0: i32) -> (i32, i32, i32) {
    %c0_i32 = arith.constant 0 : i32
    %c0_i32_0 = arith.constant 0 : i32
    %c0_i32_1 = arith.constant 0 : i32
    return %arg0, %c0_i32, %c0_i32_0 : i32, i32, i32
  }
  func.func @transform_1(%arg0: i32) -> (i32, i32) {
    %c0_i32 = arith.constant 0 : i32
    %c0_i32_0 = arith.constant 0 : i32
    %c0_i32_1 = arith.constant 0 : i32
    return %c0_i32, %c0_i32_0 : i32, i32
  }
  func.func @transform_2(%arg0: i32) -> (i32, i32) {
    %c0_i32 = arith.constant 0 : i32
    %c0_i32_0 = arith.constant 0 : i32
    %c0_i32_1 = arith.constant 0 : i32
    return %c0_i32, %c0_i32_0 : i32, i32
  }
  func.func @transform_3(%arg0: i32) -> (i32, i32) {
    %c0_i32 = arith.constant 0 : i32
    %c0_i32_0 = arith.constant 0 : i32
    %c0_i32_1 = arith.constant 0 : i32
    return %c0_i32, %c0_i32_0 : i32, i32
  }
  func.func @transform_4(%arg0: i32) -> (i32, i32) {
    %c0_i32 = arith.constant 0 : i32
    %c0_i32_0 = arith.constant 0 : i32
    %c0_i32_1 = arith.constant 0 : i32
    return %c0_i32, %c0_i32_0 : i32, i32
  }
  func.func @transform_5(%arg0: i32) -> (i32, i32) {
    %c0_i32 = arith.constant 0 : i32
    %c0_i32_0 = arith.constant 0 : i32
    %c0_i32_1 = arith.constant 0 : i32
    return %c0_i32, %c0_i32_0 : i32, i32
  }
  func.func @transform_6(%arg0: i32) -> (i32, i32, i32) {
    %c0_i32 = arith.constant 0 : i32
    %c0_i32_0 = arith.constant 0 : i32
    %c0_i32_1 = arith.constant 0 : i32
    return %arg0, %c0_i32, %c0_i32_0 : i32, i32, i32
  }
}

module attributes {stable_mosaic.version = 11 : i64} {
  func.func @_vit_block_kernel(%arg0: i32, %arg1: memref<1x5x128xf32, #tpu.memory_space<vmem>>, %arg2: memref<1x128xf32, #tpu.memory_space<vmem>>, %arg3: memref<1x128xf32, #tpu.memory_space<vmem>>, %arg4: memref<128x384xbf16, #tpu.memory_space<vmem>>, %arg5: memref<1x384xf32, #tpu.memory_space<vmem>>, %arg6: memref<128x128xbf16, #tpu.memory_space<vmem>>, %arg7: memref<1x128xf32, #tpu.memory_space<vmem>>, %arg8: memref<1x128xf32, #tpu.memory_space<vmem>>, %arg9: memref<1x128xf32, #tpu.memory_space<vmem>>, %arg10: memref<128x512xbf16, #tpu.memory_space<vmem>>, %arg11: memref<1x512xf32, #tpu.memory_space<vmem>>, %arg12: memref<512x128xbf16, #tpu.memory_space<vmem>>, %arg13: memref<1x128xf32, #tpu.memory_space<vmem>>, %arg14: memref<1x5x128xf32, #tpu.memory_space<vmem>>) attributes {dimension_semantics = [#tpu.dimension_semantics<parallel>], iteration_bounds = array<i64: 8>, scalar_prefetch = 0 : i64, scratch_operands = 0 : i64, tpu.core_type = #tpu.core_type<tc>, window_params = [{transform_indices = @transform_0, window_bounds = array<i64: 1, 5, 128>}, {pipeline_mode = #tpu.pipeline_mode<synchronous>, transform_indices = @transform_1, window_bounds = array<i64: 1, 128>}, {pipeline_mode = #tpu.pipeline_mode<synchronous>, transform_indices = @transform_2, window_bounds = array<i64: 1, 128>}, {pipeline_mode = #tpu.pipeline_mode<synchronous>, transform_indices = @transform_3, window_bounds = array<i64: 128, 384>}, {pipeline_mode = #tpu.pipeline_mode<synchronous>, transform_indices = @transform_4, window_bounds = array<i64: 1, 384>}, {pipeline_mode = #tpu.pipeline_mode<synchronous>, transform_indices = @transform_5, window_bounds = array<i64: 128, 128>}, {pipeline_mode = #tpu.pipeline_mode<synchronous>, transform_indices = @transform_6, window_bounds = array<i64: 1, 128>}, {pipeline_mode = #tpu.pipeline_mode<synchronous>, transform_indices = @transform_7, window_bounds = array<i64: 1, 128>}, {pipeline_mode = #tpu.pipeline_mode<synchronous>, transform_indices = @transform_8, window_bounds = array<i64: 1, 128>}, {pipeline_mode = #tpu.pipeline_mode<synchronous>, transform_indices = @transform_9, window_bounds = array<i64: 128, 512>}, {pipeline_mode = #tpu.pipeline_mode<synchronous>, transform_indices = @transform_10, window_bounds = array<i64: 1, 512>}, {pipeline_mode = #tpu.pipeline_mode<synchronous>, transform_indices = @transform_11, window_bounds = array<i64: 512, 128>}, {pipeline_mode = #tpu.pipeline_mode<synchronous>, transform_indices = @transform_12, window_bounds = array<i64: 1, 128>}, {transform_indices = @transform_13, window_bounds = array<i64: 1, 5, 128>}]} {
    %c0 = arith.constant 0 : index
    %c0_0 = arith.constant 0 : index
    %c0_1 = arith.constant 0 : index
    %0 = vector.load %arg1[%c0, %c0_0, %c0_1] : memref<1x5x128xf32, #tpu.memory_space<vmem>>, vector<1x5x128xf32>
    %1 = vector.shape_cast %0 : vector<1x5x128xf32> to vector<5x128xf32>
    %c0_2 = arith.constant 0 : index
    %c0_3 = arith.constant 0 : index
    %2 = vector.load %arg2[%c0_2, %c0_3] : memref<1x128xf32, #tpu.memory_space<vmem>>, vector<1x128xf32>
    %c0_4 = arith.constant 0 : index
    %c0_5 = arith.constant 0 : index
    %3 = vector.load %arg3[%c0_4, %c0_5] : memref<1x128xf32, #tpu.memory_space<vmem>>, vector<1x128xf32>
    %cst = arith.constant dense<0.000000e+00> : vector<5xf32>
    %4 = vector.multi_reduction <add>, %1, %cst [1] : vector<5x128xf32> to vector<5xf32>
    %5 = vector.shape_cast %4 : vector<5xf32> to vector<5x1xf32>
    %cst_6 = arith.constant 1.280000e+02 : f32
    %6 = vector.broadcast %cst_6 : f32 to vector<5x1xf32>
    %7 = arith.divf %5, %6 : vector<5x1xf32>
    %8 = vector.broadcast %7 : vector<5x1xf32> to vector<5x128xf32>
    %9 = arith.subf %1, %8 : vector<5x128xf32>
    %10 = arith.mulf %9, %9 : vector<5x128xf32>
    %cst_7 = arith.constant dense<0.000000e+00> : vector<5xf32>
    %11 = vector.multi_reduction <add>, %10, %cst_7 [1] : vector<5x128xf32> to vector<5xf32>
    %12 = vector.shape_cast %11 : vector<5xf32> to vector<5x1xf32>
    %cst_8 = arith.constant 1.280000e+02 : f32
    %13 = vector.broadcast %cst_8 : f32 to vector<5x1xf32>
    %14 = arith.divf %12, %13 : vector<5x1xf32>
    %15 = vector.broadcast %7 : vector<5x1xf32> to vector<5x128xf32>
    %16 = arith.subf %1, %15 : vector<5x128xf32>
    %cst_9 = arith.constant 9.99999974E-6 : f32
    %17 = vector.broadcast %cst_9 : f32 to vector<5x1xf32>
    %18 = arith.addf %14, %17 : vector<5x1xf32>
    %19 = math.rsqrt %18 : vector<5x1xf32>
    %20 = vector.broadcast %19 : vector<5x1xf32> to vector<5x128xf32>
    %21 = arith.mulf %16, %20 : vector<5x128xf32>
    %22 = vector.broadcast %2 : vector<1x128xf32> to vector<5x128xf32>
    %23 = arith.mulf %21, %22 : vector<5x128xf32>
    %24 = vector.broadcast %3 : vector<1x128xf32> to vector<5x128xf32>
    %25 = arith.addf %23, %24 : vector<5x128xf32>
    %c0_10 = arith.constant 0 : index
    %c0_11 = arith.constant 0 : index
    %26 = vector.load %arg4[%c0_10, %c0_11] : memref<128x384xbf16, #tpu.memory_space<vmem>>, vector<128x384xbf16>
    %c0_12 = arith.constant 0 : index
    %c0_13 = arith.constant 0 : index
    %27 = vector.load %arg5[%c0_12, %c0_13] : memref<1x384xf32, #tpu.memory_space<vmem>>, vector<1x384xf32>
    %c0_14 = arith.constant 0 : index
    %c0_15 = arith.constant 0 : index
    %28 = vector.load %arg6[%c0_14, %c0_15] : memref<128x128xbf16, #tpu.memory_space<vmem>>, vector<128x128xbf16>
    %c0_16 = arith.constant 0 : index
    %c0_17 = arith.constant 0 : index
    %29 = vector.load %arg7[%c0_16, %c0_17] : memref<1x128xf32, #tpu.memory_space<vmem>>, vector<1x128xf32>
    %30 = arith.truncf %25 : vector<5x128xf32> to vector<5x128xbf16>
    %cst_18 = arith.constant dense<0.000000e+00> : vector<5x384xf32>
    %31 = tpu.matmul %30, %26, %cst_18 {dimension_numbers = #tpu.dot_dimension_numbers<[1], [0], [0], [1], [0, 0, 1, 1], [], []>} : vector<5x128xbf16>, vector<128x384xbf16>, vector<5x384xf32> -> vector<5x384xf32>
    %32 = vector.broadcast %27 : vector<1x384xf32> to vector<5x384xf32>
    %33 = arith.addf %31, %32 : vector<5x384xf32>
    %cst_19 = arith.constant 0.000000e+00 : f32
    %34 = vector.broadcast %cst_19 : f32 to vector<5x128xf32>
    %35 = vector.extract_strided_slice %33 {offsets = [0, 0], sizes = [5, 32], strides = [1, 1]} : vector<5x384xf32> to vector<5x32xf32>
    %36 = vector.extract_strided_slice %33 {offsets = [0, 128], sizes = [5, 32], strides = [1, 1]} : vector<5x384xf32> to vector<5x32xf32>
    %37 = vector.extract_strided_slice %33 {offsets = [0, 256], sizes = [5, 32], strides = [1, 1]} : vector<5x384xf32> to vector<5x32xf32>
    %38 = arith.truncf %35 : vector<5x32xf32> to vector<5x32xbf16>
    %39 = arith.truncf %36 : vector<5x32xf32> to vector<5x32xbf16>
    %cst_20 = arith.constant dense<0.000000e+00> : vector<5x5xf32>
    %40 = tpu.matmul %38, %39, %cst_20 {dimension_numbers = #tpu.dot_dimension_numbers<[1], [1], [0], [0], [0, 0, 1, 0], [], []>} : vector<5x32xbf16>, vector<5x32xbf16>, vector<5x5xf32> -> vector<5x5xf32>
    %cst_21 = arith.constant 0.176776692 : f32
    %41 = vector.broadcast %cst_21 : f32 to vector<5x5xf32>
    %42 = arith.mulf %40, %41 : vector<5x5xf32>
    %cst_22 = arith.constant dense<0xFF800000> : vector<5xf32>
    %43 = vector.multi_reduction <maximumf>, %42, %cst_22 [1] : vector<5x5xf32> to vector<5xf32>
    %44 = vector.shape_cast %43 : vector<5xf32> to vector<5x1xf32>
    %45 = vector.broadcast %44 : vector<5x1xf32> to vector<5x5xf32>
    %46 = arith.subf %42, %45 : vector<5x5xf32>
    %47 = math.exp %46 : vector<5x5xf32>
    %cst_23 = arith.constant dense<0.000000e+00> : vector<5xf32>
    %48 = vector.multi_reduction <add>, %47, %cst_23 [1] : vector<5x5xf32> to vector<5xf32>
    %49 = vector.shape_cast %48 : vector<5xf32> to vector<5x1xf32>
    %50 = tpu.reciprocal %49 {approx = true} : vector<5x1xf32> -> vector<5x1xf32>
    %51 = vector.broadcast %50 : vector<5x1xf32> to vector<5x5xf32>
    %52 = arith.mulf %47, %51 : vector<5x5xf32>
    %53 = arith.truncf %52 : vector<5x5xf32> to vector<5x5xbf16>
    %54 = arith.truncf %37 : vector<5x32xf32> to vector<5x32xbf16>
    %cst_24 = arith.constant dense<0.000000e+00> : vector<5x32xf32>
    %55 = tpu.matmul %53, %54, %cst_24 {dimension_numbers = #tpu.dot_dimension_numbers<[1], [0], [0], [1], [0, 0, 1, 1], [], []>} : vector<5x5xbf16>, vector<5x32xbf16>, vector<5x32xf32> -> vector<5x32xf32>
    %56 = vector.extract_strided_slice %28 {offsets = [0, 0], sizes = [32, 128], strides = [1, 1]} : vector<128x128xbf16> to vector<32x128xbf16>
    %57 = arith.truncf %55 : vector<5x32xf32> to vector<5x32xbf16>
    %cst_25 = arith.constant dense<0.000000e+00> : vector<5x128xf32>
    %58 = tpu.matmul %57, %56, %cst_25 {dimension_numbers = #tpu.dot_dimension_numbers<[1], [0], [0], [1], [0, 0, 1, 1], [], []>} : vector<5x32xbf16>, vector<32x128xbf16>, vector<5x128xf32> -> vector<5x128xf32>
    %59 = arith.addf %34, %58 : vector<5x128xf32>
    %60 = vector.extract_strided_slice %33 {offsets = [0, 32], sizes = [5, 32], strides = [1, 1]} : vector<5x384xf32> to vector<5x32xf32>
    %61 = vector.extract_strided_slice %33 {offsets = [0, 160], sizes = [5, 32], strides = [1, 1]} : vector<5x384xf32> to vector<5x32xf32>
    %62 = vector.extract_strided_slice %33 {offsets = [0, 288], sizes = [5, 32], strides = [1, 1]} : vector<5x384xf32> to vector<5x32xf32>
    %63 = arith.truncf %60 : vector<5x32xf32> to vector<5x32xbf16>
    %64 = arith.truncf %61 : vector<5x32xf32> to vector<5x32xbf16>
    %cst_26 = arith.constant dense<0.000000e+00> : vector<5x5xf32>
    %65 = tpu.matmul %63, %64, %cst_26 {dimension_numbers = #tpu.dot_dimension_numbers<[1], [1], [0], [0], [0, 0, 1, 0], [], []>} : vector<5x32xbf16>, vector<5x32xbf16>, vector<5x5xf32> -> vector<5x5xf32>
    %cst_27 = arith.constant 0.176776692 : f32
    %66 = vector.broadcast %cst_27 : f32 to vector<5x5xf32>
    %67 = arith.mulf %65, %66 : vector<5x5xf32>
    %cst_28 = arith.constant dense<0xFF800000> : vector<5xf32>
    %68 = vector.multi_reduction <maximumf>, %67, %cst_28 [1] : vector<5x5xf32> to vector<5xf32>
    %69 = vector.shape_cast %68 : vector<5xf32> to vector<5x1xf32>
    %70 = vector.broadcast %69 : vector<5x1xf32> to vector<5x5xf32>
    %71 = arith.subf %67, %70 : vector<5x5xf32>
    %72 = math.exp %71 : vector<5x5xf32>
    %cst_29 = arith.constant dense<0.000000e+00> : vector<5xf32>
    %73 = vector.multi_reduction <add>, %72, %cst_29 [1] : vector<5x5xf32> to vector<5xf32>
    %74 = vector.shape_cast %73 : vector<5xf32> to vector<5x1xf32>
    %75 = tpu.reciprocal %74 {approx = true} : vector<5x1xf32> -> vector<5x1xf32>
    %76 = vector.broadcast %75 : vector<5x1xf32> to vector<5x5xf32>
    %77 = arith.mulf %72, %76 : vector<5x5xf32>
    %78 = arith.truncf %77 : vector<5x5xf32> to vector<5x5xbf16>
    %79 = arith.truncf %62 : vector<5x32xf32> to vector<5x32xbf16>
    %cst_30 = arith.constant dense<0.000000e+00> : vector<5x32xf32>
    %80 = tpu.matmul %78, %79, %cst_30 {dimension_numbers = #tpu.dot_dimension_numbers<[1], [0], [0], [1], [0, 0, 1, 1], [], []>} : vector<5x5xbf16>, vector<5x32xbf16>, vector<5x32xf32> -> vector<5x32xf32>
    %81 = vector.extract_strided_slice %28 {offsets = [32, 0], sizes = [32, 128], strides = [1, 1]} : vector<128x128xbf16> to vector<32x128xbf16>
    %82 = arith.truncf %80 : vector<5x32xf32> to vector<5x32xbf16>
    %cst_31 = arith.constant dense<0.000000e+00> : vector<5x128xf32>
    %83 = tpu.matmul %82, %81, %cst_31 {dimension_numbers = #tpu.dot_dimension_numbers<[1], [0], [0], [1], [0, 0, 1, 1], [], []>} : vector<5x32xbf16>, vector<32x128xbf16>, vector<5x128xf32> -> vector<5x128xf32>
    %84 = arith.addf %59, %83 : vector<5x128xf32>
    %85 = vector.extract_strided_slice %33 {offsets = [0, 64], sizes = [5, 32], strides = [1, 1]} : vector<5x384xf32> to vector<5x32xf32>
    %86 = vector.extract_strided_slice %33 {offsets = [0, 192], sizes = [5, 32], strides = [1, 1]} : vector<5x384xf32> to vector<5x32xf32>
    %87 = vector.extract_strided_slice %33 {offsets = [0, 320], sizes = [5, 32], strides = [1, 1]} : vector<5x384xf32> to vector<5x32xf32>
    %88 = arith.truncf %85 : vector<5x32xf32> to vector<5x32xbf16>
    %89 = arith.truncf %86 : vector<5x32xf32> to vector<5x32xbf16>
    %cst_32 = arith.constant dense<0.000000e+00> : vector<5x5xf32>
    %90 = tpu.matmul %88, %89, %cst_32 {dimension_numbers = #tpu.dot_dimension_numbers<[1], [1], [0], [0], [0, 0, 1, 0], [], []>} : vector<5x32xbf16>, vector<5x32xbf16>, vector<5x5xf32> -> vector<5x5xf32>
    %cst_33 = arith.constant 0.176776692 : f32
    %91 = vector.broadcast %cst_33 : f32 to vector<5x5xf32>
    %92 = arith.mulf %90, %91 : vector<5x5xf32>
    %cst_34 = arith.constant dense<0xFF800000> : vector<5xf32>
    %93 = vector.multi_reduction <maximumf>, %92, %cst_34 [1] : vector<5x5xf32> to vector<5xf32>
    %94 = vector.shape_cast %93 : vector<5xf32> to vector<5x1xf32>
    %95 = vector.broadcast %94 : vector<5x1xf32> to vector<5x5xf32>
    %96 = arith.subf %92, %95 : vector<5x5xf32>
    %97 = math.exp %96 : vector<5x5xf32>
    %cst_35 = arith.constant dense<0.000000e+00> : vector<5xf32>
    %98 = vector.multi_reduction <add>, %97, %cst_35 [1] : vector<5x5xf32> to vector<5xf32>
    %99 = vector.shape_cast %98 : vector<5xf32> to vector<5x1xf32>
    %100 = tpu.reciprocal %99 {approx = true} : vector<5x1xf32> -> vector<5x1xf32>
    %101 = vector.broadcast %100 : vector<5x1xf32> to vector<5x5xf32>
    %102 = arith.mulf %97, %101 : vector<5x5xf32>
    %103 = arith.truncf %102 : vector<5x5xf32> to vector<5x5xbf16>
    %104 = arith.truncf %87 : vector<5x32xf32> to vector<5x32xbf16>
    %cst_36 = arith.constant dense<0.000000e+00> : vector<5x32xf32>
    %105 = tpu.matmul %103, %104, %cst_36 {dimension_numbers = #tpu.dot_dimension_numbers<[1], [0], [0], [1], [0, 0, 1, 1], [], []>} : vector<5x5xbf16>, vector<5x32xbf16>, vector<5x32xf32> -> vector<5x32xf32>
    %106 = vector.extract_strided_slice %28 {offsets = [64, 0], sizes = [32, 128], strides = [1, 1]} : vector<128x128xbf16> to vector<32x128xbf16>
    %107 = arith.truncf %105 : vector<5x32xf32> to vector<5x32xbf16>
    %cst_37 = arith.constant dense<0.000000e+00> : vector<5x128xf32>
    %108 = tpu.matmul %107, %106, %cst_37 {dimension_numbers = #tpu.dot_dimension_numbers<[1], [0], [0], [1], [0, 0, 1, 1], [], []>} : vector<5x32xbf16>, vector<32x128xbf16>, vector<5x128xf32> -> vector<5x128xf32>
    %109 = arith.addf %84, %108 : vector<5x128xf32>
    %110 = vector.extract_strided_slice %33 {offsets = [0, 96], sizes = [5, 32], strides = [1, 1]} : vector<5x384xf32> to vector<5x32xf32>
    %111 = vector.extract_strided_slice %33 {offsets = [0, 224], sizes = [5, 32], strides = [1, 1]} : vector<5x384xf32> to vector<5x32xf32>
    %112 = vector.extract_strided_slice %33 {offsets = [0, 352], sizes = [5, 32], strides = [1, 1]} : vector<5x384xf32> to vector<5x32xf32>
    %113 = arith.truncf %110 : vector<5x32xf32> to vector<5x32xbf16>
    %114 = arith.truncf %111 : vector<5x32xf32> to vector<5x32xbf16>
    %cst_38 = arith.constant dense<0.000000e+00> : vector<5x5xf32>
    %115 = tpu.matmul %113, %114, %cst_38 {dimension_numbers = #tpu.dot_dimension_numbers<[1], [1], [0], [0], [0, 0, 1, 0], [], []>} : vector<5x32xbf16>, vector<5x32xbf16>, vector<5x5xf32> -> vector<5x5xf32>
    %cst_39 = arith.constant 0.176776692 : f32
    %116 = vector.broadcast %cst_39 : f32 to vector<5x5xf32>
    %117 = arith.mulf %115, %116 : vector<5x5xf32>
    %cst_40 = arith.constant dense<0xFF800000> : vector<5xf32>
    %118 = vector.multi_reduction <maximumf>, %117, %cst_40 [1] : vector<5x5xf32> to vector<5xf32>
    %119 = vector.shape_cast %118 : vector<5xf32> to vector<5x1xf32>
    %120 = vector.broadcast %119 : vector<5x1xf32> to vector<5x5xf32>
    %121 = arith.subf %117, %120 : vector<5x5xf32>
    %122 = math.exp %121 : vector<5x5xf32>
    %cst_41 = arith.constant dense<0.000000e+00> : vector<5xf32>
    %123 = vector.multi_reduction <add>, %122, %cst_41 [1] : vector<5x5xf32> to vector<5xf32>
    %124 = vector.shape_cast %123 : vector<5xf32> to vector<5x1xf32>
    %125 = tpu.reciprocal %124 {approx = true} : vector<5x1xf32> -> vector<5x1xf32>
    %126 = vector.broadcast %125 : vector<5x1xf32> to vector<5x5xf32>
    %127 = arith.mulf %122, %126 : vector<5x5xf32>
    %128 = arith.truncf %127 : vector<5x5xf32> to vector<5x5xbf16>
    %129 = arith.truncf %112 : vector<5x32xf32> to vector<5x32xbf16>
    %cst_42 = arith.constant dense<0.000000e+00> : vector<5x32xf32>
    %130 = tpu.matmul %128, %129, %cst_42 {dimension_numbers = #tpu.dot_dimension_numbers<[1], [0], [0], [1], [0, 0, 1, 1], [], []>} : vector<5x5xbf16>, vector<5x32xbf16>, vector<5x32xf32> -> vector<5x32xf32>
    %131 = vector.extract_strided_slice %28 {offsets = [96, 0], sizes = [32, 128], strides = [1, 1]} : vector<128x128xbf16> to vector<32x128xbf16>
    %132 = arith.truncf %130 : vector<5x32xf32> to vector<5x32xbf16>
    %cst_43 = arith.constant dense<0.000000e+00> : vector<5x128xf32>
    %133 = tpu.matmul %132, %131, %cst_43 {dimension_numbers = #tpu.dot_dimension_numbers<[1], [0], [0], [1], [0, 0, 1, 1], [], []>} : vector<5x32xbf16>, vector<32x128xbf16>, vector<5x128xf32> -> vector<5x128xf32>
    %134 = arith.addf %109, %133 : vector<5x128xf32>
    %135 = vector.broadcast %29 : vector<1x128xf32> to vector<5x128xf32>
    %136 = arith.addf %134, %135 : vector<5x128xf32>
    %137 = arith.addf %1, %136 : vector<5x128xf32>
    %c0_44 = arith.constant 0 : index
    %c0_45 = arith.constant 0 : index
    %138 = vector.load %arg8[%c0_44, %c0_45] : memref<1x128xf32, #tpu.memory_space<vmem>>, vector<1x128xf32>
    %c0_46 = arith.constant 0 : index
    %c0_47 = arith.constant 0 : index
    %139 = vector.load %arg9[%c0_46, %c0_47] : memref<1x128xf32, #tpu.memory_space<vmem>>, vector<1x128xf32>
    %cst_48 = arith.constant dense<0.000000e+00> : vector<5xf32>
    %140 = vector.multi_reduction <add>, %137, %cst_48 [1] : vector<5x128xf32> to vector<5xf32>
    %141 = vector.shape_cast %140 : vector<5xf32> to vector<5x1xf32>
    %cst_49 = arith.constant 1.280000e+02 : f32
    %142 = vector.broadcast %cst_49 : f32 to vector<5x1xf32>
    %143 = arith.divf %141, %142 : vector<5x1xf32>
    %144 = vector.broadcast %143 : vector<5x1xf32> to vector<5x128xf32>
    %145 = arith.subf %137, %144 : vector<5x128xf32>
    %146 = arith.mulf %145, %145 : vector<5x128xf32>
    %cst_50 = arith.constant dense<0.000000e+00> : vector<5xf32>
    %147 = vector.multi_reduction <add>, %146, %cst_50 [1] : vector<5x128xf32> to vector<5xf32>
    %148 = vector.shape_cast %147 : vector<5xf32> to vector<5x1xf32>
    %cst_51 = arith.constant 1.280000e+02 : f32
    %149 = vector.broadcast %cst_51 : f32 to vector<5x1xf32>
    %150 = arith.divf %148, %149 : vector<5x1xf32>
    %151 = vector.broadcast %143 : vector<5x1xf32> to vector<5x128xf32>
    %152 = arith.subf %137, %151 : vector<5x128xf32>
    %cst_52 = arith.constant 9.99999974E-6 : f32
    %153 = vector.broadcast %cst_52 : f32 to vector<5x1xf32>
    %154 = arith.addf %150, %153 : vector<5x1xf32>
    %155 = math.rsqrt %154 : vector<5x1xf32>
    %156 = vector.broadcast %155 : vector<5x1xf32> to vector<5x128xf32>
    %157 = arith.mulf %152, %156 : vector<5x128xf32>
    %158 = vector.broadcast %138 : vector<1x128xf32> to vector<5x128xf32>
    %159 = arith.mulf %157, %158 : vector<5x128xf32>
    %160 = vector.broadcast %139 : vector<1x128xf32> to vector<5x128xf32>
    %161 = arith.addf %159, %160 : vector<5x128xf32>
    %c0_53 = arith.constant 0 : index
    %c0_54 = arith.constant 0 : index
    %162 = vector.load %arg10[%c0_53, %c0_54] : memref<128x512xbf16, #tpu.memory_space<vmem>>, vector<128x512xbf16>
    %163 = arith.truncf %161 : vector<5x128xf32> to vector<5x128xbf16>
    %cst_55 = arith.constant dense<0.000000e+00> : vector<5x512xf32>
    %164 = tpu.matmul %163, %162, %cst_55 {dimension_numbers = #tpu.dot_dimension_numbers<[1], [0], [0], [1], [0, 0, 1, 1], [], []>} : vector<5x128xbf16>, vector<128x512xbf16>, vector<5x512xf32> -> vector<5x512xf32>
    %c0_56 = arith.constant 0 : index
    %c0_57 = arith.constant 0 : index
    %165 = vector.load %arg11[%c0_56, %c0_57] : memref<1x512xf32, #tpu.memory_space<vmem>>, vector<1x512xf32>
    %166 = vector.broadcast %165 : vector<1x512xf32> to vector<5x512xf32>
    %167 = arith.addf %164, %166 : vector<5x512xf32>
    %cst_58 = arith.constant 5.000000e-01 : f32
    %168 = vector.broadcast %cst_58 : f32 to vector<5x512xf32>
    %169 = arith.mulf %168, %167 : vector<5x512xf32>
    %cst_59 = arith.constant 4.471500e-02 : f32
    %170 = vector.broadcast %cst_59 : f32 to vector<5x512xf32>
    %171 = arith.mulf %170, %167 : vector<5x512xf32>
    %172 = arith.mulf %171, %167 : vector<5x512xf32>
    %173 = arith.mulf %172, %167 : vector<5x512xf32>
    %174 = arith.addf %167, %173 : vector<5x512xf32>
    %cst_60 = arith.constant 0.797884583 : f32
    %175 = vector.broadcast %cst_60 : f32 to vector<5x512xf32>
    %176 = arith.mulf %175, %174 : vector<5x512xf32>
    %177 = math.tanh %176 : vector<5x512xf32>
    %cst_61 = arith.constant 1.000000e+00 : f32
    %178 = vector.broadcast %cst_61 : f32 to vector<5x512xf32>
    %179 = arith.addf %178, %177 : vector<5x512xf32>
    %180 = arith.mulf %169, %179 : vector<5x512xf32>
    %c0_62 = arith.constant 0 : index
    %c0_63 = arith.constant 0 : index
    %181 = vector.load %arg12[%c0_62, %c0_63] : memref<512x128xbf16, #tpu.memory_space<vmem>>, vector<512x128xbf16>
    %182 = arith.truncf %180 : vector<5x512xf32> to vector<5x512xbf16>
    %cst_64 = arith.constant dense<0.000000e+00> : vector<5x128xf32>
    %183 = tpu.matmul %182, %181, %cst_64 {dimension_numbers = #tpu.dot_dimension_numbers<[1], [0], [0], [1], [0, 0, 1, 1], [], []>} : vector<5x512xbf16>, vector<512x128xbf16>, vector<5x128xf32> -> vector<5x128xf32>
    %184 = arith.addf %137, %183 : vector<5x128xf32>
    %c0_65 = arith.constant 0 : index
    %c0_66 = arith.constant 0 : index
    %185 = vector.load %arg13[%c0_65, %c0_66] : memref<1x128xf32, #tpu.memory_space<vmem>>, vector<1x128xf32>
    %186 = vector.broadcast %185 : vector<1x128xf32> to vector<5x128xf32>
    %187 = arith.addf %184, %186 : vector<5x128xf32>
    %c0_67 = arith.constant 0 : index
    %c0_68 = arith.constant 0 : index
    %c0_69 = arith.constant 0 : index
    %188 = vector.load %arg14[%c0_67, %c0_68, %c0_69] : memref<1x5x128xf32, #tpu.memory_space<vmem>>, vector<1x5x128xf32>
    %189 = vector.shape_cast %188 : vector<1x5x128xf32> to vector<5x128xf32>
    %190 = vector.shape_cast %187 : vector<5x128xf32> to vector<1x5x128xf32>
    tpu.vector_store %arg14[%c0_67, %c0_68, %c0_69], %190 {strides = array<i32>} : memref<1x5x128xf32, #tpu.memory_space<vmem>>, vector<1x5x128xf32>,
    return
  }
  func.func @transform_0(%arg0: i32) -> (i32, i32, i32) {
    %c0_i32 = arith.constant 0 : i32
    %c0_i32_0 = arith.constant 0 : i32
    %c0_i32_1 = arith.constant 0 : i32
    return %arg0, %c0_i32, %c0_i32_0 : i32, i32, i32
  }
  func.func @transform_1(%arg0: i32) -> (i32, i32) {
    %c0_i32 = arith.constant 0 : i32
    %c0_i32_0 = arith.constant 0 : i32
    %c0_i32_1 = arith.constant 0 : i32
    return %c0_i32, %c0_i32_0 : i32, i32
  }
  func.func @transform_2(%arg0: i32) -> (i32, i32) {
    %c0_i32 = arith.constant 0 : i32
    %c0_i32_0 = arith.constant 0 : i32
    %c0_i32_1 = arith.constant 0 : i32
    return %c0_i32, %c0_i32_0 : i32, i32
  }
  func.func @transform_3(%arg0: i32) -> (i32, i32) {
    %c0_i32 = arith.constant 0 : i32
    %c0_i32_0 = arith.constant 0 : i32
    %c0_i32_1 = arith.constant 0 : i32
    return %c0_i32, %c0_i32_0 : i32, i32
  }
  func.func @transform_4(%arg0: i32) -> (i32, i32) {
    %c0_i32 = arith.constant 0 : i32
    %c0_i32_0 = arith.constant 0 : i32
    %c0_i32_1 = arith.constant 0 : i32
    return %c0_i32, %c0_i32_0 : i32, i32
  }
  func.func @transform_5(%arg0: i32) -> (i32, i32) {
    %c0_i32 = arith.constant 0 : i32
    %c0_i32_0 = arith.constant 0 : i32
    %c0_i32_1 = arith.constant 0 : i32
    return %c0_i32, %c0_i32_0 : i32, i32
  }
  func.func @transform_6(%arg0: i32) -> (i32, i32) {
    %c0_i32 = arith.constant 0 : i32
    %c0_i32_0 = arith.constant 0 : i32
    %c0_i32_1 = arith.constant 0 : i32
    return %c0_i32, %c0_i32_0 : i32, i32
  }
  func.func @transform_7(%arg0: i32) -> (i32, i32) {
    %c0_i32 = arith.constant 0 : i32
    %c0_i32_0 = arith.constant 0 : i32
    %c0_i32_1 = arith.constant 0 : i32
    return %c0_i32, %c0_i32_0 : i32, i32
  }
  func.func @transform_8(%arg0: i32) -> (i32, i32) {
    %c0_i32 = arith.constant 0 : i32
    %c0_i32_0 = arith.constant 0 : i32
    %c0_i32_1 = arith.constant 0 : i32
    return %c0_i32, %c0_i32_0 : i32, i32
  }
  func.func @transform_9(%arg0: i32) -> (i32, i32) {
    %c0_i32 = arith.constant 0 : i32
    %c0_i32_0 = arith.constant 0 : i32
    %c0_i32_1 = arith.constant 0 : i32
    return %c0_i32, %c0_i32_0 : i32, i32
  }
  func.func @transform_10(%arg0: i32) -> (i32, i32) {
    %c0_i32 = arith.constant 0 : i32
    %c0_i32_0 = arith.constant 0 : i32
    %c0_i32_1 = arith.constant 0 : i32
    return %c0_i32, %c0_i32_0 : i32, i32
  }
  func.func @transform_11(%arg0: i32) -> (i32, i32) {
    %c0_i32 = arith.constant 0 : i32
    %c0_i32_0 = arith.constant 0 : i32
    %c0_i32_1 = arith.constant 0 : i32
    return %c0_i32, %c0_i32_0 : i32, i32
  }
  func.func @transform_12(%arg0: i32) -> (i32, i32) {
    %c0_i32 = arith.constant 0 : i32
    %c0_i32_0 = arith.constant 0 : i32
    %c0_i32_1 = arith.constant 0 : i32
    return %c0_i32, %c0_i32_0 : i32, i32
  }
  func.func @transform_13(%arg0: i32) -> (i32, i32, i32) {
    %c0_i32 = arith.constant 0 : i32
    %c0_i32_0 = arith.constant 0 : i32
    %c0_i32_1 = arith.constant 0 : i32
    return %arg0, %c0_i32, %c0_i32_0 : i32, i32, i32
  }
}

module attributes {stable_mosaic.version = 11 : i64} {
  func.func @_vit_head_kernel(%arg0: memref<8x5x128xf32, #tpu.memory_space<vmem>>, %arg1: memref<1x128xf32, #tpu.memory_space<vmem>>, %arg2: memref<1x128xf32, #tpu.memory_space<vmem>>, %arg3: memref<8x128xf32, #tpu.memory_space<vmem>>) attributes {dimension_semantics = [], scalar_prefetch = 0 : i64, scratch_operands = 0 : i64, tpu.core_type = #tpu.core_type<tc>} {
    %c0 = arith.constant 0 : index
    %c0_0 = arith.constant 0 : index
    %c0_1 = arith.constant 0 : index
    %0 = vector.load %arg0[%c0, %c0_0, %c0_1] : memref<8x5x128xf32, #tpu.memory_space<vmem>>, vector<8x1x128xf32>
    %1 = vector.shape_cast %0 : vector<8x1x128xf32> to vector<8x128xf32>
    %c0_2 = arith.constant 0 : index
    %c0_3 = arith.constant 0 : index
    %2 = vector.load %arg1[%c0_2, %c0_3] : memref<1x128xf32, #tpu.memory_space<vmem>>, vector<1x128xf32>
    %c0_4 = arith.constant 0 : index
    %c0_5 = arith.constant 0 : index
    %3 = vector.load %arg2[%c0_4, %c0_5] : memref<1x128xf32, #tpu.memory_space<vmem>>, vector<1x128xf32>
    %cst = arith.constant dense<0.000000e+00> : vector<8xf32>
    %4 = vector.multi_reduction <add>, %1, %cst [1] : vector<8x128xf32> to vector<8xf32>
    %5 = vector.shape_cast %4 : vector<8xf32> to vector<8x1xf32>
    %cst_6 = arith.constant 1.280000e+02 : f32
    %6 = vector.broadcast %cst_6 : f32 to vector<8x1xf32>
    %7 = arith.divf %5, %6 : vector<8x1xf32>
    %8 = vector.broadcast %7 : vector<8x1xf32> to vector<8x128xf32>
    %9 = arith.subf %1, %8 : vector<8x128xf32>
    %10 = arith.mulf %9, %9 : vector<8x128xf32>
    %cst_7 = arith.constant dense<0.000000e+00> : vector<8xf32>
    %11 = vector.multi_reduction <add>, %10, %cst_7 [1] : vector<8x128xf32> to vector<8xf32>
    %12 = vector.shape_cast %11 : vector<8xf32> to vector<8x1xf32>
    %cst_8 = arith.constant 1.280000e+02 : f32
    %13 = vector.broadcast %cst_8 : f32 to vector<8x1xf32>
    %14 = arith.divf %12, %13 : vector<8x1xf32>
    %15 = vector.broadcast %7 : vector<8x1xf32> to vector<8x128xf32>
    %16 = arith.subf %1, %15 : vector<8x128xf32>
    %cst_9 = arith.constant 9.99999974E-6 : f32
    %17 = vector.broadcast %cst_9 : f32 to vector<8x1xf32>
    %18 = arith.addf %14, %17 : vector<8x1xf32>
    %19 = math.rsqrt %18 : vector<8x1xf32>
    %20 = vector.broadcast %19 : vector<8x1xf32> to vector<8x128xf32>
    %21 = arith.mulf %16, %20 : vector<8x128xf32>
    %22 = vector.broadcast %2 : vector<1x128xf32> to vector<8x128xf32>
    %23 = arith.mulf %21, %22 : vector<8x128xf32>
    %24 = vector.broadcast %3 : vector<1x128xf32> to vector<8x128xf32>
    %25 = arith.addf %23, %24 : vector<8x128xf32>
    %c0_10 = arith.constant 0 : index
    %c0_11 = arith.constant 0 : index
    %26 = vector.load %arg3[%c0_10, %c0_11] : memref<8x128xf32, #tpu.memory_space<vmem>>, vector<8x128xf32>
    tpu.vector_store %arg3[%c0_10, %c0_11], %25 {strides = array<i32>} : memref<8x128xf32, #tpu.memory_space<vmem>>, vector<8x128xf32>,
    return
  }
}

module attributes {stable_mosaic.version = 11 : i64} {
  func.func @_mil_block_kernel(%arg0: i32, %arg1: memref<1x4x128xf32, #tpu.memory_space<vmem>>, %arg2: memref<4x128xf32, #tpu.memory_space<vmem>>, %arg3: memref<1x128xf32, #tpu.memory_space<vmem>>, %arg4: memref<1x128xf32, #tpu.memory_space<vmem>>, %arg5: memref<128x384xbf16, #tpu.memory_space<vmem>>, %arg6: memref<1x384xf32, #tpu.memory_space<vmem>>, %arg7: memref<128x128xbf16, #tpu.memory_space<vmem>>, %arg8: memref<1x128xf32, #tpu.memory_space<vmem>>, %arg9: memref<1x128xf32, #tpu.memory_space<vmem>>, %arg10: memref<1x128xf32, #tpu.memory_space<vmem>>, %arg11: memref<128x512xbf16, #tpu.memory_space<vmem>>, %arg12: memref<1x512xf32, #tpu.memory_space<vmem>>, %arg13: memref<512x128xbf16, #tpu.memory_space<vmem>>, %arg14: memref<1x128xf32, #tpu.memory_space<vmem>>, %arg15: memref<1x4x128xf32, #tpu.memory_space<vmem>>) attributes {dimension_semantics = [#tpu.dimension_semantics<parallel>], iteration_bounds = array<i64: 2>, scalar_prefetch = 0 : i64, scratch_operands = 0 : i64, tpu.core_type = #tpu.core_type<tc>, window_params = [{transform_indices = @transform_0, window_bounds = array<i64: 1, 4, 128>}, {pipeline_mode = #tpu.pipeline_mode<synchronous>, transform_indices = @transform_1, window_bounds = array<i64: 4, 128>}, {pipeline_mode = #tpu.pipeline_mode<synchronous>, transform_indices = @transform_2, window_bounds = array<i64: 1, 128>}, {pipeline_mode = #tpu.pipeline_mode<synchronous>, transform_indices = @transform_3, window_bounds = array<i64: 1, 128>}, {pipeline_mode = #tpu.pipeline_mode<synchronous>, transform_indices = @transform_4, window_bounds = array<i64: 128, 384>}, {pipeline_mode = #tpu.pipeline_mode<synchronous>, transform_indices = @transform_5, window_bounds = array<i64: 1, 384>}, {pipeline_mode = #tpu.pipeline_mode<synchronous>, transform_indices = @transform_6, window_bounds = array<i64: 128, 128>}, {pipeline_mode = #tpu.pipeline_mode<synchronous>, transform_indices = @transform_7, window_bounds = array<i64: 1, 128>}, {pipeline_mode = #tpu.pipeline_mode<synchronous>, transform_indices = @transform_8, window_bounds = array<i64: 1, 128>}, {pipeline_mode = #tpu.pipeline_mode<synchronous>, transform_indices = @transform_9, window_bounds = array<i64: 1, 128>}, {pipeline_mode = #tpu.pipeline_mode<synchronous>, transform_indices = @transform_10, window_bounds = array<i64: 128, 512>}, {pipeline_mode = #tpu.pipeline_mode<synchronous>, transform_indices = @transform_11, window_bounds = array<i64: 1, 512>}, {pipeline_mode = #tpu.pipeline_mode<synchronous>, transform_indices = @transform_12, window_bounds = array<i64: 512, 128>}, {pipeline_mode = #tpu.pipeline_mode<synchronous>, transform_indices = @transform_13, window_bounds = array<i64: 1, 128>}, {transform_indices = @transform_14, window_bounds = array<i64: 1, 4, 128>}]} {
    %c0 = arith.constant 0 : index
    %c0_0 = arith.constant 0 : index
    %c0_1 = arith.constant 0 : index
    %0 = vector.load %arg1[%c0, %c0_0, %c0_1] : memref<1x4x128xf32, #tpu.memory_space<vmem>>, vector<1x4x128xf32>
    %1 = vector.shape_cast %0 : vector<1x4x128xf32> to vector<4x128xf32>
    %c0_2 = arith.constant 0 : index
    %c0_3 = arith.constant 0 : index
    %2 = vector.load %arg2[%c0_2, %c0_3] : memref<4x128xf32, #tpu.memory_space<vmem>>, vector<4x128xf32>
    %3 = arith.addf %1, %2 : vector<4x128xf32>
    %c0_4 = arith.constant 0 : index
    %c0_5 = arith.constant 0 : index
    %4 = vector.load %arg5[%c0_4, %c0_5] : memref<128x384xbf16, #tpu.memory_space<vmem>>, vector<128x384xbf16>
    %c0_6 = arith.constant 0 : index
    %c0_7 = arith.constant 0 : index
    %5 = vector.load %arg6[%c0_6, %c0_7] : memref<1x384xf32, #tpu.memory_space<vmem>>, vector<1x384xf32>
    %c0_8 = arith.constant 0 : index
    %c0_9 = arith.constant 0 : index
    %6 = vector.load %arg7[%c0_8, %c0_9] : memref<128x128xbf16, #tpu.memory_space<vmem>>, vector<128x128xbf16>
    %c0_10 = arith.constant 0 : index
    %c0_11 = arith.constant 0 : index
    %7 = vector.load %arg8[%c0_10, %c0_11] : memref<1x128xf32, #tpu.memory_space<vmem>>, vector<1x128xf32>
    %8 = arith.truncf %3 : vector<4x128xf32> to vector<4x128xbf16>
    %cst = arith.constant dense<0.000000e+00> : vector<4x384xf32>
    %9 = tpu.matmul %8, %4, %cst {dimension_numbers = #tpu.dot_dimension_numbers<[1], [0], [0], [1], [0, 0, 1, 1], [], []>} : vector<4x128xbf16>, vector<128x384xbf16>, vector<4x384xf32> -> vector<4x384xf32>
    %10 = vector.broadcast %5 : vector<1x384xf32> to vector<4x384xf32>
    %11 = arith.addf %9, %10 : vector<4x384xf32>
    %cst_12 = arith.constant 0.000000e+00 : f32
    %12 = vector.broadcast %cst_12 : f32 to vector<4x128xf32>
    %13 = vector.extract_strided_slice %11 {offsets = [0, 0], sizes = [4, 16], strides = [1, 1]} : vector<4x384xf32> to vector<4x16xf32>
    %14 = vector.extract_strided_slice %11 {offsets = [0, 128], sizes = [4, 16], strides = [1, 1]} : vector<4x384xf32> to vector<4x16xf32>
    %15 = vector.extract_strided_slice %11 {offsets = [0, 256], sizes = [4, 16], strides = [1, 1]} : vector<4x384xf32> to vector<4x16xf32>
    %16 = arith.truncf %13 : vector<4x16xf32> to vector<4x16xbf16>
    %17 = arith.truncf %14 : vector<4x16xf32> to vector<4x16xbf16>
    %cst_13 = arith.constant dense<0.000000e+00> : vector<4x4xf32>
    %18 = tpu.matmul %16, %17, %cst_13 {dimension_numbers = #tpu.dot_dimension_numbers<[1], [1], [0], [0], [0, 0, 1, 0], [], []>} : vector<4x16xbf16>, vector<4x16xbf16>, vector<4x4xf32> -> vector<4x4xf32>
    %cst_14 = arith.constant 2.500000e-01 : f32
    %19 = vector.broadcast %cst_14 : f32 to vector<4x4xf32>
    %20 = arith.mulf %18, %19 : vector<4x4xf32>
    %cst_15 = arith.constant dense<0xFF800000> : vector<4xf32>
    %21 = vector.multi_reduction <maximumf>, %20, %cst_15 [1] : vector<4x4xf32> to vector<4xf32>
    %22 = vector.shape_cast %21 : vector<4xf32> to vector<4x1xf32>
    %23 = vector.broadcast %22 : vector<4x1xf32> to vector<4x4xf32>
    %24 = arith.subf %20, %23 : vector<4x4xf32>
    %25 = math.exp %24 : vector<4x4xf32>
    %cst_16 = arith.constant dense<0.000000e+00> : vector<4xf32>
    %26 = vector.multi_reduction <add>, %25, %cst_16 [1] : vector<4x4xf32> to vector<4xf32>
    %27 = vector.shape_cast %26 : vector<4xf32> to vector<4x1xf32>
    %28 = tpu.reciprocal %27 {approx = true} : vector<4x1xf32> -> vector<4x1xf32>
    %29 = vector.broadcast %28 : vector<4x1xf32> to vector<4x4xf32>
    %30 = arith.mulf %25, %29 : vector<4x4xf32>
    %31 = arith.truncf %30 : vector<4x4xf32> to vector<4x4xbf16>
    %32 = arith.truncf %15 : vector<4x16xf32> to vector<4x16xbf16>
    %cst_17 = arith.constant dense<0.000000e+00> : vector<4x16xf32>
    %33 = tpu.matmul %31, %32, %cst_17 {dimension_numbers = #tpu.dot_dimension_numbers<[1], [0], [0], [1], [0, 0, 1, 1], [], []>} : vector<4x4xbf16>, vector<4x16xbf16>, vector<4x16xf32> -> vector<4x16xf32>
    %34 = vector.extract_strided_slice %6 {offsets = [0, 0], sizes = [16, 128], strides = [1, 1]} : vector<128x128xbf16> to vector<16x128xbf16>
    %35 = arith.truncf %33 : vector<4x16xf32> to vector<4x16xbf16>
    %cst_18 = arith.constant dense<0.000000e+00> : vector<4x128xf32>
    %36 = tpu.matmul %35, %34, %cst_18 {dimension_numbers = #tpu.dot_dimension_numbers<[1], [0], [0], [1], [0, 0, 1, 1], [], []>} : vector<4x16xbf16>, vector<16x128xbf16>, vector<4x128xf32> -> vector<4x128xf32>
    %37 = arith.addf %12, %36 : vector<4x128xf32>
    %38 = vector.extract_strided_slice %11 {offsets = [0, 16], sizes = [4, 16], strides = [1, 1]} : vector<4x384xf32> to vector<4x16xf32>
    %39 = vector.extract_strided_slice %11 {offsets = [0, 144], sizes = [4, 16], strides = [1, 1]} : vector<4x384xf32> to vector<4x16xf32>
    %40 = vector.extract_strided_slice %11 {offsets = [0, 272], sizes = [4, 16], strides = [1, 1]} : vector<4x384xf32> to vector<4x16xf32>
    %41 = arith.truncf %38 : vector<4x16xf32> to vector<4x16xbf16>
    %42 = arith.truncf %39 : vector<4x16xf32> to vector<4x16xbf16>
    %cst_19 = arith.constant dense<0.000000e+00> : vector<4x4xf32>
    %43 = tpu.matmul %41, %42, %cst_19 {dimension_numbers = #tpu.dot_dimension_numbers<[1], [1], [0], [0], [0, 0, 1, 0], [], []>} : vector<4x16xbf16>, vector<4x16xbf16>, vector<4x4xf32> -> vector<4x4xf32>
    %cst_20 = arith.constant 2.500000e-01 : f32
    %44 = vector.broadcast %cst_20 : f32 to vector<4x4xf32>
    %45 = arith.mulf %43, %44 : vector<4x4xf32>
    %cst_21 = arith.constant dense<0xFF800000> : vector<4xf32>
    %46 = vector.multi_reduction <maximumf>, %45, %cst_21 [1] : vector<4x4xf32> to vector<4xf32>
    %47 = vector.shape_cast %46 : vector<4xf32> to vector<4x1xf32>
    %48 = vector.broadcast %47 : vector<4x1xf32> to vector<4x4xf32>
    %49 = arith.subf %45, %48 : vector<4x4xf32>
    %50 = math.exp %49 : vector<4x4xf32>
    %cst_22 = arith.constant dense<0.000000e+00> : vector<4xf32>
    %51 = vector.multi_reduction <add>, %50, %cst_22 [1] : vector<4x4xf32> to vector<4xf32>
    %52 = vector.shape_cast %51 : vector<4xf32> to vector<4x1xf32>
    %53 = tpu.reciprocal %52 {approx = true} : vector<4x1xf32> -> vector<4x1xf32>
    %54 = vector.broadcast %53 : vector<4x1xf32> to vector<4x4xf32>
    %55 = arith.mulf %50, %54 : vector<4x4xf32>
    %56 = arith.truncf %55 : vector<4x4xf32> to vector<4x4xbf16>
    %57 = arith.truncf %40 : vector<4x16xf32> to vector<4x16xbf16>
    %cst_23 = arith.constant dense<0.000000e+00> : vector<4x16xf32>
    %58 = tpu.matmul %56, %57, %cst_23 {dimension_numbers = #tpu.dot_dimension_numbers<[1], [0], [0], [1], [0, 0, 1, 1], [], []>} : vector<4x4xbf16>, vector<4x16xbf16>, vector<4x16xf32> -> vector<4x16xf32>
    %59 = vector.extract_strided_slice %6 {offsets = [16, 0], sizes = [16, 128], strides = [1, 1]} : vector<128x128xbf16> to vector<16x128xbf16>
    %60 = arith.truncf %58 : vector<4x16xf32> to vector<4x16xbf16>
    %cst_24 = arith.constant dense<0.000000e+00> : vector<4x128xf32>
    %61 = tpu.matmul %60, %59, %cst_24 {dimension_numbers = #tpu.dot_dimension_numbers<[1], [0], [0], [1], [0, 0, 1, 1], [], []>} : vector<4x16xbf16>, vector<16x128xbf16>, vector<4x128xf32> -> vector<4x128xf32>
    %62 = arith.addf %37, %61 : vector<4x128xf32>
    %63 = vector.extract_strided_slice %11 {offsets = [0, 32], sizes = [4, 16], strides = [1, 1]} : vector<4x384xf32> to vector<4x16xf32>
    %64 = vector.extract_strided_slice %11 {offsets = [0, 160], sizes = [4, 16], strides = [1, 1]} : vector<4x384xf32> to vector<4x16xf32>
    %65 = vector.extract_strided_slice %11 {offsets = [0, 288], sizes = [4, 16], strides = [1, 1]} : vector<4x384xf32> to vector<4x16xf32>
    %66 = arith.truncf %63 : vector<4x16xf32> to vector<4x16xbf16>
    %67 = arith.truncf %64 : vector<4x16xf32> to vector<4x16xbf16>
    %cst_25 = arith.constant dense<0.000000e+00> : vector<4x4xf32>
    %68 = tpu.matmul %66, %67, %cst_25 {dimension_numbers = #tpu.dot_dimension_numbers<[1], [1], [0], [0], [0, 0, 1, 0], [], []>} : vector<4x16xbf16>, vector<4x16xbf16>, vector<4x4xf32> -> vector<4x4xf32>
    %cst_26 = arith.constant 2.500000e-01 : f32
    %69 = vector.broadcast %cst_26 : f32 to vector<4x4xf32>
    %70 = arith.mulf %68, %69 : vector<4x4xf32>
    %cst_27 = arith.constant dense<0xFF800000> : vector<4xf32>
    %71 = vector.multi_reduction <maximumf>, %70, %cst_27 [1] : vector<4x4xf32> to vector<4xf32>
    %72 = vector.shape_cast %71 : vector<4xf32> to vector<4x1xf32>
    %73 = vector.broadcast %72 : vector<4x1xf32> to vector<4x4xf32>
    %74 = arith.subf %70, %73 : vector<4x4xf32>
    %75 = math.exp %74 : vector<4x4xf32>
    %cst_28 = arith.constant dense<0.000000e+00> : vector<4xf32>
    %76 = vector.multi_reduction <add>, %75, %cst_28 [1] : vector<4x4xf32> to vector<4xf32>
    %77 = vector.shape_cast %76 : vector<4xf32> to vector<4x1xf32>
    %78 = tpu.reciprocal %77 {approx = true} : vector<4x1xf32> -> vector<4x1xf32>
    %79 = vector.broadcast %78 : vector<4x1xf32> to vector<4x4xf32>
    %80 = arith.mulf %75, %79 : vector<4x4xf32>
    %81 = arith.truncf %80 : vector<4x4xf32> to vector<4x4xbf16>
    %82 = arith.truncf %65 : vector<4x16xf32> to vector<4x16xbf16>
    %cst_29 = arith.constant dense<0.000000e+00> : vector<4x16xf32>
    %83 = tpu.matmul %81, %82, %cst_29 {dimension_numbers = #tpu.dot_dimension_numbers<[1], [0], [0], [1], [0, 0, 1, 1], [], []>} : vector<4x4xbf16>, vector<4x16xbf16>, vector<4x16xf32> -> vector<4x16xf32>
    %84 = vector.extract_strided_slice %6 {offsets = [32, 0], sizes = [16, 128], strides = [1, 1]} : vector<128x128xbf16> to vector<16x128xbf16>
    %85 = arith.truncf %83 : vector<4x16xf32> to vector<4x16xbf16>
    %cst_30 = arith.constant dense<0.000000e+00> : vector<4x128xf32>
    %86 = tpu.matmul %85, %84, %cst_30 {dimension_numbers = #tpu.dot_dimension_numbers<[1], [0], [0], [1], [0, 0, 1, 1], [], []>} : vector<4x16xbf16>, vector<16x128xbf16>, vector<4x128xf32> -> vector<4x128xf32>
    %87 = arith.addf %62, %86 : vector<4x128xf32>
    %88 = vector.extract_strided_slice %11 {offsets = [0, 48], sizes = [4, 16], strides = [1, 1]} : vector<4x384xf32> to vector<4x16xf32>
    %89 = vector.extract_strided_slice %11 {offsets = [0, 176], sizes = [4, 16], strides = [1, 1]} : vector<4x384xf32> to vector<4x16xf32>
    %90 = vector.extract_strided_slice %11 {offsets = [0, 304], sizes = [4, 16], strides = [1, 1]} : vector<4x384xf32> to vector<4x16xf32>
    %91 = arith.truncf %88 : vector<4x16xf32> to vector<4x16xbf16>
    %92 = arith.truncf %89 : vector<4x16xf32> to vector<4x16xbf16>
    %cst_31 = arith.constant dense<0.000000e+00> : vector<4x4xf32>
    %93 = tpu.matmul %91, %92, %cst_31 {dimension_numbers = #tpu.dot_dimension_numbers<[1], [1], [0], [0], [0, 0, 1, 0], [], []>} : vector<4x16xbf16>, vector<4x16xbf16>, vector<4x4xf32> -> vector<4x4xf32>
    %cst_32 = arith.constant 2.500000e-01 : f32
    %94 = vector.broadcast %cst_32 : f32 to vector<4x4xf32>
    %95 = arith.mulf %93, %94 : vector<4x4xf32>
    %cst_33 = arith.constant dense<0xFF800000> : vector<4xf32>
    %96 = vector.multi_reduction <maximumf>, %95, %cst_33 [1] : vector<4x4xf32> to vector<4xf32>
    %97 = vector.shape_cast %96 : vector<4xf32> to vector<4x1xf32>
    %98 = vector.broadcast %97 : vector<4x1xf32> to vector<4x4xf32>
    %99 = arith.subf %95, %98 : vector<4x4xf32>
    %100 = math.exp %99 : vector<4x4xf32>
    %cst_34 = arith.constant dense<0.000000e+00> : vector<4xf32>
    %101 = vector.multi_reduction <add>, %100, %cst_34 [1] : vector<4x4xf32> to vector<4xf32>
    %102 = vector.shape_cast %101 : vector<4xf32> to vector<4x1xf32>
    %103 = tpu.reciprocal %102 {approx = true} : vector<4x1xf32> -> vector<4x1xf32>
    %104 = vector.broadcast %103 : vector<4x1xf32> to vector<4x4xf32>
    %105 = arith.mulf %100, %104 : vector<4x4xf32>
    %106 = arith.truncf %105 : vector<4x4xf32> to vector<4x4xbf16>
    %107 = arith.truncf %90 : vector<4x16xf32> to vector<4x16xbf16>
    %cst_35 = arith.constant dense<0.000000e+00> : vector<4x16xf32>
    %108 = tpu.matmul %106, %107, %cst_35 {dimension_numbers = #tpu.dot_dimension_numbers<[1], [0], [0], [1], [0, 0, 1, 1], [], []>} : vector<4x4xbf16>, vector<4x16xbf16>, vector<4x16xf32> -> vector<4x16xf32>
    %109 = vector.extract_strided_slice %6 {offsets = [48, 0], sizes = [16, 128], strides = [1, 1]} : vector<128x128xbf16> to vector<16x128xbf16>
    %110 = arith.truncf %108 : vector<4x16xf32> to vector<4x16xbf16>
    %cst_36 = arith.constant dense<0.000000e+00> : vector<4x128xf32>
    %111 = tpu.matmul %110, %109, %cst_36 {dimension_numbers = #tpu.dot_dimension_numbers<[1], [0], [0], [1], [0, 0, 1, 1], [], []>} : vector<4x16xbf16>, vector<16x128xbf16>, vector<4x128xf32> -> vector<4x128xf32>
    %112 = arith.addf %87, %111 : vector<4x128xf32>
    %113 = vector.extract_strided_slice %11 {offsets = [0, 64], sizes = [4, 16], strides = [1, 1]} : vector<4x384xf32> to vector<4x16xf32>
    %114 = vector.extract_strided_slice %11 {offsets = [0, 192], sizes = [4, 16], strides = [1, 1]} : vector<4x384xf32> to vector<4x16xf32>
    %115 = vector.extract_strided_slice %11 {offsets = [0, 320], sizes = [4, 16], strides = [1, 1]} : vector<4x384xf32> to vector<4x16xf32>
    %116 = arith.truncf %113 : vector<4x16xf32> to vector<4x16xbf16>
    %117 = arith.truncf %114 : vector<4x16xf32> to vector<4x16xbf16>
    %cst_37 = arith.constant dense<0.000000e+00> : vector<4x4xf32>
    %118 = tpu.matmul %116, %117, %cst_37 {dimension_numbers = #tpu.dot_dimension_numbers<[1], [1], [0], [0], [0, 0, 1, 0], [], []>} : vector<4x16xbf16>, vector<4x16xbf16>, vector<4x4xf32> -> vector<4x4xf32>
    %cst_38 = arith.constant 2.500000e-01 : f32
    %119 = vector.broadcast %cst_38 : f32 to vector<4x4xf32>
    %120 = arith.mulf %118, %119 : vector<4x4xf32>
    %cst_39 = arith.constant dense<0xFF800000> : vector<4xf32>
    %121 = vector.multi_reduction <maximumf>, %120, %cst_39 [1] : vector<4x4xf32> to vector<4xf32>
    %122 = vector.shape_cast %121 : vector<4xf32> to vector<4x1xf32>
    %123 = vector.broadcast %122 : vector<4x1xf32> to vector<4x4xf32>
    %124 = arith.subf %120, %123 : vector<4x4xf32>
    %125 = math.exp %124 : vector<4x4xf32>
    %cst_40 = arith.constant dense<0.000000e+00> : vector<4xf32>
    %126 = vector.multi_reduction <add>, %125, %cst_40 [1] : vector<4x4xf32> to vector<4xf32>
    %127 = vector.shape_cast %126 : vector<4xf32> to vector<4x1xf32>
    %128 = tpu.reciprocal %127 {approx = true} : vector<4x1xf32> -> vector<4x1xf32>
    %129 = vector.broadcast %128 : vector<4x1xf32> to vector<4x4xf32>
    %130 = arith.mulf %125, %129 : vector<4x4xf32>
    %131 = arith.truncf %130 : vector<4x4xf32> to vector<4x4xbf16>
    %132 = arith.truncf %115 : vector<4x16xf32> to vector<4x16xbf16>
    %cst_41 = arith.constant dense<0.000000e+00> : vector<4x16xf32>
    %133 = tpu.matmul %131, %132, %cst_41 {dimension_numbers = #tpu.dot_dimension_numbers<[1], [0], [0], [1], [0, 0, 1, 1], [], []>} : vector<4x4xbf16>, vector<4x16xbf16>, vector<4x16xf32> -> vector<4x16xf32>
    %134 = vector.extract_strided_slice %6 {offsets = [64, 0], sizes = [16, 128], strides = [1, 1]} : vector<128x128xbf16> to vector<16x128xbf16>
    %135 = arith.truncf %133 : vector<4x16xf32> to vector<4x16xbf16>
    %cst_42 = arith.constant dense<0.000000e+00> : vector<4x128xf32>
    %136 = tpu.matmul %135, %134, %cst_42 {dimension_numbers = #tpu.dot_dimension_numbers<[1], [0], [0], [1], [0, 0, 1, 1], [], []>} : vector<4x16xbf16>, vector<16x128xbf16>, vector<4x128xf32> -> vector<4x128xf32>
    %137 = arith.addf %112, %136 : vector<4x128xf32>
    %138 = vector.extract_strided_slice %11 {offsets = [0, 80], sizes = [4, 16], strides = [1, 1]} : vector<4x384xf32> to vector<4x16xf32>
    %139 = vector.extract_strided_slice %11 {offsets = [0, 208], sizes = [4, 16], strides = [1, 1]} : vector<4x384xf32> to vector<4x16xf32>
    %140 = vector.extract_strided_slice %11 {offsets = [0, 336], sizes = [4, 16], strides = [1, 1]} : vector<4x384xf32> to vector<4x16xf32>
    %141 = arith.truncf %138 : vector<4x16xf32> to vector<4x16xbf16>
    %142 = arith.truncf %139 : vector<4x16xf32> to vector<4x16xbf16>
    %cst_43 = arith.constant dense<0.000000e+00> : vector<4x4xf32>
    %143 = tpu.matmul %141, %142, %cst_43 {dimension_numbers = #tpu.dot_dimension_numbers<[1], [1], [0], [0], [0, 0, 1, 0], [], []>} : vector<4x16xbf16>, vector<4x16xbf16>, vector<4x4xf32> -> vector<4x4xf32>
    %cst_44 = arith.constant 2.500000e-01 : f32
    %144 = vector.broadcast %cst_44 : f32 to vector<4x4xf32>
    %145 = arith.mulf %143, %144 : vector<4x4xf32>
    %cst_45 = arith.constant dense<0xFF800000> : vector<4xf32>
    %146 = vector.multi_reduction <maximumf>, %145, %cst_45 [1] : vector<4x4xf32> to vector<4xf32>
    %147 = vector.shape_cast %146 : vector<4xf32> to vector<4x1xf32>
    %148 = vector.broadcast %147 : vector<4x1xf32> to vector<4x4xf32>
    %149 = arith.subf %145, %148 : vector<4x4xf32>
    %150 = math.exp %149 : vector<4x4xf32>
    %cst_46 = arith.constant dense<0.000000e+00> : vector<4xf32>
    %151 = vector.multi_reduction <add>, %150, %cst_46 [1] : vector<4x4xf32> to vector<4xf32>
    %152 = vector.shape_cast %151 : vector<4xf32> to vector<4x1xf32>
    %153 = tpu.reciprocal %152 {approx = true} : vector<4x1xf32> -> vector<4x1xf32>
    %154 = vector.broadcast %153 : vector<4x1xf32> to vector<4x4xf32>
    %155 = arith.mulf %150, %154 : vector<4x4xf32>
    %156 = arith.truncf %155 : vector<4x4xf32> to vector<4x4xbf16>
    %157 = arith.truncf %140 : vector<4x16xf32> to vector<4x16xbf16>
    %cst_47 = arith.constant dense<0.000000e+00> : vector<4x16xf32>
    %158 = tpu.matmul %156, %157, %cst_47 {dimension_numbers = #tpu.dot_dimension_numbers<[1], [0], [0], [1], [0, 0, 1, 1], [], []>} : vector<4x4xbf16>, vector<4x16xbf16>, vector<4x16xf32> -> vector<4x16xf32>
    %159 = vector.extract_strided_slice %6 {offsets = [80, 0], sizes = [16, 128], strides = [1, 1]} : vector<128x128xbf16> to vector<16x128xbf16>
    %160 = arith.truncf %158 : vector<4x16xf32> to vector<4x16xbf16>
    %cst_48 = arith.constant dense<0.000000e+00> : vector<4x128xf32>
    %161 = tpu.matmul %160, %159, %cst_48 {dimension_numbers = #tpu.dot_dimension_numbers<[1], [0], [0], [1], [0, 0, 1, 1], [], []>} : vector<4x16xbf16>, vector<16x128xbf16>, vector<4x128xf32> -> vector<4x128xf32>
    %162 = arith.addf %137, %161 : vector<4x128xf32>
    %163 = vector.extract_strided_slice %11 {offsets = [0, 96], sizes = [4, 16], strides = [1, 1]} : vector<4x384xf32> to vector<4x16xf32>
    %164 = vector.extract_strided_slice %11 {offsets = [0, 224], sizes = [4, 16], strides = [1, 1]} : vector<4x384xf32> to vector<4x16xf32>
    %165 = vector.extract_strided_slice %11 {offsets = [0, 352], sizes = [4, 16], strides = [1, 1]} : vector<4x384xf32> to vector<4x16xf32>
    %166 = arith.truncf %163 : vector<4x16xf32> to vector<4x16xbf16>
    %167 = arith.truncf %164 : vector<4x16xf32> to vector<4x16xbf16>
    %cst_49 = arith.constant dense<0.000000e+00> : vector<4x4xf32>
    %168 = tpu.matmul %166, %167, %cst_49 {dimension_numbers = #tpu.dot_dimension_numbers<[1], [1], [0], [0], [0, 0, 1, 0], [], []>} : vector<4x16xbf16>, vector<4x16xbf16>, vector<4x4xf32> -> vector<4x4xf32>
    %cst_50 = arith.constant 2.500000e-01 : f32
    %169 = vector.broadcast %cst_50 : f32 to vector<4x4xf32>
    %170 = arith.mulf %168, %169 : vector<4x4xf32>
    %cst_51 = arith.constant dense<0xFF800000> : vector<4xf32>
    %171 = vector.multi_reduction <maximumf>, %170, %cst_51 [1] : vector<4x4xf32> to vector<4xf32>
    %172 = vector.shape_cast %171 : vector<4xf32> to vector<4x1xf32>
    %173 = vector.broadcast %172 : vector<4x1xf32> to vector<4x4xf32>
    %174 = arith.subf %170, %173 : vector<4x4xf32>
    %175 = math.exp %174 : vector<4x4xf32>
    %cst_52 = arith.constant dense<0.000000e+00> : vector<4xf32>
    %176 = vector.multi_reduction <add>, %175, %cst_52 [1] : vector<4x4xf32> to vector<4xf32>
    %177 = vector.shape_cast %176 : vector<4xf32> to vector<4x1xf32>
    %178 = tpu.reciprocal %177 {approx = true} : vector<4x1xf32> -> vector<4x1xf32>
    %179 = vector.broadcast %178 : vector<4x1xf32> to vector<4x4xf32>
    %180 = arith.mulf %175, %179 : vector<4x4xf32>
    %181 = arith.truncf %180 : vector<4x4xf32> to vector<4x4xbf16>
    %182 = arith.truncf %165 : vector<4x16xf32> to vector<4x16xbf16>
    %cst_53 = arith.constant dense<0.000000e+00> : vector<4x16xf32>
    %183 = tpu.matmul %181, %182, %cst_53 {dimension_numbers = #tpu.dot_dimension_numbers<[1], [0], [0], [1], [0, 0, 1, 1], [], []>} : vector<4x4xbf16>, vector<4x16xbf16>, vector<4x16xf32> -> vector<4x16xf32>
    %184 = vector.extract_strided_slice %6 {offsets = [96, 0], sizes = [16, 128], strides = [1, 1]} : vector<128x128xbf16> to vector<16x128xbf16>
    %185 = arith.truncf %183 : vector<4x16xf32> to vector<4x16xbf16>
    %cst_54 = arith.constant dense<0.000000e+00> : vector<4x128xf32>
    %186 = tpu.matmul %185, %184, %cst_54 {dimension_numbers = #tpu.dot_dimension_numbers<[1], [0], [0], [1], [0, 0, 1, 1], [], []>} : vector<4x16xbf16>, vector<16x128xbf16>, vector<4x128xf32> -> vector<4x128xf32>
    %187 = arith.addf %162, %186 : vector<4x128xf32>
    %188 = vector.extract_strided_slice %11 {offsets = [0, 112], sizes = [4, 16], strides = [1, 1]} : vector<4x384xf32> to vector<4x16xf32>
    %189 = vector.extract_strided_slice %11 {offsets = [0, 240], sizes = [4, 16], strides = [1, 1]} : vector<4x384xf32> to vector<4x16xf32>
    %190 = vector.extract_strided_slice %11 {offsets = [0, 368], sizes = [4, 16], strides = [1, 1]} : vector<4x384xf32> to vector<4x16xf32>
    %191 = arith.truncf %188 : vector<4x16xf32> to vector<4x16xbf16>
    %192 = arith.truncf %189 : vector<4x16xf32> to vector<4x16xbf16>
    %cst_55 = arith.constant dense<0.000000e+00> : vector<4x4xf32>
    %193 = tpu.matmul %191, %192, %cst_55 {dimension_numbers = #tpu.dot_dimension_numbers<[1], [1], [0], [0], [0, 0, 1, 0], [], []>} : vector<4x16xbf16>, vector<4x16xbf16>, vector<4x4xf32> -> vector<4x4xf32>
    %cst_56 = arith.constant 2.500000e-01 : f32
    %194 = vector.broadcast %cst_56 : f32 to vector<4x4xf32>
    %195 = arith.mulf %193, %194 : vector<4x4xf32>
    %cst_57 = arith.constant dense<0xFF800000> : vector<4xf32>
    %196 = vector.multi_reduction <maximumf>, %195, %cst_57 [1] : vector<4x4xf32> to vector<4xf32>
    %197 = vector.shape_cast %196 : vector<4xf32> to vector<4x1xf32>
    %198 = vector.broadcast %197 : vector<4x1xf32> to vector<4x4xf32>
    %199 = arith.subf %195, %198 : vector<4x4xf32>
    %200 = math.exp %199 : vector<4x4xf32>
    %cst_58 = arith.constant dense<0.000000e+00> : vector<4xf32>
    %201 = vector.multi_reduction <add>, %200, %cst_58 [1] : vector<4x4xf32> to vector<4xf32>
    %202 = vector.shape_cast %201 : vector<4xf32> to vector<4x1xf32>
    %203 = tpu.reciprocal %202 {approx = true} : vector<4x1xf32> -> vector<4x1xf32>
    %204 = vector.broadcast %203 : vector<4x1xf32> to vector<4x4xf32>
    %205 = arith.mulf %200, %204 : vector<4x4xf32>
    %206 = arith.truncf %205 : vector<4x4xf32> to vector<4x4xbf16>
    %207 = arith.truncf %190 : vector<4x16xf32> to vector<4x16xbf16>
    %cst_59 = arith.constant dense<0.000000e+00> : vector<4x16xf32>
    %208 = tpu.matmul %206, %207, %cst_59 {dimension_numbers = #tpu.dot_dimension_numbers<[1], [0], [0], [1], [0, 0, 1, 1], [], []>} : vector<4x4xbf16>, vector<4x16xbf16>, vector<4x16xf32> -> vector<4x16xf32>
    %209 = vector.extract_strided_slice %6 {offsets = [112, 0], sizes = [16, 128], strides = [1, 1]} : vector<128x128xbf16> to vector<16x128xbf16>
    %210 = arith.truncf %208 : vector<4x16xf32> to vector<4x16xbf16>
    %cst_60 = arith.constant dense<0.000000e+00> : vector<4x128xf32>
    %211 = tpu.matmul %210, %209, %cst_60 {dimension_numbers = #tpu.dot_dimension_numbers<[1], [0], [0], [1], [0, 0, 1, 1], [], []>} : vector<4x16xbf16>, vector<16x128xbf16>, vector<4x128xf32> -> vector<4x128xf32>
    %212 = arith.addf %187, %211 : vector<4x128xf32>
    %213 = vector.broadcast %7 : vector<1x128xf32> to vector<4x128xf32>
    %214 = arith.addf %212, %213 : vector<4x128xf32>
    %215 = arith.addf %3, %214 : vector<4x128xf32>
    %c0_61 = arith.constant 0 : index
    %c0_62 = arith.constant 0 : index
    %216 = vector.load %arg3[%c0_61, %c0_62] : memref<1x128xf32, #tpu.memory_space<vmem>>, vector<1x128xf32>
    %c0_63 = arith.constant 0 : index
    %c0_64 = arith.constant 0 : index
    %217 = vector.load %arg4[%c0_63, %c0_64] : memref<1x128xf32, #tpu.memory_space<vmem>>, vector<1x128xf32>
    %cst_65 = arith.constant dense<0.000000e+00> : vector<4xf32>
    %218 = vector.multi_reduction <add>, %215, %cst_65 [1] : vector<4x128xf32> to vector<4xf32>
    %219 = vector.shape_cast %218 : vector<4xf32> to vector<4x1xf32>
    %cst_66 = arith.constant 1.280000e+02 : f32
    %220 = vector.broadcast %cst_66 : f32 to vector<4x1xf32>
    %221 = arith.divf %219, %220 : vector<4x1xf32>
    %222 = vector.broadcast %221 : vector<4x1xf32> to vector<4x128xf32>
    %223 = arith.subf %215, %222 : vector<4x128xf32>
    %224 = arith.mulf %223, %223 : vector<4x128xf32>
    %cst_67 = arith.constant dense<0.000000e+00> : vector<4xf32>
    %225 = vector.multi_reduction <add>, %224, %cst_67 [1] : vector<4x128xf32> to vector<4xf32>
    %226 = vector.shape_cast %225 : vector<4xf32> to vector<4x1xf32>
    %cst_68 = arith.constant 1.280000e+02 : f32
    %227 = vector.broadcast %cst_68 : f32 to vector<4x1xf32>
    %228 = arith.divf %226, %227 : vector<4x1xf32>
    %229 = vector.broadcast %221 : vector<4x1xf32> to vector<4x128xf32>
    %230 = arith.subf %215, %229 : vector<4x128xf32>
    %cst_69 = arith.constant 9.99999974E-6 : f32
    %231 = vector.broadcast %cst_69 : f32 to vector<4x1xf32>
    %232 = arith.addf %228, %231 : vector<4x1xf32>
    %233 = math.rsqrt %232 : vector<4x1xf32>
    %234 = vector.broadcast %233 : vector<4x1xf32> to vector<4x128xf32>
    %235 = arith.mulf %230, %234 : vector<4x128xf32>
    %236 = vector.broadcast %216 : vector<1x128xf32> to vector<4x128xf32>
    %237 = arith.mulf %235, %236 : vector<4x128xf32>
    %238 = vector.broadcast %217 : vector<1x128xf32> to vector<4x128xf32>
    %239 = arith.addf %237, %238 : vector<4x128xf32>
    %c0_70 = arith.constant 0 : index
    %c0_71 = arith.constant 0 : index
    %240 = vector.load %arg11[%c0_70, %c0_71] : memref<128x512xbf16, #tpu.memory_space<vmem>>, vector<128x512xbf16>
    %241 = arith.truncf %239 : vector<4x128xf32> to vector<4x128xbf16>
    %cst_72 = arith.constant dense<0.000000e+00> : vector<4x512xf32>
    %242 = tpu.matmul %241, %240, %cst_72 {dimension_numbers = #tpu.dot_dimension_numbers<[1], [0], [0], [1], [0, 0, 1, 1], [], []>} : vector<4x128xbf16>, vector<128x512xbf16>, vector<4x512xf32> -> vector<4x512xf32>
    %c0_73 = arith.constant 0 : index
    %c0_74 = arith.constant 0 : index
    %243 = vector.load %arg12[%c0_73, %c0_74] : memref<1x512xf32, #tpu.memory_space<vmem>>, vector<1x512xf32>
    %244 = vector.broadcast %243 : vector<1x512xf32> to vector<4x512xf32>
    %245 = arith.addf %242, %244 : vector<4x512xf32>
    %cst_75 = arith.constant 5.000000e-01 : f32
    %246 = vector.broadcast %cst_75 : f32 to vector<4x512xf32>
    %247 = arith.mulf %246, %245 : vector<4x512xf32>
    %cst_76 = arith.constant 4.471500e-02 : f32
    %248 = vector.broadcast %cst_76 : f32 to vector<4x512xf32>
    %249 = arith.mulf %248, %245 : vector<4x512xf32>
    %250 = arith.mulf %249, %245 : vector<4x512xf32>
    %251 = arith.mulf %250, %245 : vector<4x512xf32>
    %252 = arith.addf %245, %251 : vector<4x512xf32>
    %cst_77 = arith.constant 0.797884583 : f32
    %253 = vector.broadcast %cst_77 : f32 to vector<4x512xf32>
    %254 = arith.mulf %253, %252 : vector<4x512xf32>
    %255 = math.tanh %254 : vector<4x512xf32>
    %cst_78 = arith.constant 1.000000e+00 : f32
    %256 = vector.broadcast %cst_78 : f32 to vector<4x512xf32>
    %257 = arith.addf %256, %255 : vector<4x512xf32>
    %258 = arith.mulf %247, %257 : vector<4x512xf32>
    %c0_79 = arith.constant 0 : index
    %c0_80 = arith.constant 0 : index
    %259 = vector.load %arg13[%c0_79, %c0_80] : memref<512x128xbf16, #tpu.memory_space<vmem>>, vector<512x128xbf16>
    %260 = arith.truncf %258 : vector<4x512xf32> to vector<4x512xbf16>
    %cst_81 = arith.constant dense<0.000000e+00> : vector<4x128xf32>
    %261 = tpu.matmul %260, %259, %cst_81 {dimension_numbers = #tpu.dot_dimension_numbers<[1], [0], [0], [1], [0, 0, 1, 1], [], []>} : vector<4x512xbf16>, vector<512x128xbf16>, vector<4x128xf32> -> vector<4x128xf32>
    %c0_82 = arith.constant 0 : index
    %c0_83 = arith.constant 0 : index
    %262 = vector.load %arg14[%c0_82, %c0_83] : memref<1x128xf32, #tpu.memory_space<vmem>>, vector<1x128xf32>
    %263 = vector.broadcast %262 : vector<1x128xf32> to vector<4x128xf32>
    %264 = arith.addf %261, %263 : vector<4x128xf32>
    %265 = arith.addf %239, %264 : vector<4x128xf32>
    %c0_84 = arith.constant 0 : index
    %c0_85 = arith.constant 0 : index
    %266 = vector.load %arg9[%c0_84, %c0_85] : memref<1x128xf32, #tpu.memory_space<vmem>>, vector<1x128xf32>
    %c0_86 = arith.constant 0 : index
    %c0_87 = arith.constant 0 : index
    %267 = vector.load %arg10[%c0_86, %c0_87] : memref<1x128xf32, #tpu.memory_space<vmem>>, vector<1x128xf32>
    %cst_88 = arith.constant dense<0.000000e+00> : vector<4xf32>
    %268 = vector.multi_reduction <add>, %265, %cst_88 [1] : vector<4x128xf32> to vector<4xf32>
    %269 = vector.shape_cast %268 : vector<4xf32> to vector<4x1xf32>
    %cst_89 = arith.constant 1.280000e+02 : f32
    %270 = vector.broadcast %cst_89 : f32 to vector<4x1xf32>
    %271 = arith.divf %269, %270 : vector<4x1xf32>
    %272 = vector.broadcast %271 : vector<4x1xf32> to vector<4x128xf32>
    %273 = arith.subf %265, %272 : vector<4x128xf32>
    %274 = arith.mulf %273, %273 : vector<4x128xf32>
    %cst_90 = arith.constant dense<0.000000e+00> : vector<4xf32>
    %275 = vector.multi_reduction <add>, %274, %cst_90 [1] : vector<4x128xf32> to vector<4xf32>
    %276 = vector.shape_cast %275 : vector<4xf32> to vector<4x1xf32>
    %cst_91 = arith.constant 1.280000e+02 : f32
    %277 = vector.broadcast %cst_91 : f32 to vector<4x1xf32>
    %278 = arith.divf %276, %277 : vector<4x1xf32>
    %279 = vector.broadcast %271 : vector<4x1xf32> to vector<4x128xf32>
    %280 = arith.subf %265, %279 : vector<4x128xf32>
    %cst_92 = arith.constant 9.99999974E-6 : f32
    %281 = vector.broadcast %cst_92 : f32 to vector<4x1xf32>
    %282 = arith.addf %278, %281 : vector<4x1xf32>
    %283 = math.rsqrt %282 : vector<4x1xf32>
    %284 = vector.broadcast %283 : vector<4x1xf32> to vector<4x128xf32>
    %285 = arith.mulf %280, %284 : vector<4x128xf32>
    %286 = vector.broadcast %266 : vector<1x128xf32> to vector<4x128xf32>
    %287 = arith.mulf %285, %286 : vector<4x128xf32>
    %288 = vector.broadcast %267 : vector<1x128xf32> to vector<4x128xf32>
    %289 = arith.addf %287, %288 : vector<4x128xf32>
    %c0_93 = arith.constant 0 : index
    %c0_94 = arith.constant 0 : index
    %c0_95 = arith.constant 0 : index
    %290 = vector.load %arg15[%c0_93, %c0_94, %c0_95] : memref<1x4x128xf32, #tpu.memory_space<vmem>>, vector<1x4x128xf32>
    %291 = vector.shape_cast %290 : vector<1x4x128xf32> to vector<4x128xf32>
    %292 = vector.shape_cast %289 : vector<4x128xf32> to vector<1x4x128xf32>
    tpu.vector_store %arg15[%c0_93, %c0_94, %c0_95], %292 {strides = array<i32>} : memref<1x4x128xf32, #tpu.memory_space<vmem>>, vector<1x4x128xf32>,
    return
  }
  func.func @transform_0(%arg0: i32) -> (i32, i32, i32) {
    %c0_i32 = arith.constant 0 : i32
    %c0_i32_0 = arith.constant 0 : i32
    %c0_i32_1 = arith.constant 0 : i32
    return %arg0, %c0_i32, %c0_i32_0 : i32, i32, i32
  }
  func.func @transform_1(%arg0: i32) -> (i32, i32) {
    %c0_i32 = arith.constant 0 : i32
    %c0_i32_0 = arith.constant 0 : i32
    %c0_i32_1 = arith.constant 0 : i32
    return %c0_i32, %c0_i32_0 : i32, i32
  }
  func.func @transform_2(%arg0: i32) -> (i32, i32) {
    %c0_i32 = arith.constant 0 : i32
    %c0_i32_0 = arith.constant 0 : i32
    %c0_i32_1 = arith.constant 0 : i32
    return %c0_i32, %c0_i32_0 : i32, i32
  }
  func.func @transform_3(%arg0: i32) -> (i32, i32) {
    %c0_i32 = arith.constant 0 : i32
    %c0_i32_0 = arith.constant 0 : i32
    %c0_i32_1 = arith.constant 0 : i32
    return %c0_i32, %c0_i32_0 : i32, i32
  }
  func.func @transform_4(%arg0: i32) -> (i32, i32) {
    %c0_i32 = arith.constant 0 : i32
    %c0_i32_0 = arith.constant 0 : i32
    %c0_i32_1 = arith.constant 0 : i32
    return %c0_i32, %c0_i32_0 : i32, i32
  }
  func.func @transform_5(%arg0: i32) -> (i32, i32) {
    %c0_i32 = arith.constant 0 : i32
    %c0_i32_0 = arith.constant 0 : i32
    %c0_i32_1 = arith.constant 0 : i32
    return %c0_i32, %c0_i32_0 : i32, i32
  }
  func.func @transform_6(%arg0: i32) -> (i32, i32) {
    %c0_i32 = arith.constant 0 : i32
    %c0_i32_0 = arith.constant 0 : i32
    %c0_i32_1 = arith.constant 0 : i32
    return %c0_i32, %c0_i32_0 : i32, i32
  }
  func.func @transform_7(%arg0: i32) -> (i32, i32) {
    %c0_i32 = arith.constant 0 : i32
    %c0_i32_0 = arith.constant 0 : i32
    %c0_i32_1 = arith.constant 0 : i32
    return %c0_i32, %c0_i32_0 : i32, i32
  }
  func.func @transform_8(%arg0: i32) -> (i32, i32) {
    %c0_i32 = arith.constant 0 : i32
    %c0_i32_0 = arith.constant 0 : i32
    %c0_i32_1 = arith.constant 0 : i32
    return %c0_i32, %c0_i32_0 : i32, i32
  }
  func.func @transform_9(%arg0: i32) -> (i32, i32) {
    %c0_i32 = arith.constant 0 : i32
    %c0_i32_0 = arith.constant 0 : i32
    %c0_i32_1 = arith.constant 0 : i32
    return %c0_i32, %c0_i32_0 : i32, i32
  }
  func.func @transform_10(%arg0: i32) -> (i32, i32) {
    %c0_i32 = arith.constant 0 : i32
    %c0_i32_0 = arith.constant 0 : i32
    %c0_i32_1 = arith.constant 0 : i32
    return %c0_i32, %c0_i32_0 : i32, i32
  }
  func.func @transform_11(%arg0: i32) -> (i32, i32) {
    %c0_i32 = arith.constant 0 : i32
    %c0_i32_0 = arith.constant 0 : i32
    %c0_i32_1 = arith.constant 0 : i32
    return %c0_i32, %c0_i32_0 : i32, i32
  }
  func.func @transform_12(%arg0: i32) -> (i32, i32) {
    %c0_i32 = arith.constant 0 : i32
    %c0_i32_0 = arith.constant 0 : i32
    %c0_i32_1 = arith.constant 0 : i32
    return %c0_i32, %c0_i32_0 : i32, i32
  }
  func.func @transform_13(%arg0: i32) -> (i32, i32) {
    %c0_i32 = arith.constant 0 : i32
    %c0_i32_0 = arith.constant 0 : i32
    %c0_i32_1 = arith.constant 0 : i32
    return %c0_i32, %c0_i32_0 : i32, i32
  }
  func.func @transform_14(%arg0: i32) -> (i32, i32, i32) {
    %c0_i32 = arith.constant 0 : i32
    %c0_i32_0 = arith.constant 0 : i32
    %c0_i32_1 = arith.constant 0 : i32
    return %arg0, %c0_i32, %c0_i32_0 : i32, i32, i32
  }
}

module attributes {stable_mosaic.version = 11 : i64} {
  func.func @_mil_block_kernel(%arg0: i32, %arg1: memref<1x4x128xf32, #tpu.memory_space<vmem>>, %arg2: memref<4x128xf32, #tpu.memory_space<vmem>>, %arg3: memref<1x128xf32, #tpu.memory_space<vmem>>, %arg4: memref<1x128xf32, #tpu.memory_space<vmem>>, %arg5: memref<128x384xbf16, #tpu.memory_space<vmem>>, %arg6: memref<1x384xf32, #tpu.memory_space<vmem>>, %arg7: memref<128x128xbf16, #tpu.memory_space<vmem>>, %arg8: memref<1x128xf32, #tpu.memory_space<vmem>>, %arg9: memref<1x128xf32, #tpu.memory_space<vmem>>, %arg10: memref<1x128xf32, #tpu.memory_space<vmem>>, %arg11: memref<128x512xbf16, #tpu.memory_space<vmem>>, %arg12: memref<1x512xf32, #tpu.memory_space<vmem>>, %arg13: memref<512x128xbf16, #tpu.memory_space<vmem>>, %arg14: memref<1x128xf32, #tpu.memory_space<vmem>>, %arg15: memref<1x4x128xf32, #tpu.memory_space<vmem>>) attributes {dimension_semantics = [#tpu.dimension_semantics<parallel>], iteration_bounds = array<i64: 2>, scalar_prefetch = 0 : i64, scratch_operands = 0 : i64, tpu.core_type = #tpu.core_type<tc>, window_params = [{transform_indices = @transform_0, window_bounds = array<i64: 1, 4, 128>}, {pipeline_mode = #tpu.pipeline_mode<synchronous>, transform_indices = @transform_1, window_bounds = array<i64: 4, 128>}, {pipeline_mode = #tpu.pipeline_mode<synchronous>, transform_indices = @transform_2, window_bounds = array<i64: 1, 128>}, {pipeline_mode = #tpu.pipeline_mode<synchronous>, transform_indices = @transform_3, window_bounds = array<i64: 1, 128>}, {pipeline_mode = #tpu.pipeline_mode<synchronous>, transform_indices = @transform_4, window_bounds = array<i64: 128, 384>}, {pipeline_mode = #tpu.pipeline_mode<synchronous>, transform_indices = @transform_5, window_bounds = array<i64: 1, 384>}, {pipeline_mode = #tpu.pipeline_mode<synchronous>, transform_indices = @transform_6, window_bounds = array<i64: 128, 128>}, {pipeline_mode = #tpu.pipeline_mode<synchronous>, transform_indices = @transform_7, window_bounds = array<i64: 1, 128>}, {pipeline_mode = #tpu.pipeline_mode<synchronous>, transform_indices = @transform_8, window_bounds = array<i64: 1, 128>}, {pipeline_mode = #tpu.pipeline_mode<synchronous>, transform_indices = @transform_9, window_bounds = array<i64: 1, 128>}, {pipeline_mode = #tpu.pipeline_mode<synchronous>, transform_indices = @transform_10, window_bounds = array<i64: 128, 512>}, {pipeline_mode = #tpu.pipeline_mode<synchronous>, transform_indices = @transform_11, window_bounds = array<i64: 1, 512>}, {pipeline_mode = #tpu.pipeline_mode<synchronous>, transform_indices = @transform_12, window_bounds = array<i64: 512, 128>}, {pipeline_mode = #tpu.pipeline_mode<synchronous>, transform_indices = @transform_13, window_bounds = array<i64: 1, 128>}, {transform_indices = @transform_14, window_bounds = array<i64: 1, 4, 128>}]} {
    %c0 = arith.constant 0 : index
    %c0_0 = arith.constant 0 : index
    %c0_1 = arith.constant 0 : index
    %0 = vector.load %arg1[%c0, %c0_0, %c0_1] : memref<1x4x128xf32, #tpu.memory_space<vmem>>, vector<1x4x128xf32>
    %1 = vector.shape_cast %0 : vector<1x4x128xf32> to vector<4x128xf32>
    %c0_2 = arith.constant 0 : index
    %c0_3 = arith.constant 0 : index
    %2 = vector.load %arg5[%c0_2, %c0_3] : memref<128x384xbf16, #tpu.memory_space<vmem>>, vector<128x384xbf16>
    %c0_4 = arith.constant 0 : index
    %c0_5 = arith.constant 0 : index
    %3 = vector.load %arg6[%c0_4, %c0_5] : memref<1x384xf32, #tpu.memory_space<vmem>>, vector<1x384xf32>
    %c0_6 = arith.constant 0 : index
    %c0_7 = arith.constant 0 : index
    %4 = vector.load %arg7[%c0_6, %c0_7] : memref<128x128xbf16, #tpu.memory_space<vmem>>, vector<128x128xbf16>
    %c0_8 = arith.constant 0 : index
    %c0_9 = arith.constant 0 : index
    %5 = vector.load %arg8[%c0_8, %c0_9] : memref<1x128xf32, #tpu.memory_space<vmem>>, vector<1x128xf32>
    %6 = arith.truncf %1 : vector<4x128xf32> to vector<4x128xbf16>
    %cst = arith.constant dense<0.000000e+00> : vector<4x384xf32>
    %7 = tpu.matmul %6, %2, %cst {dimension_numbers = #tpu.dot_dimension_numbers<[1], [0], [0], [1], [0, 0, 1, 1], [], []>} : vector<4x128xbf16>, vector<128x384xbf16>, vector<4x384xf32> -> vector<4x384xf32>
    %8 = vector.broadcast %3 : vector<1x384xf32> to vector<4x384xf32>
    %9 = arith.addf %7, %8 : vector<4x384xf32>
    %cst_10 = arith.constant 0.000000e+00 : f32
    %10 = vector.broadcast %cst_10 : f32 to vector<4x128xf32>
    %11 = vector.extract_strided_slice %9 {offsets = [0, 0], sizes = [4, 16], strides = [1, 1]} : vector<4x384xf32> to vector<4x16xf32>
    %12 = vector.extract_strided_slice %9 {offsets = [0, 128], sizes = [4, 16], strides = [1, 1]} : vector<4x384xf32> to vector<4x16xf32>
    %13 = vector.extract_strided_slice %9 {offsets = [0, 256], sizes = [4, 16], strides = [1, 1]} : vector<4x384xf32> to vector<4x16xf32>
    %14 = arith.truncf %11 : vector<4x16xf32> to vector<4x16xbf16>
    %15 = arith.truncf %12 : vector<4x16xf32> to vector<4x16xbf16>
    %cst_11 = arith.constant dense<0.000000e+00> : vector<4x4xf32>
    %16 = tpu.matmul %14, %15, %cst_11 {dimension_numbers = #tpu.dot_dimension_numbers<[1], [1], [0], [0], [0, 0, 1, 0], [], []>} : vector<4x16xbf16>, vector<4x16xbf16>, vector<4x4xf32> -> vector<4x4xf32>
    %cst_12 = arith.constant 2.500000e-01 : f32
    %17 = vector.broadcast %cst_12 : f32 to vector<4x4xf32>
    %18 = arith.mulf %16, %17 : vector<4x4xf32>
    %cst_13 = arith.constant dense<0xFF800000> : vector<4xf32>
    %19 = vector.multi_reduction <maximumf>, %18, %cst_13 [1] : vector<4x4xf32> to vector<4xf32>
    %20 = vector.shape_cast %19 : vector<4xf32> to vector<4x1xf32>
    %21 = vector.broadcast %20 : vector<4x1xf32> to vector<4x4xf32>
    %22 = arith.subf %18, %21 : vector<4x4xf32>
    %23 = math.exp %22 : vector<4x4xf32>
    %cst_14 = arith.constant dense<0.000000e+00> : vector<4xf32>
    %24 = vector.multi_reduction <add>, %23, %cst_14 [1] : vector<4x4xf32> to vector<4xf32>
    %25 = vector.shape_cast %24 : vector<4xf32> to vector<4x1xf32>
    %26 = tpu.reciprocal %25 {approx = true} : vector<4x1xf32> -> vector<4x1xf32>
    %27 = vector.broadcast %26 : vector<4x1xf32> to vector<4x4xf32>
    %28 = arith.mulf %23, %27 : vector<4x4xf32>
    %29 = arith.truncf %28 : vector<4x4xf32> to vector<4x4xbf16>
    %30 = arith.truncf %13 : vector<4x16xf32> to vector<4x16xbf16>
    %cst_15 = arith.constant dense<0.000000e+00> : vector<4x16xf32>
    %31 = tpu.matmul %29, %30, %cst_15 {dimension_numbers = #tpu.dot_dimension_numbers<[1], [0], [0], [1], [0, 0, 1, 1], [], []>} : vector<4x4xbf16>, vector<4x16xbf16>, vector<4x16xf32> -> vector<4x16xf32>
    %32 = vector.extract_strided_slice %4 {offsets = [0, 0], sizes = [16, 128], strides = [1, 1]} : vector<128x128xbf16> to vector<16x128xbf16>
    %33 = arith.truncf %31 : vector<4x16xf32> to vector<4x16xbf16>
    %cst_16 = arith.constant dense<0.000000e+00> : vector<4x128xf32>
    %34 = tpu.matmul %33, %32, %cst_16 {dimension_numbers = #tpu.dot_dimension_numbers<[1], [0], [0], [1], [0, 0, 1, 1], [], []>} : vector<4x16xbf16>, vector<16x128xbf16>, vector<4x128xf32> -> vector<4x128xf32>
    %35 = arith.addf %10, %34 : vector<4x128xf32>
    %36 = vector.extract_strided_slice %9 {offsets = [0, 16], sizes = [4, 16], strides = [1, 1]} : vector<4x384xf32> to vector<4x16xf32>
    %37 = vector.extract_strided_slice %9 {offsets = [0, 144], sizes = [4, 16], strides = [1, 1]} : vector<4x384xf32> to vector<4x16xf32>
    %38 = vector.extract_strided_slice %9 {offsets = [0, 272], sizes = [4, 16], strides = [1, 1]} : vector<4x384xf32> to vector<4x16xf32>
    %39 = arith.truncf %36 : vector<4x16xf32> to vector<4x16xbf16>
    %40 = arith.truncf %37 : vector<4x16xf32> to vector<4x16xbf16>
    %cst_17 = arith.constant dense<0.000000e+00> : vector<4x4xf32>
    %41 = tpu.matmul %39, %40, %cst_17 {dimension_numbers = #tpu.dot_dimension_numbers<[1], [1], [0], [0], [0, 0, 1, 0], [], []>} : vector<4x16xbf16>, vector<4x16xbf16>, vector<4x4xf32> -> vector<4x4xf32>
    %cst_18 = arith.constant 2.500000e-01 : f32
    %42 = vector.broadcast %cst_18 : f32 to vector<4x4xf32>
    %43 = arith.mulf %41, %42 : vector<4x4xf32>
    %cst_19 = arith.constant dense<0xFF800000> : vector<4xf32>
    %44 = vector.multi_reduction <maximumf>, %43, %cst_19 [1] : vector<4x4xf32> to vector<4xf32>
    %45 = vector.shape_cast %44 : vector<4xf32> to vector<4x1xf32>
    %46 = vector.broadcast %45 : vector<4x1xf32> to vector<4x4xf32>
    %47 = arith.subf %43, %46 : vector<4x4xf32>
    %48 = math.exp %47 : vector<4x4xf32>
    %cst_20 = arith.constant dense<0.000000e+00> : vector<4xf32>
    %49 = vector.multi_reduction <add>, %48, %cst_20 [1] : vector<4x4xf32> to vector<4xf32>
    %50 = vector.shape_cast %49 : vector<4xf32> to vector<4x1xf32>
    %51 = tpu.reciprocal %50 {approx = true} : vector<4x1xf32> -> vector<4x1xf32>
    %52 = vector.broadcast %51 : vector<4x1xf32> to vector<4x4xf32>
    %53 = arith.mulf %48, %52 : vector<4x4xf32>
    %54 = arith.truncf %53 : vector<4x4xf32> to vector<4x4xbf16>
    %55 = arith.truncf %38 : vector<4x16xf32> to vector<4x16xbf16>
    %cst_21 = arith.constant dense<0.000000e+00> : vector<4x16xf32>
    %56 = tpu.matmul %54, %55, %cst_21 {dimension_numbers = #tpu.dot_dimension_numbers<[1], [0], [0], [1], [0, 0, 1, 1], [], []>} : vector<4x4xbf16>, vector<4x16xbf16>, vector<4x16xf32> -> vector<4x16xf32>
    %57 = vector.extract_strided_slice %4 {offsets = [16, 0], sizes = [16, 128], strides = [1, 1]} : vector<128x128xbf16> to vector<16x128xbf16>
    %58 = arith.truncf %56 : vector<4x16xf32> to vector<4x16xbf16>
    %cst_22 = arith.constant dense<0.000000e+00> : vector<4x128xf32>
    %59 = tpu.matmul %58, %57, %cst_22 {dimension_numbers = #tpu.dot_dimension_numbers<[1], [0], [0], [1], [0, 0, 1, 1], [], []>} : vector<4x16xbf16>, vector<16x128xbf16>, vector<4x128xf32> -> vector<4x128xf32>
    %60 = arith.addf %35, %59 : vector<4x128xf32>
    %61 = vector.extract_strided_slice %9 {offsets = [0, 32], sizes = [4, 16], strides = [1, 1]} : vector<4x384xf32> to vector<4x16xf32>
    %62 = vector.extract_strided_slice %9 {offsets = [0, 160], sizes = [4, 16], strides = [1, 1]} : vector<4x384xf32> to vector<4x16xf32>
    %63 = vector.extract_strided_slice %9 {offsets = [0, 288], sizes = [4, 16], strides = [1, 1]} : vector<4x384xf32> to vector<4x16xf32>
    %64 = arith.truncf %61 : vector<4x16xf32> to vector<4x16xbf16>
    %65 = arith.truncf %62 : vector<4x16xf32> to vector<4x16xbf16>
    %cst_23 = arith.constant dense<0.000000e+00> : vector<4x4xf32>
    %66 = tpu.matmul %64, %65, %cst_23 {dimension_numbers = #tpu.dot_dimension_numbers<[1], [1], [0], [0], [0, 0, 1, 0], [], []>} : vector<4x16xbf16>, vector<4x16xbf16>, vector<4x4xf32> -> vector<4x4xf32>
    %cst_24 = arith.constant 2.500000e-01 : f32
    %67 = vector.broadcast %cst_24 : f32 to vector<4x4xf32>
    %68 = arith.mulf %66, %67 : vector<4x4xf32>
    %cst_25 = arith.constant dense<0xFF800000> : vector<4xf32>
    %69 = vector.multi_reduction <maximumf>, %68, %cst_25 [1] : vector<4x4xf32> to vector<4xf32>
    %70 = vector.shape_cast %69 : vector<4xf32> to vector<4x1xf32>
    %71 = vector.broadcast %70 : vector<4x1xf32> to vector<4x4xf32>
    %72 = arith.subf %68, %71 : vector<4x4xf32>
    %73 = math.exp %72 : vector<4x4xf32>
    %cst_26 = arith.constant dense<0.000000e+00> : vector<4xf32>
    %74 = vector.multi_reduction <add>, %73, %cst_26 [1] : vector<4x4xf32> to vector<4xf32>
    %75 = vector.shape_cast %74 : vector<4xf32> to vector<4x1xf32>
    %76 = tpu.reciprocal %75 {approx = true} : vector<4x1xf32> -> vector<4x1xf32>
    %77 = vector.broadcast %76 : vector<4x1xf32> to vector<4x4xf32>
    %78 = arith.mulf %73, %77 : vector<4x4xf32>
    %79 = arith.truncf %78 : vector<4x4xf32> to vector<4x4xbf16>
    %80 = arith.truncf %63 : vector<4x16xf32> to vector<4x16xbf16>
    %cst_27 = arith.constant dense<0.000000e+00> : vector<4x16xf32>
    %81 = tpu.matmul %79, %80, %cst_27 {dimension_numbers = #tpu.dot_dimension_numbers<[1], [0], [0], [1], [0, 0, 1, 1], [], []>} : vector<4x4xbf16>, vector<4x16xbf16>, vector<4x16xf32> -> vector<4x16xf32>
    %82 = vector.extract_strided_slice %4 {offsets = [32, 0], sizes = [16, 128], strides = [1, 1]} : vector<128x128xbf16> to vector<16x128xbf16>
    %83 = arith.truncf %81 : vector<4x16xf32> to vector<4x16xbf16>
    %cst_28 = arith.constant dense<0.000000e+00> : vector<4x128xf32>
    %84 = tpu.matmul %83, %82, %cst_28 {dimension_numbers = #tpu.dot_dimension_numbers<[1], [0], [0], [1], [0, 0, 1, 1], [], []>} : vector<4x16xbf16>, vector<16x128xbf16>, vector<4x128xf32> -> vector<4x128xf32>
    %85 = arith.addf %60, %84 : vector<4x128xf32>
    %86 = vector.extract_strided_slice %9 {offsets = [0, 48], sizes = [4, 16], strides = [1, 1]} : vector<4x384xf32> to vector<4x16xf32>
    %87 = vector.extract_strided_slice %9 {offsets = [0, 176], sizes = [4, 16], strides = [1, 1]} : vector<4x384xf32> to vector<4x16xf32>
    %88 = vector.extract_strided_slice %9 {offsets = [0, 304], sizes = [4, 16], strides = [1, 1]} : vector<4x384xf32> to vector<4x16xf32>
    %89 = arith.truncf %86 : vector<4x16xf32> to vector<4x16xbf16>
    %90 = arith.truncf %87 : vector<4x16xf32> to vector<4x16xbf16>
    %cst_29 = arith.constant dense<0.000000e+00> : vector<4x4xf32>
    %91 = tpu.matmul %89, %90, %cst_29 {dimension_numbers = #tpu.dot_dimension_numbers<[1], [1], [0], [0], [0, 0, 1, 0], [], []>} : vector<4x16xbf16>, vector<4x16xbf16>, vector<4x4xf32> -> vector<4x4xf32>
    %cst_30 = arith.constant 2.500000e-01 : f32
    %92 = vector.broadcast %cst_30 : f32 to vector<4x4xf32>
    %93 = arith.mulf %91, %92 : vector<4x4xf32>
    %cst_31 = arith.constant dense<0xFF800000> : vector<4xf32>
    %94 = vector.multi_reduction <maximumf>, %93, %cst_31 [1] : vector<4x4xf32> to vector<4xf32>
    %95 = vector.shape_cast %94 : vector<4xf32> to vector<4x1xf32>
    %96 = vector.broadcast %95 : vector<4x1xf32> to vector<4x4xf32>
    %97 = arith.subf %93, %96 : vector<4x4xf32>
    %98 = math.exp %97 : vector<4x4xf32>
    %cst_32 = arith.constant dense<0.000000e+00> : vector<4xf32>
    %99 = vector.multi_reduction <add>, %98, %cst_32 [1] : vector<4x4xf32> to vector<4xf32>
    %100 = vector.shape_cast %99 : vector<4xf32> to vector<4x1xf32>
    %101 = tpu.reciprocal %100 {approx = true} : vector<4x1xf32> -> vector<4x1xf32>
    %102 = vector.broadcast %101 : vector<4x1xf32> to vector<4x4xf32>
    %103 = arith.mulf %98, %102 : vector<4x4xf32>
    %104 = arith.truncf %103 : vector<4x4xf32> to vector<4x4xbf16>
    %105 = arith.truncf %88 : vector<4x16xf32> to vector<4x16xbf16>
    %cst_33 = arith.constant dense<0.000000e+00> : vector<4x16xf32>
    %106 = tpu.matmul %104, %105, %cst_33 {dimension_numbers = #tpu.dot_dimension_numbers<[1], [0], [0], [1], [0, 0, 1, 1], [], []>} : vector<4x4xbf16>, vector<4x16xbf16>, vector<4x16xf32> -> vector<4x16xf32>
    %107 = vector.extract_strided_slice %4 {offsets = [48, 0], sizes = [16, 128], strides = [1, 1]} : vector<128x128xbf16> to vector<16x128xbf16>
    %108 = arith.truncf %106 : vector<4x16xf32> to vector<4x16xbf16>
    %cst_34 = arith.constant dense<0.000000e+00> : vector<4x128xf32>
    %109 = tpu.matmul %108, %107, %cst_34 {dimension_numbers = #tpu.dot_dimension_numbers<[1], [0], [0], [1], [0, 0, 1, 1], [], []>} : vector<4x16xbf16>, vector<16x128xbf16>, vector<4x128xf32> -> vector<4x128xf32>
    %110 = arith.addf %85, %109 : vector<4x128xf32>
    %111 = vector.extract_strided_slice %9 {offsets = [0, 64], sizes = [4, 16], strides = [1, 1]} : vector<4x384xf32> to vector<4x16xf32>
    %112 = vector.extract_strided_slice %9 {offsets = [0, 192], sizes = [4, 16], strides = [1, 1]} : vector<4x384xf32> to vector<4x16xf32>
    %113 = vector.extract_strided_slice %9 {offsets = [0, 320], sizes = [4, 16], strides = [1, 1]} : vector<4x384xf32> to vector<4x16xf32>
    %114 = arith.truncf %111 : vector<4x16xf32> to vector<4x16xbf16>
    %115 = arith.truncf %112 : vector<4x16xf32> to vector<4x16xbf16>
    %cst_35 = arith.constant dense<0.000000e+00> : vector<4x4xf32>
    %116 = tpu.matmul %114, %115, %cst_35 {dimension_numbers = #tpu.dot_dimension_numbers<[1], [1], [0], [0], [0, 0, 1, 0], [], []>} : vector<4x16xbf16>, vector<4x16xbf16>, vector<4x4xf32> -> vector<4x4xf32>
    %cst_36 = arith.constant 2.500000e-01 : f32
    %117 = vector.broadcast %cst_36 : f32 to vector<4x4xf32>
    %118 = arith.mulf %116, %117 : vector<4x4xf32>
    %cst_37 = arith.constant dense<0xFF800000> : vector<4xf32>
    %119 = vector.multi_reduction <maximumf>, %118, %cst_37 [1] : vector<4x4xf32> to vector<4xf32>
    %120 = vector.shape_cast %119 : vector<4xf32> to vector<4x1xf32>
    %121 = vector.broadcast %120 : vector<4x1xf32> to vector<4x4xf32>
    %122 = arith.subf %118, %121 : vector<4x4xf32>
    %123 = math.exp %122 : vector<4x4xf32>
    %cst_38 = arith.constant dense<0.000000e+00> : vector<4xf32>
    %124 = vector.multi_reduction <add>, %123, %cst_38 [1] : vector<4x4xf32> to vector<4xf32>
    %125 = vector.shape_cast %124 : vector<4xf32> to vector<4x1xf32>
    %126 = tpu.reciprocal %125 {approx = true} : vector<4x1xf32> -> vector<4x1xf32>
    %127 = vector.broadcast %126 : vector<4x1xf32> to vector<4x4xf32>
    %128 = arith.mulf %123, %127 : vector<4x4xf32>
    %129 = arith.truncf %128 : vector<4x4xf32> to vector<4x4xbf16>
    %130 = arith.truncf %113 : vector<4x16xf32> to vector<4x16xbf16>
    %cst_39 = arith.constant dense<0.000000e+00> : vector<4x16xf32>
    %131 = tpu.matmul %129, %130, %cst_39 {dimension_numbers = #tpu.dot_dimension_numbers<[1], [0], [0], [1], [0, 0, 1, 1], [], []>} : vector<4x4xbf16>, vector<4x16xbf16>, vector<4x16xf32> -> vector<4x16xf32>
    %132 = vector.extract_strided_slice %4 {offsets = [64, 0], sizes = [16, 128], strides = [1, 1]} : vector<128x128xbf16> to vector<16x128xbf16>
    %133 = arith.truncf %131 : vector<4x16xf32> to vector<4x16xbf16>
    %cst_40 = arith.constant dense<0.000000e+00> : vector<4x128xf32>
    %134 = tpu.matmul %133, %132, %cst_40 {dimension_numbers = #tpu.dot_dimension_numbers<[1], [0], [0], [1], [0, 0, 1, 1], [], []>} : vector<4x16xbf16>, vector<16x128xbf16>, vector<4x128xf32> -> vector<4x128xf32>
    %135 = arith.addf %110, %134 : vector<4x128xf32>
    %136 = vector.extract_strided_slice %9 {offsets = [0, 80], sizes = [4, 16], strides = [1, 1]} : vector<4x384xf32> to vector<4x16xf32>
    %137 = vector.extract_strided_slice %9 {offsets = [0, 208], sizes = [4, 16], strides = [1, 1]} : vector<4x384xf32> to vector<4x16xf32>
    %138 = vector.extract_strided_slice %9 {offsets = [0, 336], sizes = [4, 16], strides = [1, 1]} : vector<4x384xf32> to vector<4x16xf32>
    %139 = arith.truncf %136 : vector<4x16xf32> to vector<4x16xbf16>
    %140 = arith.truncf %137 : vector<4x16xf32> to vector<4x16xbf16>
    %cst_41 = arith.constant dense<0.000000e+00> : vector<4x4xf32>
    %141 = tpu.matmul %139, %140, %cst_41 {dimension_numbers = #tpu.dot_dimension_numbers<[1], [1], [0], [0], [0, 0, 1, 0], [], []>} : vector<4x16xbf16>, vector<4x16xbf16>, vector<4x4xf32> -> vector<4x4xf32>
    %cst_42 = arith.constant 2.500000e-01 : f32
    %142 = vector.broadcast %cst_42 : f32 to vector<4x4xf32>
    %143 = arith.mulf %141, %142 : vector<4x4xf32>
    %cst_43 = arith.constant dense<0xFF800000> : vector<4xf32>
    %144 = vector.multi_reduction <maximumf>, %143, %cst_43 [1] : vector<4x4xf32> to vector<4xf32>
    %145 = vector.shape_cast %144 : vector<4xf32> to vector<4x1xf32>
    %146 = vector.broadcast %145 : vector<4x1xf32> to vector<4x4xf32>
    %147 = arith.subf %143, %146 : vector<4x4xf32>
    %148 = math.exp %147 : vector<4x4xf32>
    %cst_44 = arith.constant dense<0.000000e+00> : vector<4xf32>
    %149 = vector.multi_reduction <add>, %148, %cst_44 [1] : vector<4x4xf32> to vector<4xf32>
    %150 = vector.shape_cast %149 : vector<4xf32> to vector<4x1xf32>
    %151 = tpu.reciprocal %150 {approx = true} : vector<4x1xf32> -> vector<4x1xf32>
    %152 = vector.broadcast %151 : vector<4x1xf32> to vector<4x4xf32>
    %153 = arith.mulf %148, %152 : vector<4x4xf32>
    %154 = arith.truncf %153 : vector<4x4xf32> to vector<4x4xbf16>
    %155 = arith.truncf %138 : vector<4x16xf32> to vector<4x16xbf16>
    %cst_45 = arith.constant dense<0.000000e+00> : vector<4x16xf32>
    %156 = tpu.matmul %154, %155, %cst_45 {dimension_numbers = #tpu.dot_dimension_numbers<[1], [0], [0], [1], [0, 0, 1, 1], [], []>} : vector<4x4xbf16>, vector<4x16xbf16>, vector<4x16xf32> -> vector<4x16xf32>
    %157 = vector.extract_strided_slice %4 {offsets = [80, 0], sizes = [16, 128], strides = [1, 1]} : vector<128x128xbf16> to vector<16x128xbf16>
    %158 = arith.truncf %156 : vector<4x16xf32> to vector<4x16xbf16>
    %cst_46 = arith.constant dense<0.000000e+00> : vector<4x128xf32>
    %159 = tpu.matmul %158, %157, %cst_46 {dimension_numbers = #tpu.dot_dimension_numbers<[1], [0], [0], [1], [0, 0, 1, 1], [], []>} : vector<4x16xbf16>, vector<16x128xbf16>, vector<4x128xf32> -> vector<4x128xf32>
    %160 = arith.addf %135, %159 : vector<4x128xf32>
    %161 = vector.extract_strided_slice %9 {offsets = [0, 96], sizes = [4, 16], strides = [1, 1]} : vector<4x384xf32> to vector<4x16xf32>
    %162 = vector.extract_strided_slice %9 {offsets = [0, 224], sizes = [4, 16], strides = [1, 1]} : vector<4x384xf32> to vector<4x16xf32>
    %163 = vector.extract_strided_slice %9 {offsets = [0, 352], sizes = [4, 16], strides = [1, 1]} : vector<4x384xf32> to vector<4x16xf32>
    %164 = arith.truncf %161 : vector<4x16xf32> to vector<4x16xbf16>
    %165 = arith.truncf %162 : vector<4x16xf32> to vector<4x16xbf16>
    %cst_47 = arith.constant dense<0.000000e+00> : vector<4x4xf32>
    %166 = tpu.matmul %164, %165, %cst_47 {dimension_numbers = #tpu.dot_dimension_numbers<[1], [1], [0], [0], [0, 0, 1, 0], [], []>} : vector<4x16xbf16>, vector<4x16xbf16>, vector<4x4xf32> -> vector<4x4xf32>
    %cst_48 = arith.constant 2.500000e-01 : f32
    %167 = vector.broadcast %cst_48 : f32 to vector<4x4xf32>
    %168 = arith.mulf %166, %167 : vector<4x4xf32>
    %cst_49 = arith.constant dense<0xFF800000> : vector<4xf32>
    %169 = vector.multi_reduction <maximumf>, %168, %cst_49 [1] : vector<4x4xf32> to vector<4xf32>
    %170 = vector.shape_cast %169 : vector<4xf32> to vector<4x1xf32>
    %171 = vector.broadcast %170 : vector<4x1xf32> to vector<4x4xf32>
    %172 = arith.subf %168, %171 : vector<4x4xf32>
    %173 = math.exp %172 : vector<4x4xf32>
    %cst_50 = arith.constant dense<0.000000e+00> : vector<4xf32>
    %174 = vector.multi_reduction <add>, %173, %cst_50 [1] : vector<4x4xf32> to vector<4xf32>
    %175 = vector.shape_cast %174 : vector<4xf32> to vector<4x1xf32>
    %176 = tpu.reciprocal %175 {approx = true} : vector<4x1xf32> -> vector<4x1xf32>
    %177 = vector.broadcast %176 : vector<4x1xf32> to vector<4x4xf32>
    %178 = arith.mulf %173, %177 : vector<4x4xf32>
    %179 = arith.truncf %178 : vector<4x4xf32> to vector<4x4xbf16>
    %180 = arith.truncf %163 : vector<4x16xf32> to vector<4x16xbf16>
    %cst_51 = arith.constant dense<0.000000e+00> : vector<4x16xf32>
    %181 = tpu.matmul %179, %180, %cst_51 {dimension_numbers = #tpu.dot_dimension_numbers<[1], [0], [0], [1], [0, 0, 1, 1], [], []>} : vector<4x4xbf16>, vector<4x16xbf16>, vector<4x16xf32> -> vector<4x16xf32>
    %182 = vector.extract_strided_slice %4 {offsets = [96, 0], sizes = [16, 128], strides = [1, 1]} : vector<128x128xbf16> to vector<16x128xbf16>
    %183 = arith.truncf %181 : vector<4x16xf32> to vector<4x16xbf16>
    %cst_52 = arith.constant dense<0.000000e+00> : vector<4x128xf32>
    %184 = tpu.matmul %183, %182, %cst_52 {dimension_numbers = #tpu.dot_dimension_numbers<[1], [0], [0], [1], [0, 0, 1, 1], [], []>} : vector<4x16xbf16>, vector<16x128xbf16>, vector<4x128xf32> -> vector<4x128xf32>
    %185 = arith.addf %160, %184 : vector<4x128xf32>
    %186 = vector.extract_strided_slice %9 {offsets = [0, 112], sizes = [4, 16], strides = [1, 1]} : vector<4x384xf32> to vector<4x16xf32>
    %187 = vector.extract_strided_slice %9 {offsets = [0, 240], sizes = [4, 16], strides = [1, 1]} : vector<4x384xf32> to vector<4x16xf32>
    %188 = vector.extract_strided_slice %9 {offsets = [0, 368], sizes = [4, 16], strides = [1, 1]} : vector<4x384xf32> to vector<4x16xf32>
    %189 = arith.truncf %186 : vector<4x16xf32> to vector<4x16xbf16>
    %190 = arith.truncf %187 : vector<4x16xf32> to vector<4x16xbf16>
    %cst_53 = arith.constant dense<0.000000e+00> : vector<4x4xf32>
    %191 = tpu.matmul %189, %190, %cst_53 {dimension_numbers = #tpu.dot_dimension_numbers<[1], [1], [0], [0], [0, 0, 1, 0], [], []>} : vector<4x16xbf16>, vector<4x16xbf16>, vector<4x4xf32> -> vector<4x4xf32>
    %cst_54 = arith.constant 2.500000e-01 : f32
    %192 = vector.broadcast %cst_54 : f32 to vector<4x4xf32>
    %193 = arith.mulf %191, %192 : vector<4x4xf32>
    %cst_55 = arith.constant dense<0xFF800000> : vector<4xf32>
    %194 = vector.multi_reduction <maximumf>, %193, %cst_55 [1] : vector<4x4xf32> to vector<4xf32>
    %195 = vector.shape_cast %194 : vector<4xf32> to vector<4x1xf32>
    %196 = vector.broadcast %195 : vector<4x1xf32> to vector<4x4xf32>
    %197 = arith.subf %193, %196 : vector<4x4xf32>
    %198 = math.exp %197 : vector<4x4xf32>
    %cst_56 = arith.constant dense<0.000000e+00> : vector<4xf32>
    %199 = vector.multi_reduction <add>, %198, %cst_56 [1] : vector<4x4xf32> to vector<4xf32>
    %200 = vector.shape_cast %199 : vector<4xf32> to vector<4x1xf32>
    %201 = tpu.reciprocal %200 {approx = true} : vector<4x1xf32> -> vector<4x1xf32>
    %202 = vector.broadcast %201 : vector<4x1xf32> to vector<4x4xf32>
    %203 = arith.mulf %198, %202 : vector<4x4xf32>
    %204 = arith.truncf %203 : vector<4x4xf32> to vector<4x4xbf16>
    %205 = arith.truncf %188 : vector<4x16xf32> to vector<4x16xbf16>
    %cst_57 = arith.constant dense<0.000000e+00> : vector<4x16xf32>
    %206 = tpu.matmul %204, %205, %cst_57 {dimension_numbers = #tpu.dot_dimension_numbers<[1], [0], [0], [1], [0, 0, 1, 1], [], []>} : vector<4x4xbf16>, vector<4x16xbf16>, vector<4x16xf32> -> vector<4x16xf32>
    %207 = vector.extract_strided_slice %4 {offsets = [112, 0], sizes = [16, 128], strides = [1, 1]} : vector<128x128xbf16> to vector<16x128xbf16>
    %208 = arith.truncf %206 : vector<4x16xf32> to vector<4x16xbf16>
    %cst_58 = arith.constant dense<0.000000e+00> : vector<4x128xf32>
    %209 = tpu.matmul %208, %207, %cst_58 {dimension_numbers = #tpu.dot_dimension_numbers<[1], [0], [0], [1], [0, 0, 1, 1], [], []>} : vector<4x16xbf16>, vector<16x128xbf16>, vector<4x128xf32> -> vector<4x128xf32>
    %210 = arith.addf %185, %209 : vector<4x128xf32>
    %211 = vector.broadcast %5 : vector<1x128xf32> to vector<4x128xf32>
    %212 = arith.addf %210, %211 : vector<4x128xf32>
    %213 = arith.addf %1, %212 : vector<4x128xf32>
    %c0_59 = arith.constant 0 : index
    %c0_60 = arith.constant 0 : index
    %214 = vector.load %arg3[%c0_59, %c0_60] : memref<1x128xf32, #tpu.memory_space<vmem>>, vector<1x128xf32>
    %c0_61 = arith.constant 0 : index
    %c0_62 = arith.constant 0 : index
    %215 = vector.load %arg4[%c0_61, %c0_62] : memref<1x128xf32, #tpu.memory_space<vmem>>, vector<1x128xf32>
    %cst_63 = arith.constant dense<0.000000e+00> : vector<4xf32>
    %216 = vector.multi_reduction <add>, %213, %cst_63 [1] : vector<4x128xf32> to vector<4xf32>
    %217 = vector.shape_cast %216 : vector<4xf32> to vector<4x1xf32>
    %cst_64 = arith.constant 1.280000e+02 : f32
    %218 = vector.broadcast %cst_64 : f32 to vector<4x1xf32>
    %219 = arith.divf %217, %218 : vector<4x1xf32>
    %220 = vector.broadcast %219 : vector<4x1xf32> to vector<4x128xf32>
    %221 = arith.subf %213, %220 : vector<4x128xf32>
    %222 = arith.mulf %221, %221 : vector<4x128xf32>
    %cst_65 = arith.constant dense<0.000000e+00> : vector<4xf32>
    %223 = vector.multi_reduction <add>, %222, %cst_65 [1] : vector<4x128xf32> to vector<4xf32>
    %224 = vector.shape_cast %223 : vector<4xf32> to vector<4x1xf32>
    %cst_66 = arith.constant 1.280000e+02 : f32
    %225 = vector.broadcast %cst_66 : f32 to vector<4x1xf32>
    %226 = arith.divf %224, %225 : vector<4x1xf32>
    %227 = vector.broadcast %219 : vector<4x1xf32> to vector<4x128xf32>
    %228 = arith.subf %213, %227 : vector<4x128xf32>
    %cst_67 = arith.constant 9.99999974E-6 : f32
    %229 = vector.broadcast %cst_67 : f32 to vector<4x1xf32>
    %230 = arith.addf %226, %229 : vector<4x1xf32>
    %231 = math.rsqrt %230 : vector<4x1xf32>
    %232 = vector.broadcast %231 : vector<4x1xf32> to vector<4x128xf32>
    %233 = arith.mulf %228, %232 : vector<4x128xf32>
    %234 = vector.broadcast %214 : vector<1x128xf32> to vector<4x128xf32>
    %235 = arith.mulf %233, %234 : vector<4x128xf32>
    %236 = vector.broadcast %215 : vector<1x128xf32> to vector<4x128xf32>
    %237 = arith.addf %235, %236 : vector<4x128xf32>
    %c0_68 = arith.constant 0 : index
    %c0_69 = arith.constant 0 : index
    %238 = vector.load %arg11[%c0_68, %c0_69] : memref<128x512xbf16, #tpu.memory_space<vmem>>, vector<128x512xbf16>
    %239 = arith.truncf %237 : vector<4x128xf32> to vector<4x128xbf16>
    %cst_70 = arith.constant dense<0.000000e+00> : vector<4x512xf32>
    %240 = tpu.matmul %239, %238, %cst_70 {dimension_numbers = #tpu.dot_dimension_numbers<[1], [0], [0], [1], [0, 0, 1, 1], [], []>} : vector<4x128xbf16>, vector<128x512xbf16>, vector<4x512xf32> -> vector<4x512xf32>
    %c0_71 = arith.constant 0 : index
    %c0_72 = arith.constant 0 : index
    %241 = vector.load %arg12[%c0_71, %c0_72] : memref<1x512xf32, #tpu.memory_space<vmem>>, vector<1x512xf32>
    %242 = vector.broadcast %241 : vector<1x512xf32> to vector<4x512xf32>
    %243 = arith.addf %240, %242 : vector<4x512xf32>
    %cst_73 = arith.constant 5.000000e-01 : f32
    %244 = vector.broadcast %cst_73 : f32 to vector<4x512xf32>
    %245 = arith.mulf %244, %243 : vector<4x512xf32>
    %cst_74 = arith.constant 4.471500e-02 : f32
    %246 = vector.broadcast %cst_74 : f32 to vector<4x512xf32>
    %247 = arith.mulf %246, %243 : vector<4x512xf32>
    %248 = arith.mulf %247, %243 : vector<4x512xf32>
    %249 = arith.mulf %248, %243 : vector<4x512xf32>
    %250 = arith.addf %243, %249 : vector<4x512xf32>
    %cst_75 = arith.constant 0.797884583 : f32
    %251 = vector.broadcast %cst_75 : f32 to vector<4x512xf32>
    %252 = arith.mulf %251, %250 : vector<4x512xf32>
    %253 = math.tanh %252 : vector<4x512xf32>
    %cst_76 = arith.constant 1.000000e+00 : f32
    %254 = vector.broadcast %cst_76 : f32 to vector<4x512xf32>
    %255 = arith.addf %254, %253 : vector<4x512xf32>
    %256 = arith.mulf %245, %255 : vector<4x512xf32>
    %c0_77 = arith.constant 0 : index
    %c0_78 = arith.constant 0 : index
    %257 = vector.load %arg13[%c0_77, %c0_78] : memref<512x128xbf16, #tpu.memory_space<vmem>>, vector<512x128xbf16>
    %258 = arith.truncf %256 : vector<4x512xf32> to vector<4x512xbf16>
    %cst_79 = arith.constant dense<0.000000e+00> : vector<4x128xf32>
    %259 = tpu.matmul %258, %257, %cst_79 {dimension_numbers = #tpu.dot_dimension_numbers<[1], [0], [0], [1], [0, 0, 1, 1], [], []>} : vector<4x512xbf16>, vector<512x128xbf16>, vector<4x128xf32> -> vector<4x128xf32>
    %c0_80 = arith.constant 0 : index
    %c0_81 = arith.constant 0 : index
    %260 = vector.load %arg14[%c0_80, %c0_81] : memref<1x128xf32, #tpu.memory_space<vmem>>, vector<1x128xf32>
    %261 = vector.broadcast %260 : vector<1x128xf32> to vector<4x128xf32>
    %262 = arith.addf %259, %261 : vector<4x128xf32>
    %263 = arith.addf %237, %262 : vector<4x128xf32>
    %c0_82 = arith.constant 0 : index
    %c0_83 = arith.constant 0 : index
    %264 = vector.load %arg9[%c0_82, %c0_83] : memref<1x128xf32, #tpu.memory_space<vmem>>, vector<1x128xf32>
    %c0_84 = arith.constant 0 : index
    %c0_85 = arith.constant 0 : index
    %265 = vector.load %arg10[%c0_84, %c0_85] : memref<1x128xf32, #tpu.memory_space<vmem>>, vector<1x128xf32>
    %cst_86 = arith.constant dense<0.000000e+00> : vector<4xf32>
    %266 = vector.multi_reduction <add>, %263, %cst_86 [1] : vector<4x128xf32> to vector<4xf32>
    %267 = vector.shape_cast %266 : vector<4xf32> to vector<4x1xf32>
    %cst_87 = arith.constant 1.280000e+02 : f32
    %268 = vector.broadcast %cst_87 : f32 to vector<4x1xf32>
    %269 = arith.divf %267, %268 : vector<4x1xf32>
    %270 = vector.broadcast %269 : vector<4x1xf32> to vector<4x128xf32>
    %271 = arith.subf %263, %270 : vector<4x128xf32>
    %272 = arith.mulf %271, %271 : vector<4x128xf32>
    %cst_88 = arith.constant dense<0.000000e+00> : vector<4xf32>
    %273 = vector.multi_reduction <add>, %272, %cst_88 [1] : vector<4x128xf32> to vector<4xf32>
    %274 = vector.shape_cast %273 : vector<4xf32> to vector<4x1xf32>
    %cst_89 = arith.constant 1.280000e+02 : f32
    %275 = vector.broadcast %cst_89 : f32 to vector<4x1xf32>
    %276 = arith.divf %274, %275 : vector<4x1xf32>
    %277 = vector.broadcast %269 : vector<4x1xf32> to vector<4x128xf32>
    %278 = arith.subf %263, %277 : vector<4x128xf32>
    %cst_90 = arith.constant 9.99999974E-6 : f32
    %279 = vector.broadcast %cst_90 : f32 to vector<4x1xf32>
    %280 = arith.addf %276, %279 : vector<4x1xf32>
    %281 = math.rsqrt %280 : vector<4x1xf32>
    %282 = vector.broadcast %281 : vector<4x1xf32> to vector<4x128xf32>
    %283 = arith.mulf %278, %282 : vector<4x128xf32>
    %284 = vector.broadcast %264 : vector<1x128xf32> to vector<4x128xf32>
    %285 = arith.mulf %283, %284 : vector<4x128xf32>
    %286 = vector.broadcast %265 : vector<1x128xf32> to vector<4x128xf32>
    %287 = arith.addf %285, %286 : vector<4x128xf32>
    %c0_91 = arith.constant 0 : index
    %c0_92 = arith.constant 0 : index
    %c0_93 = arith.constant 0 : index
    %288 = vector.load %arg15[%c0_91, %c0_92, %c0_93] : memref<1x4x128xf32, #tpu.memory_space<vmem>>, vector<1x4x128xf32>
    %289 = vector.shape_cast %288 : vector<1x4x128xf32> to vector<4x128xf32>
    %290 = vector.shape_cast %287 : vector<4x128xf32> to vector<1x4x128xf32>
    tpu.vector_store %arg15[%c0_91, %c0_92, %c0_93], %290 {strides = array<i32>} : memref<1x4x128xf32, #tpu.memory_space<vmem>>, vector<1x4x128xf32>,
    return
  }
  func.func @transform_0(%arg0: i32) -> (i32, i32, i32) {
    %c0_i32 = arith.constant 0 : i32
    %c0_i32_0 = arith.constant 0 : i32
    %c0_i32_1 = arith.constant 0 : i32
    return %arg0, %c0_i32, %c0_i32_0 : i32, i32, i32
  }
  func.func @transform_1(%arg0: i32) -> (i32, i32) {
    %c0_i32 = arith.constant 0 : i32
    %c0_i32_0 = arith.constant 0 : i32
    %c0_i32_1 = arith.constant 0 : i32
    return %c0_i32, %c0_i32_0 : i32, i32
  }
  func.func @transform_2(%arg0: i32) -> (i32, i32) {
    %c0_i32 = arith.constant 0 : i32
    %c0_i32_0 = arith.constant 0 : i32
    %c0_i32_1 = arith.constant 0 : i32
    return %c0_i32, %c0_i32_0 : i32, i32
  }
  func.func @transform_3(%arg0: i32) -> (i32, i32) {
    %c0_i32 = arith.constant 0 : i32
    %c0_i32_0 = arith.constant 0 : i32
    %c0_i32_1 = arith.constant 0 : i32
    return %c0_i32, %c0_i32_0 : i32, i32
  }
  func.func @transform_4(%arg0: i32) -> (i32, i32) {
    %c0_i32 = arith.constant 0 : i32
    %c0_i32_0 = arith.constant 0 : i32
    %c0_i32_1 = arith.constant 0 : i32
    return %c0_i32, %c0_i32_0 : i32, i32
  }
  func.func @transform_5(%arg0: i32) -> (i32, i32) {
    %c0_i32 = arith.constant 0 : i32
    %c0_i32_0 = arith.constant 0 : i32
    %c0_i32_1 = arith.constant 0 : i32
    return %c0_i32, %c0_i32_0 : i32, i32
  }
  func.func @transform_6(%arg0: i32) -> (i32, i32) {
    %c0_i32 = arith.constant 0 : i32
    %c0_i32_0 = arith.constant 0 : i32
    %c0_i32_1 = arith.constant 0 : i32
    return %c0_i32, %c0_i32_0 : i32, i32
  }
  func.func @transform_7(%arg0: i32) -> (i32, i32) {
    %c0_i32 = arith.constant 0 : i32
    %c0_i32_0 = arith.constant 0 : i32
    %c0_i32_1 = arith.constant 0 : i32
    return %c0_i32, %c0_i32_0 : i32, i32
  }
  func.func @transform_8(%arg0: i32) -> (i32, i32) {
    %c0_i32 = arith.constant 0 : i32
    %c0_i32_0 = arith.constant 0 : i32
    %c0_i32_1 = arith.constant 0 : i32
    return %c0_i32, %c0_i32_0 : i32, i32
  }
  func.func @transform_9(%arg0: i32) -> (i32, i32) {
    %c0_i32 = arith.constant 0 : i32
    %c0_i32_0 = arith.constant 0 : i32
    %c0_i32_1 = arith.constant 0 : i32
    return %c0_i32, %c0_i32_0 : i32, i32
  }
  func.func @transform_10(%arg0: i32) -> (i32, i32) {
    %c0_i32 = arith.constant 0 : i32
    %c0_i32_0 = arith.constant 0 : i32
    %c0_i32_1 = arith.constant 0 : i32
    return %c0_i32, %c0_i32_0 : i32, i32
  }
  func.func @transform_11(%arg0: i32) -> (i32, i32) {
    %c0_i32 = arith.constant 0 : i32
    %c0_i32_0 = arith.constant 0 : i32
    %c0_i32_1 = arith.constant 0 : i32
    return %c0_i32, %c0_i32_0 : i32, i32
  }
  func.func @transform_12(%arg0: i32) -> (i32, i32) {
    %c0_i32 = arith.constant 0 : i32
    %c0_i32_0 = arith.constant 0 : i32
    %c0_i32_1 = arith.constant 0 : i32
    return %c0_i32, %c0_i32_0 : i32, i32
  }
  func.func @transform_13(%arg0: i32) -> (i32, i32) {
    %c0_i32 = arith.constant 0 : i32
    %c0_i32_0 = arith.constant 0 : i32
    %c0_i32_1 = arith.constant 0 : i32
    return %c0_i32, %c0_i32_0 : i32, i32
  }
  func.func @transform_14(%arg0: i32) -> (i32, i32, i32) {
    %c0_i32 = arith.constant 0 : i32
    %c0_i32_0 = arith.constant 0 : i32
    %c0_i32_1 = arith.constant 0 : i32
    return %arg0, %c0_i32, %c0_i32_0 : i32, i32, i32
  }
}

module attributes {stable_mosaic.version = 11 : i64} {
  func.func @_classifier_kernel(%arg0: memref<2x4x128xf32, #tpu.memory_space<vmem>>, %arg1: memref<128x64xbf16, #tpu.memory_space<vmem>>, %arg2: memref<1x64xf32, #tpu.memory_space<vmem>>, %arg3: memref<64x2xbf16, #tpu.memory_space<vmem>>, %arg4: memref<1x2xf32, #tpu.memory_space<vmem>>, %arg5: memref<2x2xf32, #tpu.memory_space<vmem>>) attributes {dimension_semantics = [], scalar_prefetch = 0 : i64, scratch_operands = 0 : i64, tpu.core_type = #tpu.core_type<tc>} {
    %c0 = arith.constant 0 : index
    %c0_0 = arith.constant 0 : index
    %c0_1 = arith.constant 0 : index
    %0 = vector.load %arg0[%c0, %c0_0, %c0_1] : memref<2x4x128xf32, #tpu.memory_space<vmem>>, vector<2x4x128xf32>
    %cst = arith.constant dense<0.000000e+00> : vector<2x128xf32>
    %1 = vector.multi_reduction <add>, %0, %cst [1] : vector<2x4x128xf32> to vector<2x128xf32>
    %cst_2 = arith.constant 4.000000e+00 : f32
    %2 = vector.broadcast %cst_2 : f32 to vector<2x128xf32>
    %3 = arith.divf %1, %2 : vector<2x128xf32>
    %c0_3 = arith.constant 0 : index
    %c0_4 = arith.constant 0 : index
    %4 = vector.load %arg1[%c0_3, %c0_4] : memref<128x64xbf16, #tpu.memory_space<vmem>>, vector<128x64xbf16>
    %5 = arith.truncf %3 : vector<2x128xf32> to vector<2x128xbf16>
    %cst_5 = arith.constant dense<0.000000e+00> : vector<2x64xf32>
    %6 = tpu.matmul %5, %4, %cst_5 {dimension_numbers = #tpu.dot_dimension_numbers<[1], [0], [0], [1], [0, 0, 1, 1], [], []>} : vector<2x128xbf16>, vector<128x64xbf16>, vector<2x64xf32> -> vector<2x64xf32>
    %c0_6 = arith.constant 0 : index
    %c0_7 = arith.constant 0 : index
    %7 = vector.load %arg2[%c0_6, %c0_7] : memref<1x64xf32, #tpu.memory_space<vmem>>, vector<1x64xf32>
    %8 = vector.broadcast %7 : vector<1x64xf32> to vector<2x64xf32>
    %9 = arith.addf %6, %8 : vector<2x64xf32>
    %cst_8 = arith.constant 0.000000e+00 : f32
    %10 = vector.broadcast %cst_8 : f32 to vector<2x64xf32>
    %11 = arith.maximumf %9, %10 : vector<2x64xf32>
    %c0_9 = arith.constant 0 : index
    %c0_10 = arith.constant 0 : index
    %12 = vector.load %arg3[%c0_9, %c0_10] : memref<64x2xbf16, #tpu.memory_space<vmem>>, vector<64x2xbf16>
    %13 = arith.truncf %11 : vector<2x64xf32> to vector<2x64xbf16>
    %cst_11 = arith.constant dense<0.000000e+00> : vector<2x2xf32>
    %14 = tpu.matmul %13, %12, %cst_11 {dimension_numbers = #tpu.dot_dimension_numbers<[1], [0], [0], [1], [0, 0, 1, 1], [], []>} : vector<2x64xbf16>, vector<64x2xbf16>, vector<2x2xf32> -> vector<2x2xf32>
    %c0_12 = arith.constant 0 : index
    %c0_13 = arith.constant 0 : index
    %15 = vector.load %arg4[%c0_12, %c0_13] : memref<1x2xf32, #tpu.memory_space<vmem>>, vector<1x2xf32>
    %16 = vector.broadcast %15 : vector<1x2xf32> to vector<2x2xf32>
    %17 = arith.addf %14, %16 : vector<2x2xf32>
    %c0_14 = arith.constant 0 : index
    %c0_15 = arith.constant 0 : index
    %18 = vector.load %arg5[%c0_14, %c0_15] : memref<2x2xf32, #tpu.memory_space<vmem>>, vector<2x2xf32>
    tpu.vector_store %arg5[%c0_14, %c0_15], %17 {strides = array<i32>} : memref<2x2xf32, #tpu.memory_space<vmem>>, vector<2x2xf32>,
    return
  }
}

</mosaic_0001>

<bundles_post_ra>
// kernel: transmilx_forward.7
= control target key start
LH: loop header
LB: loop body
LE: loop exit
PB: predicated region body
PF: predicated region fallthrough
CT: control target
= control target key end

     0   :  { %s432_s21 = smov 0   ;;  %s470_s0 = inlined_call_operand.vmem [shape: f32[8,4,48], index: 0, kind: input, shape index: {}]   ;;  %s471_s1 = inlined_call_operand.vmem [shape: bf16[48,128], index: 1, kind: input, shape index: {}]   ;;  %s472_s2 = inlined_call_operand.vmem [shape: f32[1,128], index: 2, kind: input, shape index: {}]   ;;  %s473_s3 = inlined_call_operand.vmem [shape: f32[1,128], index: 3, kind: input, shape index: {}]   ;;  %s474_s4 = inlined_call_operand.vmem [shape: f32[1,128], index: 4, kind: input, shape index: {}]   ;;  %s475_s5 = inlined_call_operand.vmem [shape: f32[4,128], index: 5, kind: input, shape index: {}]   ;;  %s476_s6 = inlined_call_operand.vmem [shape: f32[8,5,128], index: 6, kind: output, shape index: {}]  }
   0x1 LB: > { %s355_s22 = sadd.s32 4294967295, %s395_s21   ;;  %p359_p0 = scmp.ge.s32.totalorder %s395_s21, 1  ;;  %s395_s21 = sphi %s432_s21, %s16_s21  }
   0x2   : > { %p211_p1 = scmp.lt.s32.totalorder %s395_s21, 9 }
   0x4   : > { %p212_p2 = pnand %p359_p0, %p211_p1 }
   0x5   : > { %p239_p3 = scmp.lt.s32.totalorder (!%p212_p2), %s355_s22, 7 }
   0x6   : > { %215 = sbr.rel (%p212_p2) target bundleno = 157 (0x9d), region = 44 }
   0xb   : > { %v379_v0 = vld [vmem:[%s471_s1 + $0x10] sm:$0xff]  ;;  %v378_v1 = vld [vmem:[%s471_s1 + $0x8] sm:$0xff]  ;;  %s478_s22 = smov (!%p239_p3, %s355_s22), 7  ;;  %v377_v2 = vld [vmem:[%s471_s1] sm:$0xff]  ;;  %vm278_vm0 = vcmask 392192  }
   0xc   : > { %287 = vmatpush.bf16.msra.mxu0 %v379_v0  ;;  %s360_s27 = sshll.u32 %s478_s22, 2  ;;  %s361_s9 = sshll.u32 %s478_s22, 3  ;;  %v295_v5 = vld [vmem:[%s473_s3] sm:$0x1] }
   0xd   : > { %s242_s30 = scalar_lea.vmem %s470_s0, %s360_s27  ;;  %v296_v6 = vld [vmem:[%s474_s4] sm:$0x1]  ;;  %s246_s16 = scalar_lea.vmem %s476_s6, %s361_s9 }
   0xe   : > { %v248_v3 = vld [vmem:[%s242_s30] sm:$0xf]  ;;  %v297_v7 = vadd.f32 %v296_v6, %v295_v5 }
   0xf   : > { %v255_v4 = vpack.c.bf16 %v248_v3, %v248_v3  ;;  %v388_v8 = vld [vmem:[%s472_s2] ss:$0 sm:$0xff] }
  0x10   : > { %288 = vmatpush.bf16.msra.mxu0 %v378_v1  ;;  %298 = vst [vmem:[%s246_s16] sm:$0x1] %v297_v7  ;;  %v299_v10 = vld [vmem:[%s475_s5] sm:$0xf] }
  0x14   : > { %289 = vmatpush.bf16.msra.mxu0 %v377_v2 }
  0x17   : > { %374 = vmatmul.msk.bf16.vlgmr.msra.gmra.mxu0 %vm278_vm0, %v255_v4 }
  0x94   : > { %v291_v9 = vpop.f32.mrf.mxu0 }
  0x95   : > { %v292_v11 = vadd.f32 %v388_v8, %v291_v9 }
  0x97   : > { %v300_v12 = vadd.f32 %v299_v10, %v292_v11 }
  0x99   : > { %301 = vst [vmem:[%s246_s16 + $0x1] sm:$0xf] %v300_v12 }
  0x9c   : > { %v293_v13 = vpop.f32.mrf.mxu0 }
  0x9d PF: > { %s16_s21 = sadd.s32 1, %s395_s21  }
  0x9e   : > { %p13_p4 = scmp.ge.s32.totalorder %s16_s21, 10  }
  0xa0   :  { %15 = sbr.rel (!%p13_p4) target bundleno = 1 (0x1), region = 74 }

// kernel: transmilx_forward.10
= control target key start
LH: loop header
LB: loop body
LE: loop exit
PB: predicated region body
PF: predicated region fallthrough
CT: control target
= control target key end

     0   :  { %vm33_vm0 = vcmask 1041409   ;;  %vm36_vm1 = vcmask 1042434   ;;  %vm39_vm2 = vcmask 1043459   ;;  %vm42_vm3 = vcmask 1044484   ;;  %s289_s0 = inlined_call_operand.vmem [shape: f32[8,5,128], index: 0, kind: input, shape index: {}]   ;;  %s290_s1 = inlined_call_operand.vmem [shape: f32[1,128], index: 1, kind: input, shape index: {}]   ;;  %s291_s2 = inlined_call_operand.vmem [shape: f32[1,128], index: 2, kind: input, shape index: {}]   ;;  %s292_s3 = inlined_call_operand.vmem [shape: f32[8,128], index: 3, kind: output, shape index: {}]  }
   0x1   :  { %v14_v0 = vld [vmem:[%s289_s0] sm:$0x1]  ;;  %v15_v1 = vld [vmem:[%s289_s0 + $0x8] sm:$0x1]  ;;  %v16_v2 = vld [vmem:[%s289_s0 + $0x10] sm:$0x1] }
   0x2   :  { %v17_v3 = vld [vmem:[%s289_s0 + $0x18] sm:$0x1]  ;;  %v18_v4 = vld [vmem:[%s289_s0 + $0x20] sm:$0x1]  ;;  %v19_v5 = vld [vmem:[%s289_s0 + $0x28] sm:$0x1] }
   0x3   :  { %v20_v6 = vld [vmem:[%s289_s0 + $0x30] sm:$0x1]  ;;  %v32_v7 = vrot.slane %v15_v1, 7  ;;  %v35_v8 = vrot.slane %v16_v2, 6  ;;  %v21_v9 = vld [vmem:[%s289_s0 + $0x38] sm:$0x1] }
   0x4   :  { %v38_v10 = vrot.slane %v17_v3, 5  ;;  %v41_v11 = vrot.slane %v18_v4, 4  ;;  %v44_v13 = vrot.slane %v19_v5, 3  ;;  %vm45_vm4 = vcmask 1045509  }
   0x5   :  { %v34_v12 = vsel %vm33_vm0, %v32_v7, %v14_v0  ;;  %v47_v15 = vrot.slane %v20_v6, 2  ;;  %vm48_vm5 = vcmask 1046534   ;;  %v50_v17 = vrot.slane %v21_v9, 1 }
   0x6   :  { %v37_v14 = vsel %vm36_vm1, %v35_v8, %v34_v12  ;;  %vm51_vm6 = vcmask 1047559   ;;  %v214_v22 = vmov 128.0  }
   0x7   :  { %v40_v16 = vsel %vm39_vm2, %v38_v10, %v37_v14  ;;  %210 = vrcp.f32 %v214_v22 }
   0x8   :  { %v43_v18 = vsel %vm42_vm3, %v41_v11, %v40_v16 }
   0x9   :  { %v46_v19 = vsel %vm45_vm4, %v44_v13, %v43_v18  ;;  %v208_v13 = vld [vmem:[%s290_s1] ss:$0 sm:$0xff] }
   0xa   :  { %v49_v20 = vsel %vm48_vm5, %v47_v15, %v46_v19 }
   0xb   :  { %v52_v21 = vsel %vm51_vm6, %v50_v17, %v49_v20 }
   0xc   :  { %54 = vadd.xlane.f32.xlu0 %v52_v21 }
   0xd   :  { %v211_v23 = vpop.eup %210 }
   0xe   :  { %v57_v24 = vmul.f32 128.0, %v211_v23  ;;  %vm61_vm7 = vweird.f32 %v211_v23 }
  0x10   :  { %v58_v25 = vsub.f32 1.0, %v57_v24 }
  0x12   :  { %v59_v26 = vmul.f32 %v211_v23, %v58_v25 }
  0x14   :  { %v60_v27 = vadd.f32 %v211_v23, %v59_v26 }
  0x16   :  { %v62_v28 = vsel %vm61_vm7, %v211_v23, %v60_v27 }
  0x7f   :  { %v55_v29 = vpop.xlane.xlu0 %54 }
  0x80   :  { %v63_v30 = vmul.f32 %v62_v28, %v55_v29 }
  0x82   :  { %v65_v31 = vrot.slane %v63_v30, 1  ;;  %v66_v32 = vrot.slane %v63_v30, 2  ;;  %v67_v33 = vrot.slane %v63_v30, 3  ;;  %v68_v34 = vrot.slane %v63_v30, 4 }
  0x83   :  { %v69_v35 = vrot.slane %v63_v30, 5  ;;  %v70_v36 = vrot.slane %v63_v30, 6  ;;  %v71_v37 = vrot.slane %v63_v30, 7  ;;  %v80_v38 = vsub.f32 %v14_v0, %v63_v30 }
  0x84   :  { %v81_v39 = vsub.f32 %v15_v1, %v65_v31  ;;  %v82_v40 = vsub.f32 %v16_v2, %v66_v32  ;;  %v83_v41 = vsub.f32 %v17_v3, %v67_v33  ;;  %v84_v42 = vsub.f32 %v18_v4, %v68_v34  ;;  %v209_v31 = vld [vmem:[%s291_s2] ss:$0 sm:$0xff] }
  0x85   :  { %v85_v43 = vsub.f32 %v19_v5, %v69_v35  ;;  %v86_v44 = vsub.f32 %v20_v6, %v70_v36  ;;  %v87_v45 = vsub.f32 %v21_v9, %v71_v37  ;;  %v88_v50 = vmul.f32 %v80_v38, %v80_v38 }
  0x86   :  { %v89_v46 = vmul.f32 %v81_v39, %v81_v39  ;;  %v90_v47 = vmul.f32 %v82_v40, %v82_v40  ;;  %v91_v48 = vmul.f32 %v83_v41, %v83_v41  ;;  %v92_v49 = vmul.f32 %v84_v42, %v84_v42 }
  0x87   :  { %v93_v51 = vmul.f32 %v85_v43, %v85_v43  ;;  %v94_v54 = vmul.f32 %v86_v44, %v86_v44  ;;  %v95_v55 = vmul.f32 %v87_v45, %v87_v45 }
  0x88   :  { %v104_v52 = vrot.slane %v89_v46, 7  ;;  %v106_v53 = vrot.slane %v90_v47, 6  ;;  %v108_v57 = vrot.slane %v91_v48, 5  ;;  %v110_v59 = vrot.slane %v92_v49, 4 }
  0x89   :  { %v112_v61 = vrot.slane %v93_v51, 3  ;;  %v114_v63 = vrot.slane %v94_v54, 2  ;;  %v116_v1 = vrot.slane %v95_v55, 1 }
  0x8a   :  { %v105_v56 = vsel %vm33_vm0, %v104_v52, %v88_v50 }
  0x8b   :  { %v107_v58 = vsel %vm36_vm1, %v106_v53, %v105_v56 }
  0x8c   :  { %v109_v60 = vsel %vm39_vm2, %v108_v57, %v107_v58 }
  0x8d   :  { %v111_v62 = vsel %vm42_vm3, %v110_v59, %v109_v60 }
  0x8e   :  { %v113_v0 = vsel %vm45_vm4, %v112_v61, %v111_v62 }
  0x8f   :  { %v115_v2 = vsel %vm48_vm5, %v114_v63, %v113_v0 }
  0x90   :  { %v117_v3 = vsel %vm51_vm6, %v116_v1, %v115_v2 }
  0x91   :  { %119 = vadd.xlane.f32.xlu0 %v117_v3 }
 0x104   :  { %v120_v4 = vpop.xlane.xlu0 %119 }
 0x105   :  { %v121_v5 = vmul.f32 %v120_v4, %v62_v28 }
 0x107   :  { %v122_v6 = vadd.f32 1e-05, %v121_v5 }
 0x109   :  { %212 = vrsqrt.f32 %v122_v6  ;;  %vm129_vm9 = vweird.f32 %v122_v6 }
 0x10f   :  { %v213_v7 = vpop.eup %212 }
 0x110   :  { %v124_v8 = vmul.f32 %v213_v7, %v122_v6  ;;  %vm130_vm8 = vweird.f32 %v213_v7 }
 0x111   :  { %vm131_vm10 = vmor %vm129_vm9, %vm130_vm8 }
 0x112   :  { %v125_v9 = vmul.f32 %v213_v7, %v124_v8 }
 0x114   :  { %v126_v10 = vmul.f32 0.5, %v125_v9 }
 0x116   :  { %v127_v11 = vsub.f32 1.5, %v126_v10 }
 0x118   :  { %v128_v12 = vmul.f32 %v213_v7, %v127_v11 }
 0x11a   :  { %v132_v14 = vsel %vm131_vm10, %v213_v7, %v128_v12 }
 0x11b   :  { %v134_v15 = vrot.slane %v132_v14, 1  ;;  %v135_v16 = vrot.slane %v132_v14, 2  ;;  %v136_v17 = vrot.slane %v132_v14, 3  ;;  %v137_v18 = vrot.slane %v132_v14, 4 }
 0x11c   :  { %v138_v19 = vrot.slane %v132_v14, 5  ;;  %v139_v20 = vrot.slane %v132_v14, 6  ;;  %v140_v21 = vrot.slane %v132_v14, 7  ;;  %v149_v22 = vmul.f32 %v132_v14, %v80_v38 }
 0x11d   :  { %v150_v23 = vmul.f32 %v134_v15, %v81_v39  ;;  %v151_v24 = vmul.f32 %v135_v16, %v82_v40  ;;  %v152_v25 = vmul.f32 %v136_v17, %v83_v41  ;;  %v153_v26 = vmul.f32 %v137_v18, %v84_v42 }
 0x11e   :  { %v154_v27 = vmul.f32 %v138_v19, %v85_v43  ;;  %v155_v28 = vmul.f32 %v139_v20, %v86_v44  ;;  %v156_v29 = vmul.f32 %v140_v21, %v87_v45  ;;  %v160_v30 = vmul.f32 %v208_v13, %v149_v22 }
 0x11f   :  { %v161_v32 = vmul.f32 %v208_v13, %v150_v23  ;;  %v162_v33 = vmul.f32 %v208_v13, %v151_v24  ;;  %v163_v34 = vmul.f32 %v208_v13, %v152_v25  ;;  %v164_v35 = vmul.f32 %v208_v13, %v153_v26 }
 0x120   :  { %v165_v36 = vmul.f32 %v208_v13, %v154_v27  ;;  %v166_v37 = vmul.f32 %v208_v13, %v155_v28  ;;  %v167_v46 = vmul.f32 %v208_v13, %v156_v29  ;;  %v171_v42 = vadd.f32 %v209_v31, %v160_v30 }
 0x121   :  { %v172_v38 = vadd.f32 %v209_v31, %v161_v32  ;;  %v173_v39 = vadd.f32 %v209_v31, %v162_v33  ;;  %v174_v40 = vadd.f32 %v209_v31, %v163_v34  ;;  %v175_v41 = vadd.f32 %v209_v31, %v164_v35 }
 0x122   :  { %v176_v43 = vadd.f32 %v209_v31, %v165_v36  ;;  %v177_v47 = vadd.f32 %v209_v31, %v166_v37  ;;  %v178_v48 = vadd.f32 %v209_v31, %v167_v46 }
 0x123   :  { %v187_v44 = vrot.slane %v172_v38, 7  ;;  %v189_v45 = vrot.slane %v173_v39, 6  ;;  %v191_v50 = vrot.slane %v174_v40, 5  ;;  %v193_v52 = vrot.slane %v175_v41, 4 }
 0x124   :  { %v195_v54 = vrot.slane %v176_v43, 3  ;;  %v197_v56 = vrot.slane %v177_v47, 2  ;;  %v199_v58 = vrot.slane %v178_v48, 1 }
 0x125   :  { %v188_v49 = vsel %vm33_vm0, %v187_v44, %v171_v42 }
 0x126   :  { %v190_v51 = vsel %vm36_vm1, %v189_v45, %v188_v49 }
 0x127   :  { %v192_v53 = vsel %vm39_vm2, %v191_v50, %v190_v51 }
 0x128   :  { %v194_v55 = vsel %vm42_vm3, %v193_v52, %v192_v53 }
 0x129   :  { %v196_v57 = vsel %vm45_vm4, %v195_v54, %v194_v55 }
 0x12a   :  { %v198_v59 = vsel %vm48_vm5, %v197_v56, %v196_v57 }
 0x12b   :  { %v200_v60 = vsel %vm51_vm6, %v199_v58, %v198_v59 }
 0x12c   :  { %202 = vst [vmem:[%s292_s3] sm:$0xff] %v200_v60 }

// kernel: transmilx_forward.8
= control target key start
LH: loop header
LB: loop body
LE: loop exit
PB: predicated region body
PF: predicated region fallthrough
CT: control target
= control target key end

     0   :  { %s2389_s25 = smov 0   ;;  %s2971_s0 = inlined_call_operand.vmem [shape: f32[8,5,128], index: 0, kind: input, shape index: {}]   ;;  %s2972_s1 = inlined_call_operand.vmem [shape: f32[1,128], index: 1, kind: input, shape index: {}]   ;;  %s2973_s2 = inlined_call_operand.vmem [shape: f32[1,128], index: 2, kind: input, shape index: {}]   ;;  %s2974_s3 = inlined_call_operand.vmem [shape: bf16[128,384], index: 3, kind: input, shape index: {}]   ;;  %s2975_s4 = inlined_call_operand.vmem [shape: f32[1,384], index: 4, kind: input, shape index: {}]   ;;  %s2976_s5 = inlined_call_operand.vmem [shape: bf16[128,128], index: 5, kind: input, shape index: {}]   ;;  %s2977_s6 = inlined_call_operand.vmem [shape: f32[1,128], index: 6, kind: input, shape index: {}]   ;;  %s2978_s7 = inlined_call_operand.vmem [shape: f32[1,128], index: 7, kind: input, shape index: {}]   ;;  %s2979_s8 = inlined_call_operand.vmem [shape: f32[1,128], index: 8, kind: input, shape index: {}]   ;;  %s2980_s9 = inlined_call_operand.vmem [shape: bf16[128,512], index: 9, kind: input, shape index: {}]   ;;  %s2981_s10 = inlined_call_operand.vmem [shape: f32[1,512], index: 10, kind: input, shape index: {}]   ;;  %s2982_s11 = inlined_call_operand.vmem [shape: bf16[512,128], index: 11, kind: input, shape index: {}]   ;;  %s2983_s12 = inlined_call_operand.vmem [shape: f32[1,128], index: 12, kind: input, shape index: {}]   ;;  %s2984_s13 = inlined_call_operand.vmem [shape: f32[8,5,128], index: 13, kind: output, shape index: {}]  }
   0x1 LB: > { %s1756_s26 = sadd.s32 4294967295, %s2312_s25   ;;  %p1760_p0 = scmp.ge.s32.totalorder %s2312_s25, 1  ;;  %s2312_s25 = sphi %s2389_s25, %s23_s25  }
   0x2   : > { %p386_p1 = scmp.lt.s32.totalorder %s2312_s25, 9 }
   0x4   : > { %p387_p2 = pnand %p1760_p0, %p386_p1 }
   0x5   : > { %p428_p3 = scmp.lt.s32.totalorder (!%p387_p2), %s1756_s26, 7  ;;  %s2315_s18 = smov (!%p387_p2), 32  }
   0x6   : > { %390 = sbr.rel (%p387_p2) target bundleno = 2191 (0x88f), region = 72  ;;  %s2316_s19 = smov (!%p387_p2), 96  }
   0x7   : > { %s2318_s20 = smov (!%p387_p2), 64  }
   0xb   : > { %s2986_s26 = smov (!%p428_p3, %s1756_s26), 7  ;;  %vm440_vm0 = vcmask 1044480   ;;  %v2314_v2 = vmov 128.0   ;;  %v1849_v3 = vld [vmem:[%s2974_s3 + $0xa8] sm:$0xf]  ;;  %vm705_vm5 = vcmask 261120  }
   0xc   : > { %s1761_s27 = sshll.u32 %s2986_s26, 3  ;;  %2276 = vrcp.f32 %v2314_v2  ;;  %v2183_v4 = vld [vmem:[%s2974_s3 + $0xb0] sm:$0xf0]  ;;  %v2182_v5 = vld [vmem:[%s2974_s3 + $0xac] sm:$0xf]  ;;  %vm744_vm6 = vcmask 1041408  }
   0xd   : > { %s431_s30 = scalar_lea.vmem %s2971_s0, %s1761_s27  ;;  %v1850_v6 = vor.u32 %v2183_v4, %v1849_v3  ;;  %v1851_v7 = vld [vmem:[%s2974_s3 + $0xb4] sm:$0xf0]  ;;  %v1857_v8 = vld [vmem:[%s2974_s3 + $0xb0] sm:$0xf]  ;;  %v2184_v9 = vld [vmem:[%s2974_s3 + $0xb8] sm:$0xf0]  ;;  %s435_s17 = scalar_lea.vmem %s2984_s13, %s1761_s27 }
   0xe   : > { %v2405_v0 = vld [vmem:[%s431_s30] sm:$0x1f]  ;;  %v1854_v10 = vor.u32 %v2182_v5, %v1851_v7  ;;  %v1858_v11 = vor.u32 %v2184_v9, %v1857_v8  ;;  %v1837_v23 = vld [vmem:[%s2974_s3 + $0x90] sm:$0xf]  ;;  %v2180_v24 = vld [vmem:[%s2974_s3 + $0x98] sm:$0xf0] }
   0xf   : > { %v441_v1 = vsel %vm440_vm0, %v2405_v0, 0.0  ;;  %664 = vmatpush.bf16.msra.mxu0 %v1850_v6  ;;  %v2179_v25 = vld [vmem:[%s2974_s3 + $0x94] sm:$0xf]  ;;  %v1838_v26 = vor.u32 %v2180_v24, %v1837_v23  ;;  %v1839_v27 = vld [vmem:[%s2974_s3 + $0x9c] sm:$0xf0]  ;;  %vm745_vm7 = vcmask 1042432  }
  0x10   : > { %442 = vadd.xlane.f32.xlu0 %v441_v1  ;;  %677 = vmatpush.bf16.msra.mxu1 %v1854_v10  ;;  %v1845_v28 = vld [vmem:[%s2974_s3 + $0x98] sm:$0xf]  ;;  %v2181_v29 = vld [vmem:[%s2974_s3 + $0xa0] sm:$0xf0]  ;;  %v1842_v30 = vor.u32 %v2179_v25, %v1839_v27  ;;  %v2176_v34 = vld [vmem:[%s2974_s3 + $0x7c] sm:$0xf] }
  0x11   : > { %690 = vmatpush.bf16.msra.mxu2 %v1858_v11  ;;  %v1846_v31 = vor.u32 %v2181_v29, %v1845_v28  ;;  %v1825_v32 = vld [vmem:[%s2974_s3 + $0x78] sm:$0xf]  ;;  %v2177_v33 = vld [vmem:[%s2974_s3 + $0x80] sm:$0xf0]  ;;  %v1827_v36 = vld [vmem:[%s2974_s3 + $0x84] sm:$0xf0] }
  0x12   : > { %v2277_v12 = vpop.eup %2276  ;;  %v1826_v35 = vor.u32 %v2177_v33, %v1825_v32  ;;  %v1833_v37 = vld [vmem:[%s2974_s3 + $0x80] sm:$0xf]  ;;  %v2178_v38 = vld [vmem:[%s2974_s3 + $0x88] sm:$0xf0]  ;;  %v1830_v39 = vor.u32 %v2176_v34, %v1827_v36  ;;  %v2173_v43 = vld [vmem:[%s2974_s3 + $0x64] sm:$0xf] }
  0x13   : > { %v445_v13 = vmul.f32 128.0, %v2277_v12  ;;  %vm449_vm1 = vweird.f32 %v2277_v12  ;;  %665 = vmatpush.bf16.msra.mxu0 %v1838_v26  ;;  %v1834_v40 = vor.u32 %v2178_v38, %v1833_v37  ;;  %v1813_v41 = vld [vmem:[%s2974_s3 + $0x60] sm:$0xf]  ;;  %v2174_v42 = vld [vmem:[%s2974_s3 + $0x68] sm:$0xf0]  ;;  %vm726_vm8 = vcmask 36864  }
  0x14   : > { %678 = vmatpush.bf16.msra.mxu1 %v1842_v30  ;;  %v1814_v44 = vor.u32 %v2174_v42, %v1813_v41  ;;  %v1815_v45 = vld [vmem:[%s2974_s3 + $0x6c] sm:$0xf0]  ;;  %v1821_v46 = vld [vmem:[%s2974_s3 + $0x68] sm:$0xf]  ;;  %v2175_v47 = vld [vmem:[%s2974_s3 + $0x70] sm:$0xf0] }
  0x15   : > { %v446_v14 = vsub.f32 1.0, %v445_v13  ;;  %691 = vmatpush.bf16.msra.mxu2 %v1846_v31  ;;  %v1818_v48 = vor.u32 %v2173_v43, %v1815_v45  ;;  %v1822_v49 = vor.u32 %v2175_v47, %v1821_v46  ;;  %v1801_v50 = vld [vmem:[%s2974_s3 + $0x48] sm:$0xf]  ;;  %v2171_v51 = vld [vmem:[%s2974_s3 + $0x50] sm:$0xf0]  ;;  %vm740_vm9 = vcmask 39936  }
  0x16   : > { %v2170_v52 = vld [vmem:[%s2974_s3 + $0x4c] sm:$0xf]  ;;  %v1802_v53 = vor.u32 %v2171_v51, %v1801_v50  ;;  %v1803_v54 = vld [vmem:[%s2974_s3 + $0x54] sm:$0xf0]  ;;  %v1809_v55 = vld [vmem:[%s2974_s3 + $0x50] sm:$0xf] }
  0x17   : > { %v447_v15 = vmul.f32 %v2277_v12, %v446_v14  ;;  %666 = vmatpush.bf16.msra.mxu0 %v1826_v35  ;;  %v2172_v56 = vld [vmem:[%s2974_s3 + $0x58] sm:$0xf0]  ;;  %v1806_v57 = vor.u32 %v2170_v52, %v1803_v54  ;;  %v1789_v59 = vld [vmem:[%s2974_s3 + $0x30] sm:$0xf]  ;;  %v2167_v61 = vld [vmem:[%s2974_s3 + $0x34] sm:$0xf] }
  0x18   : > { %679 = vmatpush.bf16.msra.mxu1 %v1830_v39  ;;  %v1810_v58 = vor.u32 %v2172_v56, %v1809_v55  ;;  %v2168_v60 = vld [vmem:[%s2974_s3 + $0x38] sm:$0xf0]  ;;  %v1791_v63 = vld [vmem:[%s2974_s3 + $0x3c] sm:$0xf0]  ;;  %v1797_v1 = vld [vmem:[%s2974_s3 + $0x38] sm:$0xf] }
  0x19   : > { %v448_v16 = vadd.f32 %v2277_v12, %v447_v15  ;;  %692 = vmatpush.bf16.msra.mxu2 %v1834_v40  ;;  %v1790_v62 = vor.u32 %v2168_v60, %v1789_v59  ;;  %v2169_v2 = vld [vmem:[%s2974_s3 + $0x40] sm:$0xf0]  ;;  %v1794_v3 = vor.u32 %v2167_v61, %v1791_v63  ;;  %v1777_v5 = vld [vmem:[%s2974_s3 + $0x18] sm:$0xf]  ;;  %v2164_v7 = vld [vmem:[%s2974_s3 + $0x1c] sm:$0xf] }
  0x1a   : > { %v1798_v4 = vor.u32 %v2169_v2, %v1797_v1  ;;  %v2165_v6 = vld [vmem:[%s2974_s3 + $0x20] sm:$0xf0]  ;;  %v1779_v9 = vld [vmem:[%s2974_s3 + $0x24] sm:$0xf0]  ;;  %v1785_v10 = vld [vmem:[%s2974_s3 + $0x20] sm:$0xf] }
  0x1b   : > { %v2427_v17 = vsel %vm449_vm1, %v2277_v12, %v448_v16  ;;  %667 = vmatpush.bf16.msra.mxu0 %v1814_v44  ;;  %v1778_v8 = vor.u32 %v2165_v6, %v1777_v5  ;;  %v2166_v11 = vld [vmem:[%s2974_s3 + $0x28] sm:$0xf0]  ;;  %v1782_v12 = vor.u32 %v2164_v7, %v1779_v9  ;;  %v1765_v14 = vld [vmem:[%s2974_s3] sm:$0xf]  ;;  %v2161_v16 = vld [vmem:[%s2974_s3 + $0x4] sm:$0xf] }
  0x1c   : > { %680 = vmatpush.bf16.msra.mxu1 %v1818_v48  ;;  %v1786_v13 = vor.u32 %v2166_v11, %v1785_v10  ;;  %v2162_v15 = vld [vmem:[%s2974_s3 + $0x8] sm:$0xf0]  ;;  %v2270_v34 = vld [vmem:[%s2972_s1] ss:$0 sm:$0xff] }
  0x1d   : > { %693 = vmatpush.bf16.msra.mxu2 %v1822_v49  ;;  %v2271_v37 = vld [vmem:[%s2973_s2] ss:$0 sm:$0xff]  ;;  %v2317_v49 = vmov 65535   ;;  %v2186_v61 = vld [vmem:[%s2976_s5 + $0x8] sm:$0xff] }
  0x1e   : > { %v510_v41 = vld [vmem:[%s2975_s4] sm:$0x7]  ;;  %v746_v50 = vsel %vm744_vm6, 4294967295, %v2317_v49 }
  0x1f   : > { %668 = vmatpush.bf16.msra.mxu0 %v1802_v53  ;;  %v531_v42 = vperm.slane %v510_v41, 1  ;;  %v532_v47 = vperm.slane %v510_v41, 2  ;;  %v2576_v56 = vsel %vm745_vm7, %v746_v50, 0 }
  0x20   : > { %681 = vmatpush.bf16.msra.mxu1 %v1806_v57 }
  0x21   : > { %694 = vmatpush.bf16.msra.mxu2 %v1810_v58 }
  0x23   : > { %669 = vmatpush.bf16.msra.mxu0 %v1790_v62  ;;  %v2185_v62 = vld [vmem:[%s2976_s5] sm:$0xff] }
  0x24   : > { %682 = vmatpush.bf16.msra.mxu1 %v1794_v3 }
  0x25   : > { %695 = vmatpush.bf16.msra.mxu2 %v1798_v4 }
  0x27   : > { %670 = vmatpush.bf16.msra.mxu0 %v1778_v8 }
  0x28   : > { %683 = vmatpush.bf16.msra.mxu1 %v1782_v12 }
  0x29   : > { %696 = vmatpush.bf16.msra.mxu2 %v1786_v13 }
  0x83   : > { %v443_v18 = vpop.xlane.xlu0 %442 }
  0x84   : > { %v451_v19 = vmul.f32 %v2427_v17, %v443_v18  ;;  %v1766_v18 = vor.u32 %v2162_v15, %v1765_v14 }
  0x86   : > { %v2431_v20 = vsub.f32 %v2405_v0, %v451_v19  ;;  %v1767_v19 = vld [vmem:[%s2974_s3 + $0xc] sm:$0xf0]  ;;  %671 = vmatpush.bf16.msra.mxu0 %v1766_v18 }
  0x87   : > { %v1770_v23 = vor.u32 %v2161_v16, %v1767_v19 }
  0x88   : > { %v453_v21 = vmul.f32 %v2431_v20, %v2431_v20 }
  0x89   : > { %684 = vmatpush.bf16.msra.mxu1 %v1770_v23 }
  0x8a   : > { %v454_v22 = vsel %vm440_vm0, %v453_v21, 0.0  ;;  %v1773_v21 = vld [vmem:[%s2974_s3 + $0x8] sm:$0xf] }
  0x8b   : > { %455 = vadd.xlane.f32.xlu0 %v454_v22  ;;  %v2163_v22 = vld [vmem:[%s2974_s3 + $0x10] sm:$0xf0] }
  0x8c   : > { %v1774_v24 = vor.u32 %v2163_v22, %v1773_v21 }
  0x8e   : > { %697 = vmatpush.bf16.msra.mxu2 %v1774_v24 }
  0x92   : > { %875 = vmatpush.bf16.msrb.mxu2 %v2186_v61 }
  0x96   : > { %876 = vmatpush.bf16.msrb.mxu2 %v2185_v62 }
  0xfe   : > { %v456_v25 = vpop.xlane.xlu0 %455 }
  0xff   : > { %v457_v26 = vmul.f32 %v456_v25, %v2427_v17 }
 0x101   : > { %v458_v27 = vadd.f32 1e-05, %v457_v26 }
 0x103   : > { %2278 = vrsqrt.f32 %v458_v27  ;;  %vm465_vm3 = vweird.f32 %v458_v27 }
 0x109   : > { %v2279_v28 = vpop.eup %2278 }
 0x10a   : > { %v460_v29 = vmul.f32 %v2279_v28, %v458_v27  ;;  %vm466_vm2 = vweird.f32 %v2279_v28 }
 0x10b   : > { %vm467_vm4 = vmor %vm465_vm3, %vm466_vm2 }
 0x10c   : > { %v461_v30 = vmul.f32 %v2279_v28, %v460_v29 }
 0x10e   : > { %v462_v31 = vmul.f32 0.5, %v461_v30 }
 0x110   : > { %v463_v32 = vsub.f32 1.5, %v462_v31 }
 0x112   : > { %v464_v33 = vmul.f32 %v2279_v28, %v463_v32 }
 0x114   : > { %v468_v35 = vsel %vm467_vm4, %v2279_v28, %v464_v33 }
 0x115   : > { %v469_v36 = vmul.f32 %v468_v35, %v2431_v20  ;;  %v530_v20 = vperm.slane %v510_v41, 0 }
 0x117   : > { %v473_v38 = vmul.f32 %v2270_v34, %v469_v36 }
 0x119   : > { %v477_v39 = vadd.f32 %v2271_v37, %v473_v38 }
 0x11b   : > { %v528_v40 = vpack.c.bf16 %v477_v39, %v477_v39 }
 0x11d   : > { %672 = vmatmul.bf16.vlgmr.msra.gmra.mxu0 %v528_v40  ;;  %685 = vmatmul.bf16.vlgmr.msra.gmra.mxu1 %v528_v40 }
 0x11e   : > { %698 = vmatmul.bf16.vlgmr.msra.gmra.mxu2 %v528_v40 }
 0x19a   : > { %v673_v43 = vpop.f32.mrf.mxu0  ;;  %v686_v44 = vpop.f32.mrf.mxu1 }
 0x19b   : > { %v687_v45 = vadd.f32 %v686_v44, %v531_v42  ;;  %v674_v51 = vadd.f32 %v673_v43, %v530_v20 }
 0x19d   : > { %v704_v46 = vpack.c.bf16 %v687_v45, %v687_v45  ;;  %v703_v58 = vpack.c.bf16 %v674_v51, %v674_v51 }
 0x19f   : > { %971 = vrot.lane.b32.xlu0 %v704_v46, %s2315_s18  ;;  %769 = vrot.lane.b32.xlu2 %v704_v46, %s2316_s19  ;;  %v710_v48 = vsel %vm705_vm5, %v704_v46, 0 }
 0x1a0   : > { %719 = vmatpush.bf16.xpose.msra.mxu3 %v710_v48 }
 0x1a1   : > { %v699_v52 = vpop.f32.mrf.mxu2 }
 0x1a2   : > { %v700_v53 = vadd.f32 %v699_v52, %v532_v47  ;;  %v675_v54 = vpop.f32.mrf.mxu0  ;;  %v688_v55 = vpop.f32.mrf.mxu1 }
 0x1a4   : > { %v2578_v57 = vpack.c.bf16 %v700_v53, %v700_v53 }
 0x1a6   : > { %v749_v59 = vand.u32 %v2576_v56, %v2578_v57 }
 0x1a7   : > { %766 = vrot.lane.b32.xlu2 %v703_v58, %s2316_s19  ;;  %1859 = vmatmul.msk.bf16.vlgmr.msra.gmra.mxu3 %vm705_vm5, %v703_v58 }
 0x1a8   : > { %758 = vmatpush.bf16.msrb.mxu3 %v749_v59 }
 0x1a9   : > { %v701_v60 = vpop.f32.mrf.mxu2 }
 0x1af   : > { %969 = vrot.lane.b32.xlu2 %v703_v58, %s2315_s18 }
 0x1b7   : > { %882 = vrot.lane.b32.xlu2 %v703_v58, %s2318_s20 }
 0x1f9   : > { %v770_v63 = vpop.permute.xlu2 %769 }
 0x1fa   : > { %v775_v1 = vsel %vm705_vm5, %v770_v63, 0 }
 0x1fb   : > { %784 = vmatpush.bf16.xpose.msra.mxu3 %v775_v1 }
 0x201   : > { %v767_v18 = vpop.permute.xlu2 %766 }
 0x209   : > { %v970_v22 = vpop.permute.xlu2 %969 }
 0x211   : > { %v972_v2 = vpop.permute.xlu0 %971  ;;  %v883_v23 = vpop.permute.xlu2 %882 }
 0x212   : > { %v977_v3 = vsel %vm705_vm5, %v972_v2, 0 }
 0x213   : > { %986 = vmatpush.bf16.xpose.msra.mxu2 %v977_v3 }
 0x22a   : > { %v721_v4 = vpop.f32.mrf.mxu3 }
 0x22b   : > { %v725_v5 = vmul.f32 0.17677669, %v721_v4 }
 0x22d   : > { %v727_v6 = vsel %vm726_vm8, %v725_v5, -inf }
 0x22e   : > { %728 = vmax.xlane.f32.xlu1 %v727_v6  ;;  %v2188_v6 = vld [vmem:[%s2976_s5 + $0x18] sm:$0xff] }
 0x22f   : > { %847 = vmatpush.bf16.msrb.mxu1 %v2188_v6  ;;  %v1985_v6 = vld [vmem:[%s2980_s9 + $0xa0] sm:$0xf] }
 0x232   : > { %v723_v7 = vpop.f32.mrf.mxu3 }
 0x233   : > { %v2187_v7 = vld [vmem:[%s2976_s5 + $0x10] sm:$0xff] }
 0x234   : > { %848 = vmatpush.bf16.msrb.mxu1 %v2187_v7  ;;  %v2215_v7 = vld [vmem:[%s2980_s9 + $0xac] sm:$0xf0] }
 0x2a1   : > { %v729_v8 = vpop.xlane.xlu1 %728 }
 0x2a2   : > { %v730_v9 = vsub.f32 %v725_v5, %v729_v8  ;;  %v2190_v8 = vld [vmem:[%s2976_s5 + $0x28] sm:$0xff] }
 0x2a3   : > { %961 = vmatpush.bf16.msra.mxu1 %v2190_v8  ;;  %v2213_v8 = vld [vmem:[%s2980_s9 + $0xa4] sm:$0xf] }
 0x2a4   : > { %v731_v10 = vmul.f32 1.442695, %v730_v9 }
 0x2a6   : > { %2280 = vpow2.f32 %v731_v10 }
 0x2ac   : > { %v2281_v11 = vpop.eup %2280 }
 0x2ad   : > { %v733_v12 = vsel %vm726_vm8, %v2281_v11, 0.0 }
 0x2ae   : > { %734 = vadd.xlane.f32.xlu1 %v733_v12 }
 0x2c7   : > { %884 = vrot.lane.b32.xlu1 %v704_v46, %s2318_s20 }
 0x321   : > { %v735_v13 = vpop.xlane.xlu1 %734 }
 0x322   : > { %2282 = vrcp.f32 %v735_v13 }
 0x328   : > { %v2283_v14 = vpop.eup %2282 }
 0x329   : > { %v737_v15 = vmul.f32 %v2283_v14, %v2281_v11 }
 0x32b   : > { %v738_v16 = vpack.c.bf16 %v737_v15, %v737_v15  ;;  %v2192_v15 = vld [vmem:[%s2976_s5 + $0x38] sm:$0xff] }
 0x32d   : > { %1860 = vmatmul.msk.bf16.vlgmr.msrb.gmra.mxu3 %vm740_vm9, %v738_v16 }
 0x339   : > { %v885_v19 = vpop.permute.xlu1 %884 }
 0x33a   : > { %v890_v21 = vsel %vm705_vm5, %v885_v19, 0 }
 0x33b   : > { %899 = vmatpush.bf16.xpose.msrb.mxu3 %v890_v21 }
 0x33d   : > { %1861 = vmatmul.msk.bf16.vlgmr.msra.gmra.mxu3 %vm705_vm5, %v767_v18 }
 0x34d   : > { %1881 = vmatmul.msk.bf16.vlgmr.msrb.gmra.mxu3 %vm705_vm5, %v883_v23 }
 0x3b0   : > { %v760_v24 = vpop.f32.mrf.mxu3 }
 0x3b1   : > { %v764_v25 = vpack.c.bf16 %v760_v24, %v760_v24 }
 0x3b3   : > { %1880 = vmatmul.msk.bf16.vlgmr.msrb.gmra.mxu2 %vm705_vm5, %v764_v25 }
 0x3b8   : > { %v762_v26 = vpop.f32.mrf.mxu3 }
 0x3c0   : > { %v786_v27 = vpop.f32.mrf.mxu3 }
 0x3c1   : > { %v790_v28 = vmul.f32 0.17677669, %v786_v27 }
 0x3c3   : > { %1892 = vmatmul.msk.bf16.vlgmr.msra.gmra.mxu2 %vm705_vm5, %v970_v22  ;;  %v791_v29 = vsel %vm726_vm8, %v790_v28, -inf }
 0x3c4   : > { %792 = vmax.xlane.f32.xlu2 %v791_v29 }
 0x3c8   : > { %v788_v30 = vpop.f32.mrf.mxu3 }
 0x3d0   : > { %v901_v31 = vpop.f32.mrf.mxu3 }
 0x3d1   : > { %v905_v32 = vmul.f32 0.17677669, %v901_v31 }
 0x3d3   : > { %v906_v33 = vsel %vm726_vm8, %v905_v32, -inf }
 0x3d4   : > { %907 = vmax.xlane.f32.xlu1 %v906_v33  ;;  %v2272_v33 = vld [vmem:[%s2977_s6] ss:$0 sm:$0xff] }
 0x3d8   : > { %v903_v34 = vpop.f32.mrf.mxu3 }
 0x436   : > { %v2605_v35 = vpop.f32.mrf.mxu2 }
 0x437   : > { %v793_v36 = vpop.xlane.xlu2 %792 }
 0x438   : > { %v794_v37 = vsub.f32 %v790_v28, %v793_v36 }
 0x43a   : > { %v795_v38 = vmul.f32 1.442695, %v794_v37 }
 0x43c   : > { %2284 = vpow2.f32 %v795_v38 }
 0x43e   : > { %v880_v39 = vpop.f32.mrf.mxu2 }
 0x442   : > { %v2285_v40 = vpop.eup %2284 }
 0x443   : > { %v797_v41 = vsel %vm726_vm8, %v2285_v40, 0.0 }
 0x444   : > { %798 = vadd.xlane.f32.xlu2 %v797_v41  ;;  %v2223_v41 = vld [vmem:[%s2980_s9 + $0xec] sm:$0xf0] }
 0x446   : > { %v988_v42 = vpop.f32.mrf.mxu2 }
 0x447   : > { %v992_v43 = vmul.f32 0.17677669, %v988_v42  ;;  %v908_v44 = vpop.xlane.xlu1 %907  ;;  %v2221_v42 = vld [vmem:[%s2980_s9 + $0xe4] sm:$0xf] }
 0x448   : > { %v909_v45 = vsub.f32 %v905_v32, %v908_v44  ;;  %v2025_v44 = vld [vmem:[%s2980_s9 + $0xe8] sm:$0xf] }
 0x449   : > { %v993_v20 = vsel %vm726_vm8, %v992_v43, -inf }
 0x44a   : > { %v910_v46 = vmul.f32 1.442695, %v909_v45  ;;  %994 = vmax.xlane.f32.xlu0 %v993_v20  ;;  %v2224_v45 = vld [vmem:[%s2980_s9 + $0xf4] sm:$0xf0] }
 0x44c   : > { %2286 = vpow2.f32 %v910_v46  ;;  %v2026_v46 = vor.u32 %v2224_v45, %v2025_v44  ;;  %v2201_v44 = vld [vmem:[%s2980_s9 + $0x44] sm:$0xf] }
 0x44e   : > { %v990_v47 = vpop.f32.mrf.mxu2 }
 0x44f   : > { %v2222_v47 = vld [vmem:[%s2980_s9 + $0xec] sm:$0xf] }
 0x452   : > { %v2287_v48 = vpop.eup %2286 }
 0x453   : > { %v912_v49 = vsel %vm726_vm8, %v2287_v48, 0.0 }
 0x454   : > { %913 = vadd.xlane.f32.xlu1 %v912_v49 }
 0x45e   : > { %804 = vrot.lane.b32.xlu0 %v2578_v57, %s2316_s19 }
 0x46d   : > { %918 = vrot.lane.b32.xlu1 %v2578_v57, %s2318_s20 }
 0x4b7   : > { %v799_v53 = vpop.xlane.xlu2 %798 }
 0x4bd   : > { %v995_v50 = vpop.xlane.xlu0 %994 }
 0x4be   : > { %v996_v51 = vsub.f32 %v992_v43, %v995_v50 }
 0x4c0   : > { %v997_v52 = vmul.f32 1.442695, %v996_v51 }
 0x4c2   : > { %2288 = vpow2.f32 %v997_v52 }
 0x4c3   : > { %2290 = vrcp.f32 %v799_v53 }
 0x4c7   : > { %v914_v62 = vpop.xlane.xlu1 %913 }
 0x4c8   : > { %v2289_v54 = vpop.eup %2288  ;;  %2292 = vrcp.f32 %v914_v62  ;;  %v2009_v62 = vld [vmem:[%s2980_s9 + $0xc8] sm:$0xf] }
 0x4c9   : > { %v999_v55 = vsel %vm726_vm8, %v2289_v54, 0.0  ;;  %v2291_v58 = vpop.eup %2290 }
 0x4ca   : > { %1000 = vadd.xlane.f32.xlu2 %v999_v55  ;;  %v801_v59 = vmul.f32 %v2291_v58, %v2285_v40  ;;  %v2001_v55 = vld [vmem:[%s2980_s9 + $0xc0] sm:$0xf]  ;;  %v2219_v58 = vld [vmem:[%s2980_s9 + $0xcc] sm:$0xf0] }
 0x4cc   : > { %v802_v63 = vpack.c.bf16 %v801_v59, %v801_v59  ;;  %v2217_v59 = vld [vmem:[%s2980_s9 + $0xc4] sm:$0xf] }
 0x4ce   : > { %v2293_v1 = vpop.eup %2292 }
 0x4cf   : > { %v916_v3 = vmul.f32 %v2293_v1, %v2287_v48  ;;  %v2027_v48 = vld [vmem:[%s2980_s9 + $0xf8] sm:$0xf0] }
 0x4d0   : > { %v805_v60 = vpop.permute.xlu0 %804  ;;  %v2030_v49 = vor.u32 %v2222_v47, %v2027_v48  ;;  %v2204_v47 = vld [vmem:[%s2980_s9 + $0x54] sm:$0xf0] }
 0x4d1   : > { %v810_v61 = vand.u32 %v805_v60, %v2576_v56  ;;  %v917_v5 = vpack.c.bf16 %v916_v3, %v916_v3  ;;  %v2002_v60 = vor.u32 %v2219_v58, %v2001_v55  ;;  %v2218_v3 = vld [vmem:[%s2980_s9 + $0xcc] sm:$0xf]  ;;  %v2199_v55 = vld [vmem:[%s2980_s9 + $0x2c] sm:$0xf0]  ;;  %v2197_v58 = vld [vmem:[%s2980_s9 + $0x24] sm:$0xf] }
 0x4d3   : > { %819 = vmatpush.bf16.msrb.mxu0 %v810_v61  ;;  %v2003_v61 = vld [vmem:[%s2980_s9 + $0xd0] sm:$0xf0] }
 0x4d4   : > { %v2006_v1 = vor.u32 %v2217_v59, %v2003_v61  ;;  %v1929_v61 = vld [vmem:[%s2980_s9 + $0x28] sm:$0xf] }
 0x4d6   : > { %1862 = vmatmul.msk.bf16.vlgmr.msrb.gmra.mxu0 %vm740_vm9, %v802_v63  ;;  %v2220_v63 = vld [vmem:[%s2980_s9 + $0xd4] sm:$0xf0] }
 0x4df   : > { %v919_v2 = vpop.permute.xlu1 %918 }
 0x4e0   : > { %v924_v4 = vand.u32 %v919_v2, %v2576_v56  ;;  %v2010_v2 = vor.u32 %v2220_v63, %v2009_v62  ;;  %v2200_v62 = vld [vmem:[%s2980_s9 + $0x34] sm:$0xf0] }
 0x4e2   : > { %1005 = vrot.lane.b32.xlu2 %v2578_v57, %s2315_s18  ;;  %933 = vmatpush.bf16.msra.mxu0 %v924_v4  ;;  %v2189_v57 = vld [vmem:[%s2976_s5 + $0x20] sm:$0xff]  ;;  %v2011_v4 = vld [vmem:[%s2980_s9 + $0xd8] sm:$0xf0] }
 0x4e3   : > { %962 = vmatpush.bf16.msra.mxu1 %v2189_v57  ;;  %v1987_v57 = vld [vmem:[%s2980_s9 + $0xb0] sm:$0xf0] }
 0x4e6   : > { %1882 = vmatmul.msk.bf16.vlgmr.msra.gmra.mxu0 %vm740_vm9, %v917_v5  ;;  %v2014_v5 = vor.u32 %v2218_v3, %v2011_v4  ;;  %v1931_v3 = vld [vmem:[%s2980_s9 + $0x38] sm:$0xf0]  ;;  %v1905_v4 = vld [vmem:[%s2980_s9] sm:$0xf] }
 0x4e7   : > { %1048 = vmatpush.bf16.msrb.mxu0 %v2192_v15  ;;  %v1995_v15 = vld [vmem:[%s2980_s9 + $0xb8] sm:$0xf0] }
 0x53d   : > { %v1001_v9 = vpop.xlane.xlu2 %1000 }
 0x53e   : > { %2294 = vrcp.f32 %v1001_v9  ;;  %v1986_v9 = vor.u32 %v2215_v7, %v1985_v6  ;;  %v2195_v6 = vld [vmem:[%s2980_s9 + $0xc] sm:$0xf0]  ;;  %v2193_v7 = vld [vmem:[%s2980_s9 + $0x4] sm:$0xf] }
 0x544   : > { %v2295_v10 = vpop.eup %2294 }
 0x545   : > { %v1003_v11 = vmul.f32 %v2295_v10, %v2289_v54  ;;  %v1006_v12 = vpop.permute.xlu2 %1005  ;;  %v1993_v10 = vld [vmem:[%s2980_s9 + $0xa8] sm:$0xf] }
 0x546   : > { %v1011_v13 = vand.u32 %v1006_v12, %v2576_v56  ;;  %v2191_v56 = vld [vmem:[%s2976_s5 + $0x30] sm:$0xff]  ;;  %v1990_v12 = vor.u32 %v2213_v8, %v1987_v57 }
 0x547   : > { %v1004_v14 = vpack.c.bf16 %v1003_v11, %v1003_v11  ;;  %1049 = vmatpush.bf16.msrb.mxu0 %v2191_v56  ;;  %v2216_v11 = vld [vmem:[%s2980_s9 + $0xb4] sm:$0xf0]  ;;  %v1977_v56 = vld [vmem:[%s2980_s9 + $0x88] sm:$0xf]  ;;  %v1907_v8 = vld [vmem:[%s2980_s9 + $0x10] sm:$0xf0] }
 0x548   : > { %1020 = vmatpush.bf16.msra.mxu3 %v1011_v13  ;;  %v1994_v13 = vor.u32 %v2216_v11, %v1993_v10  ;;  %v1910_v57 = vor.u32 %v2193_v7, %v1907_v8  ;;  %v1913_v10 = vld [vmem:[%s2980_s9 + $0x8] sm:$0xf]  ;;  %v2196_v11 = vld [vmem:[%s2980_s9 + $0x14] sm:$0xf0] }
 0x54b   : > { %1893 = vmatmul.msk.bf16.vlgmr.msra.gmra.mxu3 %vm740_vm9, %v1004_v14  ;;  %1335 = vmatpush.bf16.msra.mxu0 %v2030_v49  ;;  %v2214_v14 = vld [vmem:[%s2980_s9 + $0xac] sm:$0xf] }
 0x54c   : > { %1322 = vmatpush.bf16.msrb.mxu3 %v2026_v46  ;;  %v1945_v46 = vld [vmem:[%s2980_s9 + $0x48] sm:$0xf] }
 0x54d   : > { %v1946_v49 = vor.u32 %v2204_v47, %v1945_v46  ;;  %v2237_v46 = vld [vmem:[%s2982_s11 + $0x60] sm:$0xff] }
 0x54e   : > { %v2245_v47 = vld [vmem:[%s2982_s11 + $0xa0] sm:$0xff] }
 0x54f   : > { %1336 = vmatpush.bf16.msra.mxu0 %v2014_v5 }
 0x550   : > { %1323 = vmatpush.bf16.msrb.mxu3 %v2010_v2  ;;  %v2198_v2 = vld [vmem:[%s2980_s9 + $0x2c] sm:$0xf] }
 0x551   : > { %v1934_v5 = vor.u32 %v2198_v2, %v1931_v3  ;;  %v2241_v2 = vld [vmem:[%s2982_s11 + $0x80] sm:$0xff] }
 0x553   : > { %v821_v16 = vpop.f32.mrf.mxu0 }
 0x554   : > { %v825_v18 = vpack.c.bf16 %v821_v16, %v821_v16  ;;  %v1998_v16 = vor.u32 %v2214_v14, %v1995_v15  ;;  %1324 = vmatpush.bf16.msrb.mxu3 %v1994_v13  ;;  %v1914_v13 = vor.u32 %v2196_v11, %v1913_v10  ;;  %v1915_v14 = vld [vmem:[%s2980_s9 + $0x18] sm:$0xf0] }
 0x556   : > { %1871 = vmatmul.msk.bf16.vlgmr.msrb.gmra.mxu1 %vm705_vm5, %v825_v18  ;;  %v1969_v18 = vld [vmem:[%s2980_s9 + $0x80] sm:$0xf]  ;;  %1337 = vmatpush.bf16.msra.mxu0 %v1998_v16 }
 0x55b   : > { %v823_v19 = vpop.f32.mrf.mxu0 }
 0x55c   : > { %v2211_v19 = vld [vmem:[%s2980_s9 + $0x8c] sm:$0xf0] }
 0x563   : > { %v935_v21 = vpop.f32.mrf.mxu0 }
 0x564   : > { %v939_v22 = vpack.c.bf16 %v935_v21, %v935_v21  ;;  %v2209_v21 = vld [vmem:[%s2980_s9 + $0x84] sm:$0xf] }
 0x566   : > { %1891 = vmatmul.msk.bf16.vlgmr.msra.gmra.mxu1 %vm705_vm5, %v939_v22  ;;  %v1970_v22 = vor.u32 %v2211_v19, %v1969_v18  ;;  %v2232_v18 = vld [vmem:[%s2982_s11 + $0x38] sm:$0xff] }
 0x567   : > { %v2256_v19 = vld [vmem:[%s2982_s11 + $0xf8] sm:$0xff] }
 0x56b   : > { %v937_v23 = vpop.f32.mrf.mxu0 }
 0x56c   : > { %v1971_v23 = vld [vmem:[%s2980_s9 + $0x90] sm:$0xf0] }
 0x5ce   : > { %v1022_v24 = vpop.f32.mrf.mxu3 }
 0x5cf   : > { %v1026_v25 = vpack.c.bf16 %v1022_v24, %v1022_v24  ;;  %v2212_v24 = vld [vmem:[%s2980_s9 + $0x94] sm:$0xf0] }
 0x5d1   : > { %1902 = vmatmul.msk.bf16.vlgmr.msrb.gmra.mxu0 %vm705_vm5, %v1026_v25  ;;  %v1974_v25 = vor.u32 %v2209_v21, %v1971_v23  ;;  %v2255_v23 = vld [vmem:[%s2982_s11 + $0xf0] sm:$0xff] }
 0x5d3   : > { %v850_v26 = vpop.f32.mrf.mxu1 }
 0x5d4   : > { %v879_v29 = vadd.f32 %v2605_v35, %v850_v26  ;;  %v2017_v35 = vld [vmem:[%s2980_s9 + $0xe0] sm:$0xf]  ;;  %v1978_v26 = vor.u32 %v2212_v24, %v1977_v56 }
 0x5d5   : > { %v2018_v43 = vor.u32 %v2223_v41, %v2017_v35  ;;  %v2206_v35 = vld [vmem:[%s2980_s9 + $0x6c] sm:$0xf]  ;;  %v1963_v41 = vld [vmem:[%s2980_s9 + $0x78] sm:$0xf0] }
 0x5d6   : > { %v1024_v27 = vpop.f32.mrf.mxu3  ;;  %1325 = vmatpush.bf16.msrb.mxu3 %v1978_v26 }
 0x5d7   : > { %1296 = vmatpush.bf16.msrb.mxu1 %v2018_v43  ;;  %v2210_v27 = vld [vmem:[%s2980_s9 + $0x8c] sm:$0xf]  ;;  %v1937_v43 = vld [vmem:[%s2980_s9 + $0x40] sm:$0xf] }
 0x5db   : > { %v852_v28 = vpop.f32.mrf.mxu1  ;;  %1297 = vmatpush.bf16.msrb.mxu1 %v2002_v60  ;;  %v1923_v60 = vld [vmem:[%s2980_s9 + $0x30] sm:$0xf0] }
 0x5dc   : > { %v1979_v28 = vld [vmem:[%s2980_s9 + $0x98] sm:$0xf0]  ;;  %v1926_v63 = vor.u32 %v2197_v58, %v1923_v60  ;;  %v2243_v58 = vld [vmem:[%s2982_s11 + $0x90] sm:$0xff]  ;;  %v2249_v60 = vld [vmem:[%s2982_s11 + $0xc0] sm:$0xff] }
 0x5df   : > { %1298 = vmatpush.bf16.msrb.mxu1 %v1986_v9  ;;  %v1906_v9 = vor.u32 %v2195_v6, %v1905_v4 }
 0x5e3   : > { %v964_v30 = vpop.f32.mrf.mxu1  ;;  %1299 = vmatpush.bf16.msrb.mxu1 %v1970_v22  ;;  %v2231_v22 = vld [vmem:[%s2982_s11 + $0x30] sm:$0xff] }
 0x5e4   : > { %v968_v31 = vadd.f32 %v964_v30, %v879_v29  ;;  %v1982_v29 = vor.u32 %v2210_v27, %v1979_v28  ;;  %v1953_v30 = vld [vmem:[%s2980_s9 + $0x60] sm:$0xf] }
 0x5e6   : > { %1338 = vmatpush.bf16.msra.mxu0 %v1982_v29  ;;  %v2273_v29 = vld [vmem:[%s2978_s7] ss:$0 sm:$0xff] }
 0x5eb   : > { %v966_v32 = vpop.f32.mrf.mxu1 }
 0x5ec   : > { %v2205_v32 = vld [vmem:[%s2980_s9 + $0x64] sm:$0xf] }
 0x64e   : > { %v1051_v34 = vpop.f32.mrf.mxu0 }
 0x64f   : > { %v1055_v36 = vadd.f32 %v1051_v34, %v968_v31  ;;  %v2207_v31 = vld [vmem:[%s2980_s9 + $0x6c] sm:$0xf0]  ;;  %v1955_v34 = vld [vmem:[%s2980_s9 + $0x70] sm:$0xf0] }
 0x651   : > { %v1059_v37 = vadd.f32 %v2272_v33, %v1055_v36  ;;  %v1954_v33 = vor.u32 %v2207_v31, %v1953_v30  ;;  %v1961_v36 = vld [vmem:[%s2980_s9 + $0x68] sm:$0xf] }
 0x653   : > { %v2649_v38 = vadd.f32 %v1059_v37, %v2405_v0  ;;  %v2019_v0 = vld [vmem:[%s2980_s9 + $0xf0] sm:$0xf0]  ;;  %v2208_v37 = vld [vmem:[%s2980_s9 + $0x74] sm:$0xf0]  ;;  %1300 = vmatpush.bf16.msrb.mxu1 %v1954_v33 }
 0x654   : > { %v2022_v20 = vor.u32 %v2221_v42, %v2019_v0  ;;  %v1966_v42 = vor.u32 %v2206_v35, %v1963_v41  ;;  %v2203_v0 = vld [vmem:[%s2980_s9 + $0x4c] sm:$0xf0] }
 0x655   : > { %v1063_v39 = vsel %vm440_vm0, %v2649_v38, 0.0  ;;  %v1938_v45 = vor.u32 %v2203_v0, %v1937_v43  ;;  %v2239_v35 = vld [vmem:[%s2982_s11 + $0x70] sm:$0xff]  ;;  %v2253_v43 = vld [vmem:[%s2982_s11 + $0xe0] sm:$0xff]  ;;  %v2238_v0 = vld [vmem:[%s2982_s11 + $0x68] sm:$0xff] }
 0x656   : > { %1064 = vadd.xlane.f32.xlu0 %v1063_v39  ;;  %v1053_v40 = vpop.f32.mrf.mxu0  ;;  %1309 = vmatpush.bf16.msrb.mxu2 %v2022_v20  ;;  %v1958_v39 = vor.u32 %v2205_v32, %v1955_v34  ;;  %v1939_v20 = vld [vmem:[%s2980_s9 + $0x50] sm:$0xf0]  ;;  %v2274_v32 = vld [vmem:[%s2979_s8] ss:$0 sm:$0xff] }
 0x657   : > { %v1962_v40 = vor.u32 %v2208_v37, %v1961_v36  ;;  %1339 = vmatpush.bf16.msra.mxu0 %v1966_v42  ;;  %v1942_v48 = vor.u32 %v2201_v44, %v1939_v20  ;;  %1301 = vmatpush.bf16.msrb.mxu1 %v1938_v45  ;;  %v2240_v37 = vld [vmem:[%s2982_s11 + $0x78] sm:$0xff]  ;;  %v2247_v41 = vld [vmem:[%s2982_s11 + $0xb0] sm:$0xff]  ;;  %v2229_v42 = vld [vmem:[%s2982_s11 + $0x20] sm:$0xff] }
 0x658   : > { %v2246_v44 = vld [vmem:[%s2982_s11 + $0xa8] sm:$0xff]  ;;  %v2228_v45 = vld [vmem:[%s2982_s11 + $0x18] sm:$0xff] }
 0x659   : > { %1326 = vmatpush.bf16.msrb.mxu3 %v1962_v40  ;;  %v2254_v40 = vld [vmem:[%s2982_s11 + $0xe8] sm:$0xff]  ;;  %v2252_v20 = vld [vmem:[%s2982_s11 + $0xd8] sm:$0xff] }
 0x65a   : > { %1310 = vmatpush.bf16.msrb.mxu2 %v2006_v1  ;;  %v1930_v1 = vor.u32 %v2200_v62, %v1929_v61  ;;  %v2234_v61 = vld [vmem:[%s2982_s11 + $0x48] sm:$0xff] }
 0x65b   : > { %v2242_v62 = vld [vmem:[%s2982_s11 + $0x88] sm:$0xff] }
 0x65d   : > { %1327 = vmatpush.bf16.msrb.mxu3 %v1946_v49  ;;  %v2251_v49 = vld [vmem:[%s2982_s11 + $0xd0] sm:$0xff] }
 0x65e   : > { %1311 = vmatpush.bf16.msrb.mxu2 %v1990_v12  ;;  %v2194_v12 = vld [vmem:[%s2980_s9 + $0xc] sm:$0xf] }
 0x65f   : > { %v1918_v15 = vor.u32 %v2194_v12, %v1915_v14 }
 0x661   : > { %1328 = vmatpush.bf16.msrb.mxu3 %v1930_v1  ;;  %v2233_v1 = vld [vmem:[%s2982_s11 + $0x40] sm:$0xff] }
 0x662   : > { %1312 = vmatpush.bf16.msrb.mxu2 %v1974_v25 }
 0x665   : > { %1329 = vmatpush.bf16.msrb.mxu3 %v1914_v13 }
 0x666   : > { %1313 = vmatpush.bf16.msrb.mxu2 %v1958_v39  ;;  %v2248_v39 = vld [vmem:[%s2982_s11 + $0xb8] sm:$0xff] }
 0x669   : > { %1670 = vmatpush.bf16.msra.mxu3 %v2248_v39 }
 0x66a   : > { %1314 = vmatpush.bf16.msrb.mxu2 %v1942_v48  ;;  %v2227_v48 = vld [vmem:[%s2982_s11 + $0x10] sm:$0xff] }
 0x66d   : > { %1671 = vmatpush.bf16.msra.mxu3 %v2247_v41 }
 0x66e   : > { %1315 = vmatpush.bf16.msrb.mxu2 %v1926_v63  ;;  %v1126_v63 = vld [vmem:[%s2981_s10] sm:$0xf] }
 0x66f   : > { %v1128_v3 = vperm.slane %v1126_v63, 0  ;;  %v1131_v4 = vperm.slane %v1126_v63, 3  ;;  %v1130_v11 = vperm.slane %v1126_v63, 2 }
 0x671   : > { %1672 = vmatpush.bf16.msra.mxu3 %v2246_v44 }
 0x672   : > { %1316 = vmatpush.bf16.msrb.mxu2 %v1910_v57  ;;  %v1129_v57 = vperm.slane %v1126_v63, 1 }
 0x675   : > { %1673 = vmatpush.bf16.msra.mxu3 %v2245_v47 }
 0x676   : > { %1657 = vmatpush.bf16.msra.mxu2 %v2240_v37 }
 0x67a   : > { %1658 = vmatpush.bf16.msra.mxu2 %v2239_v35 }
 0x67e   : > { %1659 = vmatpush.bf16.msra.mxu2 %v2238_v0 }
 0x682   : > { %1660 = vmatpush.bf16.msra.mxu2 %v2237_v46 }
 0x6c9   : > { %v1065_v50 = vpop.xlane.xlu0 %1064 }
 0x6ca   : > { %v1066_v51 = vmul.f32 %v1065_v50, %v2427_v17  ;;  %v2202_v50 = vld [vmem:[%s2980_s9 + $0x4c] sm:$0xf] }
 0x6cc   : > { %v2679_v52 = vsub.f32 %v2649_v38, %v1066_v51  ;;  %v1947_v51 = vld [vmem:[%s2980_s9 + $0x58] sm:$0xf0] }
 0x6ce   : > { %v1068_v53 = vmul.f32 %v2679_v52, %v2679_v52 }
 0x6d0   : > { %v1069_v54 = vsel %vm440_vm0, %v1068_v53, 0.0  ;;  %v1950_v53 = vor.u32 %v2202_v50, %v1947_v51  ;;  %v2236_v50 = vld [vmem:[%s2982_s11 + $0x58] sm:$0xff] }
 0x6d1   : > { %1070 = vadd.xlane.f32.xlu2 %v1069_v54  ;;  %v1921_v54 = vld [vmem:[%s2980_s9 + $0x20] sm:$0xf]  ;;  %v2244_v51 = vld [vmem:[%s2982_s11 + $0x98] sm:$0xff]  ;;  %1661 = vmatpush.bf16.msra.mxu2 %v2236_v50 }
 0x6d2   : > { %1340 = vmatpush.bf16.msra.mxu0 %v1950_v53  ;;  %v1922_v59 = vor.u32 %v2199_v55, %v1921_v54  ;;  %v2226_v53 = vld [vmem:[%s2982_s11 + $0x8] sm:$0xff]  ;;  %1674 = vmatpush.bf16.msra.mxu3 %v2244_v51  ;;  %v2235_v55 = vld [vmem:[%s2982_s11 + $0x50] sm:$0xff] }
 0x6d3   : > { %v2250_v54 = vld [vmem:[%s2982_s11 + $0xc8] sm:$0xff] }
 0x6d4   : > { %1302 = vmatpush.bf16.msrb.mxu1 %v1922_v59  ;;  %v2225_v59 = vld [vmem:[%s2982_s11] sm:$0xff] }
 0x6d5   : > { %1662 = vmatpush.bf16.msra.mxu2 %v2235_v55 }
 0x6d6   : > { %1341 = vmatpush.bf16.msra.mxu0 %v1934_v5  ;;  %1675 = vmatpush.bf16.msra.mxu3 %v2243_v58 }
 0x6d8   : > { %1303 = vmatpush.bf16.msrb.mxu1 %v1906_v9 }
 0x6d9   : > { %1663 = vmatpush.bf16.msra.mxu2 %v2234_v61 }
 0x6da   : > { %1342 = vmatpush.bf16.msra.mxu0 %v1918_v15  ;;  %1676 = vmatpush.bf16.msra.mxu3 %v2242_v62 }
 0x6dc   : > { %1644 = vmatpush.bf16.msra.mxu1 %v2232_v18 }
 0x6dd   : > { %1664 = vmatpush.bf16.msra.mxu2 %v2233_v1 }
 0x6de   : > { %1683 = vmatpush.bf16.msrb.mxu0 %v2256_v19  ;;  %1677 = vmatpush.bf16.msra.mxu3 %v2241_v2 }
 0x6e0   : > { %1645 = vmatpush.bf16.msra.mxu1 %v2231_v22 }
 0x6e2   : > { %1684 = vmatpush.bf16.msrb.mxu0 %v2255_v23 }
 0x6e6   : > { %1685 = vmatpush.bf16.msrb.mxu0 %v2254_v40 }
 0x6ea   : > { %1686 = vmatpush.bf16.msrb.mxu0 %v2253_v43 }
 0x6ee   : > { %1687 = vmatpush.bf16.msrb.mxu0 %v2252_v20 }
 0x6f2   : > { %1688 = vmatpush.bf16.msrb.mxu0 %v2251_v49 }
 0x6f6   : > { %1689 = vmatpush.bf16.msrb.mxu0 %v2250_v54 }
 0x6fa   : > { %1690 = vmatpush.bf16.msrb.mxu0 %v2249_v60 }
 0x744   : > { %v1071_v16 = vpop.xlane.xlu2 %1070 }
 0x745   : > { %v1072_v21 = vmul.f32 %v1071_v16, %v2427_v17 }
 0x747   : > { %v1073_v56 = vadd.f32 1e-05, %v1072_v21 }
 0x749   : > { %2296 = vrsqrt.f32 %v1073_v56  ;;  %vm1080_vm11 = vweird.f32 %v1073_v56 }
 0x74f   : > { %v2297_v24 = vpop.eup %2296 }
 0x750   : > { %v1075_v25 = vmul.f32 %v2297_v24, %v1073_v56  ;;  %vm1081_vm10 = vweird.f32 %v2297_v24 }
 0x751   : > { %vm1082_vm12 = vmor %vm1080_vm11, %vm1081_vm10 }
 0x752   : > { %v1076_v26 = vmul.f32 %v2297_v24, %v1075_v25 }
 0x754   : > { %v1077_v27 = vmul.f32 0.5, %v1076_v26 }
 0x756   : > { %v1078_v28 = vsub.f32 1.5, %v1077_v27 }
 0x758   : > { %v1079_v17 = vmul.f32 %v2297_v24, %v1078_v28 }
 0x75a   : > { %v1083_v30 = vsel %vm1082_vm12, %v2297_v24, %v1079_v17 }
 0x75b   : > { %v1084_v31 = vmul.f32 %v1083_v30, %v2679_v52  ;;  %v2230_v52 = vld [vmem:[%s2982_s11 + $0x28] sm:$0xff] }
 0x75c   : > { %1646 = vmatpush.bf16.msra.mxu1 %v2230_v52 }
 0x75d   : > { %v1088_v33 = vmul.f32 %v2273_v29, %v1084_v31 }
 0x75f   : > { %v1092_v34 = vadd.f32 %v2274_v32, %v1088_v33 }
 0x760   : > { %1647 = vmatpush.bf16.msra.mxu1 %v2229_v42 }
 0x761   : > { %v1125_v36 = vpack.c.bf16 %v1092_v34, %v1092_v34 }
 0x763   : > { %1304 = vmatmul.bf16.vlgmr.msrb.gmra.mxu1 %v1125_v36  ;;  %1317 = vmatmul.bf16.vlgmr.msrb.gmra.mxu2 %v1125_v36 }
 0x764   : > { %1330 = vmatmul.bf16.vlgmr.msrb.gmra.mxu3 %v1125_v36  ;;  %1343 = vmatmul.bf16.vlgmr.msra.gmra.mxu0 %v1125_v36 }
 0x765   : > { %1648 = vmatpush.bf16.msra.mxu1 %v2228_v45 }
 0x769   : > { %1649 = vmatpush.bf16.msra.mxu1 %v2227_v48 }
 0x76d   : > { %1650 = vmatpush.bf16.msra.mxu1 %v2226_v53 }
 0x771   : > { %1651 = vmatpush.bf16.msra.mxu1 %v2225_v59 }
 0x7e0   : > { %v1305_v5 = vpop.f32.mrf.mxu1 }
 0x7e1   : > { %v1306_v6 = vadd.f32 %v1305_v5, %v1128_v3  ;;  %v1344_v7 = vpop.f32.mrf.mxu0  ;;  %v2275_v5 = vld [vmem:[%s2983_s12] ss:$0 sm:$0xff] }
 0x7e2   : > { %v1345_v8 = vadd.f32 %v1344_v7, %v1131_v4 }
 0x7e3   : > { %v1352_v9 = vmul.f32 0.044715, %v1306_v6  ;;  %v1348_v35 = vmul.f32 0.5, %v1306_v6 }
 0x7e4   : > { %v1355_v10 = vmul.f32 0.044715, %v1345_v8  ;;  %v1351_v42 = vmul.f32 0.5, %v1345_v8 }
 0x7e5   : > { %v1356_v12 = vmul.f32 %v1352_v9, %v1306_v6 }
 0x7e6   : > { %v1359_v13 = vmul.f32 %v1355_v10, %v1345_v8  ;;  %v1318_v14 = vpop.f32.mrf.mxu2 }
 0x7e7   : > { %v1360_v15 = vmul.f32 %v1356_v12, %v1306_v6  ;;  %v1319_v16 = vadd.f32 %v1318_v14, %v1129_v57  ;;  %v1331_v18 = vpop.f32.mrf.mxu3 }
 0x7e8   : > { %v1363_v19 = vmul.f32 %v1359_v13, %v1345_v8  ;;  %v1332_v21 = vadd.f32 %v1331_v18, %v1130_v11  ;;  %v1307_v22 = vpop.f32.mrf.mxu1 }
 0x7e9   : > { %v1353_v23 = vmul.f32 0.044715, %v1319_v16  ;;  %v1346_v56 = vpop.f32.mrf.mxu0  ;;  %v1364_v24 = vadd.f32 %v1360_v15, %v1306_v6  ;;  %v1349_v48 = vmul.f32 0.5, %v1319_v16 }
 0x7ea   : > { %v1354_v25 = vmul.f32 0.044715, %v1332_v21  ;;  %v1367_v26 = vadd.f32 %v1363_v19, %v1345_v8  ;;  %v1350_v50 = vmul.f32 0.5, %v1332_v21 }
 0x7eb   : > { %v1357_v27 = vmul.f32 %v1353_v23, %v1319_v16  ;;  %v1368_v28 = vmul.f32 0.7978846, %v1364_v24 }
 0x7ec   : > { %v1358_v17 = vmul.f32 %v1354_v25, %v1332_v21  ;;  %v1371_v29 = vmul.f32 0.7978846, %v1367_v26 }
 0x7ed   : > { %v1361_v30 = vmul.f32 %v1357_v27, %v1319_v16  ;;  %2298 = vtanh.f32 %v1368_v28 }
 0x7ee   : > { %v1362_v31 = vmul.f32 %v1358_v17, %v1332_v21  ;;  %v1320_v32 = vpop.f32.mrf.mxu2  ;;  %2300 = vtanh.f32 %v1371_v29 }
 0x7ef   : > { %v1333_v33 = vpop.f32.mrf.mxu3  ;;  %v1365_v34 = vadd.f32 %v1361_v30, %v1319_v16 }
 0x7f0   : > { %v1366_v36 = vadd.f32 %v1362_v31, %v1332_v21 }
 0x7f1   : > { %v1369_v37 = vmul.f32 0.7978846, %v1365_v34 }
 0x7f2   : > { %v1370_v39 = vmul.f32 0.7978846, %v1366_v36 }
 0x7f3   : > { %v2299_v52 = vpop.eup %2298  ;;  %2302 = vtanh.f32 %v1369_v37 }
 0x7f4   : > { %v2301_v40 = vpop.eup %2300  ;;  %v1376_v41 = vadd.f32 1.0, %v2299_v52  ;;  %2304 = vtanh.f32 %v1370_v39 }
 0x7f5   : > { %v1379_v43 = vadd.f32 1.0, %v2301_v40 }
 0x7f6   : > { %v1380_v0 = vmul.f32 %v1376_v41, %v1348_v35 }
 0x7f7   : > { %v1383_v44 = vmul.f32 %v1379_v43, %v1351_v42 }
 0x7f8   : > { %v1448_v45 = vpack.c.bf16 %v1380_v0, %v1380_v0 }
 0x7f9   : > { %v2303_v20 = vpop.eup %2302  ;;  %v1451_v46 = vpack.c.bf16 %v1383_v44, %v1383_v44 }
 0x7fa   : > { %v2305_v47 = vpop.eup %2304  ;;  %1652 = vmatmul.bf16.vlgmr.msra.gmra.mxu1 %v1448_v45  ;;  %v1377_v49 = vadd.f32 1.0, %v2303_v20 }
 0x7fb   : > { %1691 = vmatmul.bf16.vlgmr.msrb.gmra.mxu0 %v1451_v46  ;;  %v1378_v51 = vadd.f32 1.0, %v2305_v47 }
 0x7fc   : > { %v1381_v53 = vmul.f32 %v1377_v49, %v1349_v48 }
 0x7fd   : > { %v1382_v54 = vmul.f32 %v1378_v51, %v1350_v50 }
 0x7fe   : > { %v1449_v55 = vpack.c.bf16 %v1381_v53, %v1381_v53 }
 0x7ff   : > { %v1450_v58 = vpack.c.bf16 %v1382_v54, %v1382_v54 }
 0x800   : > { %1665 = vmatmul.bf16.vlgmr.msra.gmra.mxu2 %v1449_v55 }
 0x801   : > { %1678 = vmatmul.bf16.vlgmr.msra.gmra.mxu3 %v1450_v58 }
 0x877   : > { %v1653_v59 = vpop.f32.mrf.mxu1 }
 0x878   : > { %v1692_v60 = vpop.f32.mrf.mxu0 }
 0x87f   : > { %v1655_v61 = vpop.f32.mrf.mxu1 }
 0x880   : > { %v1694_v62 = vpop.f32.mrf.mxu0 }
 0x883   : > { %v1666_v63 = vpop.f32.mrf.mxu2 }
 0x884   : > { %v1667_v1 = vadd.f32 %v1666_v63, %v1653_v59  ;;  %v1679_v2 = vpop.f32.mrf.mxu3 }
 0x886   : > { %v1680_v3 = vadd.f32 %v1679_v2, %v1667_v1 }
 0x888   : > { %v1693_v4 = vadd.f32 %v1692_v60, %v1680_v3 }
 0x88a   : > { %v1696_v6 = vadd.f32 %v1693_v4, %v2649_v38 }
 0x88b   : > { %v1668_v7 = vpop.f32.mrf.mxu2 }
 0x88c   : > { %v1701_v8 = vadd.f32 %v2275_v5, %v1696_v6  ;;  %v1681_v9 = vpop.f32.mrf.mxu3 }
 0x88e   : > { %1702 = vst [vmem:[%s435_s17] sm:$0x1f] %v1701_v8 }
 0x88f PF: > { %s23_s25 = sadd.s32 1, %s2312_s25  }
 0x890   : > { %p20_p4 = scmp.ge.s32.totalorder %s23_s25, 10  }
 0x892   :  { %22 = sbr.rel (!%p20_p4) target bundleno = 1 (0x1), region = 102 }

// kernel: transmilx_forward.13
= control target key start
LH: loop header
LB: loop body
LE: loop exit
PB: predicated region body
PF: predicated region fallthrough
CT: control target
= control target key end

     0   :  { %vm23_vm0 = vcmask 1043456   ;;  %v265_v1 = vmov 4.0   ;;  %vm73_vm2 = vcmask 1041409   ;;  %vm176_vm3 = vcmask 523264   ;;  %s347_s1 = inlined_call_operand.vmem [shape: bf16[128,64], index: 1, kind: input, shape index: {}]   ;;  %s348_s0 = inlined_call_operand.vmem [shape: f32[2,4,128], index: 0, kind: input, shape index: {}]   ;;  %s349_s3 = inlined_call_operand.vmem [shape: bf16[64,2], index: 3, kind: input, shape index: {}]   ;;  %s350_s2 = inlined_call_operand.vmem [shape: f32[1,64], index: 2, kind: input, shape index: {}]   ;;  %s351_s4 = inlined_call_operand.vmem [shape: f32[1,2], index: 4, kind: input, shape index: {}]   ;;  %s352_s5 = inlined_call_operand.vmem [shape: f32[2,2], index: 5, kind: output, shape index: {}]  }
   0x1   :  { %v255_v0 = vld [vmem:[%s347_s1 + $0x38] sm:$0xff]  ;;  %263 = vrcp.f32 %v265_v1  ;;  %v254_v2 = vld [vmem:[%s347_s1 + $0x30] sm:$0xff]  ;;  %v21_v3 = vld [vmem:[%s348_s0] sm:$0xf]  ;;  %vm193_vm4 = vcmask 9216  }
   0x2   :  { %125 = vmatpush.bf16.msra.mxu0 %v255_v0  ;;  %v22_v4 = vld [vmem:[%s348_s0 + $0x4] sm:$0xf]  ;;  %v24_v5 = vsel %vm23_vm0, %v21_v3, 0.0  ;;  %v259_v6 = vld [vmem:[%s349_s3 + $0x18] sm:$0xff]  ;;  %v258_v10 = vld [vmem:[%s349_s3 + $0x10] sm:$0xff] }
   0x3   :  { %v25_v7 = vrot.slane %v24_v5, 4  ;;  %v31_v8 = vsel %vm23_vm0, %v22_v4, 0.0  ;;  %184 = vmatpush.bf16.msra.mxu1 %v259_v6  ;;  %v253_v12 = vld [vmem:[%s347_s1 + $0x28] sm:$0xff]  ;;  %v252_v19 = vld [vmem:[%s347_s1 + $0x20] sm:$0xff]  ;;  %v251_v26 = vld [vmem:[%s347_s1 + $0x18] sm:$0xff] }
   0x4   :  { %v32_v9 = vrot.slane %v31_v8, 4  ;;  %v250_v32 = vld [vmem:[%s347_s1 + $0x10] sm:$0xff]  ;;  %v249_v35 = vld [vmem:[%s347_s1 + $0x8] sm:$0xff]  ;;  %v248_v38 = vld [vmem:[%s347_s1] sm:$0xff] }
   0x5   :  { %v26_v13 = vadd.f32 %v25_v7, %v24_v5  ;;  %v257_v41 = vld [vmem:[%s349_s3 + $0x8] sm:$0xff]  ;;  %v256_v42 = vld [vmem:[%s349_s3] sm:$0xff] }
   0x6   :  { %126 = vmatpush.bf16.msra.mxu0 %v254_v2  ;;  %v33_v14 = vadd.f32 %v32_v9, %v31_v8  ;;  %v261_v43 = vld [vmem:[%s350_s2] ss:$0 sm:$0xff] }
   0x7   :  { %v264_v11 = vpop.eup %263  ;;  %v27_v16 = vrot.slane %v26_v13, 2  ;;  %185 = vmatpush.bf16.msra.mxu1 %v258_v10  ;;  %v262_v49 = vld [vmem:[%s351_s4] ss:$0 sm:$0xff] }
   0x8   :  { %v39_v15 = vmul.f32 4.0, %v264_v11  ;;  %v34_v17 = vrot.slane %v33_v14, 2  ;;  %vm43_vm1 = vweird.f32 %v264_v11 }
   0x9   :  { %v28_v20 = vadd.f32 %v27_v16, %v26_v13 }
   0xa   :  { %v40_v18 = vsub.f32 1.0, %v39_v15  ;;  %127 = vmatpush.bf16.msra.mxu0 %v253_v12  ;;  %v35_v21 = vadd.f32 %v34_v17, %v33_v14 }
   0xb   :  { %v29_v23 = vrot.slane %v28_v20, 1  ;;  %186 = vmatpush.bf16.msra.mxu1 %v257_v41 }
   0xc   :  { %v41_v22 = vmul.f32 %v264_v11, %v40_v18  ;;  %v36_v24 = vrot.slane %v35_v21, 1 }
   0xd   :  { %v30_v27 = vadd.f32 %v29_v23, %v28_v20 }
   0xe   :  { %v42_v25 = vadd.f32 %v264_v11, %v41_v22  ;;  %128 = vmatpush.bf16.msra.mxu0 %v252_v19  ;;  %v37_v28 = vadd.f32 %v36_v24, %v35_v21 }
   0xf   :  { %187 = vmatpush.bf16.msra.mxu1 %v256_v42 }
  0x10   :  { %v44_v29 = vsel %vm43_vm1, %v264_v11, %v42_v25 }
  0x11   :  { %v45_v30 = vmul.f32 %v44_v29, %v30_v27  ;;  %v46_v31 = vmul.f32 %v44_v29, %v37_v28 }
  0x12   :  { %129 = vmatpush.bf16.msra.mxu0 %v251_v26 }
  0x13   :  { %v63_v33 = vpack.c.bf16 %v45_v30, %v45_v30  ;;  %v64_v34 = vpack.c.bf16 %v46_v31, %v46_v31 }
  0x15   :  { %v71_v36 = vunpack.c.l.b16 %v63_v33  ;;  %v72_v37 = vunpack.c.l.b16 %v64_v34 }
  0x16   :  { %130 = vmatpush.bf16.msra.mxu0 %v250_v32 }
  0x17   :  { %v74_v39 = vsel %vm73_vm2, %v72_v37, %v71_v36 }
  0x18   :  { %v75_v40 = vpack.c.b16 %v74_v39, %v74_v39 }
  0x1a   :  { %131 = vmatpush.bf16.msra.mxu0 %v249_v35 }
  0x1e   :  { %132 = vmatpush.bf16.msra.mxu0 %v248_v38 }
  0x21   :  { %133 = vmatmul.bf16.vlgmr.msra.gmra.mxu0 %v75_v40 }
  0x9e   :  { %v134_v44 = vpop.f32.mrf.mxu0 }
  0x9f   :  { %v135_v45 = vadd.f32 %v261_v43, %v134_v44 }
  0xa1   :  { %v138_v46 = vmax.f32 %v135_v45, 0.0 }
  0xa3   :  { %v147_v47 = vpack.c.bf16 %v138_v46, %v138_v46 }
  0xa5   :  { %247 = vmatmul.msk.bf16.vlgmr.msra.gmra.mxu1 %vm176_vm3, %v147_v47 }
  0xa6   :  { %v136_v48 = vpop.f32.mrf.mxu0 }
 0x122   :  { %v189_v50 = vpop.f32.mrf.mxu1 }
 0x123   :  { %v190_v51 = vadd.f32 %v262_v49, %v189_v50 }
 0x125   :  { %194 = vst.msk [vmem:[%s352_s5] sm:$0x3] %vm193_vm4, %v190_v51 }
 0x12a   :  { %v191_v52 = vpop.f32.mrf.mxu1 }

// kernel: transmilx_forward.11
= control target key start
LH: loop header
LB: loop body
LE: loop exit
PB: predicated region body
PF: predicated region fallthrough
CT: control target
= control target key end

     0   :  { %19 = vsyncpa [#allocation3], 0  ;;  %s3568_s0 = inlined_call_operand.vmem [shape: f32[2,4,128], index: 0, kind: input, shape index: {}]   ;;  %s3569_s1 = inlined_call_operand.vmem [shape: f32[4,128], index: 1, kind: input, shape index: {}]   ;;  %s3570_s2 = inlined_call_operand.vmem [shape: f32[1,128], index: 2, kind: input, shape index: {}]   ;;  %s3571_s3 = inlined_call_operand.vmem [shape: f32[1,128], index: 3, kind: input, shape index: {}]   ;;  %s3572_s4 = inlined_call_operand.vmem [shape: bf16[128,384], index: 4, kind: input, shape index: {}]   ;;  %s3573_s5 = inlined_call_operand.vmem [shape: f32[1,384], index: 5, kind: input, shape index: {}]   ;;  %s3574_s6 = inlined_call_operand.vmem [shape: bf16[128,128], index: 6, kind: input, shape index: {}]   ;;  %s3575_s7 = inlined_call_operand.vmem [shape: f32[1,128], index: 7, kind: input, shape index: {}]   ;;  %s3576_s8 = inlined_call_operand.vmem [shape: f32[1,128], index: 8, kind: input, shape index: {}]   ;;  %s3577_s9 = inlined_call_operand.hbm [shape: f32[1,128], index: 9, kind: input, shape index: {}]   ;;  %s3578_s10 = inlined_call_operand.vmem [shape: bf16[128,512], index: 10, kind: input, shape index: {}]   ;;  %s3579_s11 = inlined_call_operand.vmem [shape: f32[1,512], index: 11, kind: input, shape index: {}]   ;;  %s3580_s12 = inlined_call_operand.vmem [shape: bf16[512,128], index: 12, kind: input, shape index: {}]   ;;  %s3581_s13 = inlined_call_operand.hbm [shape: f32[1,128], index: 13, kind: input, shape index: {}]   ;;  %s3582_s14 = inlined_call_operand.vmem [shape: f32[2,4,128], index: 14, kind: output, shape index: {}]  }
   0x1   :  { %20 = vsyncpa [#allocation5], 0  ;;  %s2900_s29 = smov 0  }
   0x2 LB: > { %s392_s16 = sshll.u32 %s3577_s9, 4  ;;  %s2909_s17 = sadd.s32 4294967295, %s2813_s29   ;;  %s2813_s29 = sphi %s2900_s29, %s26_s29   ;;  %s393_s16 = int_to_ptr.hbm [resolvable:$true] %s392_s16 }
   0x3   : > { %p2135_p0 = scmp.ge.s32.totalorder %s2813_s29, 1  ;;  %p356_p1 = scmp.lt.s32.totalorder %s2813_s29, 3 }
   0x4   : > { %p2665_p2 = scmp.eq.s32.totalorder %s2909_s17, 0  ;;  %s2815_s19 = smov [#allocation2]  }
   0x5   : > { %p2914_p3 = pnand %p2135_p0, %p356_p1  ;;  %s394_s20 = sshll.u32 %s2815_s19, 4  ;;  %s395_s20 = int_to_ptr.vmem [resolvable:$true] %s394_s20 }
   0x6   : > { %s413_s23 = sshll.u32 %s3581_s13, 4  ;;  %s2816_s24 = smov [#allocation4]   ;;  %s414_s23 = int_to_ptr.hbm [resolvable:$true] %s413_s23 }
   0x7   : > { %p2658_p4 = pneg %p2914_p3  ;;  %s415_s25 = sshll.u32 %s2816_s24, 4  ;;  %s416_s25 = int_to_ptr.vmem [resolvable:$true] %s415_s25 }
   0x8   : > { %435 = sbr.rel (%p2914_p3) target bundleno = 3303 (0xce7), region = 76 }
   0x9   : > { %p2659_p5 = pnand %p2665_p2, %p2658_p4 }
   0xb   : > { %2661 = dma.hbm_to_vmem [thread:$0]  (!%p2659_p5), %s393_s16, 16, %s395_s20, [#allocation3]  }
   0xc   : > { %2664 = dma.hbm_to_vmem [thread:$0]  (!%p2659_p5), %s414_s23, 16, %s416_s25, [#allocation5]  }
   0xd   : > { %2804 = dma.done.wait (%p2665_p2), [#allocation3], 16  }
   0xe   : > { %2806 = vsyncadd (%p2665_p2), [#allocation3], 4294967280 }
   0xf   : > { %2808 = dma.done.wait (%p2665_p2), [#allocation5], 16  }
  0x10   : > { %2810 = vsyncadd (%p2665_p2), [#allocation5], 4294967280  ;;  %v2230_v0 = vld [vmem:[%s3572_s4 + $0xa8] sm:$0xf]  ;;  %v2576_v1 = vld [vmem:[%s3572_s4 + $0xb0] sm:$0xf0] }
  0x11   : > { %v2575_v2 = vld [vmem:[%s3572_s4 + $0xac] sm:$0xf]  ;;  %v2231_v3 = vor.u32 %v2576_v1, %v2230_v0  ;;  %v2232_v4 = vld [vmem:[%s3572_s4 + $0xb4] sm:$0xf0]  ;;  %v2218_v5 = vld [vmem:[%s3572_s4 + $0x90] sm:$0xf] }
  0x12   : > { %v2573_v6 = vld [vmem:[%s3572_s4 + $0x98] sm:$0xf0]  ;;  %v2235_v7 = vor.u32 %v2575_v2, %v2232_v4  ;;  %v2572_v8 = vld [vmem:[%s3572_s4 + $0x94] sm:$0xf]  ;;  %v2220_v9 = vld [vmem:[%s3572_s4 + $0x9c] sm:$0xf0] }
  0x13   : > { %683 = vmatpush.bf16.msra.mxu0 %v2231_v3  ;;  %v2219_v10 = vor.u32 %v2573_v6, %v2218_v5  ;;  %v2223_v11 = vor.u32 %v2572_v8, %v2220_v9  ;;  %v2206_v12 = vld [vmem:[%s3572_s4 + $0x78] sm:$0xf]  ;;  %v2570_v13 = vld [vmem:[%s3572_s4 + $0x80] sm:$0xf0]  ;;  %v2569_v14 = vld [vmem:[%s3572_s4 + $0x7c] sm:$0xf] }
  0x14   : > { %696 = vmatpush.bf16.msra.mxu1 %v2235_v7  ;;  %v2208_v15 = vld [vmem:[%s3572_s4 + $0x84] sm:$0xf0]  ;;  %p485_p6 = scmp.lt.s32.totalorder %s2909_s17, 1  ;;  %v2207_v16 = vor.u32 %v2570_v13, %v2206_v12  ;;  %v2194_v18 = vld [vmem:[%s3572_s4 + $0x60] sm:$0xf]  ;;  %vm724_vm0 = vcmask 130048  }
  0x15   : > { %v2211_v17 = vor.u32 %v2569_v14, %v2208_v15  ;;  %v2567_v19 = vld [vmem:[%s3572_s4 + $0x68] sm:$0xf0]  ;;  %v2566_v20 = vld [vmem:[%s3572_s4 + $0x64] sm:$0xf]  ;;  %v2196_v21 = vld [vmem:[%s3572_s4 + $0x6c] sm:$0xf0] }
  0x16   : > { %s3585_s17 = smov (!%p485_p6, %s2909_s17), 1  ;;  %v2195_v22 = vor.u32 %v2567_v19, %v2194_v18  ;;  %v2182_v23 = vld [vmem:[%s3572_s4 + $0x48] sm:$0xf]  ;;  %v2238_v24 = vld [vmem:[%s3572_s4 + $0xb0] sm:$0xf]  ;;  %v2199_v26 = vor.u32 %v2566_v20, %v2196_v21  ;;  %s2817_s23 = smov 80  }
  0x17   : > { %684 = vmatpush.bf16.msra.mxu0 %v2219_v10  ;;  %v2577_v25 = vld [vmem:[%s3572_s4 + $0xb8] sm:$0xf0]  ;;  %v2564_v27 = vld [vmem:[%s3572_s4 + $0x50] sm:$0xf0]  ;;  %v2226_v29 = vld [vmem:[%s3572_s4 + $0x98] sm:$0xf] }
  0x18   : > { %697 = vmatpush.bf16.msra.mxu1 %v2223_v11  ;;  %v2239_v28 = vor.u32 %v2577_v25, %v2238_v24  ;;  %v2574_v30 = vld [vmem:[%s3572_s4 + $0xa0] sm:$0xf0]  ;;  %v2563_v31 = vld [vmem:[%s3572_s4 + $0x4c] sm:$0xf]  ;;  %v2184_v32 = vld [vmem:[%s3572_s4 + $0x54] sm:$0xf0]  ;;  %v2183_v34 = vor.u32 %v2564_v27, %v2182_v23 }
  0x19   : > { %v2227_v33 = vor.u32 %v2574_v30, %v2226_v29  ;;  %s2142_s18 = sshll.u32 %s3585_s17, 2  ;;  %v2214_v35 = vld [vmem:[%s3572_s4 + $0x80] sm:$0xf]  ;;  %v2571_v36 = vld [vmem:[%s3572_s4 + $0x88] sm:$0xf0]  ;;  %v2187_v37 = vor.u32 %v2563_v31, %v2184_v32  ;;  %s2818_s24 = smov 112  }
  0x1a   : > { %709 = vmatpush.bf16.msra.mxu2 %v2239_v28  ;;  %v2170_v38 = vld [vmem:[%s3572_s4 + $0x30] sm:$0xf]  ;;  %v2561_v39 = vld [vmem:[%s3572_s4 + $0x38] sm:$0xf0]  ;;  %v2560_v40 = vld [vmem:[%s3572_s4 + $0x34] sm:$0xf]  ;;  %v2215_v42 = vor.u32 %v2571_v36, %v2214_v35  ;;  %s488_s20 = scalar_lea.vmem %s3568_s0, %s2142_s18 }
  0x1b   : > { %685 = vmatpush.bf16.msra.mxu0 %v2207_v16  ;;  %v2172_v41 = vld [vmem:[%s3572_s4 + $0x3c] sm:$0xf0]  ;;  %v2171_v43 = vor.u32 %v2561_v39, %v2170_v38  ;;  %v2202_v44 = vld [vmem:[%s3572_s4 + $0x68] sm:$0xf]  ;;  %v2568_v45 = vld [vmem:[%s3572_s4 + $0x70] sm:$0xf0] }
  0x1c   : > { %698 = vmatpush.bf16.msra.mxu1 %v2211_v17  ;;  %v2175_v46 = vor.u32 %v2560_v40, %v2172_v41  ;;  %v2158_v47 = vld [vmem:[%s3572_s4 + $0x18] sm:$0xf]  ;;  %v2558_v48 = vld [vmem:[%s3572_s4 + $0x20] sm:$0xf0]  ;;  %v2557_v49 = vld [vmem:[%s3572_s4 + $0x1c] sm:$0xf]  ;;  %v2203_v52 = vor.u32 %v2568_v45, %v2202_v44 }
  0x1d   : > { %v2160_v50 = vld [vmem:[%s3572_s4 + $0x24] sm:$0xf0]  ;;  %v494_v51 = vld [vmem:[%s488_s20] sm:$0xf]  ;;  %v2159_v53 = vor.u32 %v2558_v48, %v2158_v47  ;;  %v2190_v55 = vld [vmem:[%s3572_s4 + $0x50] sm:$0xf] }
  0x1e   : > { %710 = vmatpush.bf16.msra.mxu2 %v2227_v33  ;;  %v495_v54 = vld [vmem:[%s3569_s1] sm:$0xf]  ;;  %v2565_v56 = vld [vmem:[%s3572_s4 + $0x58] sm:$0xf0]  ;;  %v2163_v57 = vor.u32 %v2557_v49, %v2160_v50  ;;  %v2555_v59 = vld [vmem:[%s3572_s4 + $0x8] sm:$0xf0] }
  0x1f   : > { %686 = vmatpush.bf16.msra.mxu0 %v2195_v22  ;;  %v2146_v58 = vld [vmem:[%s3572_s4] sm:$0xf]  ;;  %v2554_v60 = vld [vmem:[%s3572_s4 + $0x4] sm:$0xf]  ;;  %v2148_v61 = vld [vmem:[%s3572_s4 + $0xc] sm:$0xf0]  ;;  %v3074_v62 = vadd.f32 %v495_v54, %v494_v51  ;;  %v2191_v63 = vor.u32 %v2565_v56, %v2190_v55 }
  0x20   : > { %699 = vmatpush.bf16.msra.mxu1 %v2199_v26  ;;  %v2147_v0 = vor.u32 %v2555_v59, %v2146_v58  ;;  %v2178_v1 = vld [vmem:[%s3572_s4 + $0x38] sm:$0xf]  ;;  %v2562_v2 = vld [vmem:[%s3572_s4 + $0x40] sm:$0xf0]  ;;  %v2151_v3 = vor.u32 %v2554_v60, %v2148_v61  ;;  %v2166_v6 = vld [vmem:[%s3572_s4 + $0x20] sm:$0xf] }
  0x21   : > { %v547_v4 = vpack.c.bf16 %v3074_v62, %v3074_v62  ;;  %v2179_v5 = vor.u32 %v2562_v2, %v2178_v1  ;;  %v2559_v7 = vld [vmem:[%s3572_s4 + $0x28] sm:$0xf0]  ;;  %v2154_v9 = vld [vmem:[%s3572_s4 + $0x8] sm:$0xf]  ;;  %v2556_v10 = vld [vmem:[%s3572_s4 + $0x10] sm:$0xf0] }
  0x22   : > { %711 = vmatpush.bf16.msra.mxu2 %v2215_v42  ;;  %v2167_v8 = vor.u32 %v2559_v7, %v2166_v6  ;;  %v2155_v11 = vor.u32 %v2556_v10, %v2154_v9  ;;  %v529_v12 = vld [vmem:[%s3573_s5] sm:$0x7]  ;;  %s2819_s25 = smov 96   ;;  %vm763_vm1 = vcmask 1041408   ;;  %vm745_vm2 = vcmask 27648   ;;  %s2820_s20 = smov 64  }
  0x23   : > { %687 = vmatpush.bf16.msra.mxu0 %v2183_v34  ;;  %v550_v13 = vperm.slane %v529_v12, 1  ;;  %v549_v16 = vperm.slane %v529_v12, 0  ;;  %v2578_v24 = vld [vmem:[%s3574_s6] sm:$0xff]  ;;  %v551_v26 = vperm.slane %v529_v12, 2  ;;  %vm759_vm3 = vcmask 31744   ;;  %s2821_s28 = smov 48  }
  0x24   : > { %700 = vmatpush.bf16.msra.mxu1 %v2187_v37  ;;  %s2823_s26 = smov 16   ;;  %vm1379_vm4 = vcmask 1043456  }
  0x26   : > { %712 = vmatpush.bf16.msra.mxu2 %v2203_v52 }
  0x27   : > { %688 = vmatpush.bf16.msra.mxu0 %v2171_v43 }
  0x28   : > { %701 = vmatpush.bf16.msra.mxu1 %v2175_v46 }
  0x2a   : > { %713 = vmatpush.bf16.msra.mxu2 %v2191_v63 }
  0x2b   : > { %689 = vmatpush.bf16.msra.mxu0 %v2159_v53 }
  0x2c   : > { %702 = vmatpush.bf16.msra.mxu1 %v2163_v57 }
  0x2e   : > { %714 = vmatpush.bf16.msra.mxu2 %v2179_v5 }
  0x2f   : > { %690 = vmatpush.bf16.msra.mxu0 %v2147_v0 }
  0x30   : > { %703 = vmatpush.bf16.msra.mxu1 %v2151_v3 }
  0x32   : > { %691 = vmatmul.bf16.vlgmr.msra.gmra.mxu0 %v547_v4  ;;  %715 = vmatpush.bf16.msra.mxu2 %v2167_v8 }
  0x33   : > { %704 = vmatmul.bf16.vlgmr.msra.gmra.mxu1 %v547_v4 }
  0x36   : > { %716 = vmatpush.bf16.msra.mxu2 %v2155_v11 }
  0x39   : > { %717 = vmatmul.bf16.vlgmr.msra.gmra.mxu2 %v547_v4 }
  0x3a   : > { %880 = vmatpush.bf16.msrb.mxu2 %v2578_v24 }
  0xaf   : > { %v692_v14 = vpop.f32.mrf.mxu0 }
  0xb0   : > { %v705_v15 = vpop.f32.mrf.mxu1  ;;  %v693_v19 = vadd.f32 %v692_v14, %v549_v16 }
  0xb1   : > { %v706_v17 = vadd.f32 %v705_v15, %v550_v13 }
  0xb2   : > { %v3107_v23 = vpack.c.bf16 %v693_v19, %v693_v19 }
  0xb3   : > { %v3099_v18 = vpack.c.bf16 %v706_v17, %v706_v17 }
  0xb5   : > { %969 = vrot.lane.b32.xlu2 %v3099_v18, %s2817_s23  ;;  %785 = vrot.lane.b32.xlu1 %v3099_v18, %s2818_s24  ;;  %v729_v20 = vsel %vm724_vm0, %v3099_v18, 0 }
  0xb6   : > { %738 = vmatpush.bf16.xpose.msra.mxu3 %v729_v20 }
  0xb7   : > { %v694_v21 = vpop.f32.mrf.mxu0 }
  0xb8   : > { %v707_v22 = vpop.f32.mrf.mxu1 }
  0xbc   : > { %v718_v25 = vpop.f32.mrf.mxu2 }
  0xbd   : > { %888 = vrot.lane.b32.xlu2 %v3099_v18, %s2819_s25  ;;  %782 = vrot.lane.b32.xlu1 %v3107_v23, %s2818_s24  ;;  %v719_v27 = vadd.f32 %v718_v25, %v551_v26 }
  0xbe   : > { %2240 = vmatmul.msk.bf16.vlgmr.msra.gmra.mxu3 %vm724_vm0, %v3107_v23 }
  0xbf   : > { %v3120_v29 = vpack.c.bf16 %v719_v27, %v719_v27 }
  0xc1   : > { %v765_v30 = vsel %vm763_vm1, %v3120_v29, 0 }
  0xc2   : > { %774 = vmatpush.bf16.msrb.mxu3 %v765_v30 }
  0xc4   : > { %v720_v28 = vpop.f32.mrf.mxu2 }
  0xc5   : > { %886 = vrot.lane.b32.xlu1 %v3107_v23, %s2819_s25 }
 0x10f   : > { %v970_v31 = vpop.permute.xlu2 %969 }
 0x110   : > { %v975_v32 = vsel %vm724_vm0, %v970_v31, 0 }
 0x111   : > { %984 = vmatpush.bf16.xpose.msra.mxu2 %v975_v32 }
 0x117   : > { %v889_v47 = vpop.permute.xlu2 %888 }
 0x118   : > { %v894_v49 = vsel %vm724_vm0, %v889_v47, 0  ;;  %v2581_v47 = vld [vmem:[%s3574_s6 + $0x18] sm:$0xff] }
 0x127   : > { %v786_v33 = vpop.permute.xlu1 %785 }
 0x128   : > { %v791_v34 = vsel %vm724_vm0, %v786_v33, 0  ;;  %v2579_v33 = vld [vmem:[%s3574_s6 + $0x8] sm:$0xff] }
 0x129   : > { %800 = vmatpush.bf16.xpose.msra.mxu3 %v791_v34  ;;  %858 = vmatpush.bf16.msrb.mxu1 %v2579_v33  ;;  %v2580_v34 = vld [vmem:[%s3574_s6 + $0x10] sm:$0xff]  ;;  %v2583_v33 = vld [vmem:[%s3574_s6 + $0x28] sm:$0xff] }
 0x12d   : > { %960 = vmatpush.bf16.msra.mxu1 %v2580_v34 }
 0x12f   : > { %v783_v50 = vpop.permute.xlu1 %782 }
 0x137   : > { %v887_v51 = vpop.permute.xlu1 %886 }
 0x141   : > { %v740_v35 = vpop.f32.mrf.mxu3 }
 0x142   : > { %v744_v36 = vmul.f32 0.25, %v740_v35 }
 0x144   : > { %v746_v37 = vsel %vm745_vm2, %v744_v36, -inf }
 0x145   : > { %747 = vmax.xlane.f32.xlu0 %v746_v37 }
 0x149   : > { %v742_v38 = vpop.f32.mrf.mxu3 }
 0x1b8   : > { %v748_v39 = vpop.xlane.xlu0 %747 }
 0x1b9   : > { %v749_v40 = vsub.f32 %v744_v36, %v748_v39 }
 0x1bb   : > { %v750_v41 = vmul.f32 1.442695, %v749_v40 }
 0x1bd   : > { %2693 = vpow2.f32 %v750_v41 }
 0x1c3   : > { %v2694_v42 = vpop.eup %2693 }
 0x1c4   : > { %v752_v43 = vsel %vm745_vm2, %v2694_v42, 0.0 }
 0x1c5   : > { %753 = vadd.xlane.f32.xlu0 %v752_v43 }
 0x1d9   : > { %967 = vrot.lane.b32.xlu0 %v3107_v23, %s2817_s23 }
 0x238   : > { %v754_v44 = vpop.xlane.xlu0 %753 }
 0x239   : > { %2695 = vrcp.f32 %v754_v44 }
 0x23f   : > { %v2696_v45 = vpop.eup %2695 }
 0x240   : > { %v756_v46 = vmul.f32 %v2696_v45, %v2694_v42 }
 0x242   : > { %v757_v48 = vpack.c.bf16 %v756_v46, %v756_v46 }
 0x244   : > { %2241 = vmatmul.msk.bf16.vlgmr.msrb.gmra.mxu3 %vm759_vm3, %v757_v48 }
 0x245   : > { %903 = vmatpush.bf16.xpose.msrb.mxu3 %v894_v49 }
 0x24b   : > { %v968_v57 = vpop.permute.xlu0 %967 }
 0x254   : > { %2242 = vmatmul.msk.bf16.vlgmr.msra.gmra.mxu3 %vm724_vm0, %v783_v50 }
 0x264   : > { %2254 = vmatmul.msk.bf16.vlgmr.msrb.gmra.mxu3 %vm724_vm0, %v887_v51 }
 0x2c7   : > { %v776_v52 = vpop.f32.mrf.mxu3 }
 0x2c8   : > { %v780_v53 = vpack.c.bf16 %v776_v52, %v776_v52 }
 0x2ca   : > { %2253 = vmatmul.msk.bf16.vlgmr.msrb.gmra.mxu2 %vm724_vm0, %v780_v53 }
 0x2cf   : > { %v778_v54 = vpop.f32.mrf.mxu3 }
 0x2d7   : > { %v802_v55 = vpop.f32.mrf.mxu3 }
 0x2d8   : > { %v806_v56 = vmul.f32 0.25, %v802_v55 }
 0x2da   : > { %2261 = vmatmul.msk.bf16.vlgmr.msra.gmra.mxu2 %vm724_vm0, %v968_v57  ;;  %v807_v58 = vsel %vm745_vm2, %v806_v56, -inf }
 0x2db   : > { %808 = vmax.xlane.f32.xlu2 %v807_v58 }
 0x2df   : > { %v804_v59 = vpop.f32.mrf.mxu3 }
 0x2e7   : > { %v905_v60 = vpop.f32.mrf.mxu3 }
 0x2e8   : > { %v909_v61 = vmul.f32 0.25, %v905_v60 }
 0x2ea   : > { %v910_v63 = vsel %vm745_vm2, %v909_v61, -inf }
 0x2eb   : > { %911 = vmax.xlane.f32.xlu0 %v910_v63 }
 0x2ef   : > { %v907_v0 = vpop.f32.mrf.mxu3 }
 0x2ff   : > { %1003 = vrot.lane.b32.xlu0 %v3120_v29, %s2817_s23  ;;  %s2822_s23 = smov 32  }
 0x307   : > { %1048 = vrot.lane.b32.xlu0 %v3107_v23, %s2820_s20 }
 0x34d   : > { %v3142_v1 = vpop.f32.mrf.mxu2 }
 0x34e   : > { %v809_v2 = vpop.xlane.xlu2 %808 }
 0x34f   : > { %v810_v3 = vsub.f32 %v806_v56, %v809_v2 }
 0x351   : > { %v811_v4 = vmul.f32 1.442695, %v810_v3 }
 0x353   : > { %2697 = vpow2.f32 %v811_v4 }
 0x355   : > { %v884_v5 = vpop.f32.mrf.mxu2 }
 0x359   : > { %v2698_v6 = vpop.eup %2697 }
 0x35a   : > { %v813_v7 = vsel %vm745_vm2, %v2698_v6, 0.0 }
 0x35b   : > { %814 = vadd.xlane.f32.xlu2 %v813_v7 }
 0x35d   : > { %v986_v8 = vpop.f32.mrf.mxu2 }
 0x35e   : > { %v990_v9 = vmul.f32 0.25, %v986_v8  ;;  %v912_v10 = vpop.xlane.xlu0 %911 }
 0x35f   : > { %v913_v11 = vsub.f32 %v909_v61, %v912_v10 }
 0x360   : > { %v991_v12 = vsel %vm745_vm2, %v990_v9, -inf }
 0x361   : > { %v914_v13 = vmul.f32 1.442695, %v913_v11  ;;  %992 = vmax.xlane.f32.xlu1 %v991_v12 }
 0x363   : > { %2699 = vpow2.f32 %v914_v13 }
 0x365   : > { %v988_v14 = vpop.f32.mrf.mxu2 }
 0x369   : > { %v2700_v15 = vpop.eup %2699 }
 0x36a   : > { %v916_v16 = vsel %vm745_vm2, %v2700_v15, 0.0 }
 0x36b   : > { %917 = vadd.xlane.f32.xlu1 %v916_v16  ;;  %v2582_v16 = vld [vmem:[%s3574_s6 + $0x20] sm:$0xff] }
 0x371   : > { %v1004_v17 = vpop.permute.xlu0 %1003 }
 0x372   : > { %v1009_v19 = vsel %vm763_vm1, %v1004_v17, 0 }
 0x373   : > { %820 = vrot.lane.b32.xlu2 %v3120_v29, %s2818_s24  ;;  %1018 = vmatpush.bf16.msra.mxu3 %v1009_v19 }
 0x377   : > { %1122 = vmatpush.bf16.msrb.mxu3 %v2582_v16 }
 0x379   : > { %v1049_v63 = vpop.permute.xlu0 %1048 }
 0x37b   : > { %1050 = vrot.lane.b32.xlu2 %v3099_v18, %s2820_s20 }
 0x383   : > { %1131 = vrot.lane.b32.xlu2 %v3099_v18, %s2821_s28 }
 0x38b   : > { %1129 = vrot.lane.b32.xlu2 %v3107_v23, %s2821_s28 }
 0x3ce   : > { %v815_v20 = vpop.xlane.xlu2 %814 }
 0x3cf   : > { %2701 = vrcp.f32 %v815_v20 }
 0x3d4   : > { %v993_v21 = vpop.xlane.xlu1 %992 }
 0x3d5   : > { %v2702_v22 = vpop.eup %2701  ;;  %v994_v24 = vsub.f32 %v990_v9, %v993_v21 }
 0x3d6   : > { %v817_v25 = vmul.f32 %v2702_v22, %v2698_v6  ;;  %v821_v26 = vpop.permute.xlu2 %820 }
 0x3d7   : > { %v995_v27 = vmul.f32 1.442695, %v994_v24  ;;  %v826_v28 = vsel %vm763_vm1, %v821_v26, 0 }
 0x3d8   : > { %835 = vmatpush.bf16.msrb.mxu0 %v826_v28  ;;  %v818_v30 = vpack.c.bf16 %v817_v25, %v817_v25 }
 0x3d9   : > { %2703 = vpow2.f32 %v995_v27 }
 0x3db   : > { %2243 = vmatmul.msk.bf16.vlgmr.msrb.gmra.mxu0 %vm759_vm3, %v818_v30 }
 0x3de   : > { %v918_v35 = vpop.xlane.xlu1 %917  ;;  %v1051_v37 = vpop.permute.xlu2 %1050 }
 0x3df   : > { %v2704_v31 = vpop.eup %2703  ;;  %v1056_v41 = vsel %vm724_vm0, %v1051_v37, 0 }
 0x3e0   : > { %v997_v32 = vsel %vm745_vm2, %v2704_v31, 0.0 }
 0x3e1   : > { %998 = vadd.xlane.f32.xlu1 %v997_v32 }
 0x3e6   : > { %v1132_v50 = vpop.permute.xlu2 %1131 }
 0x3e7   : > { %v1137_v52 = vsel %vm724_vm0, %v1132_v50, 0 }
 0x3ee   : > { %v1130_v60 = vpop.permute.xlu2 %1129 }
 0x3fa   : > { %922 = vrot.lane.b32.xlu1 %v3120_v29, %s2819_s25 }
 0x454   : > { %v999_v36 = vpop.xlane.xlu1 %998 }
 0x455   : > { %2705 = vrcp.f32 %v999_v36 }
 0x456   : > { %2707 = vrcp.f32 %v918_v35 }
 0x458   : > { %v837_v38 = vpop.f32.mrf.mxu0 }
 0x459   : > { %v841_v39 = vpack.c.bf16 %v837_v38, %v837_v38 }
 0x45b   : > { %v2706_v40 = vpop.eup %2705  ;;  %2248 = vmatmul.msk.bf16.vlgmr.msrb.gmra.mxu1 %vm724_vm0, %v841_v39 }
 0x45c   : > { %v1001_v42 = vmul.f32 %v2706_v40, %v2704_v31  ;;  %1065 = vmatpush.bf16.xpose.msrb.mxu1 %v1056_v41  ;;  %v2708_v45 = vpop.eup %2707 }
 0x45d   : > { %v920_v46 = vmul.f32 %v2708_v45, %v2700_v15 }
 0x45e   : > { %v1002_v43 = vpack.c.bf16 %v1001_v42, %v1001_v42 }
 0x45f   : > { %v921_v51 = vpack.c.bf16 %v920_v46, %v920_v46 }
 0x460   : > { %v839_v44 = vpop.f32.mrf.mxu0  ;;  %2262 = vmatmul.msk.bf16.vlgmr.msra.gmra.mxu3 %vm759_vm3, %v1002_v43 }
 0x46c   : > { %v923_v48 = vpop.permute.xlu1 %922 }
 0x46d   : > { %v928_v49 = vsel %vm763_vm1, %v923_v48, 0 }
 0x46e   : > { %937 = vmatpush.bf16.msra.mxu0 %v928_v49 }
 0x471   : > { %2255 = vmatmul.msk.bf16.vlgmr.msra.gmra.mxu0 %vm759_vm3, %v921_v51 }
 0x472   : > { %1041 = vmatpush.bf16.msrb.mxu0 %v2581_v47 }
 0x476   : > { %1146 = vmatpush.bf16.xpose.msra.mxu0 %v1137_v52 }
 0x4d8   : > { %v860_v53 = vpop.f32.mrf.mxu1 }
 0x4d9   : > { %v883_v3 = vadd.f32 %v3142_v1, %v860_v53 }
 0x4e0   : > { %v862_v54 = vpop.f32.mrf.mxu1 }
 0x4e3   : > { %v1020_v55 = vpop.f32.mrf.mxu3 }
 0x4e4   : > { %v1024_v56 = vpack.c.bf16 %v1020_v55, %v1020_v55 }
 0x4e6   : > { %2267 = vmatmul.msk.bf16.vlgmr.msrb.gmra.mxu0 %vm724_vm0, %v1024_v56 }
 0x4eb   : > { %v1022_v57 = vpop.f32.mrf.mxu3 }
 0x4ee   : > { %v939_v58 = vpop.f32.mrf.mxu0 }
 0x4ef   : > { %v943_v59 = vpack.c.bf16 %v939_v58, %v939_v58 }
 0x4f1   : > { %2260 = vmatmul.msk.bf16.vlgmr.msra.gmra.mxu1 %vm724_vm0, %v943_v59 }
 0x4f6   : > { %v941_v61 = vpop.f32.mrf.mxu0  ;;  %2275 = vmatmul.msk.bf16.vlgmr.msra.gmra.mxu0 %vm724_vm0, %v1130_v60 }
 0x501   : > { %2268 = vmatmul.msk.bf16.vlgmr.msrb.gmra.mxu1 %vm724_vm0, %v1049_v63 }
 0x563   : > { %v1043_v0 = vpop.f32.mrf.mxu0 }
 0x56b   : > { %v1045_v2 = vpop.f32.mrf.mxu0 }
 0x56e   : > { %v962_v4 = vpop.f32.mrf.mxu1 }
 0x56f   : > { %v966_v5 = vadd.f32 %v962_v4, %v883_v3 }
 0x571   : > { %v3181_v6 = vadd.f32 %v1043_v0, %v966_v5 }
 0x573   : > { %v1148_v7 = vpop.f32.mrf.mxu0 }
 0x574   : > { %v1152_v8 = vmul.f32 0.25, %v1148_v7 }
 0x576   : > { %v964_v9 = vpop.f32.mrf.mxu1  ;;  %v1153_v10 = vsel %vm745_vm2, %v1152_v8, -inf }
 0x577   : > { %1154 = vmax.xlane.f32.xlu1 %v1153_v10 }
 0x57b   : > { %v1150_v11 = vpop.f32.mrf.mxu0 }
 0x57e   : > { %v1067_v12 = vpop.f32.mrf.mxu1 }
 0x57f   : > { %v1071_v13 = vmul.f32 0.25, %v1067_v12 }
 0x581   : > { %v1072_v14 = vsel %vm745_vm2, %v1071_v13, -inf }
 0x582   : > { %1073 = vmax.xlane.f32.xlu0 %v1072_v14 }
 0x586   : > { %v1069_v15 = vpop.f32.mrf.mxu1 }
 0x590   : > { %1084 = vrot.lane.b32.xlu1 %v3120_v29, %s2820_s20 }
 0x598   : > { %1212 = vrot.lane.b32.xlu1 %v3099_v18, %s2822_s23 }
 0x5ea   : > { %v1155_v1 = vpop.xlane.xlu1 %1154 }
 0x5eb   : > { %v1156_v17 = vsub.f32 %v1152_v8, %v1155_v1 }
 0x5ed   : > { %v1157_v19 = vmul.f32 1.442695, %v1156_v17 }
 0x5ef   : > { %2709 = vpow2.f32 %v1157_v19 }
 0x5f5   : > { %v2710_v20 = vpop.eup %2709  ;;  %v1074_v21 = vpop.xlane.xlu0 %1073 }
 0x5f6   : > { %v1075_v22 = vsub.f32 %v1071_v13, %v1074_v21  ;;  %v1159_v24 = vsel %vm745_vm2, %v2710_v20, 0.0 }
 0x5f7   : > { %1160 = vadd.xlane.f32.xlu0 %v1159_v24 }
 0x5f8   : > { %v1076_v25 = vmul.f32 1.442695, %v1075_v22 }
 0x5fa   : > { %2711 = vpow2.f32 %v1076_v25 }
 0x600   : > { %v2712_v26 = vpop.eup %2711 }
 0x601   : > { %v1078_v27 = vsel %vm745_vm2, %v2712_v26, 0.0 }
 0x602   : > { %1079 = vadd.xlane.f32.xlu2 %v1078_v27  ;;  %v1085_v28 = vpop.permute.xlu1 %1084  ;;  %v2585_v27 = vld [vmem:[%s3574_s6 + $0x38] sm:$0xff] }
 0x603   : > { %v1090_v30 = vsel %vm763_vm1, %v1085_v28, 0 }
 0x604   : > { %1099 = vmatpush.bf16.msrb.mxu2 %v1090_v30 }
 0x608   : > { %1203 = vmatpush.bf16.msra.mxu2 %v2583_v33 }
 0x60a   : > { %v1213_v31 = vpop.permute.xlu1 %1212 }
 0x60b   : > { %v1218_v32 = vsel %vm724_vm0, %v1213_v31, 0  ;;  %1293 = vrot.lane.b32.xlu0 %v3099_v18, %s2823_s26 }
 0x60c   : > { %1227 = vmatpush.bf16.xpose.msra.mxu3 %v1218_v32 }
 0x613   : > { %1291 = vrot.lane.b32.xlu0 %v3107_v23, %s2823_s26 }
 0x61a   : > { %1165 = vrot.lane.b32.xlu2 %v3120_v29, %s2821_s28  ;;  %s492_s28 = scalar_lea.vmem %s3582_s14, %s2142_s18 }
 0x622   : > { %1210 = vrot.lane.b32.xlu2 %v3107_v23, %s2822_s23 }
 0x66a   : > { %v1161_v34 = vpop.xlane.xlu0 %1160 }
 0x66b   : > { %2713 = vrcp.f32 %v1161_v34 }
 0x671   : > { %v2714_v18 = vpop.eup %2713 }
 0x672   : > { %v1163_v37 = vmul.f32 %v2714_v18, %v2710_v20 }
 0x674   : > { %v1164_v23 = vpack.c.bf16 %v1163_v37, %v1163_v37  ;;  %v2687_v37 = vld [vmem:[%s3575_s7] ss:$0 sm:$0xff] }
 0x675   : > { %v1080_v35 = vpop.xlane.xlu2 %1079 }
 0x676   : > { %2715 = vrcp.f32 %v1080_v35 }
 0x67c   : > { %v2716_v36 = vpop.eup %2715 }
 0x67d   : > { %v1082_v38 = vmul.f32 %v2716_v36, %v2712_v26  ;;  %v1166_v39 = vpop.permute.xlu2 %1165  ;;  %v1294_v41 = vpop.permute.xlu0 %1293 }
 0x67e   : > { %v1171_v40 = vsel %vm763_vm1, %v1166_v39, 0  ;;  %v1299_v43 = vsel %vm724_vm0, %v1294_v41, 0 }
 0x67f   : > { %v1083_v42 = vpack.c.bf16 %v1082_v38, %v1082_v38  ;;  %1180 = vmatpush.bf16.msra.mxu1 %v1171_v40 }
 0x681   : > { %2269 = vmatmul.msk.bf16.vlgmr.msrb.gmra.mxu2 %vm759_vm3, %v1083_v42 }
 0x682   : > { %1308 = vmatpush.bf16.xpose.msrb.mxu2 %v1299_v43  ;;  %2276 = vmatmul.msk.bf16.vlgmr.msra.gmra.mxu1 %vm759_vm3, %v1164_v23  ;;  %v2824_v43 = vmov 128.0  }
 0x685   : > { %v1292_v50 = vpop.permute.xlu0 %1291  ;;  %v1211_v51 = vpop.permute.xlu2 %1210 }
 0x6ff   : > { %v1182_v44 = vpop.f32.mrf.mxu1 }
 0x700   : > { %v1186_v45 = vpack.c.bf16 %v1182_v44, %v1182_v44  ;;  %v2410_v44 = vld [vmem:[%s3578_s10 + $0xe0] sm:$0xf] }
 0x702   : > { %2281 = vmatmul.msk.bf16.vlgmr.msra.gmra.mxu2 %vm724_vm0, %v1186_v45  ;;  %v2616_v45 = vld [vmem:[%s3578_s10 + $0xec] sm:$0xf0] }
 0x704   : > { %v1101_v46 = vpop.f32.mrf.mxu2 }
 0x705   : > { %v1105_v47 = vpack.c.bf16 %v1101_v46, %v1101_v46  ;;  %v2614_v46 = vld [vmem:[%s3578_s10 + $0xe4] sm:$0xf] }
 0x707   : > { %2274 = vmatmul.msk.bf16.vlgmr.msrb.gmra.mxu3 %vm724_vm0, %v1105_v47  ;;  %v1184_v48 = vpop.f32.mrf.mxu1  ;;  %v2412_v47 = vld [vmem:[%s3578_s10 + $0xf0] sm:$0xf0] }
 0x708   : > { %v2418_v48 = vld [vmem:[%s3578_s10 + $0xe8] sm:$0xf] }
 0x70c   : > { %v1103_v49 = vpop.f32.mrf.mxu2 }
 0x70d   : > { %v2617_v49 = vld [vmem:[%s3578_s10 + $0xf4] sm:$0xf0] }
 0x712   : > { %2289 = vmatmul.msk.bf16.vlgmr.msrb.gmra.mxu2 %vm724_vm0, %v1292_v50  ;;  %v2415_v50 = vor.u32 %v2614_v46, %v2412_v47  ;;  %v2599_v47 = vld [vmem:[%s3578_s10 + $0x6c] sm:$0xf] }
 0x714   : > { %1633 = vmatpush.bf16.msra.mxu2 %v2415_v50  ;;  %v2330_v50 = vld [vmem:[%s3578_s10 + $0x40] sm:$0xf] }
 0x717   : > { %2282 = vmatmul.msk.bf16.vlgmr.msra.gmra.mxu3 %vm724_vm0, %v1211_v51  ;;  %v2419_v51 = vor.u32 %v2617_v49, %v2418_v48  ;;  %v2356_v48 = vld [vmem:[%s3578_s10 + $0x78] sm:$0xf0] }
 0x718   : > { %v2359_v49 = vor.u32 %v2599_v47, %v2356_v48  ;;  %v2632_v47 = vld [vmem:[%s3580_s12 + $0x70] sm:$0xff] }
 0x719   : > { %v2640_v48 = vld [vmem:[%s3580_s12 + $0xb0] sm:$0xff] }
 0x785   : > { %v1205_v52 = vpop.f32.mrf.mxu2 }
 0x78a   : > { %v1124_v53 = vpop.f32.mrf.mxu3 }
 0x78b   : > { %v1128_v54 = vadd.f32 %v1124_v53, %v3181_v6  ;;  %v2420_v53 = vld [vmem:[%s3578_s10 + $0xf8] sm:$0xf0] }
 0x78d   : > { %v1207_v55 = vpop.f32.mrf.mxu2  ;;  %v1209_v56 = vadd.f32 %v1205_v52, %v1128_v54  ;;  %v2615_v52 = vld [vmem:[%s3578_s10 + $0xec] sm:$0xf] }
 0x78e   : > { %v2423_v55 = vor.u32 %v2615_v52, %v2420_v53  ;;  %v2594_v52 = vld [vmem:[%s3578_s10 + $0x44] sm:$0xf] }
 0x792   : > { %v1126_v57 = vpop.f32.mrf.mxu3 }
 0x795   : > { %v1310_v58 = vpop.f32.mrf.mxu2 }
 0x796   : > { %v1314_v59 = vmul.f32 0.25, %v1310_v58 }
 0x798   : > { %v1315_v60 = vsel %vm745_vm2, %v1314_v59, -inf }
 0x799   : > { %1316 = vmax.xlane.f32.xlu1 %v1315_v60 }
 0x79a   : > { %v1229_v61 = vpop.f32.mrf.mxu3 }
 0x79b   : > { %v1233_v63 = vmul.f32 0.25, %v1229_v61 }
 0x79d   : > { %v1312_v0 = vpop.f32.mrf.mxu2  ;;  %v1234_v2 = vsel %vm745_vm2, %v1233_v63, -inf }
 0x79e   : > { %1235 = vmax.xlane.f32.xlu0 %v1234_v2 }
 0x7a2   : > { %v1231_v3 = vpop.f32.mrf.mxu3 }
 0x7b2   : > { %1327 = vrot.lane.b32.xlu0 %v3120_v29, %s2823_s26 }
 0x80c   : > { %v1317_v4 = vpop.xlane.xlu1 %1316 }
 0x80d   : > { %v1318_v5 = vsub.f32 %v1314_v59, %v1317_v4  ;;  %v2394_v4 = vld [vmem:[%s3578_s10 + $0xc0] sm:$0xf] }
 0x80f   : > { %v1319_v6 = vmul.f32 1.442695, %v1318_v5  ;;  %v2612_v5 = vld [vmem:[%s3578_s10 + $0xcc] sm:$0xf0] }
 0x811   : > { %2717 = vpow2.f32 %v1319_v6  ;;  %v1236_v7 = vpop.xlane.xlu0 %1235  ;;  %v2610_v6 = vld [vmem:[%s3578_s10 + $0xc4] sm:$0xf] }
 0x812   : > { %v1237_v8 = vsub.f32 %v1233_v63, %v1236_v7  ;;  %v2395_v7 = vor.u32 %v2612_v5, %v2394_v4  ;;  %v2590_v4 = vld [vmem:[%s3578_s10 + $0x24] sm:$0xf] }
 0x814   : > { %v1238_v9 = vmul.f32 1.442695, %v1237_v8  ;;  %v2396_v8 = vld [vmem:[%s3578_s10 + $0xd0] sm:$0xf0] }
 0x816   : > { %2719 = vpow2.f32 %v1238_v9  ;;  %v2402_v9 = vld [vmem:[%s3578_s10 + $0xc8] sm:$0xf] }
 0x817   : > { %v2718_v10 = vpop.eup %2717 }
 0x818   : > { %v1321_v11 = vsel %vm745_vm2, %v2718_v10, 0.0 }
 0x819   : > { %1322 = vadd.xlane.f32.xlu2 %v1321_v11  ;;  %v2399_v11 = vor.u32 %v2610_v6, %v2396_v8  ;;  %v2316_v6 = vld [vmem:[%s3578_s10 + $0x30] sm:$0xf0]  ;;  %v2593_v8 = vld [vmem:[%s3578_s10 + $0x34] sm:$0xf0] }
 0x81b   : > { %1634 = vmatpush.bf16.msra.mxu2 %v2399_v11  ;;  %v2591_v11 = vld [vmem:[%s3578_s10 + $0x2c] sm:$0xf] }
 0x81c   : > { %v2720_v12 = vpop.eup %2719 }
 0x81d   : > { %v1240_v13 = vsel %vm745_vm2, %v2720_v12, 0.0 }
 0x81e   : > { %1241 = vadd.xlane.f32.xlu1 %v1240_v13  ;;  %v2611_v13 = vld [vmem:[%s3578_s10 + $0xcc] sm:$0xf] }
 0x824   : > { %v1328_v14 = vpop.permute.xlu0 %1327 }
 0x825   : > { %v1333_v15 = vsel %vm763_vm1, %v1328_v14, 0  ;;  %v2404_v14 = vld [vmem:[%s3578_s10 + $0xd8] sm:$0xf0] }
 0x826   : > { %1342 = vmatpush.bf16.msrb.mxu3 %v1333_v15  ;;  %v2407_v15 = vor.u32 %v2611_v13, %v2404_v14  ;;  %v2298_v13 = vld [vmem:[%s3578_s10] sm:$0xf] }
 0x82a   : > { %1646 = vmatpush.bf16.msra.mxu3 %v2419_v51  ;;  %v2596_v51 = vld [vmem:[%s3578_s10 + $0x4c] sm:$0xf0] }
 0x82b   : > { %v2331_v53 = vor.u32 %v2596_v51, %v2330_v50  ;;  %v2646_v50 = vld [vmem:[%s3580_s12 + $0xe0] sm:$0xff]  ;;  %v2631_v51 = vld [vmem:[%s3580_s12 + $0x68] sm:$0xff] }
 0x831   : > { %1246 = vrot.lane.b32.xlu2 %v3120_v29, %s2822_s23  ;;  %v2584_v29 = vld [vmem:[%s3574_s6 + $0x30] sm:$0xff] }
 0x832   : > { %1284 = vmatpush.bf16.msrb.mxu1 %v2584_v29  ;;  %v2388_v29 = vld [vmem:[%s3578_s10 + $0xb8] sm:$0xf0] }
 0x88c   : > { %v1323_v1 = vpop.xlane.xlu2 %1322 }
 0x88d   : > { %2721 = vrcp.f32 %v1323_v1  ;;  %v2378_v1 = vld [vmem:[%s3578_s10 + $0xa0] sm:$0xf] }
 0x891   : > { %v1242_v16 = vpop.xlane.xlu1 %1241 }
 0x892   : > { %2723 = vrcp.f32 %v1242_v16  ;;  %v2608_v16 = vld [vmem:[%s3578_s10 + $0xac] sm:$0xf0] }
 0x893   : > { %v2722_v17 = vpop.eup %2721  ;;  %2725 = vrcp.f32 %v2824_v43  ;;  %v2348_v43 = vld [vmem:[%s3578_s10 + $0x70] sm:$0xf0] }
 0x894   : > { %v1325_v19 = vmul.f32 %v2722_v17, %v2718_v10  ;;  %v1247_v20 = vpop.permute.xlu2 %1246  ;;  %v2613_v10 = vld [vmem:[%s3578_s10 + $0xd4] sm:$0xf0]  ;;  %v2606_v17 = vld [vmem:[%s3578_s10 + $0xa4] sm:$0xf] }
 0x895   : > { %v1252_v21 = vsel %vm763_vm1, %v1247_v20, 0  ;;  %v2380_v20 = vld [vmem:[%s3578_s10 + $0xb0] sm:$0xf0] }
 0x896   : > { %v1326_v22 = vpack.c.bf16 %v1325_v19, %v1325_v19  ;;  %1261 = vmatpush.bf16.msrb.mxu0 %v1252_v21  ;;  %v2379_v19 = vor.u32 %v2608_v16, %v2378_v1  ;;  %v2386_v21 = vld [vmem:[%s3578_s10 + $0xa8] sm:$0xf]  ;;  %v2586_v1 = vld [vmem:[%s3578_s10 + $0x4] sm:$0xf]  ;;  %v2300_v16 = vld [vmem:[%s3578_s10 + $0x10] sm:$0xf0] }
 0x898   : > { %v2724_v24 = vpop.eup %2723  ;;  %2290 = vmatmul.msk.bf16.vlgmr.msrb.gmra.mxu3 %vm759_vm3, %v1326_v22  ;;  %v2609_v22 = vld [vmem:[%s3578_s10 + $0xb4] sm:$0xf0] }
 0x899   : > { %v1244_v25 = vmul.f32 %v2724_v24, %v2720_v12  ;;  %v2726_v54 = vpop.eup %2725  ;;  %v2403_v12 = vor.u32 %v2613_v10, %v2402_v9  ;;  %v2383_v24 = vor.u32 %v2606_v17, %v2380_v20  ;;  %v2319_v9 = vor.u32 %v2590_v4, %v2316_v6  ;;  %v2306_v20 = vld [vmem:[%s3578_s10 + $0x8] sm:$0xf]  ;;  %v2636_v4 = vld [vmem:[%s3580_s12 + $0x90] sm:$0xff]  ;;  %v2642_v6 = vld [vmem:[%s3580_s12 + $0xc0] sm:$0xff] }
 0x89a   : > { %1365 = vmatpush.bf16.msra.mxu0 %v2585_v27  ;;  %vm1388_vm5 = vweird.f32 %v2726_v54 }
 0x89b   : > { %v1245_v26 = vpack.c.bf16 %v1244_v25, %v1244_v25  ;;  %1647 = vmatpush.bf16.msra.mxu3 %v2403_v12  ;;  %v2387_v25 = vor.u32 %v2609_v22, %v2386_v21  ;;  %1635 = vmatpush.bf16.msra.mxu2 %v2383_v24  ;;  %v2324_v12 = vld [vmem:[%s3578_s10 + $0x38] sm:$0xf0]  ;;  %v2589_v21 = vld [vmem:[%s3578_s10 + $0x14] sm:$0xf0]  ;;  %v2587_v22 = vld [vmem:[%s3578_s10 + $0xc] sm:$0xf] }
 0x89c   : > { %v2327_v14 = vor.u32 %v2591_v11, %v2324_v12  ;;  %v2307_v24 = vor.u32 %v2589_v21, %v2306_v20  ;;  %v2634_v11 = vld [vmem:[%s3580_s12 + $0x80] sm:$0xff] }
 0x89d   : > { %2283 = vmatmul.msk.bf16.vlgmr.msrb.gmra.mxu0 %vm759_vm3, %v1245_v26  ;;  %v2607_v26 = vld [vmem:[%s3578_s10 + $0xac] sm:$0xf] }
 0x89e   : > { %1659 = vmatpush.bf16.msrb.mxu0 %v2423_v55  ;;  %v2391_v27 = vor.u32 %v2607_v26, %v2388_v29  ;;  %v2338_v55 = vld [vmem:[%s3578_s10 + $0x48] sm:$0xf] }
 0x89f   : > { %1648 = vmatpush.bf16.msra.mxu3 %v2387_v25  ;;  %v2308_v25 = vld [vmem:[%s3578_s10 + $0x18] sm:$0xf0] }
 0x8a0   : > { %v2311_v26 = vor.u32 %v2587_v22, %v2308_v25 }
 0x8a2   : > { %1660 = vmatpush.bf16.msrb.mxu0 %v2407_v15  ;;  %v2588_v15 = vld [vmem:[%s3578_s10 + $0xc] sm:$0xf0] }
 0x8a3   : > { %v2299_v17 = vor.u32 %v2588_v15, %v2298_v13 }
 0x8a6   : > { %1661 = vmatpush.bf16.msrb.mxu0 %v2391_v27  ;;  %v2625_v27 = vld [vmem:[%s3580_s12 + $0x38] sm:$0xff] }
 0x91a   : > { %v1263_v28 = vpop.f32.mrf.mxu0 }
 0x91b   : > { %v1267_v30 = vpack.c.bf16 %v1263_v28, %v1263_v28  ;;  %v1344_v31 = vpop.f32.mrf.mxu3  ;;  %v2362_v28 = vld [vmem:[%s3578_s10 + $0x80] sm:$0xf] }
 0x91c   : > { %v1348_v32 = vpack.c.bf16 %v1344_v31, %v1344_v31  ;;  %v2602_v31 = vld [vmem:[%s3578_s10 + $0x84] sm:$0xf] }
 0x91d   : > { %2288 = vmatmul.msk.bf16.vlgmr.msrb.gmra.mxu1 %vm724_vm0, %v1267_v30  ;;  %v2604_v30 = vld [vmem:[%s3578_s10 + $0x8c] sm:$0xf0] }
 0x91e   : > { %2295 = vmatmul.msk.bf16.vlgmr.msra.gmra.mxu0 %vm724_vm0, %v1348_v32  ;;  %v2363_v32 = vor.u32 %v2604_v30, %v2362_v28  ;;  %v2649_v28 = vld [vmem:[%s3580_s12 + $0xf8] sm:$0xff] }
 0x922   : > { %v1265_v33 = vpop.f32.mrf.mxu0 }
 0x923   : > { %v1346_v34 = vpop.f32.mrf.mxu3  ;;  %v2364_v33 = vld [vmem:[%s3578_s10 + $0x90] sm:$0xf0] }
 0x924   : > { %v2370_v34 = vld [vmem:[%s3578_s10 + $0x88] sm:$0xf] }
 0x99a   : > { %v1286_v35 = vpop.f32.mrf.mxu1 }
 0x99b   : > { %v1290_v18 = vadd.f32 %v1286_v35, %v1209_v56  ;;  %v1367_v36 = vpop.f32.mrf.mxu0  ;;  %v1384_v56 = vmul.f32 128.0, %v2726_v54  ;;  %v2605_v35 = vld [vmem:[%s3578_s10 + $0x94] sm:$0xf0] }
 0x99d   : > { %v1371_v38 = vadd.f32 %v1367_v36, %v1290_v18  ;;  %v1385_v57 = vsub.f32 1.0, %v1384_v56  ;;  %v2367_v18 = vor.u32 %v2602_v31, %v2364_v33  ;;  %v2371_v36 = vor.u32 %v2605_v35, %v2370_v34  ;;  %v2597_v56 = vld [vmem:[%s3578_s10 + $0x54] sm:$0xf0]  ;;  %v2624_v31 = vld [vmem:[%s3580_s12 + $0x30] sm:$0xff] }
 0x99f   : > { %v1375_v39 = vadd.f32 %v2687_v37, %v1371_v38  ;;  %v1386_v58 = vmul.f32 %v2726_v54, %v1385_v57  ;;  %v2603_v37 = vld [vmem:[%s3578_s10 + $0x8c] sm:$0xf]  ;;  %v2372_v38 = vld [vmem:[%s3578_s10 + $0x98] sm:$0xf0]  ;;  %1636 = vmatpush.bf16.msra.mxu2 %v2367_v18  ;;  %1649 = vmatpush.bf16.msra.mxu3 %v2371_v36 }
 0x9a1   : > { %v1376_v40 = vadd.f32 %v1375_v39, %v3074_v62  ;;  %v2411_v62 = vor.u32 %v2616_v45, %v2410_v44  ;;  %v1387_v59 = vadd.f32 %v2726_v54, %v1386_v58  ;;  %v2375_v39 = vor.u32 %v2603_v37, %v2372_v38  ;;  %v2354_v44 = vld [vmem:[%s3578_s10 + $0x68] sm:$0xf]  ;;  %v2601_v45 = vld [vmem:[%s3578_s10 + $0x74] sm:$0xf0] }
 0x9a2   : > { %v1288_v41 = vpop.f32.mrf.mxu1  ;;  %v2339_v58 = vor.u32 %v2597_v56, %v2338_v55  ;;  %v2630_v55 = vld [vmem:[%s3580_s12 + $0x60] sm:$0xff] }
 0x9a3   : > { %v1369_v42 = vpop.f32.mrf.mxu0  ;;  %v1380_v23 = vsel %vm1379_vm4, %v1376_v40, 0.0  ;;  %1620 = vmatpush.bf16.msra.mxu1 %v2411_v62  ;;  %v3265_v60 = vsel %vm1388_vm5, %v2726_v54, %v1387_v59  ;;  %v2600_v41 = vld [vmem:[%s3578_s10 + $0x6c] sm:$0xf0]  ;;  %1662 = vmatpush.bf16.msrb.mxu0 %v2375_v39  ;;  %v2355_v62 = vor.u32 %v2601_v45, %v2354_v44  ;;  %v2332_v54 = vld [vmem:[%s3578_s10 + $0x50] sm:$0xf0]  ;;  %v2633_v45 = vld [vmem:[%s3580_s12 + $0x78] sm:$0xff] }
 0x9a4   : > { %1381 = vadd.xlane.f32.xlu1 %v1380_v23  ;;  %v2598_v42 = vld [vmem:[%s3578_s10 + $0x64] sm:$0xf]  ;;  %v2335_v57 = vor.u32 %v2594_v52, %v2332_v54  ;;  %v2595_v59 = vld [vmem:[%s3578_s10 + $0x4c] sm:$0xf]  ;;  %v2688_v39 = vld [vmem:[%s3570_s2] ss:$0 sm:$0xff] }
 0x9a5   : > { %v2351_v46 = vor.u32 %v2598_v42, %v2348_v43  ;;  %1650 = vmatpush.bf16.msra.mxu3 %v2355_v62  ;;  %v2689_v42 = vld [vmem:[%s3571_s3] ss:$0 sm:$0xff]  ;;  %v2647_v62 = vld [vmem:[%s3580_s12 + $0xe8] sm:$0xff]  ;;  %v2645_v54 = vld [vmem:[%s3580_s12 + $0xd8] sm:$0xff] }
 0x9a6   : > { %v2639_v52 = vld [vmem:[%s3580_s12 + $0xa8] sm:$0xff]  ;;  %v2638_v56 = vld [vmem:[%s3580_s12 + $0xa0] sm:$0xff] }
 0x9a7   : > { %1621 = vmatpush.bf16.msra.mxu1 %v2395_v7  ;;  %1637 = vmatpush.bf16.msra.mxu2 %v2351_v46  ;;  %v2322_v7 = vld [vmem:[%s3578_s10 + $0x28] sm:$0xf] }
 0x9a8   : > { %1663 = vmatpush.bf16.msrb.mxu0 %v2359_v49  ;;  %v2323_v10 = vor.u32 %v2593_v8, %v2322_v7  ;;  %v2623_v46 = vld [vmem:[%s3580_s12 + $0x28] sm:$0xff]  ;;  %v2622_v49 = vld [vmem:[%s3580_s12 + $0x20] sm:$0xff] }
 0x9a9   : > { %1651 = vmatpush.bf16.msra.mxu3 %v2339_v58  ;;  %v2644_v58 = vld [vmem:[%s3580_s12 + $0xd0] sm:$0xff]  ;;  %v2627_v7 = vld [vmem:[%s3580_s12 + $0x48] sm:$0xff] }
 0x9aa   : > { %v2635_v8 = vld [vmem:[%s3580_s12 + $0x88] sm:$0xff] }
 0x9ab   : > { %1622 = vmatpush.bf16.msra.mxu1 %v2379_v19  ;;  %1638 = vmatpush.bf16.msra.mxu2 %v2335_v57  ;;  %v2303_v19 = vor.u32 %v2586_v1, %v2300_v16  ;;  %v2620_v57 = vld [vmem:[%s3580_s12 + $0x10] sm:$0xff] }
 0x9ad   : > { %1652 = vmatpush.bf16.msra.mxu3 %v2323_v10  ;;  %v2626_v10 = vld [vmem:[%s3580_s12 + $0x40] sm:$0xff] }
 0x9af   : > { %1623 = vmatpush.bf16.msra.mxu1 %v2363_v32  ;;  %1639 = vmatpush.bf16.msra.mxu2 %v2319_v9  ;;  %v2648_v32 = vld [vmem:[%s3580_s12 + $0xf0] sm:$0xff]  ;;  %v1450_v9 = vld [vmem:[%s3579_s11] sm:$0xf] }
 0x9b0   : > { %v1452_v12 = vperm.slane %v1450_v9, 0  ;;  %v1455_v13 = vperm.slane %v1450_v9, 3  ;;  %v1454_v21 = vperm.slane %v1450_v9, 2 }
 0x9b1   : > { %1653 = vmatpush.bf16.msra.mxu3 %v2307_v24 }
 0x9b3   : > { %1640 = vmatpush.bf16.msra.mxu2 %v2303_v19  ;;  %v1453_v19 = vperm.slane %v1450_v9, 1 }
 0x9b7   : > { %1985 = vmatpush.bf16.msrb.mxu2 %v2633_v45 }
 0x9bb   : > { %1986 = vmatpush.bf16.msrb.mxu2 %v2632_v47 }
 0x9bf   : > { %1987 = vmatpush.bf16.msrb.mxu2 %v2631_v51 }
 0x9c3   : > { %1988 = vmatpush.bf16.msrb.mxu2 %v2630_v55 }
 0xa17   : > { %v1382_v61 = vpop.xlane.xlu1 %1381 }
 0xa18   : > { %v1390_v63 = vmul.f32 %v3265_v60, %v1382_v61  ;;  %v2340_v61 = vld [vmem:[%s3578_s10 + $0x58] sm:$0xf0] }
 0xa1a   : > { %v3268_v0 = vsub.f32 %v1376_v40, %v1390_v63  ;;  %v2346_v40 = vld [vmem:[%s3578_s10 + $0x60] sm:$0xf]  ;;  %v2343_v63 = vor.u32 %v2595_v59, %v2340_v61  ;;  %v2629_v59 = vld [vmem:[%s3580_s12 + $0x58] sm:$0xff] }
 0xa1b   : > { %v2347_v23 = vor.u32 %v2600_v41, %v2346_v40  ;;  %v2637_v61 = vld [vmem:[%s3580_s12 + $0x98] sm:$0xff]  ;;  %1989 = vmatpush.bf16.msrb.mxu2 %v2629_v59 }
 0xa1c   : > { %v1392_v2 = vmul.f32 %v3268_v0, %v3268_v0  ;;  %1664 = vmatpush.bf16.msrb.mxu0 %v2343_v63  ;;  %v2619_v63 = vld [vmem:[%s3580_s12 + $0x8] sm:$0xff] }
 0xa1d   : > { %1624 = vmatpush.bf16.msra.mxu1 %v2347_v23 }
 0xa1e   : > { %v1393_v3 = vsel %vm1379_vm4, %v1392_v2, 0.0  ;;  %v2314_v2 = vld [vmem:[%s3578_s10 + $0x20] sm:$0xf] }
 0xa1f   : > { %1394 = vadd.xlane.f32.xlu1 %v1393_v3  ;;  %v2592_v3 = vld [vmem:[%s3578_s10 + $0x2c] sm:$0xf0] }
 0xa20   : > { %v2315_v5 = vor.u32 %v2592_v3, %v2314_v2  ;;  %1665 = vmatpush.bf16.msrb.mxu0 %v2327_v14  ;;  %v2643_v2 = vld [vmem:[%s3580_s12 + $0xc8] sm:$0xff]  ;;  %v2628_v3 = vld [vmem:[%s3580_s12 + $0x50] sm:$0xff] }
 0xa21   : > { %1625 = vmatpush.bf16.msra.mxu1 %v2331_v53  ;;  %v2621_v53 = vld [vmem:[%s3580_s12 + $0x18] sm:$0xff]  ;;  %1990 = vmatpush.bf16.msrb.mxu2 %v2628_v3 }
 0xa24   : > { %1666 = vmatpush.bf16.msrb.mxu0 %v2311_v26 }
 0xa25   : > { %1626 = vmatpush.bf16.msra.mxu1 %v2315_v5  ;;  %v2618_v5 = vld [vmem:[%s3580_s12] sm:$0xff]  ;;  %1991 = vmatpush.bf16.msrb.mxu2 %v2627_v7 }
 0xa28   : > { %2011 = vmatpush.bf16.msra.mxu0 %v2649_v28 }
 0xa29   : > { %1627 = vmatpush.bf16.msra.mxu1 %v2299_v17  ;;  %1992 = vmatpush.bf16.msrb.mxu2 %v2626_v10 }
 0xa2c   : > { %2012 = vmatpush.bf16.msra.mxu0 %v2648_v32 }
 0xa2d   : > { %1972 = vmatpush.bf16.msrb.mxu1 %v2625_v27 }
 0xa30   : > { %2013 = vmatpush.bf16.msra.mxu0 %v2647_v62 }
 0xa31   : > { %1973 = vmatpush.bf16.msrb.mxu1 %v2624_v31 }
 0xa34   : > { %2014 = vmatpush.bf16.msra.mxu0 %v2646_v50 }
 0xa35   : > { %1974 = vmatpush.bf16.msrb.mxu1 %v2623_v46 }
 0xa38   : > { %2015 = vmatpush.bf16.msra.mxu0 %v2645_v54 }
 0xa39   : > { %1975 = vmatpush.bf16.msrb.mxu1 %v2622_v49 }
 0xa3c   : > { %2016 = vmatpush.bf16.msra.mxu0 %v2644_v58 }
 0xa3d   : > { %1976 = vmatpush.bf16.msrb.mxu1 %v2621_v53 }
 0xa40   : > { %2017 = vmatpush.bf16.msra.mxu0 %v2643_v2 }
 0xa41   : > { %1977 = vmatpush.bf16.msrb.mxu1 %v2620_v57 }
 0xa44   : > { %2018 = vmatpush.bf16.msra.mxu0 %v2642_v6 }
 0xa45   : > { %1978 = vmatpush.bf16.msrb.mxu1 %v2619_v63 }
 0xa49   : > { %1979 = vmatpush.bf16.msrb.mxu1 %v2618_v5 }
 0xa92   : > { %v1395_v29 = vpop.xlane.xlu1 %1394 }
 0xa93   : > { %v1396_v30 = vmul.f32 %v1395_v29, %v3265_v60 }
 0xa95   : > { %v1397_v33 = vadd.f32 1e-05, %v1396_v30 }
 0xa97   : > { %2727 = vrsqrt.f32 %v1397_v33  ;;  %vm1404_vm7 = vweird.f32 %v1397_v33 }
 0xa9d   : > { %v2728_v34 = vpop.eup %2727 }
 0xa9e   : > { %v1399_v35 = vmul.f32 %v2728_v34, %v1397_v33  ;;  %vm1405_vm6 = vweird.f32 %v2728_v34 }
 0xa9f   : > { %vm1406_vm8 = vmor %vm1404_vm7, %vm1405_vm6 }
 0xaa0   : > { %v1400_v18 = vmul.f32 %v2728_v34, %v1399_v35 }
 0xaa2   : > { %v1401_v36 = vmul.f32 0.5, %v1400_v18 }
 0xaa4   : > { %v1402_v37 = vsub.f32 1.5, %v1401_v36 }
 0xaa6   : > { %v1403_v38 = vmul.f32 %v2728_v34, %v1402_v37 }
 0xaa8   : > { %v1407_v40 = vsel %vm1406_vm8, %v2728_v34, %v1403_v38 }
 0xaa9   : > { %v1408_v41 = vmul.f32 %v1407_v40, %v3268_v0  ;;  %v2641_v0 = vld [vmem:[%s3580_s12 + $0xb8] sm:$0xff] }
 0xaaa   : > { %1998 = vmatpush.bf16.msrb.mxu3 %v2641_v0 }
 0xaab   : > { %v1412_v23 = vmul.f32 %v2688_v39, %v1408_v41 }
 0xaad   : > { %v3461_v43 = vadd.f32 %v2689_v42, %v1412_v23 }
 0xaae   : > { %1999 = vmatpush.bf16.msrb.mxu3 %v2640_v48 }
 0xaaf   : > { %v1449_v44 = vpack.c.bf16 %v3461_v43, %v3461_v43 }
 0xab1   : > { %1628 = vmatmul.bf16.vlgmr.msra.gmra.mxu1 %v1449_v44  ;;  %1641 = vmatmul.bf16.vlgmr.msra.gmra.mxu2 %v1449_v44 }
 0xab2   : > { %1654 = vmatmul.bf16.vlgmr.msra.gmra.mxu3 %v1449_v44  ;;  %1667 = vmatmul.bf16.vlgmr.msrb.gmra.mxu0 %v1449_v44 }
 0xab3   : > { %2000 = vmatpush.bf16.msrb.mxu3 %v2639_v52 }
 0xab7   : > { %2001 = vmatpush.bf16.msrb.mxu3 %v2638_v56 }
 0xabb   : > { %2002 = vmatpush.bf16.msrb.mxu3 %v2637_v61 }
 0xabf   : > { %2003 = vmatpush.bf16.msrb.mxu3 %v2636_v4 }
 0xac3   : > { %2004 = vmatpush.bf16.msrb.mxu3 %v2635_v8  ;;  %v2690_v8 = vld [vmem:[#allocation4] ss:$0 sm:$0xff] }
 0xac7   : > { %2005 = vmatpush.bf16.msrb.mxu3 %v2634_v11 }
 0xb2e   : > { %v1629_v14 = vpop.f32.mrf.mxu1 }
 0xb2f   : > { %v1630_v15 = vadd.f32 %v1629_v14, %v1452_v12  ;;  %v1668_v1 = vpop.f32.mrf.mxu0 }
 0xb30   : > { %v1669_v16 = vadd.f32 %v1668_v1, %v1455_v13 }
 0xb31   : > { %v1676_v17 = vmul.f32 0.044715, %v1630_v15  ;;  %v1672_v48 = vmul.f32 0.5, %v1630_v15 }
 0xb32   : > { %v1679_v20 = vmul.f32 0.044715, %v1669_v16  ;;  %v1675_v50 = vmul.f32 0.5, %v1669_v16 }
 0xb33   : > { %v1680_v22 = vmul.f32 %v1676_v17, %v1630_v15 }
 0xb34   : > { %v1683_v24 = vmul.f32 %v1679_v20, %v1669_v16  ;;  %v1642_v25 = vpop.f32.mrf.mxu2 }
 0xb35   : > { %v1684_v26 = vmul.f32 %v1680_v22, %v1630_v15  ;;  %v1643_v29 = vadd.f32 %v1642_v25, %v1453_v19  ;;  %v1655_v27 = vpop.f32.mrf.mxu3 }
 0xb36   : > { %v1687_v28 = vmul.f32 %v1683_v24, %v1669_v16  ;;  %v1656_v30 = vadd.f32 %v1655_v27, %v1454_v21  ;;  %v1631_v31 = vpop.f32.mrf.mxu1 }
 0xb37   : > { %v1677_v32 = vmul.f32 0.044715, %v1643_v29  ;;  %v1670_v33 = vpop.f32.mrf.mxu0  ;;  %v1688_v34 = vadd.f32 %v1684_v26, %v1630_v15  ;;  %v1673_v58 = vmul.f32 0.5, %v1643_v29 }
 0xb38   : > { %v1678_v35 = vmul.f32 0.044715, %v1656_v30  ;;  %v1691_v18 = vadd.f32 %v1687_v28, %v1669_v16  ;;  %v1674_v61 = vmul.f32 0.5, %v1656_v30 }
 0xb39   : > { %v1681_v36 = vmul.f32 %v1677_v32, %v1643_v29  ;;  %v1692_v37 = vmul.f32 0.7978846, %v1688_v34 }
 0xb3a   : > { %v1682_v38 = vmul.f32 %v1678_v35, %v1656_v30  ;;  %v1695_v39 = vmul.f32 0.7978846, %v1691_v18  ;;  %v2691_v35 = vld [vmem:[%s3576_s8] ss:$0 sm:$0xff] }
 0xb3b   : > { %v1685_v40 = vmul.f32 %v1681_v36, %v1643_v29  ;;  %2729 = vtanh.f32 %v1692_v37  ;;  %v2692_v36 = vld [vmem:[#allocation2] ss:$0 sm:$0xff] }
 0xb3c   : > { %v1686_v41 = vmul.f32 %v1682_v38, %v1656_v30  ;;  %v1644_v42 = vpop.f32.mrf.mxu2  ;;  %2731 = vtanh.f32 %v1695_v39 }
 0xb3d   : > { %v1657_v23 = vpop.f32.mrf.mxu3  ;;  %v1689_v44 = vadd.f32 %v1685_v40, %v1643_v29 }
 0xb3e   : > { %v1690_v45 = vadd.f32 %v1686_v41, %v1656_v30 }
 0xb3f   : > { %v1693_v0 = vmul.f32 0.7978846, %v1689_v44 }
 0xb40   : > { %v1694_v46 = vmul.f32 0.7978846, %v1690_v45 }
 0xb41   : > { %v2730_v62 = vpop.eup %2729  ;;  %2733 = vtanh.f32 %v1693_v0 }
 0xb42   : > { %v2732_v47 = vpop.eup %2731  ;;  %v1700_v49 = vadd.f32 1.0, %v2730_v62  ;;  %2735 = vtanh.f32 %v1694_v46 }
 0xb43   : > { %v1703_v51 = vadd.f32 1.0, %v2732_v47 }
 0xb44   : > { %v1704_v52 = vmul.f32 %v1700_v49, %v1672_v48 }
 0xb45   : > { %v1707_v53 = vmul.f32 %v1703_v51, %v1675_v50 }
 0xb46   : > { %v1772_v54 = vpack.c.bf16 %v1704_v52, %v1704_v52 }
 0xb47   : > { %v2734_v55 = vpop.eup %2733  ;;  %v1775_v56 = vpack.c.bf16 %v1707_v53, %v1707_v53 }
 0xb48   : > { %v2736_v57 = vpop.eup %2735  ;;  %1980 = vmatmul.bf16.vlgmr.msrb.gmra.mxu1 %v1772_v54  ;;  %v1701_v59 = vadd.f32 1.0, %v2734_v55 }
 0xb49   : > { %2019 = vmatmul.bf16.vlgmr.msra.gmra.mxu0 %v1775_v56  ;;  %v1702_v63 = vadd.f32 1.0, %v2736_v57 }
 0xb4a   : > { %v1705_v2 = vmul.f32 %v1701_v59, %v1673_v58 }
 0xb4b   : > { %v1706_v3 = vmul.f32 %v1702_v63, %v1674_v61 }
 0xb4c   : > { %v1773_v4 = vpack.c.bf16 %v1705_v2, %v1705_v2 }
 0xb4d   : > { %v1774_v5 = vpack.c.bf16 %v1706_v3, %v1706_v3 }
 0xb4e   : > { %1993 = vmatmul.bf16.vlgmr.msrb.gmra.mxu2 %v1773_v4 }
 0xb4f   : > { %2006 = vmatmul.bf16.vlgmr.msrb.gmra.mxu3 %v1774_v5 }
 0xbc5   : > { %v1981_v6 = vpop.f32.mrf.mxu1 }
 0xbc6   : > { %v2020_v7 = vpop.f32.mrf.mxu0  ;;  %v1982_v11 = vadd.f32 %v2690_v8, %v1981_v6 }
 0xbcd   : > { %v1983_v9 = vpop.f32.mrf.mxu1 }
 0xbce   : > { %v2022_v10 = vpop.f32.mrf.mxu0 }
 0xbd1   : > { %v1994_v12 = vpop.f32.mrf.mxu2 }
 0xbd2   : > { %v1995_v13 = vadd.f32 %v1994_v12, %v1982_v11  ;;  %v2007_v14 = vpop.f32.mrf.mxu3 }
 0xbd4   : > { %v2008_v15 = vadd.f32 %v2007_v14, %v1995_v13 }
 0xbd6   : > { %v2021_v1 = vadd.f32 %v2020_v7, %v2008_v15 }
 0xbd8   : > { %v2024_v16 = vadd.f32 %v2021_v1, %v3461_v43 }
 0xbd9   : > { %v1996_v17 = vpop.f32.mrf.mxu2 }
 0xbda   : > { %v2009_v19 = vpop.f32.mrf.mxu3  ;;  %v2027_v20 = vsel %vm1379_vm4, %v2024_v16, 0.0 }
 0xbdb   : > { %2028 = vadd.xlane.f32.xlu0 %v2027_v20 }
 0xc4e   : > { %v2029_v21 = vpop.xlane.xlu0 %2028 }
 0xc4f   : > { %v2030_v22 = vmul.f32 %v2029_v21, %v3265_v60 }
 0xc51   : > { %v2031_v24 = vsub.f32 %v2024_v16, %v2030_v22 }
 0xc53   : > { %v2032_v25 = vmul.f32 %v2031_v24, %v2031_v24 }
 0xc55   : > { %v2033_v26 = vsel %vm1379_vm4, %v2032_v25, 0.0 }
 0xc56   : > { %2034 = vadd.xlane.f32.xlu1 %v2033_v26 }
 0xcc9   : > { %v2035_v29 = vpop.xlane.xlu1 %2034 }
 0xcca   : > { %v2036_v27 = vmul.f32 %v2035_v29, %v3265_v60 }
 0xccc   : > { %v2037_v28 = vadd.f32 1e-05, %v2036_v27 }
 0xcce   : > { %2737 = vrsqrt.f32 %v2037_v28  ;;  %vm2044_vm10 = vweird.f32 %v2037_v28 }
 0xcd4   : > { %v2738_v43 = vpop.eup %2737 }
 0xcd5   : > { %v2039_v30 = vmul.f32 %v2738_v43, %v2037_v28  ;;  %vm2045_vm9 = vweird.f32 %v2738_v43 }
 0xcd6   : > { %vm2046_vm11 = vmor %vm2044_vm10, %vm2045_vm9 }
 0xcd7   : > { %v2040_v31 = vmul.f32 %v2738_v43, %v2039_v30 }
 0xcd9   : > { %v2041_v32 = vmul.f32 0.5, %v2040_v31 }
 0xcdb   : > { %v2042_v33 = vsub.f32 1.5, %v2041_v32 }
 0xcdd   : > { %v2043_v34 = vmul.f32 %v2738_v43, %v2042_v33 }
 0xcdf   : > { %v2047_v18 = vsel %vm2046_vm11, %v2738_v43, %v2043_v34 }
 0xce0   : > { %v2048_v37 = vmul.f32 %v2047_v18, %v2031_v24 }
 0xce2   : > { %v2052_v60 = vmul.f32 %v2691_v35, %v2048_v37 }
 0xce4   : > { %v2056_v38 = vadd.f32 %v2692_v36, %v2052_v60 }
 0xce6   : > { %2057 = vst [vmem:[%s492_s28] sm:$0xf] %v2056_v38 }
 0xce7 PF: > { %s26_s29 = sadd.s32 1, %s2813_s29  }
 0xce8   : > { %p23_p7 = scmp.ge.s32.totalorder %s26_s29, 4  }
 0xcea   :  { %25 = sbr.rel (!%p23_p7) target bundleno = 2 (0x2), region = 115 }
 0xcef   :  { %2077 = vsyncpa [#allocation3], 1 }
 0xcf0   :  { %2079 = vsyncpa [#allocation3 + $0x1], 1 }
 0xcf1   :  { %2080 = vsyncpa [#allocation5], 1 }

// kernel: transmilx_forward.12
= control target key start
LH: loop header
LB: loop body
LE: loop exit
PB: predicated region body
PF: predicated region fallthrough
CT: control target
= control target key end

     0   :  { %s2751_s28 = smov 0   ;;  %s3397_s0 = inlined_call_operand.vmem [shape: f32[2,4,128], index: 0, kind: input, shape index: {}]   ;;  %s3398_s1 = inlined_call_operand.vmem [shape: f32[4,128], index: 1, kind: input, shape index: {}]   ;;  %s3399_s2 = inlined_call_operand.vmem [shape: f32[1,128], index: 2, kind: input, shape index: {}]   ;;  %s3400_s3 = inlined_call_operand.vmem [shape: f32[1,128], index: 3, kind: input, shape index: {}]   ;;  %s3401_s4 = inlined_call_operand.vmem [shape: bf16[128,384], index: 4, kind: input, shape index: {}]   ;;  %s3402_s5 = inlined_call_operand.vmem [shape: f32[1,384], index: 5, kind: input, shape index: {}]   ;;  %s3403_s6 = inlined_call_operand.vmem [shape: bf16[128,128], index: 6, kind: input, shape index: {}]   ;;  %s3404_s7 = inlined_call_operand.vmem [shape: f32[1,128], index: 7, kind: input, shape index: {}]   ;;  %s3405_s8 = inlined_call_operand.vmem [shape: f32[1,128], index: 8, kind: input, shape index: {}]   ;;  %s3406_s9 = inlined_call_operand.vmem [shape: f32[1,128], index: 9, kind: input, shape index: {}]   ;;  %s3407_s10 = inlined_call_operand.vmem [shape: bf16[128,512], index: 10, kind: input, shape index: {}]   ;;  %s3408_s11 = inlined_call_operand.vmem [shape: f32[1,512], index: 11, kind: input, shape index: {}]   ;;  %s3409_s12 = inlined_call_operand.vmem [shape: bf16[512,128], index: 12, kind: input, shape index: {}]   ;;  %s3410_s13 = inlined_call_operand.vmem [shape: f32[1,128], index: 13, kind: input, shape index: {}]   ;;  %s3411_s14 = inlined_call_operand.vmem [shape: f32[2,4,128], index: 14, kind: output, shape index: {}]  }
   0x1 LB: > { %s2079_s29 = sadd.s32 4294967295, %s2666_s28   ;;  %p2083_p0 = scmp.ge.s32.totalorder %s2666_s28, 1  ;;  %s2666_s28 = sphi %s2751_s28, %s24_s28  }
   0x2   : > { %p411_p1 = scmp.lt.s32.totalorder %s2666_s28, 3 }
   0x4   : > { %p412_p2 = pnand %p2083_p0, %p411_p1 }
   0x5   : > { %p455_p3 = scmp.lt.s32.totalorder (!%p412_p2), %s2079_s29, 1  ;;  %s2668_s27 = smov (!%p412_p2), 80  }
   0x6   : > { %415 = sbr.rel (%p412_p2) target bundleno = 3298 (0xce2), region = 76  ;;  %s2669_s30 = smov (!%p412_p2), 112  }
   0x7   : > { %s2670_s15 = smov (!%p412_p2), 96   ;;  %s2671_s17 = smov (!%p412_p2), 64  }
   0x8   : > { %s2672_s18 = smov (!%p412_p2), 48   ;;  %s2673_s26 = smov (!%p412_p2), 32  }
   0xb   : > { %v2172_v0 = vld [vmem:[%s3401_s4 + $0xa8] sm:$0xf]  ;;  %v2518_v1 = vld [vmem:[%s3401_s4 + $0xb0] sm:$0xf0]  ;;  %v2517_v2 = vld [vmem:[%s3401_s4 + $0xac] sm:$0xf] }
   0xc   : > { %v2173_v3 = vor.u32 %v2518_v1, %v2172_v0  ;;  %v2174_v4 = vld [vmem:[%s3401_s4 + $0xb4] sm:$0xf0]  ;;  %v2160_v5 = vld [vmem:[%s3401_s4 + $0x90] sm:$0xf]  ;;  %v2515_v6 = vld [vmem:[%s3401_s4 + $0x98] sm:$0xf0] }
   0xd   : > { %v2177_v7 = vor.u32 %v2517_v2, %v2174_v4  ;;  %v2514_v8 = vld [vmem:[%s3401_s4 + $0x94] sm:$0xf]  ;;  %v2162_v9 = vld [vmem:[%s3401_s4 + $0x9c] sm:$0xf0]  ;;  %v2161_v10 = vor.u32 %v2515_v6, %v2160_v5  ;;  %v2148_v12 = vld [vmem:[%s3401_s4 + $0x78] sm:$0xf] }
   0xe   : > { %651 = vmatpush.bf16.msra.mxu0 %v2173_v3  ;;  %v2165_v11 = vor.u32 %v2514_v8, %v2162_v9  ;;  %v2512_v13 = vld [vmem:[%s3401_s4 + $0x80] sm:$0xf0]  ;;  %v2511_v14 = vld [vmem:[%s3401_s4 + $0x7c] sm:$0xf]  ;;  %v2150_v15 = vld [vmem:[%s3401_s4 + $0x84] sm:$0xf0] }
   0xf   : > { %664 = vmatpush.bf16.msra.mxu1 %v2177_v7  ;;  %v2149_v16 = vor.u32 %v2512_v13, %v2148_v12  ;;  %v2153_v17 = vor.u32 %v2511_v14, %v2150_v15  ;;  %v2136_v18 = vld [vmem:[%s3401_s4 + $0x60] sm:$0xf]  ;;  %v2509_v19 = vld [vmem:[%s3401_s4 + $0x68] sm:$0xf0]  ;;  %v2508_v20 = vld [vmem:[%s3401_s4 + $0x64] sm:$0xf] }
  0x10   : > { %v2138_v21 = vld [vmem:[%s3401_s4 + $0x6c] sm:$0xf0]  ;;  %v2137_v22 = vor.u32 %v2509_v19, %v2136_v18  ;;  %v2519_v24 = vld [vmem:[%s3401_s4 + $0xb8] sm:$0xf0]  ;;  %v2168_v25 = vld [vmem:[%s3401_s4 + $0x98] sm:$0xf] }
  0x11   : > { %v2180_v23 = vld [vmem:[%s3401_s4 + $0xb0] sm:$0xf]  ;;  %v2141_v26 = vor.u32 %v2508_v20, %v2138_v21  ;;  %v2124_v27 = vld [vmem:[%s3401_s4 + $0x48] sm:$0xf]  ;;  %v2506_v28 = vld [vmem:[%s3401_s4 + $0x50] sm:$0xf0] }
  0x12   : > { %652 = vmatpush.bf16.msra.mxu0 %v2161_v10  ;;  %v2181_v29 = vor.u32 %v2519_v24, %v2180_v23  ;;  %v2516_v30 = vld [vmem:[%s3401_s4 + $0xa0] sm:$0xf0]  ;;  %v2505_v31 = vld [vmem:[%s3401_s4 + $0x4c] sm:$0xf]  ;;  %v2126_v32 = vld [vmem:[%s3401_s4 + $0x54] sm:$0xf0]  ;;  %v2125_v34 = vor.u32 %v2506_v28, %v2124_v27 }
  0x13   : > { %665 = vmatpush.bf16.msra.mxu1 %v2165_v11  ;;  %v2169_v33 = vor.u32 %v2516_v30, %v2168_v25  ;;  %v2112_v35 = vld [vmem:[%s3401_s4 + $0x30] sm:$0xf]  ;;  %v2156_v36 = vld [vmem:[%s3401_s4 + $0x80] sm:$0xf]  ;;  %v2513_v37 = vld [vmem:[%s3401_s4 + $0x88] sm:$0xf0]  ;;  %v2129_v38 = vor.u32 %v2505_v31, %v2126_v32 }
  0x14   : > { %677 = vmatpush.bf16.msra.mxu2 %v2181_v29  ;;  %v2503_v39 = vld [vmem:[%s3401_s4 + $0x38] sm:$0xf0]  ;;  %v2502_v40 = vld [vmem:[%s3401_s4 + $0x34] sm:$0xf]  ;;  %v2114_v41 = vld [vmem:[%s3401_s4 + $0x3c] sm:$0xf0]  ;;  %v2157_v43 = vor.u32 %v2513_v37, %v2156_v36 }
  0x15   : > { %s3413_s29 = smov (!%p455_p3, %s2079_s29), 1  ;;  %v2144_v42 = vld [vmem:[%s3401_s4 + $0x68] sm:$0xf]  ;;  %v2510_v44 = vld [vmem:[%s3401_s4 + $0x70] sm:$0xf0]  ;;  %v2113_v45 = vor.u32 %v2503_v39, %v2112_v35  ;;  %v2117_v46 = vor.u32 %v2502_v40, %v2114_v41  ;;  %vm692_vm0 = vcmask 130048  }
  0x16   : > { %653 = vmatpush.bf16.msra.mxu0 %v2149_v16  ;;  %v2100_v47 = vld [vmem:[%s3401_s4 + $0x18] sm:$0xf]  ;;  %v2500_v48 = vld [vmem:[%s3401_s4 + $0x20] sm:$0xf0]  ;;  %v2499_v49 = vld [vmem:[%s3401_s4 + $0x1c] sm:$0xf]  ;;  %v2145_v51 = vor.u32 %v2510_v44, %v2144_v42 }
  0x17   : > { %666 = vmatpush.bf16.msra.mxu1 %v2153_v17  ;;  %v2102_v50 = vld [vmem:[%s3401_s4 + $0x24] sm:$0xf0]  ;;  %s2084_s25 = sshll.u32 %s3413_s29, 2  ;;  %v2101_v52 = vor.u32 %v2500_v48, %v2100_v47  ;;  %v2132_v53 = vld [vmem:[%s3401_s4 + $0x50] sm:$0xf]  ;;  %vm731_vm1 = vcmask 1041408  }
  0x18   : > { %678 = vmatpush.bf16.msra.mxu2 %v2169_v33  ;;  %v2507_v54 = vld [vmem:[%s3401_s4 + $0x58] sm:$0xf0]  ;;  %v2105_v55 = vor.u32 %v2499_v49, %v2102_v50  ;;  %v2088_v56 = vld [vmem:[%s3401_s4] sm:$0xf]  ;;  %v2497_v57 = vld [vmem:[%s3401_s4 + $0x8] sm:$0xf0]  ;;  %s458_s21 = scalar_lea.vmem %s3397_s0, %s2084_s25  ;;  %s462_s19 = scalar_lea.vmem %s3411_s14, %s2084_s25 }
  0x19   : > { %v2496_v58 = vld [vmem:[%s3401_s4 + $0x4] sm:$0xf]  ;;  %v2090_v59 = vld [vmem:[%s3401_s4 + $0xc] sm:$0xf0]  ;;  %v2133_v60 = vor.u32 %v2507_v54, %v2132_v53  ;;  %v2089_v61 = vor.u32 %v2497_v57, %v2088_v56  ;;  %v2897_v62 = vld [vmem:[%s458_s21] sm:$0xf] }
  0x1a   : > { %654 = vmatpush.bf16.msra.mxu0 %v2137_v22  ;;  %v2120_v63 = vld [vmem:[%s3401_s4 + $0x38] sm:$0xf]  ;;  %v2504_v0 = vld [vmem:[%s3401_s4 + $0x40] sm:$0xf0]  ;;  %v2093_v1 = vor.u32 %v2496_v58, %v2090_v59  ;;  %v515_v2 = vpack.c.bf16 %v2897_v62, %v2897_v62  ;;  %v2108_v4 = vld [vmem:[%s3401_s4 + $0x20] sm:$0xf] }
  0x1b   : > { %667 = vmatpush.bf16.msra.mxu1 %v2141_v26  ;;  %v2121_v3 = vor.u32 %v2504_v0, %v2120_v63  ;;  %v2501_v5 = vld [vmem:[%s3401_s4 + $0x28] sm:$0xf0]  ;;  %v2096_v7 = vld [vmem:[%s3401_s4 + $0x8] sm:$0xf]  ;;  %v2498_v8 = vld [vmem:[%s3401_s4 + $0x10] sm:$0xf0] }
  0x1c   : > { %679 = vmatpush.bf16.msra.mxu2 %v2157_v43  ;;  %v2109_v6 = vor.u32 %v2501_v5, %v2108_v4  ;;  %v2097_v9 = vor.u32 %v2498_v8, %v2096_v7  ;;  %v497_v10 = vld [vmem:[%s3402_s5] sm:$0x7]  ;;  %vm713_vm2 = vcmask 27648   ;;  %vm727_vm3 = vcmask 31744  }
  0x1d   : > { %v518_v11 = vperm.slane %v497_v10, 1  ;;  %v517_v14 = vperm.slane %v497_v10, 0  ;;  %v2520_v22 = vld [vmem:[%s3403_s6] sm:$0xff]  ;;  %v519_v24 = vperm.slane %v497_v10, 2  ;;  %vm1347_vm4 = vcmask 1043456  }
  0x1e   : > { %655 = vmatpush.bf16.msra.mxu0 %v2125_v34 }
  0x1f   : > { %668 = vmatpush.bf16.msra.mxu1 %v2129_v38 }
  0x20   : > { %680 = vmatpush.bf16.msra.mxu2 %v2145_v51 }
  0x22   : > { %656 = vmatpush.bf16.msra.mxu0 %v2113_v45 }
  0x23   : > { %669 = vmatpush.bf16.msra.mxu1 %v2117_v46 }
  0x24   : > { %681 = vmatpush.bf16.msra.mxu2 %v2133_v60 }
  0x26   : > { %657 = vmatpush.bf16.msra.mxu0 %v2101_v52 }
  0x27   : > { %670 = vmatpush.bf16.msra.mxu1 %v2105_v55 }
  0x28   : > { %682 = vmatpush.bf16.msra.mxu2 %v2121_v3 }
  0x2a   : > { %658 = vmatpush.bf16.msra.mxu0 %v2089_v61 }
  0x2b   : > { %671 = vmatpush.bf16.msra.mxu1 %v2093_v1 }
  0x2c   : > { %683 = vmatpush.bf16.msra.mxu2 %v2109_v6 }
  0x2d   : > { %659 = vmatmul.bf16.vlgmr.msra.gmra.mxu0 %v515_v2 }
  0x2e   : > { %672 = vmatmul.bf16.vlgmr.msra.gmra.mxu1 %v515_v2 }
  0x30   : > { %684 = vmatpush.bf16.msra.mxu2 %v2097_v9 }
  0x33   : > { %685 = vmatmul.bf16.vlgmr.msra.gmra.mxu2 %v515_v2 }
  0x34   : > { %848 = vmatpush.bf16.msrb.mxu2 %v2520_v22 }
  0xaa   : > { %v660_v12 = vpop.f32.mrf.mxu0 }
  0xab   : > { %v673_v13 = vpop.f32.mrf.mxu1  ;;  %v661_v17 = vadd.f32 %v660_v12, %v517_v14 }
  0xac   : > { %v674_v15 = vadd.f32 %v673_v13, %v518_v11 }
  0xad   : > { %v2930_v21 = vpack.c.bf16 %v661_v17, %v661_v17 }
  0xae   : > { %v2922_v16 = vpack.c.bf16 %v674_v15, %v674_v15 }
  0xb0   : > { %937 = vrot.lane.b32.xlu2 %v2922_v16, %s2668_s27  ;;  %753 = vrot.lane.b32.xlu1 %v2922_v16, %s2669_s30  ;;  %v697_v18 = vsel %vm692_vm0, %v2922_v16, 0 }
  0xb1   : > { %706 = vmatpush.bf16.xpose.msra.mxu3 %v697_v18 }
  0xb2   : > { %v662_v19 = vpop.f32.mrf.mxu0 }
  0xb3   : > { %v675_v20 = vpop.f32.mrf.mxu1 }
  0xb6   : > { %v686_v23 = vpop.f32.mrf.mxu2 }
  0xb7   : > { %v687_v25 = vadd.f32 %v686_v23, %v519_v24 }
  0xb8   : > { %856 = vrot.lane.b32.xlu2 %v2922_v16, %s2670_s15  ;;  %750 = vrot.lane.b32.xlu1 %v2930_v21, %s2669_s30 }
  0xb9   : > { %2182 = vmatmul.msk.bf16.vlgmr.msra.gmra.mxu3 %vm692_vm0, %v2930_v21  ;;  %v2943_v27 = vpack.c.bf16 %v687_v25, %v687_v25 }
  0xbb   : > { %v733_v28 = vsel %vm731_vm1, %v2943_v27, 0 }
  0xbc   : > { %742 = vmatpush.bf16.msrb.mxu3 %v733_v28 }
  0xbe   : > { %v688_v26 = vpop.f32.mrf.mxu2 }
  0xc0   : > { %854 = vrot.lane.b32.xlu1 %v2930_v21, %s2670_s15 }
 0x10a   : > { %v938_v29 = vpop.permute.xlu2 %937 }
 0x10b   : > { %v943_v30 = vsel %vm692_vm0, %v938_v29, 0 }
 0x10c   : > { %952 = vmatpush.bf16.xpose.msra.mxu2 %v943_v30 }
 0x112   : > { %v857_v45 = vpop.permute.xlu2 %856 }
 0x113   : > { %v862_v47 = vsel %vm692_vm0, %v857_v45, 0  ;;  %v2523_v45 = vld [vmem:[%s3403_s6 + $0x18] sm:$0xff] }
 0x122   : > { %v754_v31 = vpop.permute.xlu1 %753 }
 0x123   : > { %v759_v32 = vsel %vm692_vm0, %v754_v31, 0  ;;  %v2521_v31 = vld [vmem:[%s3403_s6 + $0x8] sm:$0xff] }
 0x124   : > { %768 = vmatpush.bf16.xpose.msra.mxu3 %v759_v32  ;;  %826 = vmatpush.bf16.msrb.mxu1 %v2521_v31  ;;  %v2522_v32 = vld [vmem:[%s3403_s6 + $0x10] sm:$0xff]  ;;  %v2525_v31 = vld [vmem:[%s3403_s6 + $0x28] sm:$0xff] }
 0x128   : > { %928 = vmatpush.bf16.msra.mxu1 %v2522_v32 }
 0x12a   : > { %v751_v48 = vpop.permute.xlu1 %750 }
 0x132   : > { %v855_v49 = vpop.permute.xlu1 %854 }
 0x13c   : > { %v708_v33 = vpop.f32.mrf.mxu3 }
 0x13d   : > { %v712_v34 = vmul.f32 0.25, %v708_v33 }
 0x13f   : > { %v714_v35 = vsel %vm713_vm2, %v712_v34, -inf }
 0x140   : > { %715 = vmax.xlane.f32.xlu0 %v714_v35 }
 0x144   : > { %v710_v36 = vpop.f32.mrf.mxu3 }
 0x1b3   : > { %v716_v37 = vpop.xlane.xlu0 %715 }
 0x1b4   : > { %v717_v38 = vsub.f32 %v712_v34, %v716_v37 }
 0x1b6   : > { %v718_v39 = vmul.f32 1.442695, %v717_v38 }
 0x1b8   : > { %2614 = vpow2.f32 %v718_v39 }
 0x1be   : > { %v2615_v40 = vpop.eup %2614 }
 0x1bf   : > { %v720_v41 = vsel %vm713_vm2, %v2615_v40, 0.0 }
 0x1c0   : > { %721 = vadd.xlane.f32.xlu0 %v720_v41 }
 0x1d4   : > { %935 = vrot.lane.b32.xlu0 %v2930_v21, %s2668_s27 }
 0x233   : > { %v722_v42 = vpop.xlane.xlu0 %721 }
 0x234   : > { %2616 = vrcp.f32 %v722_v42 }
 0x23a   : > { %v2617_v43 = vpop.eup %2616 }
 0x23b   : > { %v724_v44 = vmul.f32 %v2617_v43, %v2615_v40 }
 0x23d   : > { %v725_v46 = vpack.c.bf16 %v724_v44, %v724_v44 }
 0x23f   : > { %2183 = vmatmul.msk.bf16.vlgmr.msrb.gmra.mxu3 %vm727_vm3, %v725_v46 }
 0x240   : > { %871 = vmatpush.bf16.xpose.msrb.mxu3 %v862_v47 }
 0x246   : > { %v936_v55 = vpop.permute.xlu0 %935 }
 0x24f   : > { %2184 = vmatmul.msk.bf16.vlgmr.msra.gmra.mxu3 %vm692_vm0, %v751_v48 }
 0x25f   : > { %2196 = vmatmul.msk.bf16.vlgmr.msrb.gmra.mxu3 %vm692_vm0, %v855_v49 }
 0x2c2   : > { %v744_v50 = vpop.f32.mrf.mxu3 }
 0x2c3   : > { %v748_v51 = vpack.c.bf16 %v744_v50, %v744_v50 }
 0x2c5   : > { %2195 = vmatmul.msk.bf16.vlgmr.msrb.gmra.mxu2 %vm692_vm0, %v748_v51 }
 0x2ca   : > { %v746_v52 = vpop.f32.mrf.mxu3 }
 0x2d2   : > { %v770_v53 = vpop.f32.mrf.mxu3 }
 0x2d3   : > { %v774_v54 = vmul.f32 0.25, %v770_v53 }
 0x2d5   : > { %2203 = vmatmul.msk.bf16.vlgmr.msra.gmra.mxu2 %vm692_vm0, %v936_v55  ;;  %v775_v56 = vsel %vm713_vm2, %v774_v54, -inf }
 0x2d6   : > { %776 = vmax.xlane.f32.xlu2 %v775_v56 }
 0x2da   : > { %v772_v57 = vpop.f32.mrf.mxu3 }
 0x2e2   : > { %v873_v58 = vpop.f32.mrf.mxu3 }
 0x2e3   : > { %v877_v59 = vmul.f32 0.25, %v873_v58 }
 0x2e5   : > { %v878_v60 = vsel %vm713_vm2, %v877_v59, -inf }
 0x2e6   : > { %879 = vmax.xlane.f32.xlu0 %v878_v60 }
 0x2ea   : > { %v875_v61 = vpop.f32.mrf.mxu3 }
 0x2fa   : > { %971 = vrot.lane.b32.xlu0 %v2943_v27, %s2668_s27 }
 0x302   : > { %1016 = vrot.lane.b32.xlu0 %v2930_v21, %s2671_s17 }
 0x348   : > { %v2965_v63 = vpop.f32.mrf.mxu2 }
 0x349   : > { %v777_v0 = vpop.xlane.xlu2 %776 }
 0x34a   : > { %v778_v1 = vsub.f32 %v774_v54, %v777_v0 }
 0x34c   : > { %v779_v2 = vmul.f32 1.442695, %v778_v1 }
 0x34e   : > { %2618 = vpow2.f32 %v779_v2 }
 0x350   : > { %v852_v3 = vpop.f32.mrf.mxu2 }
 0x354   : > { %v2619_v4 = vpop.eup %2618 }
 0x355   : > { %v781_v5 = vsel %vm713_vm2, %v2619_v4, 0.0 }
 0x356   : > { %782 = vadd.xlane.f32.xlu2 %v781_v5 }
 0x358   : > { %v954_v6 = vpop.f32.mrf.mxu2 }
 0x359   : > { %v958_v7 = vmul.f32 0.25, %v954_v6  ;;  %v880_v8 = vpop.xlane.xlu0 %879 }
 0x35a   : > { %v881_v9 = vsub.f32 %v877_v59, %v880_v8 }
 0x35b   : > { %v959_v10 = vsel %vm713_vm2, %v958_v7, -inf }
 0x35c   : > { %v882_v11 = vmul.f32 1.442695, %v881_v9  ;;  %960 = vmax.xlane.f32.xlu1 %v959_v10 }
 0x35e   : > { %2620 = vpow2.f32 %v882_v11 }
 0x360   : > { %v956_v12 = vpop.f32.mrf.mxu2 }
 0x364   : > { %v2621_v13 = vpop.eup %2620 }
 0x365   : > { %v884_v14 = vsel %vm713_vm2, %v2621_v13, 0.0 }
 0x366   : > { %885 = vadd.xlane.f32.xlu1 %v884_v14  ;;  %v2524_v14 = vld [vmem:[%s3403_s6 + $0x20] sm:$0xff] }
 0x36c   : > { %v972_v15 = vpop.permute.xlu0 %971 }
 0x36d   : > { %v977_v17 = vsel %vm731_vm1, %v972_v15, 0 }
 0x36e   : > { %788 = vrot.lane.b32.xlu2 %v2943_v27, %s2669_s30  ;;  %986 = vmatpush.bf16.msra.mxu3 %v977_v17 }
 0x372   : > { %1090 = vmatpush.bf16.msrb.mxu3 %v2524_v14 }
 0x374   : > { %v1017_v60 = vpop.permute.xlu0 %1016 }
 0x376   : > { %1018 = vrot.lane.b32.xlu2 %v2922_v16, %s2671_s17 }
 0x37e   : > { %1099 = vrot.lane.b32.xlu2 %v2922_v16, %s2672_s18 }
 0x386   : > { %1097 = vrot.lane.b32.xlu2 %v2930_v21, %s2672_s18 }
 0x3c9   : > { %v783_v18 = vpop.xlane.xlu2 %782 }
 0x3ca   : > { %2622 = vrcp.f32 %v783_v18 }
 0x3cf   : > { %v961_v19 = vpop.xlane.xlu1 %960 }
 0x3d0   : > { %v2623_v20 = vpop.eup %2622  ;;  %v962_v22 = vsub.f32 %v958_v7, %v961_v19 }
 0x3d1   : > { %v785_v23 = vmul.f32 %v2623_v20, %v2619_v4  ;;  %v789_v24 = vpop.permute.xlu2 %788 }
 0x3d2   : > { %v963_v25 = vmul.f32 1.442695, %v962_v22  ;;  %v794_v26 = vsel %vm731_vm1, %v789_v24, 0 }
 0x3d3   : > { %803 = vmatpush.bf16.msrb.mxu0 %v794_v26  ;;  %v786_v28 = vpack.c.bf16 %v785_v23, %v785_v23 }
 0x3d4   : > { %2624 = vpow2.f32 %v963_v25 }
 0x3d6   : > { %2185 = vmatmul.msk.bf16.vlgmr.msrb.gmra.mxu0 %vm727_vm3, %v786_v28 }
 0x3d9   : > { %v886_v33 = vpop.xlane.xlu1 %885  ;;  %v1019_v35 = vpop.permute.xlu2 %1018 }
 0x3da   : > { %v2625_v29 = vpop.eup %2624  ;;  %v1024_v39 = vsel %vm692_vm0, %v1019_v35, 0 }
 0x3db   : > { %v965_v30 = vsel %vm713_vm2, %v2625_v29, 0.0 }
 0x3dc   : > { %966 = vadd.xlane.f32.xlu1 %v965_v30 }
 0x3e1   : > { %v1100_v48 = vpop.permute.xlu2 %1099 }
 0x3e2   : > { %v1105_v50 = vsel %vm692_vm0, %v1100_v48, 0 }
 0x3e9   : > { %v1098_v58 = vpop.permute.xlu2 %1097 }
 0x3f5   : > { %890 = vrot.lane.b32.xlu1 %v2943_v27, %s2670_s15  ;;  %s2674_s15 = smov 16  }
 0x44f   : > { %v967_v34 = vpop.xlane.xlu1 %966 }
 0x450   : > { %2626 = vrcp.f32 %v967_v34 }
 0x451   : > { %2628 = vrcp.f32 %v886_v33 }
 0x453   : > { %v805_v36 = vpop.f32.mrf.mxu0 }
 0x454   : > { %v809_v37 = vpack.c.bf16 %v805_v36, %v805_v36 }
 0x456   : > { %v2627_v38 = vpop.eup %2626  ;;  %2190 = vmatmul.msk.bf16.vlgmr.msrb.gmra.mxu1 %vm692_vm0, %v809_v37 }
 0x457   : > { %v969_v40 = vmul.f32 %v2627_v38, %v2625_v29  ;;  %1033 = vmatpush.bf16.xpose.msrb.mxu1 %v1024_v39  ;;  %v2629_v43 = vpop.eup %2628 }
 0x458   : > { %v888_v44 = vmul.f32 %v2629_v43, %v2621_v13 }
 0x459   : > { %v970_v41 = vpack.c.bf16 %v969_v40, %v969_v40 }
 0x45a   : > { %v889_v49 = vpack.c.bf16 %v888_v44, %v888_v44 }
 0x45b   : > { %v807_v42 = vpop.f32.mrf.mxu0  ;;  %2204 = vmatmul.msk.bf16.vlgmr.msra.gmra.mxu3 %vm727_vm3, %v970_v41 }
 0x467   : > { %v891_v46 = vpop.permute.xlu1 %890 }
 0x468   : > { %v896_v47 = vsel %vm731_vm1, %v891_v46, 0 }
 0x469   : > { %905 = vmatpush.bf16.msra.mxu0 %v896_v47 }
 0x46c   : > { %2197 = vmatmul.msk.bf16.vlgmr.msra.gmra.mxu0 %vm727_vm3, %v889_v49 }
 0x46d   : > { %1009 = vmatpush.bf16.msrb.mxu0 %v2523_v45 }
 0x471   : > { %1114 = vmatpush.bf16.xpose.msra.mxu0 %v1105_v50 }
 0x4d3   : > { %v828_v51 = vpop.f32.mrf.mxu1 }
 0x4d4   : > { %v851_v1 = vadd.f32 %v2965_v63, %v828_v51 }
 0x4db   : > { %v830_v52 = vpop.f32.mrf.mxu1 }
 0x4de   : > { %v988_v53 = vpop.f32.mrf.mxu3 }
 0x4df   : > { %v992_v54 = vpack.c.bf16 %v988_v53, %v988_v53 }
 0x4e1   : > { %2209 = vmatmul.msk.bf16.vlgmr.msrb.gmra.mxu0 %vm692_vm0, %v992_v54 }
 0x4e6   : > { %v990_v55 = vpop.f32.mrf.mxu3 }
 0x4e9   : > { %v907_v56 = vpop.f32.mrf.mxu0 }
 0x4ea   : > { %v911_v57 = vpack.c.bf16 %v907_v56, %v907_v56 }
 0x4ec   : > { %2202 = vmatmul.msk.bf16.vlgmr.msra.gmra.mxu1 %vm692_vm0, %v911_v57 }
 0x4f1   : > { %v909_v59 = vpop.f32.mrf.mxu0  ;;  %2217 = vmatmul.msk.bf16.vlgmr.msra.gmra.mxu0 %vm692_vm0, %v1098_v58 }
 0x4fc   : > { %2210 = vmatmul.msk.bf16.vlgmr.msrb.gmra.mxu1 %vm692_vm0, %v1017_v60 }
 0x55e   : > { %v1011_v61 = vpop.f32.mrf.mxu0 }
 0x566   : > { %v1013_v0 = vpop.f32.mrf.mxu0 }
 0x569   : > { %v930_v2 = vpop.f32.mrf.mxu1 }
 0x56a   : > { %v934_v3 = vadd.f32 %v930_v2, %v851_v1 }
 0x56c   : > { %v3004_v4 = vadd.f32 %v1011_v61, %v934_v3 }
 0x56e   : > { %v1116_v5 = vpop.f32.mrf.mxu0 }
 0x56f   : > { %v1120_v6 = vmul.f32 0.25, %v1116_v5 }
 0x571   : > { %v932_v7 = vpop.f32.mrf.mxu1  ;;  %v1121_v8 = vsel %vm713_vm2, %v1120_v6, -inf }
 0x572   : > { %1122 = vmax.xlane.f32.xlu1 %v1121_v8 }
 0x576   : > { %v1118_v9 = vpop.f32.mrf.mxu0 }
 0x579   : > { %v1035_v10 = vpop.f32.mrf.mxu1 }
 0x57a   : > { %v1039_v11 = vmul.f32 0.25, %v1035_v10 }
 0x57c   : > { %v1040_v12 = vsel %vm713_vm2, %v1039_v11, -inf }
 0x57d   : > { %1041 = vmax.xlane.f32.xlu0 %v1040_v12 }
 0x581   : > { %v1037_v13 = vpop.f32.mrf.mxu1 }
 0x58b   : > { %1052 = vrot.lane.b32.xlu1 %v2943_v27, %s2671_s17 }
 0x593   : > { %1180 = vrot.lane.b32.xlu1 %v2922_v16, %s2673_s26 }
 0x5e5   : > { %v1123_v63 = vpop.xlane.xlu1 %1122 }
 0x5e6   : > { %v1124_v15 = vsub.f32 %v1120_v6, %v1123_v63 }
 0x5e8   : > { %v1125_v17 = vmul.f32 1.442695, %v1124_v15 }
 0x5ea   : > { %2630 = vpow2.f32 %v1125_v17 }
 0x5f0   : > { %v2631_v18 = vpop.eup %2630  ;;  %v1042_v19 = vpop.xlane.xlu0 %1041 }
 0x5f1   : > { %v1043_v20 = vsub.f32 %v1039_v11, %v1042_v19  ;;  %v1127_v22 = vsel %vm713_vm2, %v2631_v18, 0.0 }
 0x5f2   : > { %1128 = vadd.xlane.f32.xlu0 %v1127_v22 }
 0x5f3   : > { %v1044_v23 = vmul.f32 1.442695, %v1043_v20 }
 0x5f5   : > { %2632 = vpow2.f32 %v1044_v23 }
 0x5fb   : > { %v2633_v24 = vpop.eup %2632 }
 0x5fc   : > { %v1046_v25 = vsel %vm713_vm2, %v2633_v24, 0.0 }
 0x5fd   : > { %1047 = vadd.xlane.f32.xlu2 %v1046_v25  ;;  %v1053_v26 = vpop.permute.xlu1 %1052  ;;  %v2527_v25 = vld [vmem:[%s3403_s6 + $0x38] sm:$0xff] }
 0x5fe   : > { %v1058_v28 = vsel %vm731_vm1, %v1053_v26, 0 }
 0x5ff   : > { %1067 = vmatpush.bf16.msrb.mxu2 %v1058_v28 }
 0x603   : > { %1171 = vmatpush.bf16.msra.mxu2 %v2525_v31 }
 0x605   : > { %v1181_v29 = vpop.permute.xlu1 %1180 }
 0x606   : > { %v1186_v30 = vsel %vm692_vm0, %v1181_v29, 0  ;;  %1261 = vrot.lane.b32.xlu0 %v2922_v16, %s2674_s15 }
 0x607   : > { %1195 = vmatpush.bf16.xpose.msra.mxu3 %v1186_v30 }
 0x60e   : > { %1259 = vrot.lane.b32.xlu0 %v2930_v21, %s2674_s15 }
 0x615   : > { %1133 = vrot.lane.b32.xlu2 %v2943_v27, %s2672_s18 }
 0x61d   : > { %1178 = vrot.lane.b32.xlu2 %v2930_v21, %s2673_s26 }
 0x665   : > { %v1129_v32 = vpop.xlane.xlu0 %1128 }
 0x666   : > { %2634 = vrcp.f32 %v1129_v32 }
 0x66c   : > { %v2635_v16 = vpop.eup %2634 }
 0x66d   : > { %v1131_v35 = vmul.f32 %v2635_v16, %v2631_v18 }
 0x66f   : > { %v1132_v21 = vpack.c.bf16 %v1131_v35, %v1131_v35  ;;  %v2608_v35 = vld [vmem:[%s3404_s7] ss:$0 sm:$0xff] }
 0x670   : > { %v1048_v33 = vpop.xlane.xlu2 %1047 }
 0x671   : > { %2636 = vrcp.f32 %v1048_v33 }
 0x677   : > { %v2637_v34 = vpop.eup %2636 }
 0x678   : > { %v1050_v36 = vmul.f32 %v2637_v34, %v2633_v24  ;;  %v1134_v37 = vpop.permute.xlu2 %1133  ;;  %v1262_v39 = vpop.permute.xlu0 %1261 }
 0x679   : > { %v1139_v38 = vsel %vm731_vm1, %v1134_v37, 0  ;;  %v1267_v41 = vsel %vm692_vm0, %v1262_v39, 0 }
 0x67a   : > { %v1051_v40 = vpack.c.bf16 %v1050_v36, %v1050_v36  ;;  %1148 = vmatpush.bf16.msra.mxu1 %v1139_v38 }
 0x67c   : > { %2211 = vmatmul.msk.bf16.vlgmr.msrb.gmra.mxu2 %vm727_vm3, %v1051_v40 }
 0x67d   : > { %1276 = vmatpush.bf16.xpose.msrb.mxu2 %v1267_v41  ;;  %2218 = vmatmul.msk.bf16.vlgmr.msra.gmra.mxu1 %vm727_vm3, %v1132_v21  ;;  %v2675_v41 = vmov 128.0  }
 0x680   : > { %v1260_v48 = vpop.permute.xlu0 %1259  ;;  %v1179_v49 = vpop.permute.xlu2 %1178 }
 0x6fa   : > { %v1150_v42 = vpop.f32.mrf.mxu1 }
 0x6fb   : > { %v1154_v43 = vpack.c.bf16 %v1150_v42, %v1150_v42  ;;  %v2352_v42 = vld [vmem:[%s3407_s10 + $0xe0] sm:$0xf] }
 0x6fd   : > { %2223 = vmatmul.msk.bf16.vlgmr.msra.gmra.mxu2 %vm692_vm0, %v1154_v43  ;;  %v2558_v43 = vld [vmem:[%s3407_s10 + $0xec] sm:$0xf0] }
 0x6ff   : > { %v1069_v44 = vpop.f32.mrf.mxu2 }
 0x700   : > { %v1073_v45 = vpack.c.bf16 %v1069_v44, %v1069_v44  ;;  %v2556_v44 = vld [vmem:[%s3407_s10 + $0xe4] sm:$0xf] }
 0x702   : > { %2216 = vmatmul.msk.bf16.vlgmr.msrb.gmra.mxu3 %vm692_vm0, %v1073_v45  ;;  %v1152_v46 = vpop.f32.mrf.mxu1  ;;  %v2354_v45 = vld [vmem:[%s3407_s10 + $0xf0] sm:$0xf0] }
 0x703   : > { %v2360_v46 = vld [vmem:[%s3407_s10 + $0xe8] sm:$0xf] }
 0x707   : > { %v1071_v47 = vpop.f32.mrf.mxu2 }
 0x708   : > { %v2559_v47 = vld [vmem:[%s3407_s10 + $0xf4] sm:$0xf0] }
 0x70d   : > { %2231 = vmatmul.msk.bf16.vlgmr.msrb.gmra.mxu2 %vm692_vm0, %v1260_v48  ;;  %v2357_v48 = vor.u32 %v2556_v44, %v2354_v45  ;;  %v2541_v45 = vld [vmem:[%s3407_s10 + $0x6c] sm:$0xf] }
 0x70f   : > { %1601 = vmatpush.bf16.msra.mxu2 %v2357_v48  ;;  %v2272_v48 = vld [vmem:[%s3407_s10 + $0x40] sm:$0xf] }
 0x712   : > { %2224 = vmatmul.msk.bf16.vlgmr.msra.gmra.mxu3 %vm692_vm0, %v1179_v49  ;;  %v2361_v49 = vor.u32 %v2559_v47, %v2360_v46  ;;  %v2298_v46 = vld [vmem:[%s3407_s10 + $0x78] sm:$0xf0] }
 0x713   : > { %v2301_v47 = vor.u32 %v2541_v45, %v2298_v46  ;;  %v2574_v45 = vld [vmem:[%s3409_s12 + $0x70] sm:$0xff] }
 0x714   : > { %v2582_v46 = vld [vmem:[%s3409_s12 + $0xb0] sm:$0xff] }
 0x780   : > { %v1173_v50 = vpop.f32.mrf.mxu2 }
 0x785   : > { %v1092_v51 = vpop.f32.mrf.mxu3 }
 0x786   : > { %v1096_v52 = vadd.f32 %v1092_v51, %v3004_v4  ;;  %v2362_v51 = vld [vmem:[%s3407_s10 + $0xf8] sm:$0xf0] }
 0x788   : > { %v1175_v53 = vpop.f32.mrf.mxu2  ;;  %v1177_v54 = vadd.f32 %v1173_v50, %v1096_v52  ;;  %v2557_v50 = vld [vmem:[%s3407_s10 + $0xec] sm:$0xf] }
 0x789   : > { %v2365_v53 = vor.u32 %v2557_v50, %v2362_v51  ;;  %v2536_v50 = vld [vmem:[%s3407_s10 + $0x44] sm:$0xf] }
 0x78d   : > { %v1094_v55 = vpop.f32.mrf.mxu3 }
 0x790   : > { %v1278_v56 = vpop.f32.mrf.mxu2 }
 0x791   : > { %v1282_v57 = vmul.f32 0.25, %v1278_v56 }
 0x793   : > { %v1283_v58 = vsel %vm713_vm2, %v1282_v57, -inf }
 0x794   : > { %1284 = vmax.xlane.f32.xlu1 %v1283_v58 }
 0x795   : > { %v1197_v59 = vpop.f32.mrf.mxu3 }
 0x796   : > { %v1201_v60 = vmul.f32 0.25, %v1197_v59 }
 0x798   : > { %v1280_v61 = vpop.f32.mrf.mxu2  ;;  %v1202_v0 = vsel %vm713_vm2, %v1201_v60, -inf }
 0x799   : > { %1203 = vmax.xlane.f32.xlu0 %v1202_v0 }
 0x79d   : > { %v1199_v1 = vpop.f32.mrf.mxu3 }
 0x7ad   : > { %1295 = vrot.lane.b32.xlu0 %v2943_v27, %s2674_s15 }
 0x807   : > { %v1285_v2 = vpop.xlane.xlu1 %1284 }
 0x808   : > { %v1286_v3 = vsub.f32 %v1282_v57, %v1285_v2  ;;  %v2336_v2 = vld [vmem:[%s3407_s10 + $0xc0] sm:$0xf] }
 0x80a   : > { %v1287_v4 = vmul.f32 1.442695, %v1286_v3  ;;  %v2554_v3 = vld [vmem:[%s3407_s10 + $0xcc] sm:$0xf0] }
 0x80c   : > { %2638 = vpow2.f32 %v1287_v4  ;;  %v1204_v5 = vpop.xlane.xlu0 %1203  ;;  %v2552_v4 = vld [vmem:[%s3407_s10 + $0xc4] sm:$0xf] }
 0x80d   : > { %v1205_v6 = vsub.f32 %v1201_v60, %v1204_v5  ;;  %v2337_v5 = vor.u32 %v2554_v3, %v2336_v2  ;;  %v2532_v2 = vld [vmem:[%s3407_s10 + $0x24] sm:$0xf] }
 0x80f   : > { %v1206_v7 = vmul.f32 1.442695, %v1205_v6  ;;  %v2338_v6 = vld [vmem:[%s3407_s10 + $0xd0] sm:$0xf0] }
 0x811   : > { %2640 = vpow2.f32 %v1206_v7  ;;  %v2344_v7 = vld [vmem:[%s3407_s10 + $0xc8] sm:$0xf] }
 0x812   : > { %v2639_v8 = vpop.eup %2638 }
 0x813   : > { %v1289_v9 = vsel %vm713_vm2, %v2639_v8, 0.0 }
 0x814   : > { %1290 = vadd.xlane.f32.xlu2 %v1289_v9  ;;  %v2341_v9 = vor.u32 %v2552_v4, %v2338_v6  ;;  %v2258_v4 = vld [vmem:[%s3407_s10 + $0x30] sm:$0xf0]  ;;  %v2535_v6 = vld [vmem:[%s3407_s10 + $0x34] sm:$0xf0] }
 0x816   : > { %1602 = vmatpush.bf16.msra.mxu2 %v2341_v9  ;;  %v2533_v9 = vld [vmem:[%s3407_s10 + $0x2c] sm:$0xf] }
 0x817   : > { %v2641_v10 = vpop.eup %2640 }
 0x818   : > { %v1208_v11 = vsel %vm713_vm2, %v2641_v10, 0.0 }
 0x819   : > { %1209 = vadd.xlane.f32.xlu1 %v1208_v11  ;;  %v2553_v11 = vld [vmem:[%s3407_s10 + $0xcc] sm:$0xf] }
 0x81f   : > { %v1296_v12 = vpop.permute.xlu0 %1295 }
 0x820   : > { %v1301_v13 = vsel %vm731_vm1, %v1296_v12, 0  ;;  %v2346_v12 = vld [vmem:[%s3407_s10 + $0xd8] sm:$0xf0] }
 0x821   : > { %1310 = vmatpush.bf16.msrb.mxu3 %v1301_v13  ;;  %v2349_v13 = vor.u32 %v2553_v11, %v2346_v12  ;;  %v2240_v11 = vld [vmem:[%s3407_s10] sm:$0xf] }
 0x825   : > { %1614 = vmatpush.bf16.msra.mxu3 %v2361_v49  ;;  %v2538_v49 = vld [vmem:[%s3407_s10 + $0x4c] sm:$0xf0] }
 0x826   : > { %v2273_v51 = vor.u32 %v2538_v49, %v2272_v48  ;;  %v2588_v48 = vld [vmem:[%s3409_s12 + $0xe0] sm:$0xff]  ;;  %v2573_v49 = vld [vmem:[%s3409_s12 + $0x68] sm:$0xff] }
 0x82c   : > { %1214 = vrot.lane.b32.xlu2 %v2943_v27, %s2673_s26  ;;  %v2526_v27 = vld [vmem:[%s3403_s6 + $0x30] sm:$0xff] }
 0x82d   : > { %1252 = vmatpush.bf16.msrb.mxu1 %v2526_v27  ;;  %v2330_v27 = vld [vmem:[%s3407_s10 + $0xb8] sm:$0xf0] }
 0x887   : > { %v1291_v63 = vpop.xlane.xlu2 %1290 }
 0x888   : > { %2642 = vrcp.f32 %v1291_v63  ;;  %v2320_v63 = vld [vmem:[%s3407_s10 + $0xa0] sm:$0xf] }
 0x88c   : > { %v1210_v14 = vpop.xlane.xlu1 %1209 }
 0x88d   : > { %2644 = vrcp.f32 %v1210_v14  ;;  %v2550_v14 = vld [vmem:[%s3407_s10 + $0xac] sm:$0xf0] }
 0x88e   : > { %v2643_v15 = vpop.eup %2642  ;;  %2646 = vrcp.f32 %v2675_v41  ;;  %v2290_v41 = vld [vmem:[%s3407_s10 + $0x70] sm:$0xf0] }
 0x88f   : > { %v1293_v17 = vmul.f32 %v2643_v15, %v2639_v8  ;;  %v1215_v18 = vpop.permute.xlu2 %1214  ;;  %v2555_v8 = vld [vmem:[%s3407_s10 + $0xd4] sm:$0xf0]  ;;  %v2548_v15 = vld [vmem:[%s3407_s10 + $0xa4] sm:$0xf] }
 0x890   : > { %v1220_v19 = vsel %vm731_vm1, %v1215_v18, 0  ;;  %v2322_v18 = vld [vmem:[%s3407_s10 + $0xb0] sm:$0xf0] }
 0x891   : > { %v1294_v20 = vpack.c.bf16 %v1293_v17, %v1293_v17  ;;  %1229 = vmatpush.bf16.msrb.mxu0 %v1220_v19  ;;  %v2321_v17 = vor.u32 %v2550_v14, %v2320_v63  ;;  %v2328_v19 = vld [vmem:[%s3407_s10 + $0xa8] sm:$0xf]  ;;  %v2528_v63 = vld [vmem:[%s3407_s10 + $0x4] sm:$0xf]  ;;  %v2242_v14 = vld [vmem:[%s3407_s10 + $0x10] sm:$0xf0] }
 0x893   : > { %v2645_v22 = vpop.eup %2644  ;;  %2232 = vmatmul.msk.bf16.vlgmr.msrb.gmra.mxu3 %vm727_vm3, %v1294_v20  ;;  %v2551_v20 = vld [vmem:[%s3407_s10 + $0xb4] sm:$0xf0] }
 0x894   : > { %v1212_v23 = vmul.f32 %v2645_v22, %v2641_v10  ;;  %v2647_v52 = vpop.eup %2646  ;;  %v2345_v10 = vor.u32 %v2555_v8, %v2344_v7  ;;  %v2325_v22 = vor.u32 %v2548_v15, %v2322_v18  ;;  %v2261_v7 = vor.u32 %v2532_v2, %v2258_v4  ;;  %v2248_v18 = vld [vmem:[%s3407_s10 + $0x8] sm:$0xf]  ;;  %v2578_v2 = vld [vmem:[%s3409_s12 + $0x90] sm:$0xff]  ;;  %v2584_v4 = vld [vmem:[%s3409_s12 + $0xc0] sm:$0xff] }
 0x895   : > { %1333 = vmatpush.bf16.msra.mxu0 %v2527_v25  ;;  %vm1356_vm5 = vweird.f32 %v2647_v52 }
 0x896   : > { %v1213_v24 = vpack.c.bf16 %v1212_v23, %v1212_v23  ;;  %1615 = vmatpush.bf16.msra.mxu3 %v2345_v10  ;;  %v2329_v23 = vor.u32 %v2551_v20, %v2328_v19  ;;  %1603 = vmatpush.bf16.msra.mxu2 %v2325_v22  ;;  %v2266_v10 = vld [vmem:[%s3407_s10 + $0x38] sm:$0xf0]  ;;  %v2531_v19 = vld [vmem:[%s3407_s10 + $0x14] sm:$0xf0]  ;;  %v2529_v20 = vld [vmem:[%s3407_s10 + $0xc] sm:$0xf] }
 0x897   : > { %v2269_v12 = vor.u32 %v2533_v9, %v2266_v10  ;;  %v2249_v22 = vor.u32 %v2531_v19, %v2248_v18  ;;  %v2576_v9 = vld [vmem:[%s3409_s12 + $0x80] sm:$0xff] }
 0x898   : > { %2225 = vmatmul.msk.bf16.vlgmr.msrb.gmra.mxu0 %vm727_vm3, %v1213_v24  ;;  %v2549_v24 = vld [vmem:[%s3407_s10 + $0xac] sm:$0xf] }
 0x899   : > { %1627 = vmatpush.bf16.msrb.mxu0 %v2365_v53  ;;  %v2333_v25 = vor.u32 %v2549_v24, %v2330_v27  ;;  %v2280_v53 = vld [vmem:[%s3407_s10 + $0x48] sm:$0xf] }
 0x89a   : > { %1616 = vmatpush.bf16.msra.mxu3 %v2329_v23  ;;  %v2250_v23 = vld [vmem:[%s3407_s10 + $0x18] sm:$0xf0] }
 0x89b   : > { %v2253_v24 = vor.u32 %v2529_v20, %v2250_v23 }
 0x89d   : > { %1628 = vmatpush.bf16.msrb.mxu0 %v2349_v13  ;;  %v2530_v13 = vld [vmem:[%s3407_s10 + $0xc] sm:$0xf0] }
 0x89e   : > { %v2241_v15 = vor.u32 %v2530_v13, %v2240_v11 }
 0x8a1   : > { %1629 = vmatpush.bf16.msrb.mxu0 %v2333_v25  ;;  %v2567_v25 = vld [vmem:[%s3409_s12 + $0x38] sm:$0xff] }
 0x915   : > { %v1231_v26 = vpop.f32.mrf.mxu0 }
 0x916   : > { %v1235_v28 = vpack.c.bf16 %v1231_v26, %v1231_v26  ;;  %v1312_v29 = vpop.f32.mrf.mxu3  ;;  %v2304_v26 = vld [vmem:[%s3407_s10 + $0x80] sm:$0xf] }
 0x917   : > { %v1316_v30 = vpack.c.bf16 %v1312_v29, %v1312_v29  ;;  %v2544_v29 = vld [vmem:[%s3407_s10 + $0x84] sm:$0xf] }
 0x918   : > { %2230 = vmatmul.msk.bf16.vlgmr.msrb.gmra.mxu1 %vm692_vm0, %v1235_v28  ;;  %v2546_v28 = vld [vmem:[%s3407_s10 + $0x8c] sm:$0xf0] }
 0x919   : > { %2237 = vmatmul.msk.bf16.vlgmr.msra.gmra.mxu0 %vm692_vm0, %v1316_v30  ;;  %v2305_v30 = vor.u32 %v2546_v28, %v2304_v26  ;;  %v2591_v26 = vld [vmem:[%s3409_s12 + $0xf8] sm:$0xff] }
 0x91d   : > { %v1233_v31 = vpop.f32.mrf.mxu0 }
 0x91e   : > { %v1314_v32 = vpop.f32.mrf.mxu3  ;;  %v2306_v31 = vld [vmem:[%s3407_s10 + $0x90] sm:$0xf0] }
 0x91f   : > { %v2312_v32 = vld [vmem:[%s3407_s10 + $0x88] sm:$0xf] }
 0x995   : > { %v1254_v33 = vpop.f32.mrf.mxu1 }
 0x996   : > { %v1258_v16 = vadd.f32 %v1254_v33, %v1177_v54  ;;  %v1335_v34 = vpop.f32.mrf.mxu0  ;;  %v1352_v54 = vmul.f32 128.0, %v2647_v52  ;;  %v2547_v33 = vld [vmem:[%s3407_s10 + $0x94] sm:$0xf0] }
 0x998   : > { %v1339_v36 = vadd.f32 %v1335_v34, %v1258_v16  ;;  %v1353_v55 = vsub.f32 1.0, %v1352_v54  ;;  %v2309_v16 = vor.u32 %v2544_v29, %v2306_v31  ;;  %v2313_v34 = vor.u32 %v2547_v33, %v2312_v32  ;;  %v2539_v54 = vld [vmem:[%s3407_s10 + $0x54] sm:$0xf0]  ;;  %v2566_v29 = vld [vmem:[%s3409_s12 + $0x30] sm:$0xff] }
 0x99a   : > { %v1343_v37 = vadd.f32 %v2608_v35, %v1339_v36  ;;  %v1354_v56 = vmul.f32 %v2647_v52, %v1353_v55  ;;  %v2545_v35 = vld [vmem:[%s3407_s10 + $0x8c] sm:$0xf]  ;;  %v2314_v36 = vld [vmem:[%s3407_s10 + $0x98] sm:$0xf0]  ;;  %1604 = vmatpush.bf16.msra.mxu2 %v2309_v16  ;;  %1617 = vmatpush.bf16.msra.mxu3 %v2313_v34 }
 0x99c   : > { %v1344_v38 = vadd.f32 %v1343_v37, %v2897_v62  ;;  %v2353_v62 = vor.u32 %v2558_v43, %v2352_v42  ;;  %v1355_v57 = vadd.f32 %v2647_v52, %v1354_v56  ;;  %v2317_v37 = vor.u32 %v2545_v35, %v2314_v36  ;;  %v2296_v42 = vld [vmem:[%s3407_s10 + $0x68] sm:$0xf]  ;;  %v2543_v43 = vld [vmem:[%s3407_s10 + $0x74] sm:$0xf0] }
 0x99d   : > { %v1256_v39 = vpop.f32.mrf.mxu1  ;;  %v2281_v56 = vor.u32 %v2539_v54, %v2280_v53  ;;  %v2572_v53 = vld [vmem:[%s3409_s12 + $0x60] sm:$0xff] }
 0x99e   : > { %v1337_v40 = vpop.f32.mrf.mxu0  ;;  %v1348_v21 = vsel %vm1347_vm4, %v1344_v38, 0.0  ;;  %1588 = vmatpush.bf16.msra.mxu1 %v2353_v62  ;;  %v3088_v58 = vsel %vm1356_vm5, %v2647_v52, %v1355_v57  ;;  %v2542_v39 = vld [vmem:[%s3407_s10 + $0x6c] sm:$0xf0]  ;;  %1630 = vmatpush.bf16.msrb.mxu0 %v2317_v37  ;;  %v2297_v62 = vor.u32 %v2543_v43, %v2296_v42  ;;  %v2274_v52 = vld [vmem:[%s3407_s10 + $0x50] sm:$0xf0]  ;;  %v2575_v43 = vld [vmem:[%s3409_s12 + $0x78] sm:$0xff] }
 0x99f   : > { %1349 = vadd.xlane.f32.xlu1 %v1348_v21  ;;  %v2540_v40 = vld [vmem:[%s3407_s10 + $0x64] sm:$0xf]  ;;  %v2277_v55 = vor.u32 %v2536_v50, %v2274_v52  ;;  %v2537_v57 = vld [vmem:[%s3407_s10 + $0x4c] sm:$0xf]  ;;  %v2609_v37 = vld [vmem:[%s3399_s2] ss:$0 sm:$0xff] }
 0x9a0   : > { %v2293_v44 = vor.u32 %v2540_v40, %v2290_v41  ;;  %1618 = vmatpush.bf16.msra.mxu3 %v2297_v62  ;;  %v2610_v40 = vld [vmem:[%s3400_s3] ss:$0 sm:$0xff]  ;;  %v2589_v62 = vld [vmem:[%s3409_s12 + $0xe8] sm:$0xff]  ;;  %v2587_v52 = vld [vmem:[%s3409_s12 + $0xd8] sm:$0xff] }
 0x9a1   : > { %v2581_v50 = vld [vmem:[%s3409_s12 + $0xa8] sm:$0xff]  ;;  %v2580_v54 = vld [vmem:[%s3409_s12 + $0xa0] sm:$0xff] }
 0x9a2   : > { %1589 = vmatpush.bf16.msra.mxu1 %v2337_v5  ;;  %1605 = vmatpush.bf16.msra.mxu2 %v2293_v44  ;;  %v2264_v5 = vld [vmem:[%s3407_s10 + $0x28] sm:$0xf] }
 0x9a3   : > { %1631 = vmatpush.bf16.msrb.mxu0 %v2301_v47  ;;  %v2265_v8 = vor.u32 %v2535_v6, %v2264_v5  ;;  %v2565_v44 = vld [vmem:[%s3409_s12 + $0x28] sm:$0xff]  ;;  %v2564_v47 = vld [vmem:[%s3409_s12 + $0x20] sm:$0xff] }
 0x9a4   : > { %1619 = vmatpush.bf16.msra.mxu3 %v2281_v56  ;;  %v2586_v56 = vld [vmem:[%s3409_s12 + $0xd0] sm:$0xff]  ;;  %v2569_v5 = vld [vmem:[%s3409_s12 + $0x48] sm:$0xff] }
 0x9a5   : > { %v2577_v6 = vld [vmem:[%s3409_s12 + $0x88] sm:$0xff] }
 0x9a6   : > { %1590 = vmatpush.bf16.msra.mxu1 %v2321_v17  ;;  %1606 = vmatpush.bf16.msra.mxu2 %v2277_v55  ;;  %v2245_v17 = vor.u32 %v2528_v63, %v2242_v14  ;;  %v2562_v55 = vld [vmem:[%s3409_s12 + $0x10] sm:$0xff] }
 0x9a8   : > { %1620 = vmatpush.bf16.msra.mxu3 %v2265_v8  ;;  %v2568_v8 = vld [vmem:[%s3409_s12 + $0x40] sm:$0xff] }
 0x9aa   : > { %1591 = vmatpush.bf16.msra.mxu1 %v2305_v30  ;;  %1607 = vmatpush.bf16.msra.mxu2 %v2261_v7  ;;  %v2590_v30 = vld [vmem:[%s3409_s12 + $0xf0] sm:$0xff]  ;;  %v1418_v7 = vld [vmem:[%s3408_s11] sm:$0xf] }
 0x9ab   : > { %v1420_v10 = vperm.slane %v1418_v7, 0  ;;  %v1423_v11 = vperm.slane %v1418_v7, 3  ;;  %v1422_v19 = vperm.slane %v1418_v7, 2 }
 0x9ac   : > { %1621 = vmatpush.bf16.msra.mxu3 %v2249_v22 }
 0x9ae   : > { %1608 = vmatpush.bf16.msra.mxu2 %v2245_v17  ;;  %v1421_v17 = vperm.slane %v1418_v7, 1 }
 0x9b2   : > { %1953 = vmatpush.bf16.msrb.mxu2 %v2575_v43 }
 0x9b6   : > { %1954 = vmatpush.bf16.msrb.mxu2 %v2574_v45 }
 0x9ba   : > { %1955 = vmatpush.bf16.msrb.mxu2 %v2573_v49 }
 0x9be   : > { %1956 = vmatpush.bf16.msrb.mxu2 %v2572_v53 }
 0xa12   : > { %v1350_v59 = vpop.xlane.xlu1 %1349 }
 0xa13   : > { %v1358_v60 = vmul.f32 %v3088_v58, %v1350_v59  ;;  %v2282_v59 = vld [vmem:[%s3407_s10 + $0x58] sm:$0xf0] }
 0xa15   : > { %v3091_v61 = vsub.f32 %v1344_v38, %v1358_v60  ;;  %v2288_v38 = vld [vmem:[%s3407_s10 + $0x60] sm:$0xf]  ;;  %v2285_v60 = vor.u32 %v2537_v57, %v2282_v59  ;;  %v2571_v57 = vld [vmem:[%s3409_s12 + $0x58] sm:$0xff] }
 0xa16   : > { %v2289_v21 = vor.u32 %v2542_v39, %v2288_v38  ;;  %v2579_v59 = vld [vmem:[%s3409_s12 + $0x98] sm:$0xff]  ;;  %1957 = vmatpush.bf16.msrb.mxu2 %v2571_v57 }
 0xa17   : > { %v1360_v0 = vmul.f32 %v3091_v61, %v3091_v61  ;;  %1632 = vmatpush.bf16.msrb.mxu0 %v2285_v60  ;;  %v2561_v60 = vld [vmem:[%s3409_s12 + $0x8] sm:$0xff] }
 0xa18   : > { %1592 = vmatpush.bf16.msra.mxu1 %v2289_v21 }
 0xa19   : > { %v1361_v1 = vsel %vm1347_vm4, %v1360_v0, 0.0  ;;  %v2256_v0 = vld [vmem:[%s3407_s10 + $0x20] sm:$0xf] }
 0xa1a   : > { %1362 = vadd.xlane.f32.xlu1 %v1361_v1  ;;  %v2534_v1 = vld [vmem:[%s3407_s10 + $0x2c] sm:$0xf0] }
 0xa1b   : > { %v2257_v3 = vor.u32 %v2534_v1, %v2256_v0  ;;  %1633 = vmatpush.bf16.msrb.mxu0 %v2269_v12  ;;  %v2585_v0 = vld [vmem:[%s3409_s12 + $0xc8] sm:$0xff]  ;;  %v2570_v1 = vld [vmem:[%s3409_s12 + $0x50] sm:$0xff] }
 0xa1c   : > { %1593 = vmatpush.bf16.msra.mxu1 %v2273_v51  ;;  %v2563_v51 = vld [vmem:[%s3409_s12 + $0x18] sm:$0xff]  ;;  %1958 = vmatpush.bf16.msrb.mxu2 %v2570_v1 }
 0xa1f   : > { %1634 = vmatpush.bf16.msrb.mxu0 %v2253_v24 }
 0xa20   : > { %1594 = vmatpush.bf16.msra.mxu1 %v2257_v3  ;;  %v2560_v3 = vld [vmem:[%s3409_s12] sm:$0xff]  ;;  %1959 = vmatpush.bf16.msrb.mxu2 %v2569_v5 }
 0xa23   : > { %1979 = vmatpush.bf16.msra.mxu0 %v2591_v26 }
 0xa24   : > { %1595 = vmatpush.bf16.msra.mxu1 %v2241_v15  ;;  %1960 = vmatpush.bf16.msrb.mxu2 %v2568_v8 }
 0xa27   : > { %1980 = vmatpush.bf16.msra.mxu0 %v2590_v30 }
 0xa28   : > { %1940 = vmatpush.bf16.msrb.mxu1 %v2567_v25 }
 0xa2b   : > { %1981 = vmatpush.bf16.msra.mxu0 %v2589_v62 }
 0xa2c   : > { %1941 = vmatpush.bf16.msrb.mxu1 %v2566_v29 }
 0xa2f   : > { %1982 = vmatpush.bf16.msra.mxu0 %v2588_v48 }
 0xa30   : > { %1942 = vmatpush.bf16.msrb.mxu1 %v2565_v44 }
 0xa33   : > { %1983 = vmatpush.bf16.msra.mxu0 %v2587_v52 }
 0xa34   : > { %1943 = vmatpush.bf16.msrb.mxu1 %v2564_v47 }
 0xa37   : > { %1984 = vmatpush.bf16.msra.mxu0 %v2586_v56 }
 0xa38   : > { %1944 = vmatpush.bf16.msrb.mxu1 %v2563_v51 }
 0xa3b   : > { %1985 = vmatpush.bf16.msra.mxu0 %v2585_v0 }
 0xa3c   : > { %1945 = vmatpush.bf16.msrb.mxu1 %v2562_v55 }
 0xa3f   : > { %1986 = vmatpush.bf16.msra.mxu0 %v2584_v4 }
 0xa40   : > { %1946 = vmatpush.bf16.msrb.mxu1 %v2561_v60 }
 0xa44   : > { %1947 = vmatpush.bf16.msrb.mxu1 %v2560_v3 }
 0xa8d   : > { %v1363_v27 = vpop.xlane.xlu1 %1362 }
 0xa8e   : > { %v1364_v28 = vmul.f32 %v1363_v27, %v3088_v58 }
 0xa90   : > { %v1365_v31 = vadd.f32 1e-05, %v1364_v28 }
 0xa92   : > { %2648 = vrsqrt.f32 %v1365_v31  ;;  %vm1372_vm7 = vweird.f32 %v1365_v31 }
 0xa98   : > { %v2649_v32 = vpop.eup %2648 }
 0xa99   : > { %v1367_v33 = vmul.f32 %v2649_v32, %v1365_v31  ;;  %vm1373_vm6 = vweird.f32 %v2649_v32 }
 0xa9a   : > { %vm1374_vm8 = vmor %vm1372_vm7, %vm1373_vm6 }
 0xa9b   : > { %v1368_v16 = vmul.f32 %v2649_v32, %v1367_v33 }
 0xa9d   : > { %v1369_v34 = vmul.f32 0.5, %v1368_v16 }
 0xa9f   : > { %v1370_v35 = vsub.f32 1.5, %v1369_v34 }
 0xaa1   : > { %v1371_v36 = vmul.f32 %v2649_v32, %v1370_v35 }
 0xaa3   : > { %v1375_v38 = vsel %vm1374_vm8, %v2649_v32, %v1371_v36 }
 0xaa4   : > { %v1376_v39 = vmul.f32 %v1375_v38, %v3091_v61  ;;  %v2583_v61 = vld [vmem:[%s3409_s12 + $0xb8] sm:$0xff] }
 0xaa5   : > { %1966 = vmatpush.bf16.msrb.mxu3 %v2583_v61 }
 0xaa6   : > { %v1380_v21 = vmul.f32 %v2609_v37, %v1376_v39 }
 0xaa8   : > { %v3284_v41 = vadd.f32 %v2610_v40, %v1380_v21 }
 0xaa9   : > { %1967 = vmatpush.bf16.msrb.mxu3 %v2582_v46 }
 0xaaa   : > { %v1417_v42 = vpack.c.bf16 %v3284_v41, %v3284_v41 }
 0xaac   : > { %1596 = vmatmul.bf16.vlgmr.msra.gmra.mxu1 %v1417_v42  ;;  %1609 = vmatmul.bf16.vlgmr.msra.gmra.mxu2 %v1417_v42 }
 0xaad   : > { %1622 = vmatmul.bf16.vlgmr.msra.gmra.mxu3 %v1417_v42  ;;  %1635 = vmatmul.bf16.vlgmr.msrb.gmra.mxu0 %v1417_v42 }
 0xaae   : > { %1968 = vmatpush.bf16.msrb.mxu3 %v2581_v50 }
 0xab2   : > { %1969 = vmatpush.bf16.msrb.mxu3 %v2580_v54 }
 0xab6   : > { %1970 = vmatpush.bf16.msrb.mxu3 %v2579_v59 }
 0xaba   : > { %1971 = vmatpush.bf16.msrb.mxu3 %v2578_v2 }
 0xabe   : > { %1972 = vmatpush.bf16.msrb.mxu3 %v2577_v6  ;;  %v2611_v6 = vld [vmem:[%s3410_s13] ss:$0 sm:$0xff] }
 0xac2   : > { %1973 = vmatpush.bf16.msrb.mxu3 %v2576_v9 }
 0xb29   : > { %v1597_v12 = vpop.f32.mrf.mxu1 }
 0xb2a   : > { %v1598_v13 = vadd.f32 %v1597_v12, %v1420_v10  ;;  %v1636_v63 = vpop.f32.mrf.mxu0 }
 0xb2b   : > { %v1637_v14 = vadd.f32 %v1636_v63, %v1423_v11 }
 0xb2c   : > { %v1644_v15 = vmul.f32 0.044715, %v1598_v13  ;;  %v1640_v46 = vmul.f32 0.5, %v1598_v13 }
 0xb2d   : > { %v1647_v18 = vmul.f32 0.044715, %v1637_v14  ;;  %v1643_v48 = vmul.f32 0.5, %v1637_v14 }
 0xb2e   : > { %v1648_v20 = vmul.f32 %v1644_v15, %v1598_v13 }
 0xb2f   : > { %v1651_v22 = vmul.f32 %v1647_v18, %v1637_v14  ;;  %v1610_v23 = vpop.f32.mrf.mxu2 }
 0xb30   : > { %v1652_v24 = vmul.f32 %v1648_v20, %v1598_v13  ;;  %v1611_v27 = vadd.f32 %v1610_v23, %v1421_v17  ;;  %v1623_v25 = vpop.f32.mrf.mxu3 }
 0xb31   : > { %v1655_v26 = vmul.f32 %v1651_v22, %v1637_v14  ;;  %v1624_v28 = vadd.f32 %v1623_v25, %v1422_v19  ;;  %v1599_v29 = vpop.f32.mrf.mxu1 }
 0xb32   : > { %v1645_v30 = vmul.f32 0.044715, %v1611_v27  ;;  %v1638_v31 = vpop.f32.mrf.mxu0  ;;  %v1656_v32 = vadd.f32 %v1652_v24, %v1598_v13  ;;  %v1641_v56 = vmul.f32 0.5, %v1611_v27 }
 0xb33   : > { %v1646_v33 = vmul.f32 0.044715, %v1624_v28  ;;  %v1659_v16 = vadd.f32 %v1655_v26, %v1637_v14  ;;  %v1642_v59 = vmul.f32 0.5, %v1624_v28 }
 0xb34   : > { %v1649_v34 = vmul.f32 %v1645_v30, %v1611_v27  ;;  %v1660_v35 = vmul.f32 0.7978846, %v1656_v32 }
 0xb35   : > { %v1650_v36 = vmul.f32 %v1646_v33, %v1624_v28  ;;  %v1663_v37 = vmul.f32 0.7978846, %v1659_v16  ;;  %v2612_v33 = vld [vmem:[%s3405_s8] ss:$0 sm:$0xff] }
 0xb36   : > { %v1653_v38 = vmul.f32 %v1649_v34, %v1611_v27  ;;  %2650 = vtanh.f32 %v1660_v35 }
 0xb37   : > { %v1654_v39 = vmul.f32 %v1650_v36, %v1624_v28  ;;  %v1612_v40 = vpop.f32.mrf.mxu2  ;;  %2652 = vtanh.f32 %v1663_v37 }
 0xb38   : > { %v1625_v21 = vpop.f32.mrf.mxu3  ;;  %v1657_v42 = vadd.f32 %v1653_v38, %v1611_v27 }
 0xb39   : > { %v1658_v43 = vadd.f32 %v1654_v39, %v1624_v28 }
 0xb3a   : > { %v1661_v61 = vmul.f32 0.7978846, %v1657_v42 }
 0xb3b   : > { %v1662_v44 = vmul.f32 0.7978846, %v1658_v43 }
 0xb3c   : > { %v2651_v62 = vpop.eup %2650  ;;  %2654 = vtanh.f32 %v1661_v61 }
 0xb3d   : > { %v2653_v45 = vpop.eup %2652  ;;  %v1668_v47 = vadd.f32 1.0, %v2651_v62  ;;  %2656 = vtanh.f32 %v1662_v44 }
 0xb3e   : > { %v1671_v49 = vadd.f32 1.0, %v2653_v45 }
 0xb3f   : > { %v1672_v50 = vmul.f32 %v1668_v47, %v1640_v46 }
 0xb40   : > { %v1675_v51 = vmul.f32 %v1671_v49, %v1643_v48 }
 0xb41   : > { %v1740_v52 = vpack.c.bf16 %v1672_v50, %v1672_v50 }
 0xb42   : > { %v2655_v53 = vpop.eup %2654  ;;  %v1743_v54 = vpack.c.bf16 %v1675_v51, %v1675_v51 }
 0xb43   : > { %v2657_v55 = vpop.eup %2656  ;;  %1948 = vmatmul.bf16.vlgmr.msrb.gmra.mxu1 %v1740_v52  ;;  %v1669_v57 = vadd.f32 1.0, %v2655_v53 }
 0xb44   : > { %1987 = vmatmul.bf16.vlgmr.msra.gmra.mxu0 %v1743_v54  ;;  %v1670_v60 = vadd.f32 1.0, %v2657_v55 }
 0xb45   : > { %v1673_v0 = vmul.f32 %v1669_v57, %v1641_v56 }
 0xb46   : > { %v1674_v1 = vmul.f32 %v1670_v60, %v1642_v59 }
 0xb47   : > { %v1741_v2 = vpack.c.bf16 %v1673_v0, %v1673_v0 }
 0xb48   : > { %v1742_v3 = vpack.c.bf16 %v1674_v1, %v1674_v1 }
 0xb49   : > { %1961 = vmatmul.bf16.vlgmr.msrb.gmra.mxu2 %v1741_v2 }
 0xb4a   : > { %1974 = vmatmul.bf16.vlgmr.msrb.gmra.mxu3 %v1742_v3 }
 0xbc0   : > { %v1949_v4 = vpop.f32.mrf.mxu1 }
 0xbc1   : > { %v1988_v5 = vpop.f32.mrf.mxu0  ;;  %v1950_v9 = vadd.f32 %v2611_v6, %v1949_v4 }
 0xbc8   : > { %v1951_v7 = vpop.f32.mrf.mxu1 }
 0xbc9   : > { %v1990_v8 = vpop.f32.mrf.mxu0 }
 0xbcc   : > { %v1962_v10 = vpop.f32.mrf.mxu2 }
 0xbcd   : > { %v1963_v11 = vadd.f32 %v1962_v10, %v1950_v9  ;;  %v1975_v12 = vpop.f32.mrf.mxu3 }
 0xbcf   : > { %v1976_v13 = vadd.f32 %v1975_v12, %v1963_v11 }
 0xbd1   : > { %v1989_v63 = vadd.f32 %v1988_v5, %v1976_v13 }
 0xbd3   : > { %v1992_v14 = vadd.f32 %v1989_v63, %v3284_v41 }
 0xbd4   : > { %v1964_v15 = vpop.f32.mrf.mxu2 }
 0xbd5   : > { %v1977_v17 = vpop.f32.mrf.mxu3  ;;  %v1995_v18 = vsel %vm1347_vm4, %v1992_v14, 0.0 }
 0xbd6   : > { %1996 = vadd.xlane.f32.xlu0 %v1995_v18 }
 0xc49   : > { %v1997_v19 = vpop.xlane.xlu0 %1996 }
 0xc4a   : > { %v1998_v20 = vmul.f32 %v1997_v19, %v3088_v58 }
 0xc4c   : > { %v1999_v22 = vsub.f32 %v1992_v14, %v1998_v20 }
 0xc4e   : > { %v2000_v23 = vmul.f32 %v1999_v22, %v1999_v22 }
 0xc50   : > { %v2001_v24 = vsel %vm1347_vm4, %v2000_v23, 0.0 }
 0xc51   : > { %2002 = vadd.xlane.f32.xlu1 %v2001_v24 }
 0xcc4   : > { %v2003_v27 = vpop.xlane.xlu1 %2002 }
 0xcc5   : > { %v2004_v25 = vmul.f32 %v2003_v27, %v3088_v58  ;;  %v2613_v58 = vld [vmem:[%s3406_s9] ss:$0 sm:$0xff] }
 0xcc7   : > { %v2005_v26 = vadd.f32 1e-05, %v2004_v25 }
 0xcc9   : > { %2658 = vrsqrt.f32 %v2005_v26  ;;  %vm2012_vm10 = vweird.f32 %v2005_v26 }
 0xccf   : > { %v2659_v41 = vpop.eup %2658 }
 0xcd0   : > { %v2007_v28 = vmul.f32 %v2659_v41, %v2005_v26  ;;  %vm2013_vm9 = vweird.f32 %v2659_v41 }
 0xcd1   : > { %vm2014_vm11 = vmor %vm2012_vm10, %vm2013_vm9 }
 0xcd2   : > { %v2008_v29 = vmul.f32 %v2659_v41, %v2007_v28 }
 0xcd4   : > { %v2009_v30 = vmul.f32 0.5, %v2008_v29 }
 0xcd6   : > { %v2010_v31 = vsub.f32 1.5, %v2009_v30 }
 0xcd8   : > { %v2011_v32 = vmul.f32 %v2659_v41, %v2010_v31 }
 0xcda   : > { %v2015_v16 = vsel %vm2014_vm11, %v2659_v41, %v2011_v32 }
 0xcdb   : > { %v2016_v34 = vmul.f32 %v2015_v16, %v1999_v22 }
 0xcdd   : > { %v2020_v35 = vmul.f32 %v2612_v33, %v2016_v34 }
 0xcdf   : > { %v2024_v36 = vadd.f32 %v2613_v58, %v2020_v35 }
 0xce1   : > { %2025 = vst [vmem:[%s462_s19] sm:$0xf] %v2024_v36 }
 0xce2 PF: > { %s24_s28 = sadd.s32 1, %s2666_s28  }
 0xce3   : > { %p21_p4 = scmp.ge.s32.totalorder %s24_s28, 4  }
 0xce5   :  { %23 = sbr.rel (!%p21_p4) target bundleno = 1 (0x1), region = 106 }

</bundles_post_ra>
